<compile_context>
chip_gen: v7x
topology: tpu7x:2x2x1
jax: 0.10.0
libtpu: 0.0.40
codegen_flags: <defaults>
</compile_context>

<pallas_src>
import jax
import jax.numpy as jnp
from jax import lax
from jax.experimental import pallas as pl
from jax.experimental.pallas import tpu as pltpu

CIN_PAD = 8                       # block-1 input channels zero-padded 3 -> 8
_VMEM_LIMIT = 32 * 1024 * 1024


def _hint(x, m):
    return x if isinstance(x, int) else pl.multiple_of(x, m)


# ----------------------------------------------------------------------------
# Fused block kernel: conv3x3+ReLU -> conv3x3(+BN)+ReLU -> maxpool2x2 [-> MLP]
# ----------------------------------------------------------------------------
def _make_block_kernel(H, W, Cin, C, T, fuse_fc):
    Hh, Wh = H // 2, W // 2
    nt = H // T
    c0 = 8                        # sublane-aligned interior column start
    assert H % T == 0 and T % 2 == 0
    if fuse_fc:
        assert nt == 1

    def loop(body):
        # Short fixed-trip row loop via fori_loop (bounds vreg live ranges).
        if nt == 1:
            body(0, 0)
        else:
            lax.fori_loop(0, nt, body, 0)

    def zero_halo(xpad, ch):
        # Only the one-pixel halo around the interior is read without being
        # written -> zero just these four strips, not the whole buffer.
        z_row = jnp.zeros((1, W + 2, ch), jnp.float32)
        z_col = jnp.zeros((H, 1, ch), jnp.float32)
        xpad[0:1, c0 - 1:c0 + W + 1, :] = z_row
        xpad[H + 1:H + 2, c0 - 1:c0 + W + 1, :] = z_row
        xpad[1:H + 1, c0 - 1:c0, :] = z_col
        xpad[1:H + 1, c0 + W:c0 + W + 1, :] = z_col

    def conv_tile(xpad, w_ref, b, r0, ci):
        # 3x3 conv over T output rows as 9 accumulating MXU matmuls (one per
        # tap): no lane-axis im2col concatenation of sub-128 channel slabs.
        acc = jnp.zeros((T * W, C), jnp.float32)
        for dy in range(3):
            for dx in range(3):
                tap = xpad[pl.ds(r0 + dy, T), c0 - 1 + dx:c0 - 1 + dx + W, :]
                acc = acc + jnp.dot(tap.reshape(T * W, ci), w_ref[dy * 3 + dx],
                                    preferred_element_type=jnp.float32)
        return jnp.maximum(acc + b, 0.0)                  # bias + ReLU

    def pool_pack(y):
        # (T*W, C) conv2 rows -> 2x2/2 max-pool -> lane-dense (T//2, Wh*C).
        h = y.reshape(T * Wh, 2, C)
        h = jnp.maximum(h[:, 0, :], h[:, 1, :])           # pool along W
        h = h.reshape(T // 2, 2, Wh, C)
        v = jnp.maximum(h[:, 0], h[:, 1])                 # pool along H
        return v.reshape(T // 2, Wh * C)

    def front_end(x_ref, w1_ref, b1_ref, xpad1, xpad2):
        zero_halo(xpad1, Cin)
        zero_halo(xpad2, C)
        b1 = b1_ref[...]

        def scatter_body(t, carry):
            # lane-dense (T, W*Cin) row tile -> interior of the padded scratch
            r0 = _hint(t * T, T)
            rows = x_ref[0, t, :, :]
            xpad1[pl.ds(1 + r0, T), c0:c0 + W, :] = rows.reshape(T, W, Cin)
            return carry

        def conv1_body(t, carry):
            r0 = _hint(t * T, T)
            y = conv_tile(xpad1, w1_ref, b1, r0, Cin)     # (T*W, C)
            xpad2[pl.ds(1 + r0, T), c0:c0 + W, :] = y.reshape(T, W, C)
            return carry

        loop(scatter_body)
        loop(conv1_body)

    def kernel(x_ref, w1_ref, b1_ref, w2_ref, b2_ref, o_ref, xpad1, xpad2):
        front_end(x_ref, w1_ref, b1_ref, xpad1, xpad2)
        b2 = b2_ref[...]

        def conv2_body(t, carry):
            r0 = _hint(t * T, T)
            y = conv_tile(xpad2, w2_ref, b2, r0, C)       # (T*W, C)
            o_ref[0, t, :, :] = pool_pack(y)              # lane-dense store
            return carry

        loop(conv2_body)

    def kernel_fc(x_ref, w1_ref, b1_ref, w2_ref, b2_ref,
                  fw1_ref, fb1_ref, fw2_ref, fb2_ref, o_ref, xpad1, xpad2):
        front_end(x_ref, w1_ref, b1_ref, xpad1, xpad2)
        y = conv_tile(xpad2, w2_ref, b2_ref[...], 0, C)   # (H*W, C), one tile
        vp = pool_pack(y)                                 # (Hh, Wh*C)
        # Flatten -> Linear(F, Dh) as Hh chunked matmuls over the packed pooled
        # rows (feature map never leaves VMEM), then Tanh and the final Linear.
        acc = fb1_ref[...]                                # (1, Dh)
        for r in range(Hh):
            acc = acc + jnp.dot(vp[r:r + 1, :], fw1_ref[r],
                                preferred_element_type=jnp.float32)
        acc = jnp.tanh(acc)
        o_ref[0] = (jnp.dot(acc, fw2_ref[...], preferred_element_type=jnp.float32)
                    + fb2_ref[...])

    return kernel_fc if fuse_fc else kernel


def _compiler_params():
    return pltpu.CompilerParams(dimension_semantics=("parallel",),
                                vmem_limit_bytes=_VMEM_LIMIT)


def _row_tile(H, W):
    # ~512 conv rows per matmul keeps live values to a handful of VMEM tiles.
    T = min(H, max(2, 512 // W))
    assert H % T == 0 and T % 2 == 0, (H, W, T)
    return T


def fused_conv_block(x_p, w1, b1, w2, b2):
    """conv3x3(s1,p1)+ReLU -> conv3x3(+folded BN)+ReLU -> maxpool2x2, fused.

    x_p: (N, H, W*Cin) lane-dense packed NHWC.  w1: (9, Cin, C), w2: (9, C, C).
    Returns (N, H//2, (W//2)*C) lane-dense packed."""
    N, H, WC = x_p.shape
    Cin, C = w1.shape[1], w1.shape[2]
    W = WC // Cin
    assert W * Cin == WC
    Hh, Wh = H // 2, W // 2
    T = _row_tile(H, W)
    nt = H // T

    kernel = _make_block_kernel(H, W, Cin, C, T, fuse_fc=False)
    out = pl.pallas_call(
        kernel,
        out_shape=jax.ShapeDtypeStruct((N, nt, T // 2, Wh * C), jnp.float32),
        grid_spec=pltpu.PrefetchScalarGridSpec(
            num_scalar_prefetch=0,
            grid=(N,),
            in_specs=[
                pl.BlockSpec((1, nt, T, WC), lambda n: (n, 0, 0, 0)),
                pl.BlockSpec((9, Cin, C), lambda n: (0, 0, 0)),
                pl.BlockSpec((1, C), lambda n: (0, 0)),
                pl.BlockSpec((9, C, C), lambda n: (0, 0, 0)),
                pl.BlockSpec((1, C), lambda n: (0, 0)),
            ],
            out_specs=pl.BlockSpec((1, nt, T // 2, Wh * C),
                                   lambda n: (n, 0, 0, 0)),
            scratch_shapes=[
                pltpu.VMEM((H + 2, W + 16, Cin), jnp.float32),
                pltpu.VMEM((H + 2, W + 16, C), jnp.float32),
            ],
        ),
        compiler_params=_compiler_params(),
    )(x_p.reshape(N, nt, T, WC), w1, b1, w2, b2)
    return out.reshape(N, Hh, Wh * C)


def fused_conv_block_classifier(x_p, w1, b1, w2, b2, fw1, fb1, fw2, fb2):
    """Block 3 (conv-conv-pool) with the MLP head fused into the epilogue.

    Returns logits (N, Do)."""
    N, H, WC = x_p.shape
    Cin, C = w1.shape[1], w1.shape[2]
    W = WC // Cin
    Hh, Wh = H // 2, W // 2
    T = H                                 # single row tile: whole block per pass
    Dh, Do = fw1.shape[2], fw2.shape[1]
    assert fw1.shape[:2] == (Hh, Wh * C)

    kernel = _make_block_kernel(H, W, Cin, C, T, fuse_fc=True)
    out = pl.pallas_call(
        kernel,
        out_shape=jax.ShapeDtypeStruct((N, 1, Do), jnp.float32),
        grid_spec=pltpu.PrefetchScalarGridSpec(
            num_scalar_prefetch=0,
            grid=(N,),
            in_specs=[
                pl.BlockSpec((1, 1, H, WC), lambda n: (n, 0, 0, 0)),
                pl.BlockSpec((9, Cin, C), lambda n: (0, 0, 0)),
                pl.BlockSpec((1, C), lambda n: (0, 0)),
                pl.BlockSpec((9, C, C), lambda n: (0, 0, 0)),
                pl.BlockSpec((1, C), lambda n: (0, 0)),
                pl.BlockSpec((Hh, Wh * C, Dh), lambda n: (0, 0, 0)),
                pl.BlockSpec((1, Dh), lambda n: (0, 0)),
                pl.BlockSpec((Dh, Do), lambda n: (0, 0)),
                pl.BlockSpec((1, Do), lambda n: (0, 0)),
            ],
            out_specs=pl.BlockSpec((1, 1, Do), lambda n: (n, 0, 0)),
            scratch_shapes=[
                pltpu.VMEM((H + 2, W + 16, Cin), jnp.float32),
                pltpu.VMEM((H + 2, W + 16, C), jnp.float32),
            ],
        ),
        compiler_params=_compiler_params(),
    )(x_p.reshape(N, 1, H, WC), w1, b1, w2, b2, fw1, fb1, fw2, fb2)
    return out.reshape(N, Do)


# ----------------------------------------------------------------------------
# Parameter init (PyTorch-style layout) and kernel-layout preparation
# ----------------------------------------------------------------------------
def init_params(key, input_shape, hidden_units, output_shape):
    keys = jax.random.split(key, 13)
    params = {}
    cins = [input_shape, hidden_units, hidden_units * 2]
    couts = [hidden_units, hidden_units * 2, hidden_units * 4]
    k = 0
    for blk in range(3):
        cin, cout = cins[blk], couts[blk]
        k1, k2, k3, k4 = jax.random.split(keys[k], 4); k += 1
        w1 = jax.random.normal(k1, (3, 3, cin, cout), jnp.float32) * 0.08
        b1 = jax.random.normal(k2, (cout,), jnp.float32) * 0.05
        w2 = jax.random.normal(k3, (3, 3, cout, cout), jnp.float32) * 0.08
        b2 = jax.random.normal(k4, (cout,), jnp.float32) * 0.05
        kb1, kb2, kb3, kb4 = jax.random.split(keys[k], 4); k += 1
        gamma = 1.0 + 0.1 * jax.random.normal(kb1, (cout,), jnp.float32)
        beta = 0.1 * jax.random.normal(kb2, (cout,), jnp.float32)
        mean = 0.05 * jax.random.normal(kb3, (cout,), jnp.float32)
        var = 1.0 + 0.1 * jax.random.uniform(kb4, (cout,), jnp.float32)
        params[f"block{blk + 1}"] = dict(w1=w1, b1=b1, w2=w2, b2=b2,
                                         bn=(gamma, beta, mean, var))
    F = hidden_units * 4 * 8 * 8
    kf1, kf2, kf3, kf4 = jax.random.split(keys[k], 4)
    params["fc"] = dict(
        w1=jax.random.normal(kf1, (F, 128), jnp.float32) * 0.03,
        b1=jax.random.normal(kf2, (128,), jnp.float32) * 0.05,
        w2=jax.random.normal(kf3, (128, output_shape), jnp.float32) * 0.2,
        b2=jax.random.normal(kf4, (output_shape,), jnp.float32) * 0.05,
    )
    return params


def prepare_kernel_params(params, hidden_units, eps=1e-5):
    """Fold eval-mode BN into conv2, pad block-1 input channels, reshape conv
    weights to tap-major (9, Cin, Cout), and fold the NCHW-flatten permutation
    into the first FC weight (all one-time host-side work)."""
    kp = {}
    for blk in ("block1", "block2", "block3"):
        p = params[blk]
        cin, cout = p["w1"].shape[2], p["w1"].shape[3]
        gamma, beta, mean, var = p["bn"]
        scale = gamma / jnp.sqrt(var + eps)
        w2f = p["w2"] * scale                             # HWIO * (cout,)
        b2f = (p["b2"] - mean) * scale + beta
        w1 = p["w1"]
        if blk == "block1" and cin < CIN_PAD:             # zero-pad input chans
            w1 = jnp.pad(w1, ((0, 0), (0, 0), (0, CIN_PAD - cin), (0, 0)))
            cin = CIN_PAD
        kp[blk] = dict(
            w1=w1.reshape(9, cin, cout),
            b1=p["b1"].reshape(1, cout),
            w2=w2f.reshape(9, cout, cout),
            b2=b2f.reshape(1, cout),
        )
    # torch Flatten uses (C, H, W) order; the blocks produce packed (h, (w, c)).
    C, Hf, Wf = hidden_units * 4, 8, 8
    w1 = params["fc"]["w1"]
    Dh = w1.shape[-1]
    w1_hwc = w1.reshape(C, Hf, Wf, Dh).transpose(1, 2, 0, 3).reshape(Hf, Wf * C, Dh)
    kp["fc"] = dict(
        w1=w1_hwc,
        b1=params["fc"]["b1"].reshape(1, Dh),
        w2=params["fc"]["w2"],
        b2=params["fc"]["b2"].reshape(1, -1),
    )
    return kp


# ----------------------------------------------------------------------------
# Forward passes
# ----------------------------------------------------------------------------
def dog_or_cat_forward(x_nchw, kparams):
    """Pallas forward pass.  x: (N, Cin, H, W) f32 (PyTorch layout)."""
    N, Cin, H, W = x_nchw.shape
    x = jnp.transpose(x_nchw, (0, 2, 3, 1))              # NCHW -> NHWC once
    if Cin < CIN_PAD:
        x = jnp.pad(x, ((0, 0), (0, 0), (0, 0), (0, CIN_PAD - Cin)))
    x = x.reshape(N, H, W * x.shape[-1])                 # lane-dense packed input
    for blk in ("block1", "block2"):
        p = kparams[blk]
        x = fused_conv_block(x, p["w1"], p["b1"], p["w2"], p["b2"])
    p3, fc = kparams["block3"], kparams["fc"]
    return fused_conv_block_classifier(
        x, p3["w1"], p3["b1"], p3["w2"], p3["b2"],
        fc["w1"], fc["b1"], fc["w2"], fc["b2"])


def reference_forward(x_nchw, params, eps=1e-5):
    """Pure-JAX emulation of the PyTorch module (eval-mode BatchNorm)."""
    def conv(x, w):
        return jax.lax.conv_general_dilated(
            x, w, window_strides=(1, 1), padding=((1, 1), (1, 1)),
            dimension_numbers=("NHWC", "HWIO", "NHWC"))

    x = jnp.transpose(x_nchw, (0, 2, 3, 1))
    for blk in ("block1", "block2", "block3"):
        p = params[blk]
        x = jnp.maximum(conv(x, p["w1"]) + p["b1"], 0.0)
        x = conv(x, p["w2"]) + p["b2"]
        gamma, beta, mean, var = p["bn"]
        x = (x - mean) / jnp.sqrt(var + eps) * gamma + beta
        x = jnp.maximum(x, 0.0)
        N, H, W, C = x.shape
        x = jnp.max(x.reshape(N, H // 2, 2, W // 2, 2, C), axis=(2, 4))
    N = x.shape[0]
    x_flat = jnp.transpose(x, (0, 3, 1, 2)).reshape(N, -1)   # torch Flatten order
    fc = params["fc"]
    h = jnp.tanh(x_flat @ fc["w1"] + fc["b1"])
    return h @ fc["w2"] + fc["b2"]


if __name__ == "__main__":
    # Smallest shapes consistent with the module: the classifier expects
    # hidden_units*4 * 8 * 8 features, i.e. 64x64 spatial input
    # (three 2x2 max-pools: 64 -> 32 -> 16 -> 8).
    batch, input_shape, hidden_units, output_shape = 2, 3, 8, 2
    key = jax.random.PRNGKey(0)
    kx, kp = jax.random.split(key)
    x = jax.random.normal(kx, (batch, input_shape, 64, 64), jnp.float32)

    params = init_params(kp, input_shape, hidden_units, output_shape)
    kparams = prepare_kernel_params(params, hidden_units)

    out = dog_or_cat_forward(x, kparams)
    out = jax.block_until_ready(out)

    ref = reference_forward(x, params)
    assert out.shape == (batch, output_shape), out.shape
    assert jnp.allclose(out, ref, rtol=1e-2, atol=2e-3), (
        float(jnp.max(jnp.abs(out - ref))))

    print("KERNEL_OK")
</pallas_src>

<mosaic_0001>
module attributes {stable_mosaic.version = 11 : i64} {
  func.func @kernel(%arg0: i32, %arg1: memref<1x8x8x512xf32, #tpu.memory_space<vmem>>, %arg2: memref<9x8x8xf32, #tpu.memory_space<vmem>>, %arg3: memref<1x8xf32, #tpu.memory_space<vmem>>, %arg4: memref<9x8x8xf32, #tpu.memory_space<vmem>>, %arg5: memref<1x8xf32, #tpu.memory_space<vmem>>, %arg6: memref<1x8x4x256xf32, #tpu.memory_space<vmem>>, %arg7: memref<66x80x8xf32, #tpu.memory_space<vmem>>, %arg8: memref<66x80x8xf32, #tpu.memory_space<vmem>>) attributes {dimension_semantics = [#tpu.dimension_semantics<parallel>], iteration_bounds = array<i64: 2>, scalar_prefetch = 0 : i64, scratch_operands = 2 : i64, tpu.core_type = #tpu.core_type<tc>, window_params = [{transform_indices = @transform_0, window_bounds = array<i64: 1, 8, 8, 512>}, {pipeline_mode = #tpu.pipeline_mode<synchronous>, transform_indices = @transform_1, window_bounds = array<i64: 9, 8, 8>}, {pipeline_mode = #tpu.pipeline_mode<synchronous>, transform_indices = @transform_2, window_bounds = array<i64: 1, 8>}, {pipeline_mode = #tpu.pipeline_mode<synchronous>, transform_indices = @transform_3, window_bounds = array<i64: 9, 8, 8>}, {pipeline_mode = #tpu.pipeline_mode<synchronous>, transform_indices = @transform_4, window_bounds = array<i64: 1, 8>}, {transform_indices = @transform_5, window_bounds = array<i64: 1, 8, 4, 256>}]} {
    %cst = arith.constant 0.000000e+00 : f32
    %0 = vector.broadcast %cst : f32 to vector<1x66x8xf32>
    %cst_0 = arith.constant 0.000000e+00 : f32
    %1 = vector.broadcast %cst_0 : f32 to vector<64x1x8xf32>
    %c0 = arith.constant 0 : index
    %c7 = arith.constant 7 : index
    %c0_1 = arith.constant 0 : index
    %2 = vector.load %arg7[%c0, %c7, %c0_1] : memref<66x80x8xf32, #tpu.memory_space<vmem>>, vector<1x66x8xf32>
    tpu.vector_store %arg7[%c0, %c7, %c0_1], %0 {strides = array<i32>} : memref<66x80x8xf32, #tpu.memory_space<vmem>>, vector<1x66x8xf32>,
    %c65 = arith.constant 65 : index
    %c7_2 = arith.constant 7 : index
    %c0_3 = arith.constant 0 : index
    %3 = vector.load %arg7[%c65, %c7_2, %c0_3] : memref<66x80x8xf32, #tpu.memory_space<vmem>>, vector<1x66x8xf32>
    tpu.vector_store %arg7[%c65, %c7_2, %c0_3], %0 {strides = array<i32>} : memref<66x80x8xf32, #tpu.memory_space<vmem>>, vector<1x66x8xf32>,
    %c1 = arith.constant 1 : index
    %c7_4 = arith.constant 7 : index
    %c0_5 = arith.constant 0 : index
    %4 = vector.load %arg7[%c1, %c7_4, %c0_5] : memref<66x80x8xf32, #tpu.memory_space<vmem>>, vector<64x1x8xf32>
    tpu.vector_store %arg7[%c1, %c7_4, %c0_5], %1 {strides = array<i32>} : memref<66x80x8xf32, #tpu.memory_space<vmem>>, vector<64x1x8xf32>,
    %c1_6 = arith.constant 1 : index
    %c72 = arith.constant 72 : index
    %c0_7 = arith.constant 0 : index
    %5 = vector.load %arg7[%c1_6, %c72, %c0_7] : memref<66x80x8xf32, #tpu.memory_space<vmem>>, vector<64x1x8xf32>
    tpu.vector_store %arg7[%c1_6, %c72, %c0_7], %1 {strides = array<i32>} : memref<66x80x8xf32, #tpu.memory_space<vmem>>, vector<64x1x8xf32>,
    %cst_8 = arith.constant 0.000000e+00 : f32
    %6 = vector.broadcast %cst_8 : f32 to vector<1x66x8xf32>
    %cst_9 = arith.constant 0.000000e+00 : f32
    %7 = vector.broadcast %cst_9 : f32 to vector<64x1x8xf32>
    %c0_10 = arith.constant 0 : index
    %c7_11 = arith.constant 7 : index
    %c0_12 = arith.constant 0 : index
    %8 = vector.load %arg8[%c0_10, %c7_11, %c0_12] : memref<66x80x8xf32, #tpu.memory_space<vmem>>, vector<1x66x8xf32>
    tpu.vector_store %arg8[%c0_10, %c7_11, %c0_12], %6 {strides = array<i32>} : memref<66x80x8xf32, #tpu.memory_space<vmem>>, vector<1x66x8xf32>,
    %c65_13 = arith.constant 65 : index
    %c7_14 = arith.constant 7 : index
    %c0_15 = arith.constant 0 : index
    %9 = vector.load %arg8[%c65_13, %c7_14, %c0_15] : memref<66x80x8xf32, #tpu.memory_space<vmem>>, vector<1x66x8xf32>
    tpu.vector_store %arg8[%c65_13, %c7_14, %c0_15], %6 {strides = array<i32>} : memref<66x80x8xf32, #tpu.memory_space<vmem>>, vector<1x66x8xf32>,
    %c1_16 = arith.constant 1 : index
    %c7_17 = arith.constant 7 : index
    %c0_18 = arith.constant 0 : index
    %10 = vector.load %arg8[%c1_16, %c7_17, %c0_18] : memref<66x80x8xf32, #tpu.memory_space<vmem>>, vector<64x1x8xf32>
    tpu.vector_store %arg8[%c1_16, %c7_17, %c0_18], %7 {strides = array<i32>} : memref<66x80x8xf32, #tpu.memory_space<vmem>>, vector<64x1x8xf32>,
    %c1_19 = arith.constant 1 : index
    %c72_20 = arith.constant 72 : index
    %c0_21 = arith.constant 0 : index
    %11 = vector.load %arg8[%c1_19, %c72_20, %c0_21] : memref<66x80x8xf32, #tpu.memory_space<vmem>>, vector<64x1x8xf32>
    tpu.vector_store %arg8[%c1_19, %c72_20, %c0_21], %7 {strides = array<i32>} : memref<66x80x8xf32, #tpu.memory_space<vmem>>, vector<64x1x8xf32>,
    %c0_22 = arith.constant 0 : index
    %c0_23 = arith.constant 0 : index
    %12 = vector.load %arg3[%c0_22, %c0_23] : memref<1x8xf32, #tpu.memory_space<vmem>>, vector<1x8xf32>
    %c0_i32 = arith.constant 0 : i32
    %c8_i32 = arith.constant 8 : i32
    %13 = arith.addi %c0_i32, %c8_i32 : i32
    %c1_i32 = arith.constant 1 : i32
    scf.for %arg9 = %c0_i32 to %13 step %c1_i32  : i32 {
      %c8_i32_35 = arith.constant 8 : i32
      %17 = arith.muli %arg9, %c8_i32_35 : i32
      %18 = tpu.assume_multiple %17, 8 : i32
      %c0_36 = arith.constant 0 : index
      %19 = arith.index_cast %arg9 : i32 to index
      %c0_37 = arith.constant 0 : index
      %c0_38 = arith.constant 0 : index
      %20 = vector.load %arg1[%c0_36, %19, %c0_37, %c0_38] : memref<1x8x8x512xf32, #tpu.memory_space<vmem>>, vector<1x1x8x512xf32>
      %21 = vector.shape_cast %20 : vector<1x1x8x512xf32> to vector<8x512xf32>
      %22 = vector.shape_cast %21 : vector<8x512xf32> to vector<8x64x8xf32>
      %c1_i32_39 = arith.constant 1 : i32
      %23 = arith.addi %c1_i32_39, %18 : i32
      %24 = arith.index_cast %23 : i32 to index
      %c8 = arith.constant 8 : index
      %c0_40 = arith.constant 0 : index
      %25 = vector.load %arg7[%24, %c8, %c0_40] : memref<66x80x8xf32, #tpu.memory_space<vmem>>, vector<8x64x8xf32>
      tpu.vector_store %arg7[%24, %c8, %c0_40], %22 {strides = array<i32>} : memref<66x80x8xf32, #tpu.memory_space<vmem>>, vector<8x64x8xf32>,
    }
    %c8_i32_24 = arith.constant 8 : i32
    %c0_i32_25 = arith.constant 0 : i32
    %c8_i32_26 = arith.constant 8 : i32
    %14 = arith.addi %c0_i32_25, %c8_i32_26 : i32
    %c1_i32_27 = arith.constant 1 : i32
    scf.for %arg9 = %c0_i32_25 to %14 step %c1_i32_27  : i32 {
      %c8_i32_35 = arith.constant 8 : i32
      %17 = arith.muli %arg9, %c8_i32_35 : i32
      %18 = tpu.assume_multiple %17, 8 : i32
      %cst_36 = arith.constant 0.000000e+00 : f32
      %19 = vector.broadcast %cst_36 : f32 to vector<512x8xf32>
      %c0_i32_37 = arith.constant 0 : i32
      %20 = arith.addi %18, %c0_i32_37 : i32
      %21 = arith.index_cast %20 : i32 to index
      %c7_38 = arith.constant 7 : index
      %c0_39 = arith.constant 0 : index
      %22 = vector.load %arg7[%21, %c7_38, %c0_39] : memref<66x80x8xf32, #tpu.memory_space<vmem>>, vector<8x64x8xf32>
      %23 = vector.shape_cast %22 : vector<8x64x8xf32> to vector<512x8xf32>
      %c0_40 = arith.constant 0 : index
      %c0_41 = arith.constant 0 : index
      %c0_42 = arith.constant 0 : index
      %24 = vector.load %arg2[%c0_40, %c0_41, %c0_42] : memref<9x8x8xf32, #tpu.memory_space<vmem>>, vector<1x8x8xf32>
      %25 = vector.shape_cast %24 : vector<1x8x8xf32> to vector<8x8xf32>
      %cst_43 = arith.constant dense<0.000000e+00> : vector<512x8xf32>
      %26 = tpu.matmul %23, %25, %cst_43 {dimension_numbers = #tpu.dot_dimension_numbers<[1], [0], [0], [1], [0, 0, 1, 1], [], []>} : vector<512x8xf32>, vector<8x8xf32>, vector<512x8xf32> -> vector<512x8xf32>
      %27 = arith.addf %19, %26 : vector<512x8xf32>
      %c0_i32_44 = arith.constant 0 : i32
      %28 = arith.addi %18, %c0_i32_44 : i32
      %29 = arith.index_cast %28 : i32 to index
      %c8 = arith.constant 8 : index
      %c0_45 = arith.constant 0 : index
      %30 = vector.load %arg7[%29, %c8, %c0_45] : memref<66x80x8xf32, #tpu.memory_space<vmem>>, vector<8x64x8xf32>
      %31 = vector.shape_cast %30 : vector<8x64x8xf32> to vector<512x8xf32>
      %c1_46 = arith.constant 1 : index
      %c0_47 = arith.constant 0 : index
      %c0_48 = arith.constant 0 : index
      %32 = vector.load %arg2[%c1_46, %c0_47, %c0_48] : memref<9x8x8xf32, #tpu.memory_space<vmem>>, vector<1x8x8xf32>
      %33 = vector.shape_cast %32 : vector<1x8x8xf32> to vector<8x8xf32>
      %cst_49 = arith.constant dense<0.000000e+00> : vector<512x8xf32>
      %34 = tpu.matmul %31, %33, %cst_49 {dimension_numbers = #tpu.dot_dimension_numbers<[1], [0], [0], [1], [0, 0, 1, 1], [], []>} : vector<512x8xf32>, vector<8x8xf32>, vector<512x8xf32> -> vector<512x8xf32>
      %35 = arith.addf %27, %34 : vector<512x8xf32>
      %c0_i32_50 = arith.constant 0 : i32
      %36 = arith.addi %18, %c0_i32_50 : i32
      %37 = arith.index_cast %36 : i32 to index
      %c9 = arith.constant 9 : index
      %c0_51 = arith.constant 0 : index
      %38 = vector.load %arg7[%37, %c9, %c0_51] : memref<66x80x8xf32, #tpu.memory_space<vmem>>, vector<8x64x8xf32>
      %39 = vector.shape_cast %38 : vector<8x64x8xf32> to vector<512x8xf32>
      %c2 = arith.constant 2 : index
      %c0_52 = arith.constant 0 : index
      %c0_53 = arith.constant 0 : index
      %40 = vector.load %arg2[%c2, %c0_52, %c0_53] : memref<9x8x8xf32, #tpu.memory_space<vmem>>, vector<1x8x8xf32>
      %41 = vector.shape_cast %40 : vector<1x8x8xf32> to vector<8x8xf32>
      %cst_54 = arith.constant dense<0.000000e+00> : vector<512x8xf32>
      %42 = tpu.matmul %39, %41, %cst_54 {dimension_numbers = #tpu.dot_dimension_numbers<[1], [0], [0], [1], [0, 0, 1, 1], [], []>} : vector<512x8xf32>, vector<8x8xf32>, vector<512x8xf32> -> vector<512x8xf32>
      %43 = arith.addf %35, %42 : vector<512x8xf32>
      %c1_i32_55 = arith.constant 1 : i32
      %44 = arith.addi %18, %c1_i32_55 : i32
      %45 = arith.index_cast %44 : i32 to index
      %c7_56 = arith.constant 7 : index
      %c0_57 = arith.constant 0 : index
      %46 = vector.load %arg7[%45, %c7_56, %c0_57] : memref<66x80x8xf32, #tpu.memory_space<vmem>>, vector<8x64x8xf32>
      %47 = vector.shape_cast %46 : vector<8x64x8xf32> to vector<512x8xf32>
      %c3 = arith.constant 3 : index
      %c0_58 = arith.constant 0 : index
      %c0_59 = arith.constant 0 : index
      %48 = vector.load %arg2[%c3, %c0_58, %c0_59] : memref<9x8x8xf32, #tpu.memory_space<vmem>>, vector<1x8x8xf32>
      %49 = vector.shape_cast %48 : vector<1x8x8xf32> to vector<8x8xf32>
      %cst_60 = arith.constant dense<0.000000e+00> : vector<512x8xf32>
      %50 = tpu.matmul %47, %49, %cst_60 {dimension_numbers = #tpu.dot_dimension_numbers<[1], [0], [0], [1], [0, 0, 1, 1], [], []>} : vector<512x8xf32>, vector<8x8xf32>, vector<512x8xf32> -> vector<512x8xf32>
      %51 = arith.addf %43, %50 : vector<512x8xf32>
      %c1_i32_61 = arith.constant 1 : i32
      %52 = arith.addi %18, %c1_i32_61 : i32
      %53 = arith.index_cast %52 : i32 to index
      %c8_62 = arith.constant 8 : index
      %c0_63 = arith.constant 0 : index
      %54 = vector.load %arg7[%53, %c8_62, %c0_63] : memref<66x80x8xf32, #tpu.memory_space<vmem>>, vector<8x64x8xf32>
      %55 = vector.shape_cast %54 : vector<8x64x8xf32> to vector<512x8xf32>
      %c4 = arith.constant 4 : index
      %c0_64 = arith.constant 0 : index
      %c0_65 = arith.constant 0 : index
      %56 = vector.load %arg2[%c4, %c0_64, %c0_65] : memref<9x8x8xf32, #tpu.memory_space<vmem>>, vector<1x8x8xf32>
      %57 = vector.shape_cast %56 : vector<1x8x8xf32> to vector<8x8xf32>
      %cst_66 = arith.constant dense<0.000000e+00> : vector<512x8xf32>
      %58 = tpu.matmul %55, %57, %cst_66 {dimension_numbers = #tpu.dot_dimension_numbers<[1], [0], [0], [1], [0, 0, 1, 1], [], []>} : vector<512x8xf32>, vector<8x8xf32>, vector<512x8xf32> -> vector<512x8xf32>
      %59 = arith.addf %51, %58 : vector<512x8xf32>
      %c1_i32_67 = arith.constant 1 : i32
      %60 = arith.addi %18, %c1_i32_67 : i32
      %61 = arith.index_cast %60 : i32 to index
      %c9_68 = arith.constant 9 : index
      %c0_69 = arith.constant 0 : index
      %62 = vector.load %arg7[%61, %c9_68, %c0_69] : memref<66x80x8xf32, #tpu.memory_space<vmem>>, vector<8x64x8xf32>
      %63 = vector.shape_cast %62 : vector<8x64x8xf32> to vector<512x8xf32>
      %c5 = arith.constant 5 : index
      %c0_70 = arith.constant 0 : index
      %c0_71 = arith.constant 0 : index
      %64 = vector.load %arg2[%c5, %c0_70, %c0_71] : memref<9x8x8xf32, #tpu.memory_space<vmem>>, vector<1x8x8xf32>
      %65 = vector.shape_cast %64 : vector<1x8x8xf32> to vector<8x8xf32>
      %cst_72 = arith.constant dense<0.000000e+00> : vector<512x8xf32>
      %66 = tpu.matmul %63, %65, %cst_72 {dimension_numbers = #tpu.dot_dimension_numbers<[1], [0], [0], [1], [0, 0, 1, 1], [], []>} : vector<512x8xf32>, vector<8x8xf32>, vector<512x8xf32> -> vector<512x8xf32>
      %67 = arith.addf %59, %66 : vector<512x8xf32>
      %c2_i32 = arith.constant 2 : i32
      %68 = arith.addi %18, %c2_i32 : i32
      %69 = arith.index_cast %68 : i32 to index
      %c7_73 = arith.constant 7 : index
      %c0_74 = arith.constant 0 : index
      %70 = vector.load %arg7[%69, %c7_73, %c0_74] : memref<66x80x8xf32, #tpu.memory_space<vmem>>, vector<8x64x8xf32>
      %71 = vector.shape_cast %70 : vector<8x64x8xf32> to vector<512x8xf32>
      %c6 = arith.constant 6 : index
      %c0_75 = arith.constant 0 : index
      %c0_76 = arith.constant 0 : index
      %72 = vector.load %arg2[%c6, %c0_75, %c0_76] : memref<9x8x8xf32, #tpu.memory_space<vmem>>, vector<1x8x8xf32>
      %73 = vector.shape_cast %72 : vector<1x8x8xf32> to vector<8x8xf32>
      %cst_77 = arith.constant dense<0.000000e+00> : vector<512x8xf32>
      %74 = tpu.matmul %71, %73, %cst_77 {dimension_numbers = #tpu.dot_dimension_numbers<[1], [0], [0], [1], [0, 0, 1, 1], [], []>} : vector<512x8xf32>, vector<8x8xf32>, vector<512x8xf32> -> vector<512x8xf32>
      %75 = arith.addf %67, %74 : vector<512x8xf32>
      %c2_i32_78 = arith.constant 2 : i32
      %76 = arith.addi %18, %c2_i32_78 : i32
      %77 = arith.index_cast %76 : i32 to index
      %c8_79 = arith.constant 8 : index
      %c0_80 = arith.constant 0 : index
      %78 = vector.load %arg7[%77, %c8_79, %c0_80] : memref<66x80x8xf32, #tpu.memory_space<vmem>>, vector<8x64x8xf32>
      %79 = vector.shape_cast %78 : vector<8x64x8xf32> to vector<512x8xf32>
      %c7_81 = arith.constant 7 : index
      %c0_82 = arith.constant 0 : index
      %c0_83 = arith.constant 0 : index
      %80 = vector.load %arg2[%c7_81, %c0_82, %c0_83] : memref<9x8x8xf32, #tpu.memory_space<vmem>>, vector<1x8x8xf32>
      %81 = vector.shape_cast %80 : vector<1x8x8xf32> to vector<8x8xf32>
      %cst_84 = arith.constant dense<0.000000e+00> : vector<512x8xf32>
      %82 = tpu.matmul %79, %81, %cst_84 {dimension_numbers = #tpu.dot_dimension_numbers<[1], [0], [0], [1], [0, 0, 1, 1], [], []>} : vector<512x8xf32>, vector<8x8xf32>, vector<512x8xf32> -> vector<512x8xf32>
      %83 = arith.addf %75, %82 : vector<512x8xf32>
      %c2_i32_85 = arith.constant 2 : i32
      %84 = arith.addi %18, %c2_i32_85 : i32
      %85 = arith.index_cast %84 : i32 to index
      %c9_86 = arith.constant 9 : index
      %c0_87 = arith.constant 0 : index
      %86 = vector.load %arg7[%85, %c9_86, %c0_87] : memref<66x80x8xf32, #tpu.memory_space<vmem>>, vector<8x64x8xf32>
      %87 = vector.shape_cast %86 : vector<8x64x8xf32> to vector<512x8xf32>
      %c8_88 = arith.constant 8 : index
      %c0_89 = arith.constant 0 : index
      %c0_90 = arith.constant 0 : index
      %88 = vector.load %arg2[%c8_88, %c0_89, %c0_90] : memref<9x8x8xf32, #tpu.memory_space<vmem>>, vector<1x8x8xf32>
      %89 = vector.shape_cast %88 : vector<1x8x8xf32> to vector<8x8xf32>
      %cst_91 = arith.constant dense<0.000000e+00> : vector<512x8xf32>
      %90 = tpu.matmul %87, %89, %cst_91 {dimension_numbers = #tpu.dot_dimension_numbers<[1], [0], [0], [1], [0, 0, 1, 1], [], []>} : vector<512x8xf32>, vector<8x8xf32>, vector<512x8xf32> -> vector<512x8xf32>
      %91 = arith.addf %83, %90 : vector<512x8xf32>
      %92 = vector.broadcast %12 : vector<1x8xf32> to vector<512x8xf32>
      %93 = arith.addf %91, %92 : vector<512x8xf32>
      %cst_92 = arith.constant 0.000000e+00 : f32
      %94 = vector.broadcast %cst_92 : f32 to vector<512x8xf32>
      %95 = arith.maximumf %93, %94 : vector<512x8xf32>
      %96 = vector.shape_cast %95 : vector<512x8xf32> to vector<8x64x8xf32>
      %c1_i32_93 = arith.constant 1 : i32
      %97 = arith.addi %c1_i32_93, %18 : i32
      %98 = arith.index_cast %97 : i32 to index
      %c8_94 = arith.constant 8 : index
      %c0_95 = arith.constant 0 : index
      %99 = vector.load %arg8[%98, %c8_94, %c0_95] : memref<66x80x8xf32, #tpu.memory_space<vmem>>, vector<8x64x8xf32>
      tpu.vector_store %arg8[%98, %c8_94, %c0_95], %96 {strides = array<i32>} : memref<66x80x8xf32, #tpu.memory_space<vmem>>, vector<8x64x8xf32>,
    }
    %c8_i32_28 = arith.constant 8 : i32
    %c0_29 = arith.constant 0 : index
    %c0_30 = arith.constant 0 : index
    %15 = vector.load %arg5[%c0_29, %c0_30] : memref<1x8xf32, #tpu.memory_space<vmem>>, vector<1x8xf32>
    %c0_i32_31 = arith.constant 0 : i32
    %c8_i32_32 = arith.constant 8 : i32
    %16 = arith.addi %c0_i32_31, %c8_i32_32 : i32
    %c1_i32_33 = arith.constant 1 : i32
    scf.for %arg9 = %c0_i32_31 to %16 step %c1_i32_33  : i32 {
      %c8_i32_35 = arith.constant 8 : i32
      %17 = arith.muli %arg9, %c8_i32_35 : i32
      %18 = tpu.assume_multiple %17, 8 : i32
      %cst_36 = arith.constant 0.000000e+00 : f32
      %19 = vector.broadcast %cst_36 : f32 to vector<512x8xf32>
      %c0_i32_37 = arith.constant 0 : i32
      %20 = arith.addi %18, %c0_i32_37 : i32
      %21 = arith.index_cast %20 : i32 to index
      %c7_38 = arith.constant 7 : index
      %c0_39 = arith.constant 0 : index
      %22 = vector.load %arg8[%21, %c7_38, %c0_39] : memref<66x80x8xf32, #tpu.memory_space<vmem>>, vector<8x64x8xf32>
      %23 = vector.shape_cast %22 : vector<8x64x8xf32> to vector<512x8xf32>
      %c0_40 = arith.constant 0 : index
      %c0_41 = arith.constant 0 : index
      %c0_42 = arith.constant 0 : index
      %24 = vector.load %arg4[%c0_40, %c0_41, %c0_42] : memref<9x8x8xf32, #tpu.memory_space<vmem>>, vector<1x8x8xf32>
      %25 = vector.shape_cast %24 : vector<1x8x8xf32> to vector<8x8xf32>
      %cst_43 = arith.constant dense<0.000000e+00> : vector<512x8xf32>
      %26 = tpu.matmul %23, %25, %cst_43 {dimension_numbers = #tpu.dot_dimension_numbers<[1], [0], [0], [1], [0, 0, 1, 1], [], []>} : vector<512x8xf32>, vector<8x8xf32>, vector<512x8xf32> -> vector<512x8xf32>
      %27 = arith.addf %19, %26 : vector<512x8xf32>
      %c0_i32_44 = arith.constant 0 : i32
      %28 = arith.addi %18, %c0_i32_44 : i32
      %29 = arith.index_cast %28 : i32 to index
      %c8 = arith.constant 8 : index
      %c0_45 = arith.constant 0 : index
      %30 = vector.load %arg8[%29, %c8, %c0_45] : memref<66x80x8xf32, #tpu.memory_space<vmem>>, vector<8x64x8xf32>
      %31 = vector.shape_cast %30 : vector<8x64x8xf32> to vector<512x8xf32>
      %c1_46 = arith.constant 1 : index
      %c0_47 = arith.constant 0 : index
      %c0_48 = arith.constant 0 : index
      %32 = vector.load %arg4[%c1_46, %c0_47, %c0_48] : memref<9x8x8xf32, #tpu.memory_space<vmem>>, vector<1x8x8xf32>
      %33 = vector.shape_cast %32 : vector<1x8x8xf32> to vector<8x8xf32>
      %cst_49 = arith.constant dense<0.000000e+00> : vector<512x8xf32>
      %34 = tpu.matmul %31, %33, %cst_49 {dimension_numbers = #tpu.dot_dimension_numbers<[1], [0], [0], [1], [0, 0, 1, 1], [], []>} : vector<512x8xf32>, vector<8x8xf32>, vector<512x8xf32> -> vector<512x8xf32>
      %35 = arith.addf %27, %34 : vector<512x8xf32>
      %c0_i32_50 = arith.constant 0 : i32
      %36 = arith.addi %18, %c0_i32_50 : i32
      %37 = arith.index_cast %36 : i32 to index
      %c9 = arith.constant 9 : index
      %c0_51 = arith.constant 0 : index
      %38 = vector.load %arg8[%37, %c9, %c0_51] : memref<66x80x8xf32, #tpu.memory_space<vmem>>, vector<8x64x8xf32>
      %39 = vector.shape_cast %38 : vector<8x64x8xf32> to vector<512x8xf32>
      %c2 = arith.constant 2 : index
      %c0_52 = arith.constant 0 : index
      %c0_53 = arith.constant 0 : index
      %40 = vector.load %arg4[%c2, %c0_52, %c0_53] : memref<9x8x8xf32, #tpu.memory_space<vmem>>, vector<1x8x8xf32>
      %41 = vector.shape_cast %40 : vector<1x8x8xf32> to vector<8x8xf32>
      %cst_54 = arith.constant dense<0.000000e+00> : vector<512x8xf32>
      %42 = tpu.matmul %39, %41, %cst_54 {dimension_numbers = #tpu.dot_dimension_numbers<[1], [0], [0], [1], [0, 0, 1, 1], [], []>} : vector<512x8xf32>, vector<8x8xf32>, vector<512x8xf32> -> vector<512x8xf32>
      %43 = arith.addf %35, %42 : vector<512x8xf32>
      %c1_i32_55 = arith.constant 1 : i32
      %44 = arith.addi %18, %c1_i32_55 : i32
      %45 = arith.index_cast %44 : i32 to index
      %c7_56 = arith.constant 7 : index
      %c0_57 = arith.constant 0 : index
      %46 = vector.load %arg8[%45, %c7_56, %c0_57] : memref<66x80x8xf32, #tpu.memory_space<vmem>>, vector<8x64x8xf32>
      %47 = vector.shape_cast %46 : vector<8x64x8xf32> to vector<512x8xf32>
      %c3 = arith.constant 3 : index
      %c0_58 = arith.constant 0 : index
      %c0_59 = arith.constant 0 : index
      %48 = vector.load %arg4[%c3, %c0_58, %c0_59] : memref<9x8x8xf32, #tpu.memory_space<vmem>>, vector<1x8x8xf32>
      %49 = vector.shape_cast %48 : vector<1x8x8xf32> to vector<8x8xf32>
      %cst_60 = arith.constant dense<0.000000e+00> : vector<512x8xf32>
      %50 = tpu.matmul %47, %49, %cst_60 {dimension_numbers = #tpu.dot_dimension_numbers<[1], [0], [0], [1], [0, 0, 1, 1], [], []>} : vector<512x8xf32>, vector<8x8xf32>, vector<512x8xf32> -> vector<512x8xf32>
      %51 = arith.addf %43, %50 : vector<512x8xf32>
      %c1_i32_61 = arith.constant 1 : i32
      %52 = arith.addi %18, %c1_i32_61 : i32
      %53 = arith.index_cast %52 : i32 to index
      %c8_62 = arith.constant 8 : index
      %c0_63 = arith.constant 0 : index
      %54 = vector.load %arg8[%53, %c8_62, %c0_63] : memref<66x80x8xf32, #tpu.memory_space<vmem>>, vector<8x64x8xf32>
      %55 = vector.shape_cast %54 : vector<8x64x8xf32> to vector<512x8xf32>
      %c4 = arith.constant 4 : index
      %c0_64 = arith.constant 0 : index
      %c0_65 = arith.constant 0 : index
      %56 = vector.load %arg4[%c4, %c0_64, %c0_65] : memref<9x8x8xf32, #tpu.memory_space<vmem>>, vector<1x8x8xf32>
      %57 = vector.shape_cast %56 : vector<1x8x8xf32> to vector<8x8xf32>
      %cst_66 = arith.constant dense<0.000000e+00> : vector<512x8xf32>
      %58 = tpu.matmul %55, %57, %cst_66 {dimension_numbers = #tpu.dot_dimension_numbers<[1], [0], [0], [1], [0, 0, 1, 1], [], []>} : vector<512x8xf32>, vector<8x8xf32>, vector<512x8xf32> -> vector<512x8xf32>
      %59 = arith.addf %51, %58 : vector<512x8xf32>
      %c1_i32_67 = arith.constant 1 : i32
      %60 = arith.addi %18, %c1_i32_67 : i32
      %61 = arith.index_cast %60 : i32 to index
      %c9_68 = arith.constant 9 : index
      %c0_69 = arith.constant 0 : index
      %62 = vector.load %arg8[%61, %c9_68, %c0_69] : memref<66x80x8xf32, #tpu.memory_space<vmem>>, vector<8x64x8xf32>
      %63 = vector.shape_cast %62 : vector<8x64x8xf32> to vector<512x8xf32>
      %c5 = arith.constant 5 : index
      %c0_70 = arith.constant 0 : index
      %c0_71 = arith.constant 0 : index
      %64 = vector.load %arg4[%c5, %c0_70, %c0_71] : memref<9x8x8xf32, #tpu.memory_space<vmem>>, vector<1x8x8xf32>
      %65 = vector.shape_cast %64 : vector<1x8x8xf32> to vector<8x8xf32>
      %cst_72 = arith.constant dense<0.000000e+00> : vector<512x8xf32>
      %66 = tpu.matmul %63, %65, %cst_72 {dimension_numbers = #tpu.dot_dimension_numbers<[1], [0], [0], [1], [0, 0, 1, 1], [], []>} : vector<512x8xf32>, vector<8x8xf32>, vector<512x8xf32> -> vector<512x8xf32>
      %67 = arith.addf %59, %66 : vector<512x8xf32>
      %c2_i32 = arith.constant 2 : i32
      %68 = arith.addi %18, %c2_i32 : i32
      %69 = arith.index_cast %68 : i32 to index
      %c7_73 = arith.constant 7 : index
      %c0_74 = arith.constant 0 : index
      %70 = vector.load %arg8[%69, %c7_73, %c0_74] : memref<66x80x8xf32, #tpu.memory_space<vmem>>, vector<8x64x8xf32>
      %71 = vector.shape_cast %70 : vector<8x64x8xf32> to vector<512x8xf32>
      %c6 = arith.constant 6 : index
      %c0_75 = arith.constant 0 : index
      %c0_76 = arith.constant 0 : index
      %72 = vector.load %arg4[%c6, %c0_75, %c0_76] : memref<9x8x8xf32, #tpu.memory_space<vmem>>, vector<1x8x8xf32>
      %73 = vector.shape_cast %72 : vector<1x8x8xf32> to vector<8x8xf32>
      %cst_77 = arith.constant dense<0.000000e+00> : vector<512x8xf32>
      %74 = tpu.matmul %71, %73, %cst_77 {dimension_numbers = #tpu.dot_dimension_numbers<[1], [0], [0], [1], [0, 0, 1, 1], [], []>} : vector<512x8xf32>, vector<8x8xf32>, vector<512x8xf32> -> vector<512x8xf32>
      %75 = arith.addf %67, %74 : vector<512x8xf32>
      %c2_i32_78 = arith.constant 2 : i32
      %76 = arith.addi %18, %c2_i32_78 : i32
      %77 = arith.index_cast %76 : i32 to index
      %c8_79 = arith.constant 8 : index
      %c0_80 = arith.constant 0 : index
      %78 = vector.load %arg8[%77, %c8_79, %c0_80] : memref<66x80x8xf32, #tpu.memory_space<vmem>>, vector<8x64x8xf32>
      %79 = vector.shape_cast %78 : vector<8x64x8xf32> to vector<512x8xf32>
      %c7_81 = arith.constant 7 : index
      %c0_82 = arith.constant 0 : index
      %c0_83 = arith.constant 0 : index
      %80 = vector.load %arg4[%c7_81, %c0_82, %c0_83] : memref<9x8x8xf32, #tpu.memory_space<vmem>>, vector<1x8x8xf32>
      %81 = vector.shape_cast %80 : vector<1x8x8xf32> to vector<8x8xf32>
      %cst_84 = arith.constant dense<0.000000e+00> : vector<512x8xf32>
      %82 = tpu.matmul %79, %81, %cst_84 {dimension_numbers = #tpu.dot_dimension_numbers<[1], [0], [0], [1], [0, 0, 1, 1], [], []>} : vector<512x8xf32>, vector<8x8xf32>, vector<512x8xf32> -> vector<512x8xf32>
      %83 = arith.addf %75, %82 : vector<512x8xf32>
      %c2_i32_85 = arith.constant 2 : i32
      %84 = arith.addi %18, %c2_i32_85 : i32
      %85 = arith.index_cast %84 : i32 to index
      %c9_86 = arith.constant 9 : index
      %c0_87 = arith.constant 0 : index
      %86 = vector.load %arg8[%85, %c9_86, %c0_87] : memref<66x80x8xf32, #tpu.memory_space<vmem>>, vector<8x64x8xf32>
      %87 = vector.shape_cast %86 : vector<8x64x8xf32> to vector<512x8xf32>
      %c8_88 = arith.constant 8 : index
      %c0_89 = arith.constant 0 : index
      %c0_90 = arith.constant 0 : index
      %88 = vector.load %arg4[%c8_88, %c0_89, %c0_90] : memref<9x8x8xf32, #tpu.memory_space<vmem>>, vector<1x8x8xf32>
      %89 = vector.shape_cast %88 : vector<1x8x8xf32> to vector<8x8xf32>
      %cst_91 = arith.constant dense<0.000000e+00> : vector<512x8xf32>
      %90 = tpu.matmul %87, %89, %cst_91 {dimension_numbers = #tpu.dot_dimension_numbers<[1], [0], [0], [1], [0, 0, 1, 1], [], []>} : vector<512x8xf32>, vector<8x8xf32>, vector<512x8xf32> -> vector<512x8xf32>
      %91 = arith.addf %83, %90 : vector<512x8xf32>
      %92 = vector.broadcast %15 : vector<1x8xf32> to vector<512x8xf32>
      %93 = arith.addf %91, %92 : vector<512x8xf32>
      %cst_92 = arith.constant 0.000000e+00 : f32
      %94 = vector.broadcast %cst_92 : f32 to vector<512x8xf32>
      %95 = arith.maximumf %93, %94 : vector<512x8xf32>
      %96 = vector.shape_cast %95 : vector<512x8xf32> to vector<256x2x8xf32>
      %97 = vector.extract_strided_slice %96 {offsets = [0, 0, 0], sizes = [256, 1, 8], strides = [1, 1, 1]} : vector<256x2x8xf32> to vector<256x1x8xf32>
      %98 = vector.shape_cast %97 : vector<256x1x8xf32> to vector<256x8xf32>
      %99 = vector.extract_strided_slice %96 {offsets = [0, 1, 0], sizes = [256, 1, 8], strides = [1, 1, 1]} : vector<256x2x8xf32> to vector<256x1x8xf32>
      %100 = vector.shape_cast %99 : vector<256x1x8xf32> to vector<256x8xf32>
      %101 = arith.maximumf %98, %100 : vector<256x8xf32>
      %102 = vector.shape_cast %101 : vector<256x8xf32> to vector<4x2x32x8xf32>
      %103 = vector.extract_strided_slice %102 {offsets = [0, 0, 0, 0], sizes = [4, 1, 32, 8], strides = [1, 1, 1, 1]} : vector<4x2x32x8xf32> to vector<4x1x32x8xf32>
      %104 = vector.shape_cast %103 : vector<4x1x32x8xf32> to vector<4x32x8xf32>
      %105 = vector.extract_strided_slice %102 {offsets = [0, 1, 0, 0], sizes = [4, 1, 32, 8], strides = [1, 1, 1, 1]} : vector<4x2x32x8xf32> to vector<4x1x32x8xf32>
      %106 = vector.shape_cast %105 : vector<4x1x32x8xf32> to vector<4x32x8xf32>
      %107 = arith.maximumf %104, %106 : vector<4x32x8xf32>
      %108 = vector.shape_cast %107 : vector<4x32x8xf32> to vector<4x256xf32>
      %c0_93 = arith.constant 0 : index
      %109 = arith.index_cast %arg9 : i32 to index
      %c0_94 = arith.constant 0 : index
      %c0_95 = arith.constant 0 : index
      %110 = vector.load %arg6[%c0_93, %109, %c0_94, %c0_95] : memref<1x8x4x256xf32, #tpu.memory_space<vmem>>, vector<1x1x4x256xf32>
      %111 = vector.shape_cast %110 : vector<1x1x4x256xf32> to vector<4x256xf32>
      %112 = vector.shape_cast %108 : vector<4x256xf32> to vector<1x1x4x256xf32>
      tpu.vector_store %arg6[%c0_93, %109, %c0_94, %c0_95], %112 {strides = array<i32>} : memref<1x8x4x256xf32, #tpu.memory_space<vmem>>, vector<1x1x4x256xf32>,
    }
    %c8_i32_34 = arith.constant 8 : i32
    return
  }
  func.func @transform_0(%arg0: i32) -> (i32, i32, i32, i32) {
    %c0_i32 = arith.constant 0 : i32
    %c0_i32_0 = arith.constant 0 : i32
    %c0_i32_1 = arith.constant 0 : i32
    %c0_i32_2 = arith.constant 0 : i32
    return %arg0, %c0_i32, %c0_i32_0, %c0_i32_1 : i32, i32, i32, i32
  }
  func.func @transform_1(%arg0: i32) -> (i32, i32, i32) {
    %c0_i32 = arith.constant 0 : i32
    %c0_i32_0 = arith.constant 0 : i32
    %c0_i32_1 = arith.constant 0 : i32
    %c0_i32_2 = arith.constant 0 : i32
    return %c0_i32, %c0_i32_0, %c0_i32_1 : i32, i32, i32
  }
  func.func @transform_2(%arg0: i32) -> (i32, i32) {
    %c0_i32 = arith.constant 0 : i32
    %c0_i32_0 = arith.constant 0 : i32
    %c0_i32_1 = arith.constant 0 : i32
    return %c0_i32, %c0_i32_0 : i32, i32
  }
  func.func @transform_3(%arg0: i32) -> (i32, i32, i32) {
    %c0_i32 = arith.constant 0 : i32
    %c0_i32_0 = arith.constant 0 : i32
    %c0_i32_1 = arith.constant 0 : i32
    %c0_i32_2 = arith.constant 0 : i32
    return %c0_i32, %c0_i32_0, %c0_i32_1 : i32, i32, i32
  }
  func.func @transform_4(%arg0: i32) -> (i32, i32) {
    %c0_i32 = arith.constant 0 : i32
    %c0_i32_0 = arith.constant 0 : i32
    %c0_i32_1 = arith.constant 0 : i32
    return %c0_i32, %c0_i32_0 : i32, i32
  }
  func.func @transform_5(%arg0: i32) -> (i32, i32, i32, i32) {
    %c0_i32 = arith.constant 0 : i32
    %c0_i32_0 = arith.constant 0 : i32
    %c0_i32_1 = arith.constant 0 : i32
    %c0_i32_2 = arith.constant 0 : i32
    return %arg0, %c0_i32, %c0_i32_0, %c0_i32_1 : i32, i32, i32, i32
  }
}

</mosaic_0001>

<bundles_post_ra>
// kernel: tpu_custom_call.1
= control target key start
LH: loop header
LB: loop body
LE: loop exit
PB: predicated region body
PF: predicated region fallthrough
CT: control target
= control target key end

     0   :  { %s32305_s0 = inlined_call_operand.hbm [shape: f32[2,8,8,512], index: 0, kind: input, shape index: {}]   ;;  %s32306_s1 = inlined_call_operand.vmem [shape: f32[9,8,8], index: 1, kind: input, shape index: {}]   ;;  %s32307_s2 = inlined_call_operand.vmem [shape: f32[1,8], index: 2, kind: input, shape index: {}]   ;;  %s32308_s3 = inlined_call_operand.vmem [shape: f32[9,8,8], index: 3, kind: input, shape index: {}]   ;;  %s32309_s4 = inlined_call_operand.vmem [shape: f32[1,8], index: 4, kind: input, shape index: {}]   ;;  %s32310_s5 = inlined_call_operand.hbm [shape: f32[2,8,4,256], index: 5, kind: output, shape index: {}]  }
   0x1   :  { %32589 = sst [smem:[#allocation213_spill]] %s32305_s0 }
   0x2   :  { %32590 = sst [smem:[#allocation214_spill]] %s32307_s2 }
   0x3   :  { %10 = vsyncpa [#allocation5], 0 }
   0x4   :  { %12 = vsyncpa [#allocation5 + $0x1], 0 }
   0x5   :  { %13 = vsyncpa [#allocation6], 0 }
   0x6   :  { %15 = vsyncpa [#allocation6 + $0x1], 0  ;;  %s25458_s18 = smov 0   ;;  %s25460_s19 = smov 0  }
   0x7   :  { %s25462_s20 = smov 0   ;;  %s25464_s21 = smov 0  }
   0x8 LB: > { %s25479_s22 = sadd.s32 4294967295, %s25375_s21   ;;  %s18820_s23 = sadd.s32 4294967294, %s25375_s21   ;;  %s25375_s21 = sphi %s25464_s21, %s33336_s21   ;;  %s25371_s20 = sphi %s25462_s20, %s33335_s20   ;;  %s25367_s19 = sphi %s25460_s19, %s33334_s19   ;;  %s25363_s18 = sphi %s25458_s18, %s33333_s18  }
   0x9   : > { %s25483_s24 = sadd.s32 1, %s25375_s21   ;;  %s28_s25 = sadd.s32 1, %s25371_s20 }
   0xa   : > { %s25_s26 = ssub.s32 %s25375_s21, %s25483_s24  ;;  %p35_p0 = scmp.ne.s32.totalorder %s25371_s20, %s25367_s19 }
   0xb   : > { %p26_p1 = scmp.eq.s32.totalorder %s25_s26, 0  ;;  %p36_p2 = scmp.eq.s32.totalorder %s25375_s21, 0 }
   0xc   : > { %p41_p3 = scmp.ne.s32.totalorder %s25367_s19, %s25363_s18  ;;  %p42_p4 = scmp.eq.s32.totalorder %s25479_s22, 0 }
   0xd   : > { %s25495_s27 = scalar_select %p26_p1, %s25371_s20, %s28_s25  }
   0xe   : > { %p25497_p5 = por %p36_p2, %p35_p0  ;;  %p25501_p6 = por %p42_p4, %p41_p3 }
   0xf   : > { %32591 = sst [smem:[#allocation10_spill]] %s25495_s27  ;;  %p149_p7 = scmp.eq.s32.totalorder %s25479_s22, 1 }
  0x10   : > { %p155_p8 = scmp.eq.s32.totalorder %s18820_s23, 1  ;;  %p25170_p10 = scmp.lt.s32.totalorder %s25375_s21, 2 }
  0x11   : > { %p25508_p11 = por %p149_p7, %p35_p0  ;;  %s187_s7 = sand.u32 1, %s25371_s20  }
  0x12   : > { %p25512_p12 = por %p155_p8, %p41_p3  ;;  %s21192_s8 = sshll.u32 %s25375_s21, 12 }
  0x13   : > { %s32594_s30 = scalar_select %p25508_p11, 1, 0 }
  0x14   : > { %s32595_s6 = scalar_select %p25512_p12, 1, 0 }
  0x15   : > { %s18823_s9 = sshll.u32 %s187_s7, 8  ;;  %s32596_s0 = sld [smem:[#allocation213_spill]] }
  0x16   : > { %s191_s13 = scalar_lea.vmem [#allocation4], %s18823_s9  ;;  %p25525_p13 = pnand %p25170_p10, %p25497_p5 }
  0x17   : > { %s198_s14 = sshll.u32 %s191_s13, 4  ;;  %s25531_s16 = scalar_lea.sflag [#allocation5], %s187_s7  ;;  %s25529_s14 = int_to_ptr.vmem [resolvable:$true] %s198_s14 }
  0x18   : > { %p25269_p1 = pneg %p25525_p13 }
  0x1b   : > { %s25521_s12 = scalar_lea.hbm %s32596_s0, %s21192_s8  ;;  %s25272_s26 = scalar_lea.hbm %s32596_s0, 8192 }
  0x1c   : > { %s25267_s17 = scalar_lea.hbm %s25521_s12, 4096  ;;  %p25273_p4 = scmp.lt.u32.totalorder %s25521_s12, %s32596_s0 }
  0x1d   : > { %p25268_p0 = scmp.ne.s32.totalorder %s25521_s12, %s25267_s17  ;;  %p25274_p5 = scmp.lt.u32.totalorder %s25272_s26, %s25267_s17 }
  0x1e   : > { %p25276_p8 = scmp.lt.u32.totalorder %s25267_s17, %s25521_s12 }
  0x1f   : > { %p25270_p2 = pnand %p25269_p1, %p25268_p0  ;;  %p25275_p7 = por %p25274_p5, %p25273_p4 }
  0x21   : > { %p25271_p3 = pneg %p25270_p2  ;;  %p25277_p10 = por %p25276_p8, %p25275_p7 }
  0x23   : > { %p25278_p9 = pnand %p25277_p10, %p25271_p3 }
  0x25   : > { %25281 = shalt.err (!%p25278_p9)
}
  0x26   : > { %s25282_s7 = scalar_lea.vmem %s25529_s14, 4096  ;;  %s25389_s9 = smov [#allocation4]  }
  0x27   : > { %p25283_p0 = scmp.ne.s32.totalorder %s25529_s14, %s25282_s7  ;;  %s25287_s10 = sshll.u32 %s25389_s9, 4  ;;  %s25288_s10 = int_to_ptr.vmem [resolvable:$false] %s25287_s10 }
  0x28   : > { %s25289_s11 = scalar_lea.vmem %s25288_s10, 8192  ;;  %p25290_p11 = scmp.lt.s32.totalorder %s25529_s14, %s25288_s10 }
  0x29   : > { %p25285_p2 = pnand %p25283_p0, %p25269_p1  ;;  %p25291_p4 = scmp.lt.s32.totalorder %s25289_s11, %s25282_s7 }
  0x2b   : > { %p25286_p12 = pneg %p25285_p2  ;;  %p25292_p5 = por %p25291_p4, %p25290_p11 }
  0x2d   : > { %p25293_p7 = pnand %p25292_p5, %p25286_p12 }
  0x2f   : > { %25296 = shalt.err (!%p25293_p7)
}
  0x30   : > { %s25390_s13 = smov 512   ;;  %s25391_s17 = smov 32  }
  0x31   : > { %25165 = dma.hbm_to_vmem [thread:$0]  (!%p25525_p13), %s25521_s12, 4096, %s25529_s14, %s25531_s16, %s25390_s13, %s25390_s13, %s25391_s17  }
  0x32   : > { %p18826_p9 = scmp.ge.s32.totalorder %s25375_s21, 1  ;;  %p206_p1 = scmp.lt.s32.totalorder %s25375_s21, 3 }
  0x34   : > { %p207_p3 = pnand %p18826_p9, %p206_p1 }
  0x36   : > { %210 = sbr.rel (%p207_p3) target bundleno = 2493 (0x9bd), region = 40 }
  0x3d   : > { %s25562_s23 = sand.u32 1, %s25367_s19  }
  0x3e   : > { %s18827_s25 = sshll.u32 %s25562_s23, 8  ;;  %s213_s26 = scalar_lea.sflag [#allocation5], %s25562_s23 }
  0x3f   : > { %s25566_s28 = scalar_lea.vmem [#allocation4], %s18827_s25 }
  0x40   : > { %32598 = sst [smem:[#allocation11_spill]] %s25566_s28 }
  0x41   : > { %25354 = dma.done.wait (%p25501_p6), %s213_s26, 4096  }
  0x42   : > { %25356 = vsyncadd (%p25501_p6), %s213_s26, 4294963200  ;;  %s18828_s12 = sshll.u32 %s25562_s23, 6  ;;  %vm243_vm0 = vcmask 64512   ;;  %vm252_vm1 = vcmask 58368   ;;  %vm265_vm2 = vcmask 57344   ;;  %v25392_v0 = vmov 0.0  }
  0x43   : > { %244 = vst.msk [vmem:[#allocation2 + $0x7] sm:$0xff] %vm243_vm0, %v25392_v0  ;;  %245 = vst.msk [vmem:[#allocation2 + $0xf] sm:$0xff] %vm243_vm0, %v25392_v0  ;;  %s32599_s2 = sld [smem:[#allocation214_spill]]  ;;  %s26164_s15 = scalar_lea.vmem [#allocation7], %s18828_s12 }
  0x44   : > { %246 = vst.msk [vmem:[#allocation2 + $0x17] sm:$0xff] %vm243_vm0, %v25392_v0  ;;  %247 = vst.msk [vmem:[#allocation2 + $0x1f] sm:$0xff] %vm243_vm0, %v25392_v0  ;;  %s26166_s16 = smov 0  }
  0x45   : > { %248 = vst.msk [vmem:[#allocation2 + $0x27] sm:$0xff] %vm243_vm0, %v25392_v0  ;;  %249 = vst.msk [vmem:[#allocation2 + $0x2f] sm:$0xff] %vm243_vm0, %v25392_v0 }
  0x46   : > { %250 = vst.msk [vmem:[#allocation2 + $0x37] sm:$0xff] %vm243_vm0, %v25392_v0  ;;  %251 = vst.msk [vmem:[#allocation2 + $0x3f] sm:$0xff] %vm243_vm0, %v25392_v0 }
  0x47   : > { %255 = vst.msk [vmem:[#allocation2 + $0x1457] sm:$0xff] %vm243_vm0, %v25392_v0  ;;  %256 = vst.msk [vmem:[#allocation2 + $0x145f] sm:$0xff] %vm243_vm0, %v25392_v0 }
  0x48   : > { %257 = vst.msk [vmem:[#allocation2 + $0x1467] sm:$0xff] %vm243_vm0, %v25392_v0  ;;  %258 = vst.msk [vmem:[#allocation2 + $0x146f] sm:$0xff] %vm243_vm0, %v25392_v0 }
  0x49   : > { %259 = vst.msk [vmem:[#allocation2 + $0x1477] sm:$0xff] %vm243_vm0, %v25392_v0  ;;  %260 = vst.msk [vmem:[#allocation2 + $0x147f] sm:$0xff] %vm243_vm0, %v25392_v0  ;;  %v26160_v1 = vld [vmem:[%s32599_s2] ss:$0 sm:$0xff] }
  0x4a   : > { %261 = vst.msk [vmem:[#allocation2 + $0x1487] sm:$0xff] %vm243_vm0, %v25392_v0  ;;  %262 = vst.msk [vmem:[#allocation2 + $0x148f] sm:$0xff] %vm243_vm0, %v25392_v0 }
  0x4b   : > { %394 = vst.msk [vmem:[#allocation3 + $0x7] sm:$0xff] %vm243_vm0, %v25392_v0  ;;  %395 = vst.msk [vmem:[#allocation3 + $0xf] sm:$0xff] %vm243_vm0, %v25392_v0 }
  0x4c   : > { %396 = vst.msk [vmem:[#allocation3 + $0x17] sm:$0xff] %vm243_vm0, %v25392_v0  ;;  %397 = vst.msk [vmem:[#allocation3 + $0x1f] sm:$0xff] %vm243_vm0, %v25392_v0 }
  0x4d   : > { %398 = vst.msk [vmem:[#allocation3 + $0x27] sm:$0xff] %vm243_vm0, %v25392_v0  ;;  %399 = vst.msk [vmem:[#allocation3 + $0x2f] sm:$0xff] %vm243_vm0, %v25392_v0 }
  0x4e   : > { %400 = vst.msk [vmem:[#allocation3 + $0x37] sm:$0xff] %vm243_vm0, %v25392_v0  ;;  %401 = vst.msk [vmem:[#allocation3 + $0x3f] sm:$0xff] %vm243_vm0, %v25392_v0 }
  0x4f   : > { %404 = vst.msk [vmem:[#allocation3 + $0x1457] sm:$0xff] %vm243_vm0, %v25392_v0  ;;  %405 = vst.msk [vmem:[#allocation3 + $0x145f] sm:$0xff] %vm243_vm0, %v25392_v0 }
  0x50   : > { %406 = vst.msk [vmem:[#allocation3 + $0x1467] sm:$0xff] %vm243_vm0, %v25392_v0  ;;  %407 = vst.msk [vmem:[#allocation3 + $0x146f] sm:$0xff] %vm243_vm0, %v25392_v0 }
  0x51   : > { %408 = vst.msk [vmem:[#allocation3 + $0x1477] sm:$0xff] %vm243_vm0, %v25392_v0  ;;  %409 = vst.msk [vmem:[#allocation3 + $0x147f] sm:$0xff] %vm243_vm0, %v25392_v0 }
  0x52   : > { %410 = vst.msk [vmem:[#allocation3 + $0x1487] sm:$0xff] %vm243_vm0, %v25392_v0  ;;  %411 = vst.msk [vmem:[#allocation3 + $0x148f] sm:$0xff] %vm243_vm0, %v25392_v0 }
  0x53   : > { %253 = vst.msk [vmem:[#allocation2 + $0x47] sm:$0x3] %vm252_vm1, %v25392_v0  ;;  %263 = vst.msk [vmem:[#allocation2 + $0x1497] sm:$0x3] %vm252_vm1, %v25392_v0 }
  0x54   : > { %402 = vst.msk [vmem:[#allocation3 + $0x47] sm:$0x3] %vm252_vm1, %v25392_v0  ;;  %412 = vst.msk [vmem:[#allocation3 + $0x1497] sm:$0x3] %vm252_vm1, %v25392_v0 }
  0x55   : > { %266 = vst.msk [vmem:[#allocation2 + $0x57] sm:$0x1] %vm265_vm2, %v25392_v0  ;;  %267 = vst.msk [vmem:[#allocation2 + $0xa7] sm:$0x1] %vm265_vm2, %v25392_v0 }
  0x56   : > { %268 = vst.msk [vmem:[#allocation2 + $0xf7] sm:$0x1] %vm265_vm2, %v25392_v0  ;;  %269 = vst.msk [vmem:[#allocation2 + $0x147] sm:$0x1] %vm265_vm2, %v25392_v0 }
  0x57   : > { %270 = vst.msk [vmem:[#allocation2 + $0x197] sm:$0x1] %vm265_vm2, %v25392_v0  ;;  %271 = vst.msk [vmem:[#allocation2 + $0x1e7] sm:$0x1] %vm265_vm2, %v25392_v0 }
  0x58   : > { %272 = vst.msk [vmem:[#allocation2 + $0x237] sm:$0x1] %vm265_vm2, %v25392_v0  ;;  %273 = vst.msk [vmem:[#allocation2 + $0x287] sm:$0x1] %vm265_vm2, %v25392_v0 }
  0x59   : > { %274 = vst.msk [vmem:[#allocation2 + $0x2d7] sm:$0x1] %vm265_vm2, %v25392_v0  ;;  %275 = vst.msk [vmem:[#allocation2 + $0x327] sm:$0x1] %vm265_vm2, %v25392_v0 }
  0x5a   : > { %276 = vst.msk [vmem:[#allocation2 + $0x377] sm:$0x1] %vm265_vm2, %v25392_v0  ;;  %277 = vst.msk [vmem:[#allocation2 + $0x3c7] sm:$0x1] %vm265_vm2, %v25392_v0 }
  0x5b   : > { %278 = vst.msk [vmem:[#allocation2 + $0x417] sm:$0x1] %vm265_vm2, %v25392_v0  ;;  %279 = vst.msk [vmem:[#allocation2 + $0x467] sm:$0x1] %vm265_vm2, %v25392_v0 }
  0x5c   : > { %280 = vst.msk [vmem:[#allocation2 + $0x4b7] sm:$0x1] %vm265_vm2, %v25392_v0  ;;  %281 = vst.msk [vmem:[#allocation2 + $0x507] sm:$0x1] %vm265_vm2, %v25392_v0 }
  0x5d   : > { %282 = vst.msk [vmem:[#allocation2 + $0x557] sm:$0x1] %vm265_vm2, %v25392_v0  ;;  %283 = vst.msk [vmem:[#allocation2 + $0x5a7] sm:$0x1] %vm265_vm2, %v25392_v0 }
  0x5e   : > { %284 = vst.msk [vmem:[#allocation2 + $0x5f7] sm:$0x1] %vm265_vm2, %v25392_v0  ;;  %285 = vst.msk [vmem:[#allocation2 + $0x647] sm:$0x1] %vm265_vm2, %v25392_v0 }
  0x5f   : > { %286 = vst.msk [vmem:[#allocation2 + $0x697] sm:$0x1] %vm265_vm2, %v25392_v0  ;;  %287 = vst.msk [vmem:[#allocation2 + $0x6e7] sm:$0x1] %vm265_vm2, %v25392_v0 }
  0x60   : > { %288 = vst.msk [vmem:[#allocation2 + $0x737] sm:$0x1] %vm265_vm2, %v25392_v0  ;;  %289 = vst.msk [vmem:[#allocation2 + $0x787] sm:$0x1] %vm265_vm2, %v25392_v0 }
  0x61   : > { %290 = vst.msk [vmem:[#allocation2 + $0x7d7] sm:$0x1] %vm265_vm2, %v25392_v0  ;;  %291 = vst.msk [vmem:[#allocation2 + $0x827] sm:$0x1] %vm265_vm2, %v25392_v0 }
  0x62   : > { %292 = vst.msk [vmem:[#allocation2 + $0x877] sm:$0x1] %vm265_vm2, %v25392_v0  ;;  %293 = vst.msk [vmem:[#allocation2 + $0x8c7] sm:$0x1] %vm265_vm2, %v25392_v0 }
  0x63   : > { %294 = vst.msk [vmem:[#allocation2 + $0x917] sm:$0x1] %vm265_vm2, %v25392_v0  ;;  %295 = vst.msk [vmem:[#allocation2 + $0x967] sm:$0x1] %vm265_vm2, %v25392_v0 }
  0x64   : > { %296 = vst.msk [vmem:[#allocation2 + $0x9b7] sm:$0x1] %vm265_vm2, %v25392_v0  ;;  %297 = vst.msk [vmem:[#allocation2 + $0xa07] sm:$0x1] %vm265_vm2, %v25392_v0 }
  0x65   : > { %298 = vst.msk [vmem:[#allocation2 + $0xa57] sm:$0x1] %vm265_vm2, %v25392_v0  ;;  %299 = vst.msk [vmem:[#allocation2 + $0xaa7] sm:$0x1] %vm265_vm2, %v25392_v0 }
  0x66   : > { %300 = vst.msk [vmem:[#allocation2 + $0xaf7] sm:$0x1] %vm265_vm2, %v25392_v0  ;;  %301 = vst.msk [vmem:[#allocation2 + $0xb47] sm:$0x1] %vm265_vm2, %v25392_v0 }
  0x67   : > { %302 = vst.msk [vmem:[#allocation2 + $0xb97] sm:$0x1] %vm265_vm2, %v25392_v0  ;;  %303 = vst.msk [vmem:[#allocation2 + $0xbe7] sm:$0x1] %vm265_vm2, %v25392_v0 }
  0x68   : > { %304 = vst.msk [vmem:[#allocation2 + $0xc37] sm:$0x1] %vm265_vm2, %v25392_v0  ;;  %305 = vst.msk [vmem:[#allocation2 + $0xc87] sm:$0x1] %vm265_vm2, %v25392_v0 }
  0x69   : > { %306 = vst.msk [vmem:[#allocation2 + $0xcd7] sm:$0x1] %vm265_vm2, %v25392_v0  ;;  %307 = vst.msk [vmem:[#allocation2 + $0xd27] sm:$0x1] %vm265_vm2, %v25392_v0 }
  0x6a   : > { %308 = vst.msk [vmem:[#allocation2 + $0xd77] sm:$0x1] %vm265_vm2, %v25392_v0  ;;  %309 = vst.msk [vmem:[#allocation2 + $0xdc7] sm:$0x1] %vm265_vm2, %v25392_v0 }
  0x6b   : > { %310 = vst.msk [vmem:[#allocation2 + $0xe17] sm:$0x1] %vm265_vm2, %v25392_v0  ;;  %311 = vst.msk [vmem:[#allocation2 + $0xe67] sm:$0x1] %vm265_vm2, %v25392_v0 }
  0x6c   : > { %312 = vst.msk [vmem:[#allocation2 + $0xeb7] sm:$0x1] %vm265_vm2, %v25392_v0  ;;  %313 = vst.msk [vmem:[#allocation2 + $0xf07] sm:$0x1] %vm265_vm2, %v25392_v0 }
  0x6d   : > { %314 = vst.msk [vmem:[#allocation2 + $0xf57] sm:$0x1] %vm265_vm2, %v25392_v0  ;;  %315 = vst.msk [vmem:[#allocation2 + $0xfa7] sm:$0x1] %vm265_vm2, %v25392_v0 }
  0x6e   : > { %316 = vst.msk [vmem:[#allocation2 + $0xff7] sm:$0x1] %vm265_vm2, %v25392_v0  ;;  %317 = vst.msk [vmem:[#allocation2 + $0x1047] sm:$0x1] %vm265_vm2, %v25392_v0 }
  0x6f   : > { %318 = vst.msk [vmem:[#allocation2 + $0x1097] sm:$0x1] %vm265_vm2, %v25392_v0  ;;  %319 = vst.msk [vmem:[#allocation2 + $0x10e7] sm:$0x1] %vm265_vm2, %v25392_v0 }
  0x70   : > { %320 = vst.msk [vmem:[#allocation2 + $0x1137] sm:$0x1] %vm265_vm2, %v25392_v0  ;;  %321 = vst.msk [vmem:[#allocation2 + $0x1187] sm:$0x1] %vm265_vm2, %v25392_v0 }
  0x71   : > { %322 = vst.msk [vmem:[#allocation2 + $0x11d7] sm:$0x1] %vm265_vm2, %v25392_v0  ;;  %323 = vst.msk [vmem:[#allocation2 + $0x1227] sm:$0x1] %vm265_vm2, %v25392_v0 }
  0x72   : > { %324 = vst.msk [vmem:[#allocation2 + $0x1277] sm:$0x1] %vm265_vm2, %v25392_v0  ;;  %325 = vst.msk [vmem:[#allocation2 + $0x12c7] sm:$0x1] %vm265_vm2, %v25392_v0 }
  0x73   : > { %326 = vst.msk [vmem:[#allocation2 + $0x1317] sm:$0x1] %vm265_vm2, %v25392_v0  ;;  %327 = vst.msk [vmem:[#allocation2 + $0x1367] sm:$0x1] %vm265_vm2, %v25392_v0 }
  0x74   : > { %328 = vst.msk [vmem:[#allocation2 + $0x13b7] sm:$0x1] %vm265_vm2, %v25392_v0  ;;  %329 = vst.msk [vmem:[#allocation2 + $0x1407] sm:$0x1] %vm265_vm2, %v25392_v0 }
  0x75   : > { %330 = vst.msk [vmem:[#allocation2 + $0x98] sm:$0x1] %vm265_vm2, %v25392_v0  ;;  %331 = vst.msk [vmem:[#allocation2 + $0xe8] sm:$0x1] %vm265_vm2, %v25392_v0 }
  0x76   : > { %332 = vst.msk [vmem:[#allocation2 + $0x138] sm:$0x1] %vm265_vm2, %v25392_v0  ;;  %333 = vst.msk [vmem:[#allocation2 + $0x188] sm:$0x1] %vm265_vm2, %v25392_v0 }
  0x77   : > { %334 = vst.msk [vmem:[#allocation2 + $0x1d8] sm:$0x1] %vm265_vm2, %v25392_v0  ;;  %335 = vst.msk [vmem:[#allocation2 + $0x228] sm:$0x1] %vm265_vm2, %v25392_v0 }
  0x78   : > { %336 = vst.msk [vmem:[#allocation2 + $0x278] sm:$0x1] %vm265_vm2, %v25392_v0  ;;  %337 = vst.msk [vmem:[#allocation2 + $0x2c8] sm:$0x1] %vm265_vm2, %v25392_v0 }
  0x79   : > { %338 = vst.msk [vmem:[#allocation2 + $0x318] sm:$0x1] %vm265_vm2, %v25392_v0  ;;  %339 = vst.msk [vmem:[#allocation2 + $0x368] sm:$0x1] %vm265_vm2, %v25392_v0 }
  0x7a   : > { %340 = vst.msk [vmem:[#allocation2 + $0x3b8] sm:$0x1] %vm265_vm2, %v25392_v0  ;;  %341 = vst.msk [vmem:[#allocation2 + $0x408] sm:$0x1] %vm265_vm2, %v25392_v0 }
  0x7b   : > { %342 = vst.msk [vmem:[#allocation2 + $0x458] sm:$0x1] %vm265_vm2, %v25392_v0  ;;  %343 = vst.msk [vmem:[#allocation2 + $0x4a8] sm:$0x1] %vm265_vm2, %v25392_v0 }
  0x7c   : > { %344 = vst.msk [vmem:[#allocation2 + $0x4f8] sm:$0x1] %vm265_vm2, %v25392_v0  ;;  %345 = vst.msk [vmem:[#allocation2 + $0x548] sm:$0x1] %vm265_vm2, %v25392_v0 }
  0x7d   : > { %346 = vst.msk [vmem:[#allocation2 + $0x598] sm:$0x1] %vm265_vm2, %v25392_v0  ;;  %347 = vst.msk [vmem:[#allocation2 + $0x5e8] sm:$0x1] %vm265_vm2, %v25392_v0 }
  0x7e   : > { %348 = vst.msk [vmem:[#allocation2 + $0x638] sm:$0x1] %vm265_vm2, %v25392_v0  ;;  %349 = vst.msk [vmem:[#allocation2 + $0x688] sm:$0x1] %vm265_vm2, %v25392_v0 }
  0x7f   : > { %350 = vst.msk [vmem:[#allocation2 + $0x6d8] sm:$0x1] %vm265_vm2, %v25392_v0  ;;  %351 = vst.msk [vmem:[#allocation2 + $0x728] sm:$0x1] %vm265_vm2, %v25392_v0 }
  0x80   : > { %352 = vst.msk [vmem:[#allocation2 + $0x778] sm:$0x1] %vm265_vm2, %v25392_v0  ;;  %353 = vst.msk [vmem:[#allocation2 + $0x7c8] sm:$0x1] %vm265_vm2, %v25392_v0 }
  0x81   : > { %354 = vst.msk [vmem:[#allocation2 + $0x818] sm:$0x1] %vm265_vm2, %v25392_v0  ;;  %355 = vst.msk [vmem:[#allocation2 + $0x868] sm:$0x1] %vm265_vm2, %v25392_v0 }
  0x82   : > { %356 = vst.msk [vmem:[#allocation2 + $0x8b8] sm:$0x1] %vm265_vm2, %v25392_v0  ;;  %357 = vst.msk [vmem:[#allocation2 + $0x908] sm:$0x1] %vm265_vm2, %v25392_v0 }
  0x83   : > { %358 = vst.msk [vmem:[#allocation2 + $0x958] sm:$0x1] %vm265_vm2, %v25392_v0  ;;  %359 = vst.msk [vmem:[#allocation2 + $0x9a8] sm:$0x1] %vm265_vm2, %v25392_v0 }
  0x84   : > { %360 = vst.msk [vmem:[#allocation2 + $0x9f8] sm:$0x1] %vm265_vm2, %v25392_v0  ;;  %361 = vst.msk [vmem:[#allocation2 + $0xa48] sm:$0x1] %vm265_vm2, %v25392_v0 }
  0x85   : > { %362 = vst.msk [vmem:[#allocation2 + $0xa98] sm:$0x1] %vm265_vm2, %v25392_v0  ;;  %363 = vst.msk [vmem:[#allocation2 + $0xae8] sm:$0x1] %vm265_vm2, %v25392_v0 }
  0x86   : > { %364 = vst.msk [vmem:[#allocation2 + $0xb38] sm:$0x1] %vm265_vm2, %v25392_v0  ;;  %365 = vst.msk [vmem:[#allocation2 + $0xb88] sm:$0x1] %vm265_vm2, %v25392_v0 }
  0x87   : > { %366 = vst.msk [vmem:[#allocation2 + $0xbd8] sm:$0x1] %vm265_vm2, %v25392_v0  ;;  %367 = vst.msk [vmem:[#allocation2 + $0xc28] sm:$0x1] %vm265_vm2, %v25392_v0 }
  0x88   : > { %368 = vst.msk [vmem:[#allocation2 + $0xc78] sm:$0x1] %vm265_vm2, %v25392_v0  ;;  %369 = vst.msk [vmem:[#allocation2 + $0xcc8] sm:$0x1] %vm265_vm2, %v25392_v0 }
  0x89   : > { %370 = vst.msk [vmem:[#allocation2 + $0xd18] sm:$0x1] %vm265_vm2, %v25392_v0  ;;  %371 = vst.msk [vmem:[#allocation2 + $0xd68] sm:$0x1] %vm265_vm2, %v25392_v0 }
  0x8a   : > { %372 = vst.msk [vmem:[#allocation2 + $0xdb8] sm:$0x1] %vm265_vm2, %v25392_v0  ;;  %373 = vst.msk [vmem:[#allocation2 + $0xe08] sm:$0x1] %vm265_vm2, %v25392_v0 }
  0x8b   : > { %374 = vst.msk [vmem:[#allocation2 + $0xe58] sm:$0x1] %vm265_vm2, %v25392_v0  ;;  %375 = vst.msk [vmem:[#allocation2 + $0xea8] sm:$0x1] %vm265_vm2, %v25392_v0 }
  0x8c   : > { %376 = vst.msk [vmem:[#allocation2 + $0xef8] sm:$0x1] %vm265_vm2, %v25392_v0  ;;  %377 = vst.msk [vmem:[#allocation2 + $0xf48] sm:$0x1] %vm265_vm2, %v25392_v0 }
  0x8d   : > { %378 = vst.msk [vmem:[#allocation2 + $0xf98] sm:$0x1] %vm265_vm2, %v25392_v0  ;;  %379 = vst.msk [vmem:[#allocation2 + $0xfe8] sm:$0x1] %vm265_vm2, %v25392_v0 }
  0x8e   : > { %380 = vst.msk [vmem:[#allocation2 + $0x1038] sm:$0x1] %vm265_vm2, %v25392_v0  ;;  %381 = vst.msk [vmem:[#allocation2 + $0x1088] sm:$0x1] %vm265_vm2, %v25392_v0 }
  0x8f   : > { %382 = vst.msk [vmem:[#allocation2 + $0x10d8] sm:$0x1] %vm265_vm2, %v25392_v0  ;;  %383 = vst.msk [vmem:[#allocation2 + $0x1128] sm:$0x1] %vm265_vm2, %v25392_v0 }
  0x90   : > { %384 = vst.msk [vmem:[#allocation2 + $0x1178] sm:$0x1] %vm265_vm2, %v25392_v0  ;;  %385 = vst.msk [vmem:[#allocation2 + $0x11c8] sm:$0x1] %vm265_vm2, %v25392_v0 }
  0x91   : > { %386 = vst.msk [vmem:[#allocation2 + $0x1218] sm:$0x1] %vm265_vm2, %v25392_v0  ;;  %387 = vst.msk [vmem:[#allocation2 + $0x1268] sm:$0x1] %vm265_vm2, %v25392_v0 }
  0x92   : > { %388 = vst.msk [vmem:[#allocation2 + $0x12b8] sm:$0x1] %vm265_vm2, %v25392_v0  ;;  %389 = vst.msk [vmem:[#allocation2 + $0x1308] sm:$0x1] %vm265_vm2, %v25392_v0 }
  0x93   : > { %390 = vst.msk [vmem:[#allocation2 + $0x1358] sm:$0x1] %vm265_vm2, %v25392_v0  ;;  %391 = vst.msk [vmem:[#allocation2 + $0x13a8] sm:$0x1] %vm265_vm2, %v25392_v0 }
  0x94   : > { %392 = vst.msk [vmem:[#allocation2 + $0x13f8] sm:$0x1] %vm265_vm2, %v25392_v0  ;;  %393 = vst.msk [vmem:[#allocation2 + $0x1448] sm:$0x1] %vm265_vm2, %v25392_v0 }
  0x95   : > { %414 = vst.msk [vmem:[#allocation3 + $0x57] sm:$0x1] %vm265_vm2, %v25392_v0  ;;  %415 = vst.msk [vmem:[#allocation3 + $0xa7] sm:$0x1] %vm265_vm2, %v25392_v0 }
  0x96   : > { %416 = vst.msk [vmem:[#allocation3 + $0xf7] sm:$0x1] %vm265_vm2, %v25392_v0  ;;  %417 = vst.msk [vmem:[#allocation3 + $0x147] sm:$0x1] %vm265_vm2, %v25392_v0 }
  0x97   : > { %418 = vst.msk [vmem:[#allocation3 + $0x197] sm:$0x1] %vm265_vm2, %v25392_v0  ;;  %419 = vst.msk [vmem:[#allocation3 + $0x1e7] sm:$0x1] %vm265_vm2, %v25392_v0 }
  0x98   : > { %420 = vst.msk [vmem:[#allocation3 + $0x237] sm:$0x1] %vm265_vm2, %v25392_v0  ;;  %421 = vst.msk [vmem:[#allocation3 + $0x287] sm:$0x1] %vm265_vm2, %v25392_v0 }
  0x99   : > { %422 = vst.msk [vmem:[#allocation3 + $0x2d7] sm:$0x1] %vm265_vm2, %v25392_v0  ;;  %423 = vst.msk [vmem:[#allocation3 + $0x327] sm:$0x1] %vm265_vm2, %v25392_v0 }
  0x9a   : > { %424 = vst.msk [vmem:[#allocation3 + $0x377] sm:$0x1] %vm265_vm2, %v25392_v0  ;;  %425 = vst.msk [vmem:[#allocation3 + $0x3c7] sm:$0x1] %vm265_vm2, %v25392_v0 }
  0x9b   : > { %426 = vst.msk [vmem:[#allocation3 + $0x417] sm:$0x1] %vm265_vm2, %v25392_v0  ;;  %427 = vst.msk [vmem:[#allocation3 + $0x467] sm:$0x1] %vm265_vm2, %v25392_v0 }
  0x9c   : > { %428 = vst.msk [vmem:[#allocation3 + $0x4b7] sm:$0x1] %vm265_vm2, %v25392_v0  ;;  %429 = vst.msk [vmem:[#allocation3 + $0x507] sm:$0x1] %vm265_vm2, %v25392_v0 }
  0x9d   : > { %430 = vst.msk [vmem:[#allocation3 + $0x557] sm:$0x1] %vm265_vm2, %v25392_v0  ;;  %431 = vst.msk [vmem:[#allocation3 + $0x5a7] sm:$0x1] %vm265_vm2, %v25392_v0 }
  0x9e   : > { %432 = vst.msk [vmem:[#allocation3 + $0x5f7] sm:$0x1] %vm265_vm2, %v25392_v0  ;;  %433 = vst.msk [vmem:[#allocation3 + $0x647] sm:$0x1] %vm265_vm2, %v25392_v0 }
  0x9f   : > { %434 = vst.msk [vmem:[#allocation3 + $0x697] sm:$0x1] %vm265_vm2, %v25392_v0  ;;  %435 = vst.msk [vmem:[#allocation3 + $0x6e7] sm:$0x1] %vm265_vm2, %v25392_v0 }
  0xa0   : > { %436 = vst.msk [vmem:[#allocation3 + $0x737] sm:$0x1] %vm265_vm2, %v25392_v0  ;;  %437 = vst.msk [vmem:[#allocation3 + $0x787] sm:$0x1] %vm265_vm2, %v25392_v0 }
  0xa1   : > { %438 = vst.msk [vmem:[#allocation3 + $0x7d7] sm:$0x1] %vm265_vm2, %v25392_v0  ;;  %439 = vst.msk [vmem:[#allocation3 + $0x827] sm:$0x1] %vm265_vm2, %v25392_v0 }
  0xa2   : > { %440 = vst.msk [vmem:[#allocation3 + $0x877] sm:$0x1] %vm265_vm2, %v25392_v0  ;;  %441 = vst.msk [vmem:[#allocation3 + $0x8c7] sm:$0x1] %vm265_vm2, %v25392_v0 }
  0xa3   : > { %442 = vst.msk [vmem:[#allocation3 + $0x917] sm:$0x1] %vm265_vm2, %v25392_v0  ;;  %443 = vst.msk [vmem:[#allocation3 + $0x967] sm:$0x1] %vm265_vm2, %v25392_v0 }
  0xa4   : > { %444 = vst.msk [vmem:[#allocation3 + $0x9b7] sm:$0x1] %vm265_vm2, %v25392_v0  ;;  %445 = vst.msk [vmem:[#allocation3 + $0xa07] sm:$0x1] %vm265_vm2, %v25392_v0 }
  0xa5   : > { %446 = vst.msk [vmem:[#allocation3 + $0xa57] sm:$0x1] %vm265_vm2, %v25392_v0  ;;  %447 = vst.msk [vmem:[#allocation3 + $0xaa7] sm:$0x1] %vm265_vm2, %v25392_v0 }
  0xa6   : > { %448 = vst.msk [vmem:[#allocation3 + $0xaf7] sm:$0x1] %vm265_vm2, %v25392_v0  ;;  %449 = vst.msk [vmem:[#allocation3 + $0xb47] sm:$0x1] %vm265_vm2, %v25392_v0 }
  0xa7   : > { %450 = vst.msk [vmem:[#allocation3 + $0xb97] sm:$0x1] %vm265_vm2, %v25392_v0  ;;  %451 = vst.msk [vmem:[#allocation3 + $0xbe7] sm:$0x1] %vm265_vm2, %v25392_v0 }
  0xa8   : > { %452 = vst.msk [vmem:[#allocation3 + $0xc37] sm:$0x1] %vm265_vm2, %v25392_v0  ;;  %453 = vst.msk [vmem:[#allocation3 + $0xc87] sm:$0x1] %vm265_vm2, %v25392_v0 }
  0xa9   : > { %454 = vst.msk [vmem:[#allocation3 + $0xcd7] sm:$0x1] %vm265_vm2, %v25392_v0  ;;  %455 = vst.msk [vmem:[#allocation3 + $0xd27] sm:$0x1] %vm265_vm2, %v25392_v0 }
  0xaa   : > { %456 = vst.msk [vmem:[#allocation3 + $0xd77] sm:$0x1] %vm265_vm2, %v25392_v0  ;;  %457 = vst.msk [vmem:[#allocation3 + $0xdc7] sm:$0x1] %vm265_vm2, %v25392_v0 }
  0xab   : > { %458 = vst.msk [vmem:[#allocation3 + $0xe17] sm:$0x1] %vm265_vm2, %v25392_v0  ;;  %459 = vst.msk [vmem:[#allocation3 + $0xe67] sm:$0x1] %vm265_vm2, %v25392_v0 }
  0xac   : > { %460 = vst.msk [vmem:[#allocation3 + $0xeb7] sm:$0x1] %vm265_vm2, %v25392_v0  ;;  %461 = vst.msk [vmem:[#allocation3 + $0xf07] sm:$0x1] %vm265_vm2, %v25392_v0 }
  0xad   : > { %462 = vst.msk [vmem:[#allocation3 + $0xf57] sm:$0x1] %vm265_vm2, %v25392_v0  ;;  %463 = vst.msk [vmem:[#allocation3 + $0xfa7] sm:$0x1] %vm265_vm2, %v25392_v0 }
  0xae   : > { %464 = vst.msk [vmem:[#allocation3 + $0xff7] sm:$0x1] %vm265_vm2, %v25392_v0  ;;  %465 = vst.msk [vmem:[#allocation3 + $0x1047] sm:$0x1] %vm265_vm2, %v25392_v0 }
  0xaf   : > { %466 = vst.msk [vmem:[#allocation3 + $0x1097] sm:$0x1] %vm265_vm2, %v25392_v0  ;;  %467 = vst.msk [vmem:[#allocation3 + $0x10e7] sm:$0x1] %vm265_vm2, %v25392_v0 }
  0xb0   : > { %468 = vst.msk [vmem:[#allocation3 + $0x1137] sm:$0x1] %vm265_vm2, %v25392_v0  ;;  %469 = vst.msk [vmem:[#allocation3 + $0x1187] sm:$0x1] %vm265_vm2, %v25392_v0 }
  0xb1   : > { %470 = vst.msk [vmem:[#allocation3 + $0x11d7] sm:$0x1] %vm265_vm2, %v25392_v0  ;;  %471 = vst.msk [vmem:[#allocation3 + $0x1227] sm:$0x1] %vm265_vm2, %v25392_v0 }
  0xb2   : > { %472 = vst.msk [vmem:[#allocation3 + $0x1277] sm:$0x1] %vm265_vm2, %v25392_v0  ;;  %473 = vst.msk [vmem:[#allocation3 + $0x12c7] sm:$0x1] %vm265_vm2, %v25392_v0 }
  0xb3   : > { %474 = vst.msk [vmem:[#allocation3 + $0x1317] sm:$0x1] %vm265_vm2, %v25392_v0  ;;  %475 = vst.msk [vmem:[#allocation3 + $0x1367] sm:$0x1] %vm265_vm2, %v25392_v0 }
  0xb4   : > { %476 = vst.msk [vmem:[#allocation3 + $0x13b7] sm:$0x1] %vm265_vm2, %v25392_v0  ;;  %477 = vst.msk [vmem:[#allocation3 + $0x1407] sm:$0x1] %vm265_vm2, %v25392_v0 }
  0xb5   : > { %478 = vst.msk [vmem:[#allocation3 + $0x98] sm:$0x1] %vm265_vm2, %v25392_v0  ;;  %479 = vst.msk [vmem:[#allocation3 + $0xe8] sm:$0x1] %vm265_vm2, %v25392_v0 }
  0xb6   : > { %480 = vst.msk [vmem:[#allocation3 + $0x138] sm:$0x1] %vm265_vm2, %v25392_v0  ;;  %481 = vst.msk [vmem:[#allocation3 + $0x188] sm:$0x1] %vm265_vm2, %v25392_v0 }
  0xb7   : > { %482 = vst.msk [vmem:[#allocation3 + $0x1d8] sm:$0x1] %vm265_vm2, %v25392_v0  ;;  %483 = vst.msk [vmem:[#allocation3 + $0x228] sm:$0x1] %vm265_vm2, %v25392_v0 }
  0xb8   : > { %484 = vst.msk [vmem:[#allocation3 + $0x278] sm:$0x1] %vm265_vm2, %v25392_v0  ;;  %485 = vst.msk [vmem:[#allocation3 + $0x2c8] sm:$0x1] %vm265_vm2, %v25392_v0 }
  0xb9   : > { %486 = vst.msk [vmem:[#allocation3 + $0x318] sm:$0x1] %vm265_vm2, %v25392_v0  ;;  %487 = vst.msk [vmem:[#allocation3 + $0x368] sm:$0x1] %vm265_vm2, %v25392_v0 }
  0xba   : > { %488 = vst.msk [vmem:[#allocation3 + $0x3b8] sm:$0x1] %vm265_vm2, %v25392_v0  ;;  %489 = vst.msk [vmem:[#allocation3 + $0x408] sm:$0x1] %vm265_vm2, %v25392_v0 }
  0xbb   : > { %490 = vst.msk [vmem:[#allocation3 + $0x458] sm:$0x1] %vm265_vm2, %v25392_v0  ;;  %491 = vst.msk [vmem:[#allocation3 + $0x4a8] sm:$0x1] %vm265_vm2, %v25392_v0 }
  0xbc   : > { %492 = vst.msk [vmem:[#allocation3 + $0x4f8] sm:$0x1] %vm265_vm2, %v25392_v0  ;;  %493 = vst.msk [vmem:[#allocation3 + $0x548] sm:$0x1] %vm265_vm2, %v25392_v0 }
  0xbd   : > { %494 = vst.msk [vmem:[#allocation3 + $0x598] sm:$0x1] %vm265_vm2, %v25392_v0  ;;  %495 = vst.msk [vmem:[#allocation3 + $0x5e8] sm:$0x1] %vm265_vm2, %v25392_v0 }
  0xbe   : > { %496 = vst.msk [vmem:[#allocation3 + $0x638] sm:$0x1] %vm265_vm2, %v25392_v0  ;;  %497 = vst.msk [vmem:[#allocation3 + $0x688] sm:$0x1] %vm265_vm2, %v25392_v0 }
  0xbf   : > { %498 = vst.msk [vmem:[#allocation3 + $0x6d8] sm:$0x1] %vm265_vm2, %v25392_v0  ;;  %499 = vst.msk [vmem:[#allocation3 + $0x728] sm:$0x1] %vm265_vm2, %v25392_v0 }
  0xc0   : > { %500 = vst.msk [vmem:[#allocation3 + $0x778] sm:$0x1] %vm265_vm2, %v25392_v0  ;;  %501 = vst.msk [vmem:[#allocation3 + $0x7c8] sm:$0x1] %vm265_vm2, %v25392_v0 }
  0xc1   : > { %502 = vst.msk [vmem:[#allocation3 + $0x818] sm:$0x1] %vm265_vm2, %v25392_v0  ;;  %503 = vst.msk [vmem:[#allocation3 + $0x868] sm:$0x1] %vm265_vm2, %v25392_v0 }
  0xc2   : > { %504 = vst.msk [vmem:[#allocation3 + $0x8b8] sm:$0x1] %vm265_vm2, %v25392_v0  ;;  %505 = vst.msk [vmem:[#allocation3 + $0x908] sm:$0x1] %vm265_vm2, %v25392_v0 }
  0xc3   : > { %506 = vst.msk [vmem:[#allocation3 + $0x958] sm:$0x1] %vm265_vm2, %v25392_v0  ;;  %507 = vst.msk [vmem:[#allocation3 + $0x9a8] sm:$0x1] %vm265_vm2, %v25392_v0 }
  0xc4   : > { %508 = vst.msk [vmem:[#allocation3 + $0x9f8] sm:$0x1] %vm265_vm2, %v25392_v0  ;;  %509 = vst.msk [vmem:[#allocation3 + $0xa48] sm:$0x1] %vm265_vm2, %v25392_v0 }
  0xc5   : > { %510 = vst.msk [vmem:[#allocation3 + $0xa98] sm:$0x1] %vm265_vm2, %v25392_v0  ;;  %511 = vst.msk [vmem:[#allocation3 + $0xae8] sm:$0x1] %vm265_vm2, %v25392_v0 }
  0xc6   : > { %512 = vst.msk [vmem:[#allocation3 + $0xb38] sm:$0x1] %vm265_vm2, %v25392_v0  ;;  %513 = vst.msk [vmem:[#allocation3 + $0xb88] sm:$0x1] %vm265_vm2, %v25392_v0 }
  0xc7   : > { %514 = vst.msk [vmem:[#allocation3 + $0xbd8] sm:$0x1] %vm265_vm2, %v25392_v0  ;;  %515 = vst.msk [vmem:[#allocation3 + $0xc28] sm:$0x1] %vm265_vm2, %v25392_v0 }
  0xc8   : > { %516 = vst.msk [vmem:[#allocation3 + $0xc78] sm:$0x1] %vm265_vm2, %v25392_v0  ;;  %517 = vst.msk [vmem:[#allocation3 + $0xcc8] sm:$0x1] %vm265_vm2, %v25392_v0 }
  0xc9   : > { %518 = vst.msk [vmem:[#allocation3 + $0xd18] sm:$0x1] %vm265_vm2, %v25392_v0  ;;  %519 = vst.msk [vmem:[#allocation3 + $0xd68] sm:$0x1] %vm265_vm2, %v25392_v0 }
  0xca   : > { %520 = vst.msk [vmem:[#allocation3 + $0xdb8] sm:$0x1] %vm265_vm2, %v25392_v0  ;;  %521 = vst.msk [vmem:[#allocation3 + $0xe08] sm:$0x1] %vm265_vm2, %v25392_v0 }
  0xcb   : > { %522 = vst.msk [vmem:[#allocation3 + $0xe58] sm:$0x1] %vm265_vm2, %v25392_v0  ;;  %523 = vst.msk [vmem:[#allocation3 + $0xea8] sm:$0x1] %vm265_vm2, %v25392_v0 }
  0xcc   : > { %524 = vst.msk [vmem:[#allocation3 + $0xef8] sm:$0x1] %vm265_vm2, %v25392_v0  ;;  %525 = vst.msk [vmem:[#allocation3 + $0xf48] sm:$0x1] %vm265_vm2, %v25392_v0 }
  0xcd   : > { %526 = vst.msk [vmem:[#allocation3 + $0xf98] sm:$0x1] %vm265_vm2, %v25392_v0  ;;  %527 = vst.msk [vmem:[#allocation3 + $0xfe8] sm:$0x1] %vm265_vm2, %v25392_v0 }
  0xce   : > { %528 = vst.msk [vmem:[#allocation3 + $0x1038] sm:$0x1] %vm265_vm2, %v25392_v0  ;;  %529 = vst.msk [vmem:[#allocation3 + $0x1088] sm:$0x1] %vm265_vm2, %v25392_v0 }
  0xcf   : > { %530 = vst.msk [vmem:[#allocation3 + $0x10d8] sm:$0x1] %vm265_vm2, %v25392_v0  ;;  %531 = vst.msk [vmem:[#allocation3 + $0x1128] sm:$0x1] %vm265_vm2, %v25392_v0 }
  0xd0   : > { %532 = vst.msk [vmem:[#allocation3 + $0x1178] sm:$0x1] %vm265_vm2, %v25392_v0  ;;  %533 = vst.msk [vmem:[#allocation3 + $0x11c8] sm:$0x1] %vm265_vm2, %v25392_v0 }
  0xd1   : > { %534 = vst.msk [vmem:[#allocation3 + $0x1218] sm:$0x1] %vm265_vm2, %v25392_v0  ;;  %535 = vst.msk [vmem:[#allocation3 + $0x1268] sm:$0x1] %vm265_vm2, %v25392_v0 }
  0xd2   : > { %536 = vst.msk [vmem:[#allocation3 + $0x12b8] sm:$0x1] %vm265_vm2, %v25392_v0  ;;  %537 = vst.msk [vmem:[#allocation3 + $0x1308] sm:$0x1] %vm265_vm2, %v25392_v0 }
  0xd3   : > { %538 = vst.msk [vmem:[#allocation3 + $0x1358] sm:$0x1] %vm265_vm2, %v25392_v0  ;;  %539 = vst.msk [vmem:[#allocation3 + $0x13a8] sm:$0x1] %vm265_vm2, %v25392_v0 }
  0xd4   : > { %540 = vst.msk [vmem:[#allocation3 + $0x13f8] sm:$0x1] %vm265_vm2, %v25392_v0  ;;  %541 = vst.msk [vmem:[#allocation3 + $0x1448] sm:$0x1] %vm265_vm2, %v25392_v0 }
  0xd5   : > { %32600 = vst [vmem:[#allocation12_spill] sm:$0xff] %v26160_v1 }
  0xd6 LB: >> { %s32601_s28 = sld [smem:[#allocation11_spill]]  ;;  %s21193_s8 = sshll.u32 %s25379_s16, 5  ;;  %v25408_v7 = vmov 1983009808   ;;  %v746_v9 = vlaneseq  ;;  %v25409_v15 = vmov 1934713408   ;;  %s25379_s16 = sphi %s26166_s16, %s548_s16  }
  0xd7   : >> { %s32326_s9 = smov 104   ;;  %s32322_s10 = smov 120   ;;  %v744_v8 = vunpack.c.l.s4 %v25408_v7  ;;  %v808_v16 = vunpack.c.l.s4 %v25409_v15 }
  0xd8   : >> { %s32330_s11 = smov 96   ;;  %s32340_s13 = smov 112   ;;  %v747_v12 = vshrl.u32 %v746_v9, 7 }
  0xd9   : >> { %s32312_s17 = smov 80   ;;  %s32328_s25 = smov 88   ;;  %v745_v11 = vunpack.c.0.s8 %v744_v8  ;;  %v809_v24 = vunpack.c.0.s8 %v808_v16 }
  0xda   : >> { %s32314_s26 = smov 64   ;;  %s32316_s12 = smov 72  }
  0xdb   : >> { %s32318_s29 = smov 48   ;;  %s32334_s14 = smov 56   ;;  %v26308_v18 = vsub.s32 %v745_v11, %v747_v12  ;;  %v26317_v35 = vsub.s32 %v809_v24, %v747_v12 }
  0xdc   : >> { %s26173_s7 = scalar_lea.vmem %s32601_s28, %s21193_s8  ;;  %s32338_s8 = smov 32  }
  0xdd   : >> { %v26176_v2 = vld [vmem:[%s26173_s7] sm:$0xff]  ;;  %v26207_v3 = vld [vmem:[%s26173_s7 + $0x8] sm:$0xff]  ;;  %v26242_v4 = vld [vmem:[%s26173_s7 + $0x10] sm:$0xff]  ;;  %s32613_s0 = smov 32   ;;  %s32614_s2 = smov 40   ;;  %32617 = vst [vmem:[#allocation13_spill] sm:$0xff] %v26308_v18 }
  0xde   : >> { %564 = vrot.lane.b32.xlu1 %v26176_v2, %s32326_s9  ;;  %558 = vrot.lane.b32.xlu0 %v26176_v2, %s32322_s10  ;;  %s32615_s28 = smov 24   ;;  %v26273_v5 = vld [vmem:[%s26173_s7 + $0x18] sm:$0xff]  ;;  %s32616_s27 = smov 112   ;;  %32618 = vst [vmem:[#allocation14_spill] sm:$0xff] %v26317_v35 }
  0xe2   : >> { %567 = vrot.lane.b32.xlu1 %v26176_v2, %s32330_s11  ;;  %561 = vrot.lane.b32.xlu0 %v26176_v2, %s32340_s13 }
  0xe6   : >> { %573 = vrot.lane.b32.xlu1 %v26176_v2, %s32312_s17  ;;  %570 = vrot.lane.b32.xlu0 %v26176_v2, %s32328_s25  ;;  %s32332_s17 = smov 40  }
  0xea   : >> { %579 = vrot.lane.b32.xlu1 %v26176_v2, %s32314_s26  ;;  %576 = vrot.lane.b32.xlu0 %v26176_v2, %s32316_s12  ;;  %s32320_s26 = smov 16   ;;  %s32336_s12 = smov 24  }
  0xee   : >> { %585 = vrot.lane.b32.xlu1 %v26176_v2, %s32318_s29  ;;  %582 = vrot.lane.b32.xlu0 %v26176_v2, %s32334_s14  ;;  %s32324_s29 = smov 8  }
  0xf2   : >> { %591 = vrot.lane.b32.xlu1 %v26176_v2, %s32338_s8  ;;  %588 = vrot.lane.b32.xlu0 %v26176_v2, %s32332_s17 }
  0xf6   : >> { %597 = vrot.lane.b32.xlu1 %v26176_v2, %s32320_s26  ;;  %594 = vrot.lane.b32.xlu0 %v26176_v2, %s32336_s12  ;;  %s32602_s26 = smov 72  }
  0xfa   : >> { %604 = vrot.lane.b32.xlu1 %v26207_v3, %s32322_s10  ;;  %600 = vrot.lane.b32.xlu0 %v26176_v2, %s32324_s29  ;;  %s32603_s10 = smov 80   ;;  %s32604_s29 = smov 64  }
  0xfe   : >> { %610 = vrot.lane.b32.xlu1 %v26207_v3, %s32326_s9  ;;  %607 = vrot.lane.b32.xlu0 %v26207_v3, %s32340_s13  ;;  %s32605_s9 = smov 48  }
 0x102   : >> { %616 = vrot.lane.b32.xlu1 %v26207_v3, %s32328_s25  ;;  %613 = vrot.lane.b32.xlu0 %v26207_v3, %s32330_s11  ;;  %s32606_s25 = smov 8   ;;  %s32607_s11 = smov 16  }
 0x106   : >> { %622 = vrot.lane.b32.xlu1 %v26207_v3, %s32602_s26  ;;  %619 = vrot.lane.b32.xlu0 %v26207_v3, %s32603_s10 }
 0x10a   : >> { %628 = vrot.lane.b32.xlu1 %v26207_v3, %s32334_s14  ;;  %625 = vrot.lane.b32.xlu0 %v26207_v3, %s32604_s29  ;;  %s32609_s14 = smov 96  }
 0x10e   : >> { %634 = vrot.lane.b32.xlu1 %v26207_v3, %s32332_s17  ;;  %631 = vrot.lane.b32.xlu0 %v26207_v3, %s32605_s9  ;;  %s32608_s17 = smov 120  }
 0x112   : >> { %640 = vrot.lane.b32.xlu1 %v26207_v3, %s32336_s12  ;;  %637 = vrot.lane.b32.xlu0 %v26207_v3, %s32338_s8  ;;  %s32610_s12 = smov 104   ;;  %s32611_s8 = smov 88  }
 0x116   : >> { %646 = vrot.lane.b32.xlu1 %v26207_v3, %s32606_s25  ;;  %643 = vrot.lane.b32.xlu0 %v26207_v3, %s32607_s11 }
 0x11a   : >> { %653 = vrot.lane.b32.xlu1 %v26242_v4, %s32340_s13  ;;  %650 = vrot.lane.b32.xlu0 %v26242_v4, %s32608_s17  ;;  %s32612_s13 = smov 56  }
 0x11e   : >> { %659 = vrot.lane.b32.xlu1 %v26242_v4, %s32609_s14  ;;  %656 = vrot.lane.b32.xlu0 %v26242_v4, %s32610_s12 }
 0x122   : >> { %665 = vrot.lane.b32.xlu1 %v26242_v4, %s32603_s10  ;;  %662 = vrot.lane.b32.xlu0 %v26242_v4, %s32611_s8 }
 0x126   : >> { %671 = vrot.lane.b32.xlu1 %v26242_v4, %s32604_s29  ;;  %668 = vrot.lane.b32.xlu0 %v26242_v4, %s32602_s26 }
 0x12a   : >> { %677 = vrot.lane.b32.xlu1 %v26242_v4, %s32605_s9  ;;  %674 = vrot.lane.b32.xlu0 %v26242_v4, %s32612_s13 }
 0x12e   : >> { %683 = vrot.lane.b32.xlu1 %v26242_v4, %s32613_s0  ;;  %680 = vrot.lane.b32.xlu0 %v26242_v4, %s32614_s2 }
 0x132   : >> { %689 = vrot.lane.b32.xlu1 %v26242_v4, %s32607_s11  ;;  %686 = vrot.lane.b32.xlu0 %v26242_v4, %s32615_s28 }
 0x136   : >> { %696 = vrot.lane.b32.xlu1 %v26273_v5, %s32608_s17  ;;  %692 = vrot.lane.b32.xlu0 %v26242_v4, %s32606_s25 }
 0x13a   : >> { %702 = vrot.lane.b32.xlu1 %v26273_v5, %s32610_s12  ;;  %699 = vrot.lane.b32.xlu0 %v26273_v5, %s32616_s27 }
 0x13e   : >> { %708 = vrot.lane.b32.xlu1 %v26273_v5, %s32611_s8  ;;  %705 = vrot.lane.b32.xlu0 %v26273_v5, %s32609_s14 }
 0x142   : >> { %714 = vrot.lane.b32.xlu1 %v26273_v5, %s32602_s26  ;;  %711 = vrot.lane.b32.xlu0 %v26273_v5, %s32603_s10 }
 0x146   : >> { %720 = vrot.lane.b32.xlu1 %v26273_v5, %s32612_s13  ;;  %717 = vrot.lane.b32.xlu0 %v26273_v5, %s32604_s29 }
 0x14a   : >> { %726 = vrot.lane.b32.xlu1 %v26273_v5, %s32614_s2  ;;  %723 = vrot.lane.b32.xlu0 %v26273_v5, %s32605_s9 }
 0x14e   : >> { %732 = vrot.lane.b32.xlu1 %v26273_v5, %s32615_s28  ;;  %729 = vrot.lane.b32.xlu0 %v26273_v5, %s32613_s0  ;;  %s18832_s0 = smul.u32 640, %s25379_s16  ;;  %s548_s16 = sadd.s32 1, %s25379_s16  }
 0x14f   : >> { %p545_p6 = scmp.ge.s32.totalorder %s548_s16, 8  }
 0x150   : >> { %v565_v6 = vpop.permute.xlu1 %564  ;;  %v559_v10 = vpop.permute.xlu0 %558  ;;  %s26332_s2 = scalar_lea.vmem [#allocation2], %s18832_s0  ;;  %s26585_s27 = smov (%p545_p6), 0  }
 0x151   : >> { %v757_v19 = vcombine.low %v559_v10, %v565_v6  ;;  %v758_v23 = vcombine.high %v559_v10, %v565_v6 }
 0x152   : >> { %738 = vrot.lane.b32.xlu1 %v26273_v5, %s32606_s25  ;;  %735 = vrot.lane.b32.xlu0 %v26273_v5, %s32607_s11 }
 0x153   : >> { %v765_v28 = vrot.slane %v757_v19, %v26308_v18  ;;  %v772_v34 = vrot.slane %v758_v23, %v26308_v18 }
 0x154   : >> { %v568_v13 = vpop.permute.xlu1 %567  ;;  %v562_v14 = vpop.permute.xlu0 %561 }
 0x155   : >> { %v741_v17 = vcombine.low %v26176_v2, %v562_v14  ;;  %v742_v20 = vcombine.high %v26176_v2, %v562_v14 }
 0x157   : >> { %v749_v25 = vrot.slane %v741_v17, %v26308_v18  ;;  %v756_v29 = vrot.slane %v742_v20, %v26308_v18 }
 0x158   : >> { %v574_v21 = vpop.permute.xlu1 %573  ;;  %v571_v22 = vpop.permute.xlu0 %570 }
 0x159   : >> { %v773_v26 = vcombine.low %v568_v13, %v574_v21  ;;  %v774_v27 = vcombine.high %v568_v13, %v574_v21  ;;  %v805_v36 = vcombine.low %v749_v25, %v765_v28  ;;  %v806_v37 = vcombine.high %v749_v25, %v765_v28 }
 0x15a   : >> { %v821_v42 = vcombine.low %v756_v29, %v772_v34  ;;  %v822_v43 = vcombine.high %v756_v29, %v772_v34 }
 0x15b   : >> { %v781_v38 = vrot.slane %v773_v26, %v26308_v18  ;;  %v788_v39 = vrot.slane %v774_v27, %v26308_v18  ;;  %v813_v50 = vrot.slane %v805_v36, %v26317_v35  ;;  %v820_v51 = vrot.slane %v806_v37, %v26317_v35 }
 0x15c   : >> { %v26314_v30 = vpop.permute.xlu1 %579  ;;  %v577_v31 = vpop.permute.xlu0 %576  ;;  %v829_v56 = vrot.slane %v821_v42, %v26317_v35  ;;  %v836_v57 = vrot.slane %v822_v43, %v26317_v35 }
 0x15d   : >> { %v789_v32 = vcombine.low %v571_v22, %v577_v31  ;;  %v790_v33 = vcombine.high %v571_v22, %v577_v31 }
 0x15f   : >> { %v797_v40 = vrot.slane %v789_v32, %v26308_v18  ;;  %v804_v41 = vrot.slane %v790_v33, %v26308_v18 }
 0x160   : >> { %v586_v44 = vpop.permute.xlu1 %585  ;;  %v583_v45 = vpop.permute.xlu0 %582 }
 0x161   : >> { %v837_v46 = vcombine.low %v781_v38, %v797_v40  ;;  %v838_v47 = vcombine.high %v781_v38, %v797_v40  ;;  %v853_v48 = vcombine.low %v788_v39, %v804_v41  ;;  %v854_v49 = vcombine.high %v788_v39, %v804_v41 }
 0x162   : >> { %v877_v11 = vcombine.low %v26314_v30, %v586_v44  ;;  %v878_v13 = vcombine.high %v26314_v30, %v586_v44 }
 0x163   : >> { %v845_v52 = vrot.slane %v837_v46, %v26317_v35  ;;  %v852_v53 = vrot.slane %v838_v47, %v26317_v35  ;;  %v861_v54 = vrot.slane %v853_v48, %v26317_v35  ;;  %v868_v55 = vrot.slane %v854_v49, %v26317_v35 }
 0x164   : >> { %v592_v58 = vpop.permute.xlu1 %591  ;;  %v589_v59 = vpop.permute.xlu0 %588  ;;  %v885_v20 = vrot.slane %v877_v11, %v26308_v18  ;;  %v892_v24 = vrot.slane %v878_v13, %v26308_v18 }
 0x165   : >> { %v869_v60 = vcombine.low %v813_v50, %v845_v52  ;;  %v870_v61 = vcombine.high %v813_v50, %v845_v52  ;;  %v871_v62 = vcombine.low %v820_v51, %v852_v53  ;;  %v872_v63 = vcombine.high %v820_v51, %v852_v53 }
 0x166   : >> { %v873_v0 = vcombine.low %v829_v56, %v861_v54  ;;  %v874_v2 = vcombine.high %v829_v56, %v861_v54  ;;  %v875_v6 = vcombine.low %v836_v57, %v868_v55  ;;  %v876_v7 = vcombine.high %v836_v57, %v868_v55 }
 0x167   : >> { %18833 = vst.msk [vmem:[%s26332_s2 + $0x58] sm:$0xff] %vm243_vm0, %v869_v60  ;;  %18841 = vst.msk [vmem:[%s26332_s2 + $0xa8] sm:$0xff] %vm243_vm0, %v870_v61  ;;  %v893_v8 = vcombine.low %v583_v45, %v589_v59  ;;  %v894_v12 = vcombine.high %v583_v45, %v589_v59 }
 0x168   : >> { %18849 = vst.msk [vmem:[%s26332_s2 + $0xf8] sm:$0xff] %vm243_vm0, %v871_v62  ;;  %18857 = vst.msk [vmem:[%s26332_s2 + $0x148] sm:$0xff] %vm243_vm0, %v872_v63  ;;  %v598_v9 = vpop.permute.xlu1 %597  ;;  %v595_v10 = vpop.permute.xlu0 %594 }
 0x169   : >> { %18865 = vst.msk [vmem:[%s26332_s2 + $0x198] sm:$0xff] %vm243_vm0, %v873_v0  ;;  %18873 = vst.msk [vmem:[%s26332_s2 + $0x1e8] sm:$0xff] %vm243_vm0, %v874_v2  ;;  %v901_v14 = vrot.slane %v893_v8, %v26308_v18  ;;  %v909_v15 = vcombine.low %v592_v58, %v598_v9  ;;  %v910_v16 = vcombine.high %v592_v58, %v598_v9 }
 0x16a   : >> { %18881 = vst.msk [vmem:[%s26332_s2 + $0x238] sm:$0xff] %vm243_vm0, %v875_v6  ;;  %18889 = vst.msk [vmem:[%s26332_s2 + $0x288] sm:$0xff] %vm243_vm0, %v876_v7  ;;  %v908_v21 = vrot.slane %v894_v12, %v26308_v18 }
 0x16b   : >> { %v941_v25 = vcombine.low %v885_v20, %v901_v14  ;;  %v942_v26 = vcombine.high %v885_v20, %v901_v14  ;;  %v917_v27 = vrot.slane %v909_v15, %v26308_v18  ;;  %v924_v28 = vrot.slane %v910_v16, %v26308_v18 }
 0x16c   : >> { %v605_v17 = vpop.permute.xlu1 %604  ;;  %v601_v19 = vpop.permute.xlu0 %600  ;;  %v957_v33 = vcombine.low %v892_v24, %v908_v21  ;;  %v958_v34 = vcombine.high %v892_v24, %v908_v21 }
 0x16d   : >> { %v925_v22 = vcombine.low %v595_v10, %v601_v19  ;;  %v926_v23 = vcombine.high %v595_v10, %v601_v19  ;;  %v949_v42 = vrot.slane %v941_v25, %v26317_v35  ;;  %v956_v43 = vrot.slane %v942_v26, %v26317_v35 }
 0x16e   : >> { %v965_v52 = vrot.slane %v957_v33, %v26317_v35  ;;  %v972_v53 = vrot.slane %v958_v34, %v26317_v35 }
 0x16f   : >> { %v933_v29 = vrot.slane %v925_v22, %v26308_v18  ;;  %v940_v30 = vrot.slane %v926_v23, %v26308_v18 }
 0x170   : >> { %v611_v31 = vpop.permute.xlu1 %610  ;;  %v608_v32 = vpop.permute.xlu0 %607 }
 0x171   : >> { %v1029_v36 = vcombine.low %v605_v17, %v611_v31  ;;  %v1013_v37 = vcombine.low %v26207_v3, %v608_v32  ;;  %v973_v38 = vcombine.low %v917_v27, %v933_v29  ;;  %v974_v39 = vcombine.high %v917_v27, %v933_v29 }
 0x172   : >> { %v989_v40 = vcombine.low %v924_v28, %v940_v30  ;;  %v990_v41 = vcombine.high %v924_v28, %v940_v30  ;;  %v1030_v44 = vcombine.high %v605_v17, %v611_v31  ;;  %v1014_v45 = vcombine.high %v26207_v3, %v608_v32 }
 0x173   : >> { %v981_v46 = vrot.slane %v973_v38, %v26317_v35  ;;  %v988_v47 = vrot.slane %v974_v39, %v26317_v35  ;;  %v1037_v3 = vrot.slane %v1029_v36, %v26308_v18  ;;  %v1021_v54 = vrot.slane %v1013_v37, %v26308_v18 }
 0x174   : >> { %v997_v48 = vrot.slane %v989_v40, %v26317_v35  ;;  %v1004_v49 = vrot.slane %v990_v41, %v26317_v35  ;;  %v617_v50 = vpop.permute.xlu1 %616  ;;  %v614_v51 = vpop.permute.xlu0 %613  ;;  %v1044_v63 = vrot.slane %v1030_v44, %v26308_v18  ;;  %v1028_v0 = vrot.slane %v1014_v45, %v26308_v18 }
 0x175   : >> { %v1005_v55 = vcombine.low %v949_v42, %v981_v46  ;;  %v1006_v56 = vcombine.high %v949_v42, %v981_v46  ;;  %v1007_v57 = vcombine.low %v956_v43, %v988_v47  ;;  %v1008_v58 = vcombine.high %v956_v43, %v988_v47 }
 0x176   : >> { %v1009_v59 = vcombine.low %v965_v52, %v997_v48  ;;  %v1010_v60 = vcombine.high %v965_v52, %v997_v48  ;;  %v1011_v61 = vcombine.low %v972_v53, %v1004_v49  ;;  %v1012_v62 = vcombine.high %v972_v53, %v1004_v49 }
 0x177   : >> { %18834 = vst.msk [vmem:[%s26332_s2 + $0x60] sm:$0xff] %vm243_vm0, %v1005_v55  ;;  %18842 = vst.msk [vmem:[%s26332_s2 + $0xb0] sm:$0xff] %vm243_vm0, %v1006_v56  ;;  %v1077_v11 = vcombine.low %v1021_v54, %v1037_v3  ;;  %v1078_v12 = vcombine.high %v1021_v54, %v1037_v3  ;;  %v1093_v17 = vcombine.low %v1028_v0, %v1044_v63 }
 0x178   : >> { %18850 = vst.msk [vmem:[%s26332_s2 + $0x100] sm:$0xff] %vm243_vm0, %v1007_v57  ;;  %18858 = vst.msk [vmem:[%s26332_s2 + $0x150] sm:$0xff] %vm243_vm0, %v1008_v58  ;;  %v623_v2 = vpop.permute.xlu1 %622  ;;  %v620_v6 = vpop.permute.xlu0 %619  ;;  %v1094_v19 = vcombine.high %v1028_v0, %v1044_v63 }
 0x179   : >> { %18866 = vst.msk [vmem:[%s26332_s2 + $0x1a0] sm:$0xff] %vm243_vm0, %v1009_v59  ;;  %18874 = vst.msk [vmem:[%s26332_s2 + $0x1f0] sm:$0xff] %vm243_vm0, %v1010_v60  ;;  %v1061_v7 = vcombine.low %v617_v50, %v623_v2  ;;  %v1062_v8 = vcombine.high %v617_v50, %v623_v2  ;;  %v1045_v9 = vcombine.low %v614_v51, %v620_v6 }
 0x17a   : >> { %18882 = vst.msk [vmem:[%s26332_s2 + $0x240] sm:$0xff] %vm243_vm0, %v1011_v61  ;;  %18890 = vst.msk [vmem:[%s26332_s2 + $0x290] sm:$0xff] %vm243_vm0, %v1012_v62  ;;  %v1046_v10 = vcombine.high %v614_v51, %v620_v6  ;;  %v1085_v26 = vrot.slane %v1077_v11, %v26317_v35  ;;  %v1092_v27 = vrot.slane %v1078_v12, %v26317_v35 }
 0x17b   : >> { %v1069_v13 = vrot.slane %v1061_v7, %v26308_v18  ;;  %v1076_v14 = vrot.slane %v1062_v8, %v26308_v18  ;;  %v1053_v15 = vrot.slane %v1045_v9, %v26308_v18  ;;  %v1101_v32 = vrot.slane %v1093_v17, %v26317_v35 }
 0x17c   : >> { %v1060_v16 = vrot.slane %v1046_v10, %v26308_v18  ;;  %v629_v20 = vpop.permute.xlu1 %628  ;;  %v626_v21 = vpop.permute.xlu0 %625  ;;  %v1108_v33 = vrot.slane %v1094_v19, %v26317_v35 }
 0x17d   : >> { %v1109_v22 = vcombine.low %v1053_v15, %v1069_v13  ;;  %v1110_v23 = vcombine.high %v1053_v15, %v1069_v13 }
 0x17e   : >> { %v1125_v24 = vcombine.low %v1060_v16, %v1076_v14  ;;  %v1126_v25 = vcombine.high %v1060_v16, %v1076_v14 }
 0x17f   : >> { %v1117_v28 = vrot.slane %v1109_v22, %v26317_v35  ;;  %v1124_v29 = vrot.slane %v1110_v23, %v26317_v35 }
 0x180   : >> { %v1133_v30 = vrot.slane %v1125_v24, %v26317_v35  ;;  %v1140_v31 = vrot.slane %v1126_v25, %v26317_v35  ;;  %v635_v34 = vpop.permute.xlu1 %634  ;;  %v632_v36 = vpop.permute.xlu0 %631 }
 0x181   : >> { %v1141_v37 = vcombine.low %v1085_v26, %v1117_v28  ;;  %v1142_v38 = vcombine.high %v1085_v26, %v1117_v28  ;;  %v1143_v39 = vcombine.low %v1092_v27, %v1124_v29  ;;  %v1144_v40 = vcombine.high %v1092_v27, %v1124_v29 }
 0x182   : >> { %v1145_v41 = vcombine.low %v1101_v32, %v1133_v30  ;;  %v1146_v42 = vcombine.high %v1101_v32, %v1133_v30  ;;  %v1147_v43 = vcombine.low %v1108_v33, %v1140_v31  ;;  %v1148_v44 = vcombine.high %v1108_v33, %v1140_v31 }
 0x183   : >> { %18835 = vst.msk [vmem:[%s26332_s2 + $0x68] sm:$0xff] %vm243_vm0, %v1141_v37  ;;  %18843 = vst.msk [vmem:[%s26332_s2 + $0xb8] sm:$0xff] %vm243_vm0, %v1142_v38  ;;  %v1165_v45 = vcombine.low %v629_v20, %v635_v34  ;;  %v1149_v46 = vcombine.low %v626_v21, %v632_v36  ;;  %v1166_v49 = vcombine.high %v629_v20, %v635_v34 }
 0x184   : >> { %18851 = vst.msk [vmem:[%s26332_s2 + $0x108] sm:$0xff] %vm243_vm0, %v1143_v39  ;;  %18859 = vst.msk [vmem:[%s26332_s2 + $0x158] sm:$0xff] %vm243_vm0, %v1144_v40  ;;  %v641_v47 = vpop.permute.xlu1 %640  ;;  %v638_v48 = vpop.permute.xlu0 %637  ;;  %v1150_v50 = vcombine.high %v626_v21, %v632_v36 }
 0x185   : >> { %18867 = vst.msk [vmem:[%s26332_s2 + $0x1a8] sm:$0xff] %vm243_vm0, %v1145_v41  ;;  %18875 = vst.msk [vmem:[%s26332_s2 + $0x1f8] sm:$0xff] %vm243_vm0, %v1146_v42  ;;  %v1173_v51 = vrot.slane %v1165_v45, %v26308_v18  ;;  %v1157_v52 = vrot.slane %v1149_v46, %v26308_v18  ;;  %v1180_v54 = vrot.slane %v1166_v49, %v26308_v18 }
 0x186   : >> { %18883 = vst.msk [vmem:[%s26332_s2 + $0x248] sm:$0xff] %vm243_vm0, %v1147_v43  ;;  %18891 = vst.msk [vmem:[%s26332_s2 + $0x298] sm:$0xff] %vm243_vm0, %v1148_v44  ;;  %v1164_v55 = vrot.slane %v1150_v50, %v26308_v18 }
 0x187   : >> { %v1213_v60 = vcombine.low %v1157_v52, %v1173_v51  ;;  %v1214_v61 = vcombine.high %v1157_v52, %v1173_v51 }
 0x188   : >> { %v647_v53 = vpop.permute.xlu1 %646  ;;  %v644_v3 = vpop.permute.xlu0 %643  ;;  %v1229_v8 = vcombine.low %v1164_v55, %v1180_v54  ;;  %v1230_v9 = vcombine.high %v1164_v55, %v1180_v54 }
 0x189   : >> { %v1197_v56 = vcombine.low %v641_v47, %v647_v53  ;;  %v1198_v57 = vcombine.high %v641_v47, %v647_v53  ;;  %v1181_v58 = vcombine.low %v638_v48, %v644_v3  ;;  %v1182_v59 = vcombine.high %v638_v48, %v644_v3 }
 0x18a   : >> { %v1221_v14 = vrot.slane %v1213_v60, %v26317_v35  ;;  %v1228_v15 = vrot.slane %v1214_v61, %v26317_v35  ;;  %v1237_v23 = vrot.slane %v1229_v8, %v26317_v35  ;;  %v1244_v24 = vrot.slane %v1230_v9, %v26317_v35 }
 0x18b   : >> { %v1205_v62 = vrot.slane %v1197_v56, %v26308_v18  ;;  %v1212_v63 = vrot.slane %v1198_v57, %v26308_v18  ;;  %v1189_v0 = vrot.slane %v1181_v58, %v26308_v18  ;;  %v1196_v2 = vrot.slane %v1182_v59, %v26308_v18 }
 0x18c   : >> { %v654_v6 = vpop.permute.xlu1 %653  ;;  %v651_v7 = vpop.permute.xlu0 %650 }
 0x18d   : >> { %v1245_v10 = vcombine.low %v1189_v0, %v1205_v62  ;;  %v1246_v11 = vcombine.high %v1189_v0, %v1205_v62  ;;  %v1261_v12 = vcombine.low %v1196_v2, %v1212_v63  ;;  %v1262_v13 = vcombine.high %v1196_v2, %v1212_v63 }
 0x18e   : >> { %v1285_v34 = vcombine.low %v26242_v4, %v654_v6  ;;  %v1286_v39 = vcombine.high %v26242_v4, %v654_v6 }
 0x18f   : >> { %v1253_v16 = vrot.slane %v1245_v10, %v26317_v35  ;;  %v1260_v17 = vrot.slane %v1246_v11, %v26317_v35  ;;  %v1269_v19 = vrot.slane %v1261_v12, %v26317_v35  ;;  %v1276_v20 = vrot.slane %v1262_v13, %v26317_v35 }
 0x190   : >> { %v660_v21 = vpop.permute.xlu1 %659  ;;  %v657_v22 = vpop.permute.xlu0 %656  ;;  %v1293_v43 = vrot.slane %v1285_v34, %v26308_v18  ;;  %v1300_v49 = vrot.slane %v1286_v39, %v26308_v18 }
 0x191   : >> { %v1301_v25 = vcombine.low %v651_v7, %v657_v22  ;;  %v1277_v26 = vcombine.low %v1221_v14, %v1253_v16  ;;  %v1278_v27 = vcombine.high %v1221_v14, %v1253_v16  ;;  %v1279_v28 = vcombine.low %v1228_v15, %v1260_v17 }
 0x192   : >> { %v1280_v29 = vcombine.high %v1228_v15, %v1260_v17  ;;  %v1281_v30 = vcombine.low %v1237_v23, %v1269_v19  ;;  %v1282_v31 = vcombine.high %v1237_v23, %v1269_v19  ;;  %v1283_v32 = vcombine.low %v1244_v24, %v1276_v20 }
 0x193   : >> { %v1284_v33 = vcombine.high %v1244_v24, %v1276_v20  ;;  %18836 = vst.msk [vmem:[%s26332_s2 + $0x70] sm:$0xff] %vm243_vm0, %v1277_v26  ;;  %18844 = vst.msk [vmem:[%s26332_s2 + $0xc0] sm:$0xff] %vm243_vm0, %v1278_v27  ;;  %v1302_v36 = vcombine.high %v651_v7, %v657_v22  ;;  %v1309_v40 = vrot.slane %v1301_v25, %v26308_v18 }
 0x194   : >> { %18852 = vst.msk [vmem:[%s26332_s2 + $0x110] sm:$0xff] %vm243_vm0, %v1279_v28  ;;  %18860 = vst.msk [vmem:[%s26332_s2 + $0x160] sm:$0xff] %vm243_vm0, %v1280_v29  ;;  %v666_v37 = vpop.permute.xlu1 %665  ;;  %v663_v38 = vpop.permute.xlu0 %662 }
 0x195   : >> { %18868 = vst.msk [vmem:[%s26332_s2 + $0x1b0] sm:$0xff] %vm243_vm0, %v1281_v30  ;;  %18876 = vst.msk [vmem:[%s26332_s2 + $0x200] sm:$0xff] %vm243_vm0, %v1282_v31  ;;  %v1317_v41 = vcombine.low %v660_v21, %v666_v37  ;;  %v1318_v42 = vcombine.high %v660_v21, %v666_v37  ;;  %v1316_v44 = vrot.slane %v1302_v36, %v26308_v18 }
 0x196   : >> { %18884 = vst.msk [vmem:[%s26332_s2 + $0x250] sm:$0xff] %vm243_vm0, %v1283_v32  ;;  %18892 = vst.msk [vmem:[%s26332_s2 + $0x2a0] sm:$0xff] %vm243_vm0, %v1284_v33  ;;  %v1349_v50 = vcombine.low %v1293_v43, %v1309_v40  ;;  %v1350_v51 = vcombine.high %v1293_v43, %v1309_v40 }
 0x197   : >> { %v1325_v52 = vrot.slane %v1317_v41, %v26308_v18  ;;  %v1332_v4 = vrot.slane %v1318_v42, %v26308_v18  ;;  %v1365_v54 = vcombine.low %v1300_v49, %v1316_v44  ;;  %v1366_v55 = vcombine.high %v1300_v49, %v1316_v44 }
 0x198   : >> { %v672_v45 = vpop.permute.xlu1 %671  ;;  %v669_v46 = vpop.permute.xlu0 %668  ;;  %v1357_v62 = vrot.slane %v1349_v50, %v26317_v35  ;;  %v1364_v63 = vrot.slane %v1350_v51, %v26317_v35 }
 0x199   : >> { %v1333_v47 = vcombine.low %v663_v38, %v669_v46  ;;  %v1334_v48 = vcombine.high %v663_v38, %v669_v46  ;;  %v1373_v8 = vrot.slane %v1365_v54, %v26317_v35  ;;  %v1380_v9 = vrot.slane %v1366_v55, %v26317_v35 }
 0x19b   : >> { %v1341_v53 = vrot.slane %v1333_v47, %v26308_v18  ;;  %v1348_v3 = vrot.slane %v1334_v48, %v26308_v18 }
 0x19c   : >> { %v678_v56 = vpop.permute.xlu1 %677  ;;  %v675_v57 = vpop.permute.xlu0 %674 }
 0x19d   : >> { %v1381_v58 = vcombine.low %v1325_v52, %v1341_v53  ;;  %v1382_v59 = vcombine.high %v1325_v52, %v1341_v53  ;;  %v1397_v60 = vcombine.low %v1332_v4, %v1348_v3  ;;  %v1398_v61 = vcombine.high %v1332_v4, %v1348_v3 }
 0x19e   : >> { %v1421_v24 = vcombine.low %v672_v45, %v678_v56  ;;  %v1422_v26 = vcombine.high %v672_v45, %v678_v56 }
 0x19f   : >> { %v1389_v0 = vrot.slane %v1381_v58, %v26317_v35  ;;  %v1396_v2 = vrot.slane %v1382_v59, %v26317_v35  ;;  %v1405_v6 = vrot.slane %v1397_v60, %v26317_v35  ;;  %v1412_v7 = vrot.slane %v1398_v61, %v26317_v35 }
 0x1a0   : >> { %v684_v10 = vpop.permute.xlu1 %683  ;;  %v681_v11 = vpop.permute.xlu0 %680  ;;  %v1429_v32 = vrot.slane %v1421_v24, %v26308_v18  ;;  %v1436_v37 = vrot.slane %v1422_v26, %v26308_v18 }
 0x1a1   : >> { %v1413_v12 = vcombine.low %v1357_v62, %v1389_v0  ;;  %v1414_v13 = vcombine.high %v1357_v62, %v1389_v0  ;;  %v1415_v14 = vcombine.low %v1364_v63, %v1396_v2  ;;  %v1416_v15 = vcombine.high %v1364_v63, %v1396_v2 }
 0x1a2   : >> { %v1417_v16 = vcombine.low %v1373_v8, %v1405_v6  ;;  %v1418_v17 = vcombine.high %v1373_v8, %v1405_v6  ;;  %v1419_v19 = vcombine.low %v1380_v9, %v1412_v7  ;;  %v1420_v20 = vcombine.high %v1380_v9, %v1412_v7 }
 0x1a3   : >> { %18837 = vst.msk [vmem:[%s26332_s2 + $0x78] sm:$0xff] %vm243_vm0, %v1413_v12  ;;  %18845 = vst.msk [vmem:[%s26332_s2 + $0xc8] sm:$0xff] %vm243_vm0, %v1414_v13  ;;  %v1437_v21 = vcombine.low %v675_v57, %v681_v11  ;;  %v1438_v25 = vcombine.high %v675_v57, %v681_v11 }
 0x1a4   : >> { %18853 = vst.msk [vmem:[%s26332_s2 + $0x118] sm:$0xff] %vm243_vm0, %v1415_v14  ;;  %18861 = vst.msk [vmem:[%s26332_s2 + $0x168] sm:$0xff] %vm243_vm0, %v1416_v15  ;;  %v690_v22 = vpop.permute.xlu1 %689  ;;  %v687_v23 = vpop.permute.xlu0 %686 }
 0x1a5   : >> { %18869 = vst.msk [vmem:[%s26332_s2 + $0x1b8] sm:$0xff] %vm243_vm0, %v1417_v16  ;;  %18877 = vst.msk [vmem:[%s26332_s2 + $0x208] sm:$0xff] %vm243_vm0, %v1418_v17  ;;  %v1445_v27 = vrot.slane %v1437_v21, %v26308_v18  ;;  %v1453_v28 = vcombine.low %v684_v10, %v690_v22  ;;  %v1454_v29 = vcombine.high %v684_v10, %v690_v22 }
 0x1a6   : >> { %18885 = vst.msk [vmem:[%s26332_s2 + $0x258] sm:$0xff] %vm243_vm0, %v1419_v19  ;;  %18893 = vst.msk [vmem:[%s26332_s2 + $0x2a8] sm:$0xff] %vm243_vm0, %v1420_v20  ;;  %v1452_v33 = vrot.slane %v1438_v25, %v26308_v18 }
 0x1a7   : >> { %v1485_v38 = vcombine.low %v1429_v32, %v1445_v27  ;;  %v1486_v39 = vcombine.high %v1429_v32, %v1445_v27  ;;  %v1461_v40 = vrot.slane %v1453_v28, %v26308_v18  ;;  %v1468_v41 = vrot.slane %v1454_v29, %v26308_v18 }
 0x1a8   : >> { %v697_v30 = vpop.permute.xlu1 %696  ;;  %v693_v31 = vpop.permute.xlu0 %692  ;;  %v1501_v46 = vcombine.low %v1436_v37, %v1452_v33  ;;  %v1502_v47 = vcombine.high %v1436_v37, %v1452_v33 }
 0x1a9   : >> { %v1469_v34 = vcombine.low %v687_v23, %v693_v31  ;;  %v1470_v36 = vcombine.high %v687_v23, %v693_v31  ;;  %v1493_v53 = vrot.slane %v1485_v38, %v26317_v35  ;;  %v1500_v3 = vrot.slane %v1486_v39, %v26317_v35 }
 0x1aa   : >> { %v1509_v62 = vrot.slane %v1501_v46, %v26317_v35  ;;  %v1516_v63 = vrot.slane %v1502_v47, %v26317_v35 }
 0x1ab   : >> { %v1477_v42 = vrot.slane %v1469_v34, %v26308_v18  ;;  %v1484_v43 = vrot.slane %v1470_v36, %v26308_v18 }
 0x1ac   : >> { %v703_v44 = vpop.permute.xlu1 %702  ;;  %v700_v45 = vpop.permute.xlu0 %699 }
 0x1ad   : >> { %v1573_v48 = vcombine.low %v697_v30, %v703_v44  ;;  %v1557_v49 = vcombine.low %v26273_v5, %v700_v45  ;;  %v1517_v50 = vcombine.low %v1461_v40, %v1477_v42  ;;  %v1518_v51 = vcombine.high %v1461_v40, %v1477_v42 }
 0x1ae   : >> { %v1533_v52 = vcombine.low %v1468_v41, %v1484_v43  ;;  %v1534_v4 = vcombine.high %v1468_v41, %v1484_v43  ;;  %v1574_v54 = vcombine.high %v697_v30, %v703_v44  ;;  %v1558_v55 = vcombine.high %v26273_v5, %v700_v45 }
 0x1af   : >> { %v1525_v56 = vrot.slane %v1517_v50, %v26317_v35  ;;  %v1532_v57 = vrot.slane %v1518_v51, %v26317_v35  ;;  %v1581_v5 = vrot.slane %v1573_v48, %v26308_v18  ;;  %v1565_v0 = vrot.slane %v1557_v49, %v26308_v18 }
 0x1b0   : >> { %v1541_v58 = vrot.slane %v1533_v52, %v26317_v35  ;;  %v1548_v59 = vrot.slane %v1534_v4, %v26317_v35  ;;  %v709_v60 = vpop.permute.xlu1 %708  ;;  %v706_v61 = vpop.permute.xlu0 %705  ;;  %v1588_v13 = vrot.slane %v1574_v54, %v26308_v18  ;;  %v1572_v14 = vrot.slane %v1558_v55, %v26308_v18 }
 0x1b1   : >> { %v1549_v2 = vcombine.low %v1493_v53, %v1525_v56  ;;  %v1550_v6 = vcombine.high %v1493_v53, %v1525_v56  ;;  %v1551_v7 = vcombine.low %v1500_v3, %v1532_v57  ;;  %v1552_v8 = vcombine.high %v1500_v3, %v1532_v57 }
 0x1b2   : >> { %v1553_v9 = vcombine.low %v1509_v62, %v1541_v58  ;;  %v1554_v10 = vcombine.high %v1509_v62, %v1541_v58  ;;  %v1555_v11 = vcombine.low %v1516_v63, %v1548_v59  ;;  %v1556_v12 = vcombine.high %v1516_v63, %v1548_v59 }
 0x1b3   : >> { %18838 = vst.msk [vmem:[%s26332_s2 + $0x80] sm:$0xff] %vm243_vm0, %v1549_v2  ;;  %18846 = vst.msk [vmem:[%s26332_s2 + $0xd0] sm:$0xff] %vm243_vm0, %v1550_v6  ;;  %v1621_v22 = vcombine.low %v1565_v0, %v1581_v5  ;;  %v1622_v23 = vcombine.high %v1565_v0, %v1581_v5  ;;  %v1637_v28 = vcombine.low %v1572_v14, %v1588_v13 }
 0x1b4   : >> { %18854 = vst.msk [vmem:[%s26332_s2 + $0x120] sm:$0xff] %vm243_vm0, %v1551_v7  ;;  %18862 = vst.msk [vmem:[%s26332_s2 + $0x170] sm:$0xff] %vm243_vm0, %v1552_v8  ;;  %v715_v15 = vpop.permute.xlu1 %714  ;;  %v712_v16 = vpop.permute.xlu0 %711  ;;  %v1638_v29 = vcombine.high %v1572_v14, %v1588_v13 }
 0x1b5   : >> { %18870 = vst.msk [vmem:[%s26332_s2 + $0x1c0] sm:$0xff] %vm243_vm0, %v1553_v9  ;;  %18878 = vst.msk [vmem:[%s26332_s2 + $0x210] sm:$0xff] %vm243_vm0, %v1554_v10  ;;  %v1605_v17 = vcombine.low %v709_v60, %v715_v15  ;;  %v1606_v19 = vcombine.high %v709_v60, %v715_v15  ;;  %v1589_v20 = vcombine.low %v706_v61, %v712_v16 }
 0x1b6   : >> { %18886 = vst.msk [vmem:[%s26332_s2 + $0x260] sm:$0xff] %vm243_vm0, %v1555_v11  ;;  %18894 = vst.msk [vmem:[%s26332_s2 + $0x2b0] sm:$0xff] %vm243_vm0, %v1556_v12  ;;  %v1590_v21 = vcombine.high %v706_v61, %v712_v16  ;;  %v1629_v37 = vrot.slane %v1621_v22, %v26317_v35  ;;  %v1636_v38 = vrot.slane %v1622_v23, %v26317_v35 }
 0x1b7   : >> { %v1613_v24 = vrot.slane %v1605_v17, %v26308_v18  ;;  %v1620_v25 = vrot.slane %v1606_v19, %v26308_v18  ;;  %v1597_v26 = vrot.slane %v1589_v20, %v26308_v18  ;;  %v1645_v43 = vrot.slane %v1637_v28, %v26317_v35 }
 0x1b8   : >> { %v1604_v27 = vrot.slane %v1590_v21, %v26308_v18  ;;  %v721_v30 = vpop.permute.xlu1 %720  ;;  %v718_v31 = vpop.permute.xlu0 %717  ;;  %v1652_v44 = vrot.slane %v1638_v29, %v26317_v35 }
 0x1b9   : >> { %v1653_v32 = vcombine.low %v1597_v26, %v1613_v24  ;;  %v1654_v33 = vcombine.high %v1597_v26, %v1613_v24 }
 0x1ba   : >> { %v1669_v34 = vcombine.low %v1604_v27, %v1620_v25  ;;  %v1670_v36 = vcombine.high %v1604_v27, %v1620_v25 }
 0x1bb   : >> { %v1661_v39 = vrot.slane %v1653_v32, %v26317_v35  ;;  %v1668_v40 = vrot.slane %v1654_v33, %v26317_v35 }
 0x1bc   : >> { %v1677_v41 = vrot.slane %v1669_v34, %v26317_v35  ;;  %v1684_v42 = vrot.slane %v1670_v36, %v26317_v35  ;;  %v727_v45 = vpop.permute.xlu1 %726  ;;  %v724_v46 = vpop.permute.xlu0 %723 }
 0x1bd   : >> { %v1685_v47 = vcombine.low %v1629_v37, %v1661_v39  ;;  %v1686_v48 = vcombine.high %v1629_v37, %v1661_v39  ;;  %v1687_v49 = vcombine.low %v1636_v38, %v1668_v40  ;;  %v1688_v50 = vcombine.high %v1636_v38, %v1668_v40 }
 0x1be   : >> { %v1689_v51 = vcombine.low %v1645_v43, %v1677_v41  ;;  %v1690_v52 = vcombine.high %v1645_v43, %v1677_v41  ;;  %v1691_v4 = vcombine.low %v1652_v44, %v1684_v42  ;;  %v1692_v53 = vcombine.high %v1652_v44, %v1684_v42 }
 0x1bf   : >> { %18839 = vst.msk [vmem:[%s26332_s2 + $0x88] sm:$0xff] %vm243_vm0, %v1685_v47  ;;  %18847 = vst.msk [vmem:[%s26332_s2 + $0xd8] sm:$0xff] %vm243_vm0, %v1686_v48  ;;  %v1709_v3 = vcombine.low %v721_v30, %v727_v45  ;;  %v1693_v54 = vcombine.low %v718_v31, %v724_v46  ;;  %v1710_v57 = vcombine.high %v721_v30, %v727_v45 }
 0x1c0   : >> { %18855 = vst.msk [vmem:[%s26332_s2 + $0x128] sm:$0xff] %vm243_vm0, %v1687_v49  ;;  %18863 = vst.msk [vmem:[%s26332_s2 + $0x178] sm:$0xff] %vm243_vm0, %v1688_v50  ;;  %v733_v55 = vpop.permute.xlu1 %732  ;;  %v730_v56 = vpop.permute.xlu0 %729  ;;  %v1694_v58 = vcombine.high %v718_v31, %v724_v46 }
 0x1c1   : >> { %18871 = vst.msk [vmem:[%s26332_s2 + $0x1c8] sm:$0xff] %vm243_vm0, %v1689_v51  ;;  %18879 = vst.msk [vmem:[%s26332_s2 + $0x218] sm:$0xff] %vm243_vm0, %v1690_v52  ;;  %v1717_v59 = vrot.slane %v1709_v3, %v26308_v18  ;;  %v1701_v60 = vrot.slane %v1693_v54, %v26308_v18  ;;  %v1724_v63 = vrot.slane %v1710_v57, %v26308_v18 }
 0x1c2   : >> { %18887 = vst.msk [vmem:[%s26332_s2 + $0x268] sm:$0xff] %vm243_vm0, %v1691_v4  ;;  %18895 = vst.msk [vmem:[%s26332_s2 + $0x2b8] sm:$0xff] %vm243_vm0, %v1692_v53  ;;  %v1708_v5 = vrot.slane %v1694_v58, %v26308_v18 }
 0x1c3   : >> { %v1757_v8 = vcombine.low %v1701_v60, %v1717_v59  ;;  %v1758_v9 = vcombine.high %v1701_v60, %v1717_v59 }
 0x1c4   : >> { %v739_v61 = vpop.permute.xlu1 %738  ;;  %v736_v62 = vpop.permute.xlu0 %735  ;;  %v1773_v14 = vcombine.low %v1708_v5, %v1724_v63  ;;  %v1774_v15 = vcombine.high %v1708_v5, %v1724_v63 }
 0x1c5   : >> { %v1741_v0 = vcombine.low %v733_v55, %v739_v61  ;;  %v1742_v2 = vcombine.high %v733_v55, %v739_v61  ;;  %v1725_v6 = vcombine.low %v730_v56, %v736_v62  ;;  %v1726_v7 = vcombine.high %v730_v56, %v736_v62 }
 0x1c6   : >> { %v1765_v21 = vrot.slane %v1757_v8, %v26317_v35  ;;  %v1772_v22 = vrot.slane %v1758_v9, %v26317_v35  ;;  %v1781_v27 = vrot.slane %v1773_v14, %v26317_v35  ;;  %v1788_v28 = vrot.slane %v1774_v15, %v26317_v35 }
 0x1c7   : >> { %v1749_v10 = vrot.slane %v1741_v0, %v26308_v18  ;;  %v1756_v11 = vrot.slane %v1742_v2, %v26308_v18  ;;  %v1733_v12 = vrot.slane %v1725_v6, %v26308_v18  ;;  %v1740_v13 = vrot.slane %v1726_v7, %v26308_v18 }
 0x1c9   : >> { %v1789_v16 = vcombine.low %v1733_v12, %v1749_v10  ;;  %v1790_v17 = vcombine.high %v1733_v12, %v1749_v10  ;;  %v1805_v19 = vcombine.low %v1740_v13, %v1756_v11  ;;  %v1806_v20 = vcombine.high %v1740_v13, %v1756_v11 }
 0x1cb   : >> { %v1797_v23 = vrot.slane %v1789_v16, %v26317_v35  ;;  %v1804_v24 = vrot.slane %v1790_v17, %v26317_v35  ;;  %v1813_v25 = vrot.slane %v1805_v19, %v26317_v35  ;;  %v1820_v26 = vrot.slane %v1806_v20, %v26317_v35 }
 0x1cc   : > { %547 = sbr.rel (!%p545_p6) target bundleno = 214 (0xd6), region = 136 }
 0x1cd   : >> { %v1821_v29 = vcombine.low %v1765_v21, %v1797_v23  ;;  %v1822_v30 = vcombine.high %v1765_v21, %v1797_v23  ;;  %v1823_v31 = vcombine.low %v1772_v22, %v1804_v24  ;;  %v1824_v32 = vcombine.high %v1772_v22, %v1804_v24 }
 0x1ce   : >> { %v1825_v33 = vcombine.low %v1781_v27, %v1813_v25  ;;  %v1826_v34 = vcombine.high %v1781_v27, %v1813_v25  ;;  %v1827_v36 = vcombine.low %v1788_v28, %v1820_v26  ;;  %v1828_v37 = vcombine.high %v1788_v28, %v1820_v26 }
 0x1cf   : >> { %18840 = vst.msk [vmem:[%s26332_s2 + $0x90] sm:$0xff] %vm243_vm0, %v1821_v29  ;;  %18848 = vst.msk [vmem:[%s26332_s2 + $0xe0] sm:$0xff] %vm243_vm0, %v1822_v30 }
 0x1d0   : >> { %18856 = vst.msk [vmem:[%s26332_s2 + $0x130] sm:$0xff] %vm243_vm0, %v1823_v31  ;;  %18864 = vst.msk [vmem:[%s26332_s2 + $0x180] sm:$0xff] %vm243_vm0, %v1824_v32 }
 0x1d1   : >> { %18872 = vst.msk [vmem:[%s26332_s2 + $0x1d0] sm:$0xff] %vm243_vm0, %v1825_v33  ;;  %18880 = vst.msk [vmem:[%s26332_s2 + $0x220] sm:$0xff] %vm243_vm0, %v1826_v34 }
 0x1d2   : >> { %18888 = vst.msk [vmem:[%s26332_s2 + $0x270] sm:$0xff] %vm243_vm0, %v1827_v36  ;;  %18896 = vst.msk [vmem:[%s26332_s2 + $0x2c0] sm:$0xff] %vm243_vm0, %v1828_v37 }
 0x1d3 LB: >> { %v18899_v38 = vld [vmem:[%s32306_s1 + $0x8] sm:$0xff]  ;;  %v26596_v39 = vld [vmem:[%s32306_s1 + $0x20] sm:$0xff]  ;;  %s18898_s25 = smul.u32 640, %s25383_s27  ;;  %v26624_v48 = vld [vmem:[%s32306_s1 + $0x30] sm:$0xff]  ;;  %s1901_s27 = sadd.s32 1, %s25383_s27   ;;  %s25383_s27 = sphi %s26585_s27, %s1901_s27  }
 0x1d4   : >> { %v1969_v40 = vld [vmem:[%s32306_s1] sm:$0xff]  ;;  %22366 = vmatprep.subr.mxu1 %v18899_v38  ;;  %22758 = vmatprep.subr.mxu0 %v26596_v39  ;;  %v19417_v41 = vld [vmem:[%s32306_s1 + $0x28] sm:$0xff]  ;;  %v26629_v49 = vld [vmem:[%s32306_s1 + $0x10] sm:$0xff]  ;;  %p1898_p11 = scmp.ge.s32.totalorder %s1901_s27, 8  }
 0x1d5   : >> { %22367 = vmatpush3.msra.mxu1 %v18899_v38  ;;  %22759 = vmatpush3.msra.mxu0 %v26596_v39  ;;  %s26609_s26 = scalar_lea.vmem [#allocation2], %s18898_s25  ;;  %v26742_v25 = vld [vmem:[%s32306_s1 + $0x38] sm:$0xff]  ;;  %s28278_s13 = scalar_lea.vmem [#allocation3], %s18898_s25 }
 0x1d6   : >> { %22464 = vmatprep.subr.mxu1 %v1969_v40  ;;  %22856 = vmatprep.subr.mxu0 %v19417_v41 }
 0x1d9   : >> { %v1970_v42 = vld [vmem:[%s26609_s26 + $0x8] sm:$0xff]  ;;  %v19224_v43 = vld [vmem:[%s26609_s26 + $0x58] sm:$0xff]  ;;  %v1971_v44 = vld [vmem:[%s26609_s26 + $0x10] sm:$0xff] }
 0x1da   : >> { %22368 = vmatprep.mubr.msk.f32.mxu1 %vm243_vm0, %v1970_v42  ;;  %22760 = vmatprep.mubr.msk.f32.mxu0 %vm243_vm0, %v19224_v43  ;;  %v19225_v45 = vld [vmem:[%s26609_s26 + $0x60] sm:$0xff]  ;;  %v1972_v46 = vld [vmem:[%s26609_s26 + $0x18] sm:$0xff]  ;;  %v19226_v47 = vld [vmem:[%s26609_s26 + $0x68] sm:$0xff] }
 0x1db   : >> { %22369 = vmatmul.mubr.msk.f32.vlgmr.msra.gmra.mrb[0].mxu1 %vm243_vm0, %v1971_v44  ;;  %22761 = vmatmul.mubr.msk.f32.vlgmr.msra.gmra.mrb[0].mxu0 %vm243_vm0, %v19225_v45  ;;  %v1973_v50 = vld [vmem:[%s26609_s26 + $0x20] sm:$0xff]  ;;  %v19227_v51 = vld [vmem:[%s26609_s26 + $0x70] sm:$0xff]  ;;  %v1974_v52 = vld [vmem:[%s26609_s26 + $0x28] sm:$0xff] }
 0x1dc   : >> { %22465 = vmatpush3.msra.mxu1 %v1969_v40  ;;  %22857 = vmatpush3.msra.mxu0 %v19417_v41  ;;  %v19228_v4 = vld [vmem:[%s26609_s26 + $0x78] sm:$0xff]  ;;  %v1975_v53 = vld [vmem:[%s26609_s26 + $0x30] sm:$0xff]  ;;  %v19229_v3 = vld [vmem:[%s26609_s26 + $0x80] sm:$0xff] }
 0x1dd   : >> { %22371 = vmatprep.mubr.msk.f32.mxu1 %vm243_vm0, %v1972_v46  ;;  %22763 = vmatprep.mubr.msk.f32.mxu0 %vm243_vm0, %v19226_v47  ;;  %v1976_v54 = vld [vmem:[%s26609_s26 + $0x38] sm:$0xff]  ;;  %v19230_v55 = vld [vmem:[%s26609_s26 + $0x88] sm:$0xff]  ;;  %v1977_v56 = vld [vmem:[%s26609_s26 + $0x40] sm:$0xff] }
 0x1de   : >> { %22954 = vmatprep.subr.mxu0 %v26624_v48  ;;  %22562 = vmatprep.subr.mxu1 %v26629_v49  ;;  %v19231_v57 = vld [vmem:[%s26609_s26 + $0x90] sm:$0xff]  ;;  %v19232_v58 = vld [vmem:[%s26609_s26 + $0xa8] sm:$0xff]  ;;  %v19234_v60 = vld [vmem:[%s26609_s26 + $0xb8] sm:$0xff] }
 0x1df   : >> { %22372 = vmatmul.mubr.msk.f32.gmra.mrb[2].mxu1 %vm243_vm0, %v1973_v50  ;;  %22764 = vmatmul.mubr.msk.f32.gmra.mrb[2].mxu0 %vm243_vm0, %v19227_v51  ;;  %v19233_v59 = vld [vmem:[%s26609_s26 + $0xb0] sm:$0xff]  ;;  %v19235_v61 = vld [vmem:[%s26609_s26 + $0xc0] sm:$0xff]  ;;  %v19236_v62 = vld [vmem:[%s26609_s26 + $0xc8] sm:$0xff] }
 0x1e0   : >> { %22374 = vmatprep.mubr.msk.f32.mxu1 %vm243_vm0, %v1974_v52  ;;  %22766 = vmatprep.mubr.msk.f32.mxu0 %vm243_vm0, %v19228_v4  ;;  %v19237_v63 = vld [vmem:[%s26609_s26 + $0xd0] sm:$0xff]  ;;  %v19238_v5 = vld [vmem:[%s26609_s26 + $0xd8] sm:$0xff]  ;;  %v19239_v0 = vld [vmem:[%s26609_s26 + $0xe0] sm:$0xff] }
 0x1e1   : >> { %v19240_v2 = vld [vmem:[%s26609_s26 + $0xf8] sm:$0xff]  ;;  %v19241_v6 = vld [vmem:[%s26609_s26 + $0x100] sm:$0xff]  ;;  %v19242_v7 = vld [vmem:[%s26609_s26 + $0x108] sm:$0xff] }
 0x1e2   : >> { %v19243_v8 = vld [vmem:[%s26609_s26 + $0x110] sm:$0xff]  ;;  %v19244_v9 = vld [vmem:[%s26609_s26 + $0x118] sm:$0xff]  ;;  %v19245_v10 = vld [vmem:[%s26609_s26 + $0x120] sm:$0xff] }
 0x1e3   : >> { %22375 = vmatmul.mubr.msk.f32.gmra.mrb[4].mxu1 %vm243_vm0, %v1975_v53  ;;  %22767 = vmatmul.mubr.msk.f32.gmra.mrb[4].mxu0 %vm243_vm0, %v19229_v3  ;;  %v19246_v11 = vld [vmem:[%s26609_s26 + $0x128] sm:$0xff]  ;;  %v19247_v12 = vld [vmem:[%s26609_s26 + $0x130] sm:$0xff]  ;;  %v19250_v15 = vld [vmem:[%s26609_s26 + $0x158] sm:$0xff] }
 0x1e4   : >> { %22377 = vmatprep.mubr.msk.f32.mxu1 %vm243_vm0, %v1976_v54  ;;  %22769 = vmatprep.mubr.msk.f32.mxu0 %vm243_vm0, %v19230_v55  ;;  %v19248_v13 = vld [vmem:[%s26609_s26 + $0x148] sm:$0xff]  ;;  %v19249_v14 = vld [vmem:[%s26609_s26 + $0x150] sm:$0xff]  ;;  %v19251_v16 = vld [vmem:[%s26609_s26 + $0x160] sm:$0xff] }
 0x1e5   : >> { %v19252_v17 = vld [vmem:[%s26609_s26 + $0x168] sm:$0xff]  ;;  %v19253_v19 = vld [vmem:[%s26609_s26 + $0x170] sm:$0xff]  ;;  %v19254_v20 = vld [vmem:[%s26609_s26 + $0x178] sm:$0xff] }
 0x1e6   : >> { %v19255_v21 = vld [vmem:[%s26609_s26 + $0x180] sm:$0xff]  ;;  %v26737_v24 = vld [vmem:[%s26609_s26 + $0x69] sm:$0xff]  ;;  %v26750_v26 = vld [vmem:[%s26609_s26 + $0x71] sm:$0xff] }
 0x1e7   : >> { %22378 = vmatmul.mubr.msk.f32.gmra.mrb[6].mxu1 %vm243_vm0, %v1977_v56  ;;  %22770 = vmatmul.mubr.msk.f32.gmra.mrb[6].mxu0 %vm243_vm0, %v19231_v57  ;;  %v26726_v22 = vld [vmem:[%s26609_s26 + $0x59] sm:$0xff]  ;;  %v26734_v23 = vld [vmem:[%s26609_s26 + $0x61] sm:$0xff]  ;;  %v26768_v29 = vld [vmem:[%s26609_s26 + $0x89] sm:$0xff] }
 0x1e8   : >> { %22380 = vmatprep.mubr.msk.f32.mxu1 %vm243_vm0, %v19224_v43  ;;  %22772 = vmatprep.mubr.msk.f32.mxu0 %vm243_vm0, %v19232_v58  ;;  %v26755_v27 = vld [vmem:[%s26609_s26 + $0x79] sm:$0xff]  ;;  %v26765_v28 = vld [vmem:[%s26609_s26 + $0x81] sm:$0xff]  ;;  %v26777_v30 = vld [vmem:[%s26609_s26 + $0x91] sm:$0xff] }
 0x1e9   : >> { %v2010_v31 = vld [vmem:[%s26609_s26 + $0x198] sm:$0xff]  ;;  %v26781_v32 = vld [vmem:[%s26609_s26 + $0xa9] sm:$0xff]  ;;  %v2011_v33 = vld [vmem:[%s26609_s26 + $0x1a0] sm:$0xff] }
 0x1ea   : >> { %v26791_v34 = vld [vmem:[%s26609_s26 + $0xb1] sm:$0xff]  ;;  %v2012_v36 = vld [vmem:[%s26609_s26 + $0x1a8] sm:$0xff]  ;;  %v26795_v37 = vld [vmem:[%s26609_s26 + $0xb9] sm:$0xff] }
 0x1eb   : >> { %22381 = vmatmul.mubr.msk.f32.gmra.mrb[8].mxu1 %vm243_vm0, %v19225_v45  ;;  %22773 = vmatmul.mubr.msk.f32.gmra.mrb[8].mxu0 %vm243_vm0, %v19233_v59  ;;  %v2013_v38 = vld [vmem:[%s26609_s26 + $0x1b0] sm:$0xff]  ;;  %v26805_v40 = vld [vmem:[%s26609_s26 + $0xc1] sm:$0xff]  ;;  %v2014_v41 = vld [vmem:[%s26609_s26 + $0x1b8] sm:$0xff] }
 0x1ec   : >> { %22383 = vmatprep.mubr.msk.f32.mxu1 %vm243_vm0, %v19226_v47  ;;  %22775 = vmatprep.mubr.msk.f32.mxu0 %vm243_vm0, %v19234_v60  ;;  %v26809_v42 = vld [vmem:[%s26609_s26 + $0xc9] sm:$0xff]  ;;  %v2015_v43 = vld [vmem:[%s26609_s26 + $0x1c0] sm:$0xff]  ;;  %v26819_v44 = vld [vmem:[%s26609_s26 + $0xd1] sm:$0xff] }
 0x1ed   : >> { %v2016_v45 = vld [vmem:[%s26609_s26 + $0x1c8] sm:$0xff]  ;;  %v26823_v46 = vld [vmem:[%s26609_s26 + $0xd9] sm:$0xff]  ;;  %v2017_v47 = vld [vmem:[%s26609_s26 + $0x1d0] sm:$0xff] }
 0x1ee   : >> { %v2018_v50 = vld [vmem:[%s26609_s26 + $0x1e8] sm:$0xff]  ;;  %v2019_v52 = vld [vmem:[%s26609_s26 + $0x1f0] sm:$0xff]  ;;  %v2020_v53 = vld [vmem:[%s26609_s26 + $0x1f8] sm:$0xff] }
 0x1ef   : >> { %22384 = vmatmul.mubr.msk.f32.gmra.mrb[10].mxu1 %vm243_vm0, %v19227_v51  ;;  %22776 = vmatmul.mubr.msk.f32.gmra.mrb[10].mxu0 %vm243_vm0, %v19235_v61  ;;  %v26837_v51 = vld [vmem:[%s26609_s26 + $0xf9] sm:$0xff]  ;;  %v2022_v56 = vld [vmem:[%s26609_s26 + $0x208] sm:$0xff] }
 0x1f0   : >> { %22386 = vmatprep.mubr.msk.f32.mxu1 %vm243_vm0, %v19228_v4  ;;  %22778 = vmatprep.mubr.msk.f32.mxu0 %vm243_vm0, %v19236_v62  ;;  %v26847_v4 = vld [vmem:[%s26609_s26 + $0x101] sm:$0xff]  ;;  %v27104_v35 = vld [vmem:[%s26609_s26 + $0xaf] sm:$0xff]  ;;  %v27110_v1 = vld [vmem:[%s26609_s26 + $0xb7] sm:$0xff] }
 0x1f1   : >> { %v2021_v54 = vld [vmem:[%s26609_s26 + $0x200] sm:$0xff]  ;;  %32637 = vst [vmem:[#allocation33_spill] sm:$0xff] %v27104_v35  ;;  %32639 = vst [vmem:[#allocation35_spill] sm:$0xff] %v27110_v1 }
 0x1f2   : >> { %v27107_v18 = vld [vmem:[%s26609_s26 + $0x241] sm:$0xff] }
 0x1f3   : >> { %22387 = vmatmul.mubr.msk.f32.gmra.mrb[12].mxu1 %vm243_vm0, %v19229_v3  ;;  %22779 = vmatmul.mubr.msk.f32.gmra.mrb[12].mxu0 %vm243_vm0, %v19237_v63  ;;  %v26851_v3 = vld [vmem:[%s26609_s26 + $0x109] sm:$0xff]  ;;  %32638 = vst [vmem:[#allocation34_spill] sm:$0xff] %v27107_v18 }
 0x1f4   : >> { %22389 = vmatprep.mubr.msk.f32.mxu1 %vm243_vm0, %v19230_v55  ;;  %22781 = vmatprep.mubr.msk.f32.mxu0 %vm243_vm0, %v19238_v5  ;;  %v26861_v55 = vld [vmem:[%s26609_s26 + $0x111] sm:$0xff] }
 0x1f7   : >> { %22390 = vmatmul.mubr.msk.f32.gmra.mrb[14].mxu1 %vm243_vm0, %v19231_v57  ;;  %22782 = vmatmul.mubr.msk.f32.gmra.mrb[14].mxu0 %vm243_vm0, %v19239_v0  ;;  %v26865_v57 = vld [vmem:[%s26609_s26 + $0x119] sm:$0xff] }
 0x1f8   : >> { %22392 = vmatprep.mubr.msk.f32.mxu1 %vm243_vm0, %v19232_v58  ;;  %22784 = vmatprep.mubr.msk.f32.mxu0 %vm243_vm0, %v19240_v2  ;;  %v2023_v58 = vld [vmem:[%s26609_s26 + $0x210] sm:$0xff] }
 0x1fb   : >> { %22393 = vmatmul.mubr.msk.f32.gmra.mrb[16].mxu1 %vm243_vm0, %v19233_v59  ;;  %22785 = vmatmul.mubr.msk.f32.gmra.mrb[16].mxu0 %vm243_vm0, %v19241_v6  ;;  %v26875_v59 = vld [vmem:[%s26609_s26 + $0x121] sm:$0xff] }
 0x1fc   : >> { %22395 = vmatprep.mubr.msk.f32.mxu1 %vm243_vm0, %v19234_v60  ;;  %22787 = vmatprep.mubr.msk.f32.mxu0 %vm243_vm0, %v19242_v7  ;;  %v2024_v60 = vld [vmem:[%s26609_s26 + $0x218] sm:$0xff] }
 0x1ff   : >> { %22396 = vmatmul.mubr.msk.f32.gmra.mrb[18].mxu1 %vm243_vm0, %v19235_v61  ;;  %22788 = vmatmul.mubr.msk.f32.gmra.mrb[18].mxu0 %vm243_vm0, %v19243_v8  ;;  %v26879_v61 = vld [vmem:[%s26609_s26 + $0x129] sm:$0xff] }
 0x200   : >> { %22398 = vmatprep.mubr.msk.f32.mxu1 %vm243_vm0, %v19236_v62  ;;  %22790 = vmatprep.mubr.msk.f32.mxu0 %vm243_vm0, %v19244_v9  ;;  %v2025_v62 = vld [vmem:[%s26609_s26 + $0x220] sm:$0xff] }
 0x203   : >> { %22399 = vmatmul.mubr.msk.f32.gmra.mrb[20].mxu1 %vm243_vm0, %v19237_v63  ;;  %22791 = vmatmul.mubr.msk.f32.gmra.mrb[20].mxu0 %vm243_vm0, %v19245_v10  ;;  %v26889_v63 = vld [vmem:[%s26609_s26 + $0x131] sm:$0xff] }
 0x204   : >> { %22401 = vmatprep.mubr.msk.f32.mxu1 %vm243_vm0, %v19238_v5  ;;  %22793 = vmatprep.mubr.msk.f32.mxu0 %vm243_vm0, %v19246_v11  ;;  %v2026_v5 = vld [vmem:[%s26609_s26 + $0x238] sm:$0xff] }
 0x207   : >> { %22402 = vmatmul.mubr.msk.f32.gmra.mrb[22].mxu1 %vm243_vm0, %v19239_v0  ;;  %22794 = vmatmul.mubr.msk.f32.gmra.mrb[22].mxu0 %vm243_vm0, %v19247_v12  ;;  %v26893_v0 = vld [vmem:[%s26609_s26 + $0x149] sm:$0xff] }
 0x208   : >> { %22404 = vmatprep.mubr.msk.f32.mxu1 %vm243_vm0, %v19240_v2  ;;  %22796 = vmatprep.mubr.msk.f32.mxu0 %vm243_vm0, %v19248_v13  ;;  %v2027_v2 = vld [vmem:[%s26609_s26 + $0x240] sm:$0xff] }
 0x20b   : >> { %22405 = vmatmul.mubr.msk.f32.gmra.mrb[24].mxu1 %vm243_vm0, %v19241_v6  ;;  %22797 = vmatmul.mubr.msk.f32.gmra.mrb[24].mxu0 %vm243_vm0, %v19249_v14  ;;  %v26903_v6 = vld [vmem:[%s26609_s26 + $0x151] sm:$0xff] }
 0x20c   : >> { %22407 = vmatprep.mubr.msk.f32.mxu1 %vm243_vm0, %v19242_v7  ;;  %22799 = vmatprep.mubr.msk.f32.mxu0 %vm243_vm0, %v19250_v15  ;;  %v2028_v7 = vld [vmem:[%s26609_s26 + $0x248] sm:$0xff] }
 0x20f   : >> { %22408 = vmatmul.mubr.msk.f32.gmra.mrb[26].mxu1 %vm243_vm0, %v19243_v8  ;;  %22800 = vmatmul.mubr.msk.f32.gmra.mrb[26].mxu0 %vm243_vm0, %v19251_v16  ;;  %v26907_v8 = vld [vmem:[%s26609_s26 + $0x159] sm:$0xff] }
 0x210   : >> { %22410 = vmatprep.mubr.msk.f32.mxu1 %vm243_vm0, %v19244_v9  ;;  %22802 = vmatprep.mubr.msk.f32.mxu0 %vm243_vm0, %v19252_v17  ;;  %v2029_v9 = vld [vmem:[%s26609_s26 + $0x250] sm:$0xff] }
 0x213   : >> { %22411 = vmatmul.mubr.msk.f32.gmra.mrb[28].mxu1 %vm243_vm0, %v19245_v10  ;;  %22803 = vmatmul.mubr.msk.f32.gmra.mrb[28].mxu0 %vm243_vm0, %v19253_v19  ;;  %v26917_v10 = vld [vmem:[%s26609_s26 + $0x161] sm:$0xff] }
 0x214   : >> { %22413 = vmatprep.mubr.msk.f32.mxu1 %vm243_vm0, %v19246_v11  ;;  %22805 = vmatprep.mubr.msk.f32.mxu0 %vm243_vm0, %v19254_v20  ;;  %v2030_v11 = vld [vmem:[%s26609_s26 + $0x258] sm:$0xff] }
 0x217   : >> { %22414 = vmatmul.mubr.msk.f32.gmra.mrb[30].mxu1 %vm243_vm0, %v19247_v12  ;;  %22806 = vmatmul.mubr.msk.f32.gmra.mrb[30].mxu0 %vm243_vm0, %v19255_v21  ;;  %v26921_v12 = vld [vmem:[%s26609_s26 + $0x169] sm:$0xff] }
 0x218   : >> { %22416 = vmatprep.mubr.msk.f32.mxu1 %vm243_vm0, %v19248_v13  ;;  %22858 = vmatprep.mubr.msk.f32.mxu0 %vm243_vm0, %v26726_v22  ;;  %v2031_v13 = vld [vmem:[%s26609_s26 + $0x260] sm:$0xff] }
 0x21b   : >> { %22417 = vmatmul.mubr.msk.f32.gmra.mrb[32].mxu1 %vm243_vm0, %v19249_v14  ;;  %22859 = vmatmul.mubr.msk.f32.vlgmr.msra.gmra.mrb[0].mxu0 %vm243_vm0, %v26734_v23  ;;  %v26931_v14 = vld [vmem:[%s26609_s26 + $0x171] sm:$0xff] }
 0x21c   : >> { %22955 = vmatpush3.msra.mxu0 %v26624_v48  ;;  %22419 = vmatprep.mubr.msk.f32.mxu1 %vm243_vm0, %v19250_v15  ;;  %v26833_v48 = vld [vmem:[%s26609_s26 + $0xe1] sm:$0xff] }
 0x21d   : >> { %22861 = vmatprep.mubr.msk.f32.mxu0 %vm243_vm0, %v26737_v24  ;;  %23052 = vmatprep.subr.mxu0 %v26742_v25  ;;  %v2032_v15 = vld [vmem:[%s26609_s26 + $0x268] sm:$0xff] }
 0x21f   : >> { %22420 = vmatmul.mubr.msk.f32.gmra.mrb[34].mxu1 %vm243_vm0, %v19251_v16  ;;  %22862 = vmatmul.mubr.msk.f32.gmra.mrb[2].mxu0 %vm243_vm0, %v26750_v26  ;;  %v26935_v16 = vld [vmem:[%s26609_s26 + $0x179] sm:$0xff] }
 0x220   : >> { %22422 = vmatprep.mubr.msk.f32.mxu1 %vm243_vm0, %v19252_v17  ;;  %22864 = vmatprep.mubr.msk.f32.mxu0 %vm243_vm0, %v26755_v27  ;;  %v2033_v17 = vld [vmem:[%s26609_s26 + $0x270] sm:$0xff] }
 0x223   : >> { %22423 = vmatmul.mubr.msk.f32.gmra.mrb[36].mxu1 %vm243_vm0, %v19253_v19  ;;  %22865 = vmatmul.mubr.msk.f32.gmra.mrb[4].mxu0 %vm243_vm0, %v26765_v28  ;;  %v26945_v19 = vld [vmem:[%s26609_s26 + $0x181] sm:$0xff] }
 0x224   : >> { %22425 = vmatprep.mubr.msk.f32.mxu1 %vm243_vm0, %v19254_v20  ;;  %22867 = vmatprep.mubr.msk.f32.mxu0 %vm243_vm0, %v26768_v29  ;;  %v1905_v20 = vld [vmem:[%s26609_s26 + $0x7] sm:$0xff] }
 0x227   : >> { %22426 = vmatmul.mubr.msk.f32.gmra.mrb[38].mxu1 %vm243_vm0, %v19255_v21  ;;  %22868 = vmatmul.mubr.msk.f32.gmra.mrb[6].mxu0 %vm243_vm0, %v26777_v30  ;;  %v26949_v21 = vld [vmem:[%s26609_s26 + $0x199] sm:$0xff] }
 0x228   : >> { %22428 = vmatprep.mubr.msk.f32.mxu1 %vm243_vm0, %v2010_v31  ;;  %22870 = vmatprep.mubr.msk.f32.mxu0 %vm243_vm0, %v26781_v32  ;;  %v1906_v31 = vld [vmem:[%s26609_s26 + $0xf] sm:$0xff] }
 0x22b   : >> { %22429 = vmatmul.mubr.msk.f32.gmra.mrb[40].mxu1 %vm243_vm0, %v2011_v33  ;;  %22871 = vmatmul.mubr.msk.f32.gmra.mrb[8].mxu0 %vm243_vm0, %v26791_v34  ;;  %v26959_v33 = vld [vmem:[%s26609_s26 + $0x1a1] sm:$0xff] }
 0x22c   : >> { %22431 = vmatprep.mubr.msk.f32.mxu1 %vm243_vm0, %v2012_v36  ;;  %22873 = vmatprep.mubr.msk.f32.mxu0 %vm243_vm0, %v26795_v37  ;;  %v1907_v36 = vld [vmem:[%s26609_s26 + $0x17] sm:$0xff] }
 0x22f   : >> { %22432 = vmatmul.mubr.msk.f32.gmra.mrb[42].mxu1 %vm243_vm0, %v2013_v38  ;;  %22874 = vmatmul.mubr.msk.f32.gmra.mrb[10].mxu0 %vm243_vm0, %v26805_v40  ;;  %v26963_v38 = vld [vmem:[%s26609_s26 + $0x1a9] sm:$0xff] }
 0x230   : >> { %22434 = vmatprep.mubr.msk.f32.mxu1 %vm243_vm0, %v2014_v41  ;;  %22876 = vmatprep.mubr.msk.f32.mxu0 %vm243_vm0, %v26809_v42  ;;  %v26968_v41 = vld [vmem:[%s32306_s1 + $0x18] sm:$0xff] }
 0x233   : >> { %22435 = vmatmul.mubr.msk.f32.gmra.mrb[44].mxu1 %vm243_vm0, %v2015_v43  ;;  %22877 = vmatmul.mubr.msk.f32.gmra.mrb[12].mxu0 %vm243_vm0, %v26819_v44  ;;  %v1908_v43 = vld [vmem:[%s26609_s26 + $0x1f] sm:$0xff] }
 0x234   : >> { %22437 = vmatprep.mubr.msk.f32.mxu1 %vm243_vm0, %v2016_v45  ;;  %22879 = vmatprep.mubr.msk.f32.mxu0 %vm243_vm0, %v26823_v46  ;;  %v26977_v45 = vld [vmem:[%s26609_s26 + $0x1b1] sm:$0xff] }
 0x237   : >> { %22438 = vmatmul.mubr.msk.f32.gmra.mrb[46].mxu1 %vm243_vm0, %v2017_v47  ;;  %22880 = vmatmul.mubr.msk.f32.gmra.mrb[14].mxu0 %vm243_vm0, %v26833_v48  ;;  %v1909_v47 = vld [vmem:[%s26609_s26 + $0x27] sm:$0xff] }
 0x238   : >> { %22440 = vmatprep.mubr.msk.f32.mxu1 %vm243_vm0, %v2018_v50  ;;  %22882 = vmatprep.mubr.msk.f32.mxu0 %vm243_vm0, %v26837_v51  ;;  %v26983_v50 = vld [vmem:[%s26609_s26 + $0x1b9] sm:$0xff] }
 0x23b   : >> { %22441 = vmatmul.mubr.msk.f32.gmra.mrb[48].mxu1 %vm243_vm0, %v2019_v52  ;;  %22883 = vmatmul.mubr.msk.f32.gmra.mrb[16].mxu0 %vm243_vm0, %v26847_v4  ;;  %v26994_v52 = vld [vmem:[%s26609_s26 + $0x1c1] sm:$0xff] }
 0x23c   : >> { %22443 = vmatprep.mubr.msk.f32.mxu1 %vm243_vm0, %v2020_v53  ;;  %22885 = vmatprep.mubr.msk.f32.mxu0 %vm243_vm0, %v26851_v3  ;;  %v1911_v53 = vld [vmem:[%s26609_s26 + $0x37] sm:$0xff] }
 0x23f   : >> { %22444 = vmatmul.mubr.msk.f32.gmra.mrb[50].mxu1 %vm243_vm0, %v2021_v54  ;;  %22886 = vmatmul.mubr.msk.f32.gmra.mrb[18].mxu0 %vm243_vm0, %v26861_v55  ;;  %v26998_v54 = vld [vmem:[%s26609_s26 + $0x1c9] sm:$0xff] }
 0x240   : >> { %22446 = vmatprep.mubr.msk.f32.mxu1 %vm243_vm0, %v2022_v56  ;;  %22888 = vmatprep.mubr.msk.f32.mxu0 %vm243_vm0, %v26865_v57  ;;  %v1912_v56 = vld [vmem:[%s26609_s26 + $0x3f] sm:$0xff] }
 0x243   : >> { %22447 = vmatmul.mubr.msk.f32.gmra.mrb[52].mxu1 %vm243_vm0, %v2023_v58  ;;  %22889 = vmatmul.mubr.msk.f32.gmra.mrb[20].mxu0 %vm243_vm0, %v26875_v59  ;;  %v27008_v58 = vld [vmem:[%s26609_s26 + $0x1d1] sm:$0xff] }
 0x244   : >> { %22449 = vmatprep.mubr.msk.f32.mxu1 %vm243_vm0, %v2024_v60  ;;  %22891 = vmatprep.mubr.msk.f32.mxu0 %vm243_vm0, %v26879_v61  ;;  %v27011_v60 = vld [vmem:[%s26609_s26 + $0x57] sm:$0xff] }
 0x245   : >> { %32619 = vst [vmem:[#allocation15_spill] sm:$0xff] %v27011_v60 }
 0x247   : >> { %22450 = vmatmul.mubr.msk.f32.gmra.mrb[54].mxu1 %vm243_vm0, %v2025_v62  ;;  %22892 = vmatmul.mubr.msk.f32.gmra.mrb[22].mxu0 %vm243_vm0, %v26889_v63  ;;  %v27014_v62 = vld [vmem:[%s26609_s26 + $0x1e9] sm:$0xff] }
 0x248   : >> { %22452 = vmatprep.mubr.msk.f32.mxu1 %vm243_vm0, %v2026_v5  ;;  %22894 = vmatprep.mubr.msk.f32.mxu0 %vm243_vm0, %v26893_v0  ;;  %32620 = vst [vmem:[#allocation16_spill] sm:$0xff] %v27014_v62  ;;  %v27024_v5 = vld [vmem:[%s26609_s26 + $0x5f] sm:$0xff] }
 0x249   : >> { %32621 = vst [vmem:[#allocation17_spill] sm:$0xff] %v27024_v5 }
 0x24b   : >> { %22453 = vmatmul.mubr.msk.f32.gmra.mrb[56].mxu1 %vm243_vm0, %v2027_v2  ;;  %22895 = vmatmul.mubr.msk.f32.gmra.mrb[24].mxu0 %vm243_vm0, %v26903_v6  ;;  %v27027_v2 = vld [vmem:[%s26609_s26 + $0x1f1] sm:$0xff] }
 0x24c   : >> { %22455 = vmatprep.mubr.msk.f32.mxu1 %vm243_vm0, %v2028_v7  ;;  %22897 = vmatprep.mubr.msk.f32.mxu0 %vm243_vm0, %v26907_v8  ;;  %32622 = vst [vmem:[#allocation18_spill] sm:$0xff] %v27027_v2  ;;  %v27030_v7 = vld [vmem:[%s26609_s26 + $0x67] sm:$0xff] }
 0x24d   : >> { %32623 = vst [vmem:[#allocation19_spill] sm:$0xff] %v27030_v7 }
 0x24f   : >> { %22456 = vmatmul.mubr.msk.f32.gmra.mrb[58].mxu1 %vm243_vm0, %v2029_v9  ;;  %22898 = vmatmul.mubr.msk.f32.gmra.mrb[26].mxu0 %vm243_vm0, %v26917_v10  ;;  %v27033_v9 = vld [vmem:[%s26609_s26 + $0x1f9] sm:$0xff] }
 0x250   : >> { %22458 = vmatprep.mubr.msk.f32.mxu1 %vm243_vm0, %v2030_v11  ;;  %22900 = vmatprep.mubr.msk.f32.mxu0 %vm243_vm0, %v26921_v12  ;;  %32624 = vst [vmem:[#allocation20_spill] sm:$0xff] %v27033_v9  ;;  %v27044_v11 = vld [vmem:[%s26609_s26 + $0x6f] sm:$0xff] }
 0x251   : >> { %32625 = vst [vmem:[#allocation21_spill] sm:$0xff] %v27044_v11 }
 0x253   : >> { %22459 = vmatmul.mubr.msk.f32.gmra.mrb[60].mxu1 %vm243_vm0, %v2031_v13  ;;  %22901 = vmatmul.mubr.msk.f32.gmra.mrb[28].mxu0 %vm243_vm0, %v26931_v14  ;;  %v27047_v13 = vld [vmem:[%s26609_s26 + $0x201] sm:$0xff] }
 0x254   : >> { %22461 = vmatprep.mubr.msk.f32.mxu1 %vm243_vm0, %v2032_v15  ;;  %22903 = vmatprep.mubr.msk.f32.mxu0 %vm243_vm0, %v26935_v16  ;;  %32626 = vst [vmem:[#allocation22_spill] sm:$0xff] %v27047_v13  ;;  %v27050_v15 = vld [vmem:[%s26609_s26 + $0x77] sm:$0xff] }
 0x255   : >> { %32627 = vst [vmem:[#allocation23_spill] sm:$0xff] %v27050_v15 }
 0x257   : >> { %22462 = vmatmul.mubr.msk.f32.gmra.mrb[62].mxu1 %vm243_vm0, %v2033_v17  ;;  %22904 = vmatmul.mubr.msk.f32.gmra.mrb[30].mxu0 %vm243_vm0, %v26945_v19  ;;  %v27053_v17 = vld [vmem:[%s26609_s26 + $0x209] sm:$0xff] }
 0x258   : >> { %22466 = vmatprep.mubr.msk.f32.mxu1 %vm243_vm0, %v1905_v20  ;;  %22906 = vmatprep.mubr.msk.f32.mxu0 %vm243_vm0, %v26949_v21  ;;  %32628 = vst [vmem:[#allocation24_spill] sm:$0xff] %v27053_v17  ;;  %v27064_v20 = vld [vmem:[%s26609_s26 + $0x7f] sm:$0xff] }
 0x259   : >> { %32629 = vst [vmem:[#allocation25_spill] sm:$0xff] %v27064_v20 }
 0x25b   : >> { %22467 = vmatmul.mubr.msk.f32.vlgmr.msra.gmra.mrb[0].mxu1 %vm243_vm0, %v1906_v31  ;;  %22907 = vmatmul.mubr.msk.f32.gmra.mrb[32].mxu0 %vm243_vm0, %v26959_v33  ;;  %v27067_v31 = vld [vmem:[%s26609_s26 + $0x211] sm:$0xff] }
 0x25c   : >> { %22563 = vmatpush3.msra.mxu1 %v26629_v49  ;;  %22469 = vmatprep.mubr.msk.f32.mxu1 %vm243_vm0, %v1907_v36  ;;  %v1910_v49 = vld [vmem:[%s26609_s26 + $0x2f] sm:$0xff]  ;;  %32630 = vst [vmem:[#allocation26_spill] sm:$0xff] %v27067_v31  ;;  %v27070_v36 = vld [vmem:[%s26609_s26 + $0x87] sm:$0xff] }
 0x25d   : >> { %22909 = vmatprep.mubr.msk.f32.mxu0 %vm243_vm0, %v26963_v38  ;;  %22660 = vmatprep.subr.mxu1 %v26968_v41  ;;  %32631 = vst [vmem:[#allocation27_spill] sm:$0xff] %v27070_v36 }
 0x25f   : >> { %22470 = vmatmul.mubr.msk.f32.gmra.mrb[2].mxu1 %vm243_vm0, %v1908_v43  ;;  %22910 = vmatmul.mubr.msk.f32.gmra.mrb[34].mxu0 %vm243_vm0, %v26977_v45  ;;  %v27073_v43 = vld [vmem:[%s26609_s26 + $0x219] sm:$0xff] }
 0x260   : >> { %22472 = vmatprep.mubr.msk.f32.mxu1 %vm243_vm0, %v1909_v47  ;;  %22912 = vmatprep.mubr.msk.f32.mxu0 %vm243_vm0, %v26983_v50  ;;  %32632 = vst [vmem:[#allocation28_spill] sm:$0xff] %v27073_v43  ;;  %v27084_v47 = vld [vmem:[%s26609_s26 + $0x8f] sm:$0xff] }
 0x261   : >> { %32633 = vst [vmem:[#allocation29_spill] sm:$0xff] %v27084_v47 }
 0x263   : >> { %22473 = vmatmul.mubr.msk.f32.gmra.mrb[4].mxu1 %vm243_vm0, %v1910_v49  ;;  %22913 = vmatmul.mubr.msk.f32.gmra.mrb[36].mxu0 %vm243_vm0, %v26994_v52  ;;  %v27087_v49 = vld [vmem:[%s26609_s26 + $0x221] sm:$0xff] }
 0x264   : >> { %22475 = vmatprep.mubr.msk.f32.mxu1 %vm243_vm0, %v1911_v53  ;;  %22915 = vmatprep.mubr.msk.f32.mxu0 %vm243_vm0, %v26998_v54  ;;  %32634 = vst [vmem:[#allocation30_spill] sm:$0xff] %v27087_v49  ;;  %v27090_v53 = vld [vmem:[%s26609_s26 + $0xa7] sm:$0xff] }
 0x265   : >> { %32635 = vst [vmem:[#allocation31_spill] sm:$0xff] %v27090_v53 }
 0x267   : >> { %22476 = vmatmul.mubr.msk.f32.gmra.mrb[6].mxu1 %vm243_vm0, %v1912_v56  ;;  %22916 = vmatmul.mubr.msk.f32.gmra.mrb[38].mxu0 %vm243_vm0, %v27008_v58  ;;  %v27093_v56 = vld [vmem:[%s26609_s26 + $0x239] sm:$0xff] }
 0x268   : >> { %22478 = vmatprep.mubr.msk.f32.mxu1 %vm243_vm0, %v27011_v60  ;;  %22918 = vmatprep.mubr.msk.f32.mxu0 %vm243_vm0, %v27014_v62  ;;  %32636 = vst [vmem:[#allocation32_spill] sm:$0xff] %v27093_v56  ;;  %v27150_v60 = vld [vmem:[%s26609_s26 + $0xd7] sm:$0xff]  ;;  %v27245_v62 = vld [vmem:[%s32306_s1 + $0x40] sm:$0xff] }
 0x269   : >> { %32647 = vst [vmem:[#allocation43_spill] sm:$0xff] %v27150_v60 }
 0x26b   : >> { %22479 = vmatmul.mubr.msk.f32.gmra.mrb[8].mxu1 %vm243_vm0, %v27024_v5  ;;  %22919 = vmatmul.mubr.msk.f32.gmra.mrb[40].mxu0 %vm243_vm0, %v27027_v2  ;;  %v27147_v5 = vld [vmem:[%s26609_s26 + $0x261] sm:$0xff] }
 0x26c   : >> { %22481 = vmatprep.mubr.msk.f32.mxu1 %vm243_vm0, %v27030_v7  ;;  %22921 = vmatprep.mubr.msk.f32.mxu0 %vm243_vm0, %v27033_v9  ;;  %v27144_v7 = vld [vmem:[%s26609_s26 + $0xcf] sm:$0xff]  ;;  %32646 = vst [vmem:[#allocation42_spill] sm:$0xff] %v27147_v5  ;;  %v19415_v9 = vld [vmem:[%s26609_s26 + $0x2b9] sm:$0xff]  ;;  %v27227_v2 = vld [vmem:[%s26609_s26 + $0x147] sm:$0xff] }
 0x26d   : >> { %32645 = vst [vmem:[#allocation41_spill] sm:$0xff] %v27144_v7  ;;  %32659 = vst [vmem:[#allocation55_spill] sm:$0xff] %v27227_v2 }
 0x26f   : >> { %22482 = vmatmul.mubr.msk.f32.gmra.mrb[10].mxu1 %vm243_vm0, %v27044_v11  ;;  %22922 = vmatmul.mubr.msk.f32.gmra.mrb[42].mxu0 %vm243_vm0, %v27047_v13  ;;  %v27133_v11 = vld [vmem:[%s26609_s26 + $0x259] sm:$0xff]  ;;  %v27213_v13 = vld [vmem:[%s26609_s26 + $0x127] sm:$0xff] }
 0x270   : >> { %22484 = vmatprep.mubr.msk.f32.mxu1 %vm243_vm0, %v27050_v15  ;;  %22924 = vmatprep.mubr.msk.f32.mxu0 %vm243_vm0, %v27053_v17  ;;  %v27130_v15 = vld [vmem:[%s26609_s26 + $0xc7] sm:$0xff]  ;;  %32644 = vst [vmem:[#allocation40_spill] sm:$0xff] %v27133_v11  ;;  %32657 = vst [vmem:[#allocation53_spill] sm:$0xff] %v27213_v13 }
 0x271   : >> { %32643 = vst [vmem:[#allocation39_spill] sm:$0xff] %v27130_v15  ;;  %v19413_v17 = vld [vmem:[%s26609_s26 + $0x2a9] sm:$0xff] }
 0x273   : >> { %22485 = vmatmul.mubr.msk.f32.gmra.mrb[12].mxu1 %vm243_vm0, %v27064_v20  ;;  %22925 = vmatmul.mubr.msk.f32.gmra.mrb[44].mxu0 %vm243_vm0, %v27067_v31  ;;  %v27127_v20 = vld [vmem:[%s26609_s26 + $0x251] sm:$0xff] }
 0x274   : >> { %22487 = vmatprep.mubr.msk.f32.mxu1 %vm243_vm0, %v27070_v36  ;;  %22927 = vmatprep.mubr.msk.f32.mxu0 %vm243_vm0, %v27073_v43  ;;  %v27113_v36 = vld [vmem:[%s26609_s26 + $0x249] sm:$0xff]  ;;  %32642 = vst [vmem:[#allocation38_spill] sm:$0xff] %v27127_v20  ;;  %v19411_v43 = vld [vmem:[%s26609_s26 + $0x299] sm:$0xff] }
 0x275   : >> { %32640 = vst [vmem:[#allocation36_spill] sm:$0xff] %v27113_v36  ;;  %v27199_v31 = vld [vmem:[%s26609_s26 + $0x117] sm:$0xff] }
 0x276   : >> { %32655 = vst [vmem:[#allocation51_spill] sm:$0xff] %v27199_v31 }
 0x277   : >> { %22488 = vmatmul.mubr.msk.f32.gmra.mrb[14].mxu1 %vm243_vm0, %v27084_v47  ;;  %22928 = vmatmul.mubr.msk.f32.gmra.mrb[46].mxu0 %vm243_vm0, %v27087_v49  ;;  %v27124_v47 = vld [vmem:[%s26609_s26 + $0xbf] sm:$0xff]  ;;  %v27185_v49 = vld [vmem:[%s26609_s26 + $0x107] sm:$0xff] }
 0x278   : >> { %22490 = vmatprep.mubr.msk.f32.mxu1 %vm243_vm0, %v27090_v53  ;;  %22930 = vmatprep.mubr.msk.f32.mxu0 %vm243_vm0, %v27093_v56  ;;  %32641 = vst [vmem:[#allocation37_spill] sm:$0xff] %v27124_v47  ;;  %v19409_v56 = vld [vmem:[%s26609_s26 + $0x289] sm:$0xff]  ;;  %32653 = vst [vmem:[#allocation49_spill] sm:$0xff] %v27185_v49 }
 0x27b   : >> { %22491 = vmatmul.mubr.msk.f32.gmra.mrb[16].mxu1 %vm243_vm0, %v27104_v35  ;;  %22931 = vmatmul.mubr.msk.f32.gmra.mrb[48].mxu0 %vm243_vm0, %v27107_v18  ;;  %v27170_v18 = vld [vmem:[%s26609_s26 + $0xf7] sm:$0xff] }
 0x27c   : >> { %22493 = vmatprep.mubr.msk.f32.mxu1 %vm243_vm0, %v27110_v1  ;;  %22933 = vmatprep.mubr.msk.f32.mxu0 %vm243_vm0, %v27113_v36  ;;  %v27153_v36 = vld [vmem:[%s26609_s26 + $0x269] sm:$0xff]  ;;  %32651 = vst [vmem:[#allocation47_spill] sm:$0xff] %v27170_v18 }
 0x27d   : >> { %32648 = vst [vmem:[#allocation44_spill] sm:$0xff] %v27153_v36 }
 0x27f   : >> { %22494 = vmatmul.mubr.msk.f32.gmra.mrb[18].mxu1 %vm243_vm0, %v27124_v47  ;;  %22934 = vmatmul.mubr.msk.f32.gmra.mrb[50].mxu0 %vm243_vm0, %v27127_v20  ;;  %v27167_v20 = vld [vmem:[%s26609_s26 + $0x271] sm:$0xff] }
 0x280   : >> { %22496 = vmatprep.mubr.msk.f32.mxu1 %vm243_vm0, %v27130_v15  ;;  %22936 = vmatprep.mubr.msk.f32.mxu0 %vm243_vm0, %v27133_v11  ;;  %v27164_v11 = vld [vmem:[%s26609_s26 + $0xdf] sm:$0xff]  ;;  %32650 = vst [vmem:[#allocation46_spill] sm:$0xff] %v27167_v20 }
 0x281   : >> { %32649 = vst [vmem:[#allocation45_spill] sm:$0xff] %v27164_v11 }
 0x283   : >> { %22497 = vmatmul.mubr.msk.f32.gmra.mrb[20].mxu1 %vm243_vm0, %v27144_v7  ;;  %22937 = vmatmul.mubr.msk.f32.gmra.mrb[52].mxu0 %vm243_vm0, %v27147_v5  ;;  %v19410_v5 = vld [vmem:[%s26609_s26 + $0x291] sm:$0xff] }
 0x284   : >> { %22499 = vmatprep.mubr.msk.f32.mxu1 %vm243_vm0, %v27150_v60  ;;  %22939 = vmatprep.mubr.msk.f32.mxu0 %vm243_vm0, %v27153_v36  ;;  %v27181_v36 = vld [vmem:[%s26609_s26 + $0xff] sm:$0xff] }
 0x285   : >> { %32652 = vst [vmem:[#allocation48_spill] sm:$0xff] %v27181_v36 }
 0x287   : >> { %22500 = vmatmul.mubr.msk.f32.gmra.mrb[22].mxu1 %vm243_vm0, %v27164_v11  ;;  %22940 = vmatmul.mubr.msk.f32.gmra.mrb[54].mxu0 %vm243_vm0, %v27167_v20  ;;  %v19412_v20 = vld [vmem:[%s26609_s26 + $0x2a1] sm:$0xff] }
 0x288   : >> { %22502 = vmatprep.mubr.msk.f32.mxu1 %vm243_vm0, %v27170_v18  ;;  %22942 = vmatprep.mubr.msk.f32.mxu0 %vm243_vm0, %v19409_v56  ;;  %v27195_v56 = vld [vmem:[%s26609_s26 + $0x10f] sm:$0xff] }
 0x289   : >> { %32654 = vst [vmem:[#allocation50_spill] sm:$0xff] %v27195_v56 }
 0x28b   : >> { %22503 = vmatmul.mubr.msk.f32.gmra.mrb[24].mxu1 %vm243_vm0, %v27181_v36  ;;  %22943 = vmatmul.mubr.msk.f32.gmra.mrb[56].mxu0 %vm243_vm0, %v19410_v5  ;;  %v27209_v5 = vld [vmem:[%s26609_s26 + $0x11f] sm:$0xff] }
 0x28c   : >> { %22505 = vmatprep.mubr.msk.f32.mxu1 %vm243_vm0, %v27185_v49  ;;  %22945 = vmatprep.mubr.msk.f32.mxu0 %vm243_vm0, %v19411_v43  ;;  %32656 = vst [vmem:[#allocation52_spill] sm:$0xff] %v27209_v5  ;;  %v19414_v43 = vld [vmem:[%s26609_s26 + $0x2b1] sm:$0xff] }
 0x28f   : >> { %22506 = vmatmul.mubr.msk.f32.gmra.mrb[26].mxu1 %vm243_vm0, %v27195_v56  ;;  %22946 = vmatmul.mubr.msk.f32.gmra.mrb[58].mxu0 %vm243_vm0, %v19412_v20  ;;  %v19416_v20 = vld [vmem:[%s26609_s26 + $0x2c1] sm:$0xff] }
 0x290   : >> { %22508 = vmatprep.mubr.msk.f32.mxu1 %vm243_vm0, %v27199_v31  ;;  %22948 = vmatprep.mubr.msk.f32.mxu0 %vm243_vm0, %v19413_v17  ;;  %v27223_v17 = vld [vmem:[%s26609_s26 + $0x12f] sm:$0xff] }
 0x291   : >> { %32658 = vst [vmem:[#allocation54_spill] sm:$0xff] %v27223_v17 }
 0x293   : >> { %22509 = vmatmul.mubr.msk.f32.gmra.mrb[28].mxu1 %vm243_vm0, %v27209_v5  ;;  %22949 = vmatmul.mubr.msk.f32.gmra.mrb[60].mxu0 %vm243_vm0, %v19414_v43  ;;  %v27237_v43 = vld [vmem:[%s26609_s26 + $0x14f] sm:$0xff] }
 0x294   : >> { %22511 = vmatprep.mubr.msk.f32.mxu1 %vm243_vm0, %v27213_v13  ;;  %22951 = vmatprep.mubr.msk.f32.mxu0 %vm243_vm0, %v19415_v9  ;;  %32660 = vst [vmem:[#allocation56_spill] sm:$0xff] %v27237_v43  ;;  %v27240_v9 = vld [vmem:[%s26609_s26 + $0x157] sm:$0xff] }
 0x295   : >> { %32661 = vst [vmem:[#allocation57_spill] sm:$0xff] %v27240_v9 }
 0x297   : >> { %22512 = vmatmul.mubr.msk.f32.gmra.mrb[30].mxu1 %vm243_vm0, %v27223_v17  ;;  %22952 = vmatmul.mubr.msk.f32.gmra.mrb[62].mxu0 %vm243_vm0, %v19416_v20  ;;  %v27255_v20 = vld [vmem:[%s26609_s26 + $0x15f] sm:$0xff] }
 0x298   : >> { %22514 = vmatprep.mubr.msk.f32.mxu1 %vm243_vm0, %v27227_v2  ;;  %22956 = vmatprep.mubr.msk.f32.mxu0 %vm243_vm0, %v27090_v53  ;;  %32662 = vst [vmem:[#allocation58_spill] sm:$0xff] %v27255_v20  ;;  %v27260_v53 = vld [vmem:[%s26609_s26 + $0x167] sm:$0xff] }
 0x299   : >> { %32663 = vst [vmem:[#allocation59_spill] sm:$0xff] %v27260_v53 }
 0x29b   : >> { %22515 = vmatmul.mubr.msk.f32.gmra.mrb[32].mxu1 %vm243_vm0, %v27237_v43  ;;  %22957 = vmatmul.mubr.msk.f32.vlgmr.msra.gmra.mrb[0].mxu0 %vm243_vm0, %v27104_v35  ;;  %v3192_v35 = vld [vmem:[%s26609_s26 + $0x19] sm:$0xff] }
 0x29c   : >> { %23053 = vmatpush3.msra.mxu0 %v26742_v25  ;;  %22517 = vmatprep.mubr.msk.f32.mxu1 %vm243_vm0, %v27240_v9  ;;  %v27272_v25 = vld [vmem:[%s26609_s26 + $0x16f] sm:$0xff] }
 0x29d   : >> { %22959 = vmatprep.mubr.msk.f32.mxu0 %vm243_vm0, %v27110_v1  ;;  %23150 = vmatprep.subr.mxu0 %v27245_v62  ;;  %32664 = vst [vmem:[#allocation60_spill] sm:$0xff] %v27272_v25  ;;  %v27275_v1 = vld [vmem:[%s26609_s26 + $0x177] sm:$0xff] }
 0x29e   : >> { %32665 = vst [vmem:[#allocation61_spill] sm:$0xff] %v27275_v1 }
 0x29f   : >> { %22518 = vmatmul.mubr.msk.f32.gmra.mrb[34].mxu1 %vm243_vm0, %v27255_v20  ;;  %22960 = vmatmul.mubr.msk.f32.gmra.mrb[2].mxu0 %vm243_vm0, %v27124_v47  ;;  %v27286_v47 = vld [vmem:[%s26609_s26 + $0x17f] sm:$0xff] }
 0x2a0   : >> { %22520 = vmatprep.mubr.msk.f32.mxu1 %vm243_vm0, %v27260_v53  ;;  %22962 = vmatprep.mubr.msk.f32.mxu0 %vm243_vm0, %v27130_v15  ;;  %32666 = vst [vmem:[#allocation62_spill] sm:$0xff] %v27286_v47  ;;  %v27289_v15 = vld [vmem:[%s26609_s26 + $0x197] sm:$0xff] }
 0x2a1   : >> { %32667 = vst [vmem:[#allocation63_spill] sm:$0xff] %v27289_v15 }
 0x2a3   : >> { %22521 = vmatmul.mubr.msk.f32.gmra.mrb[36].mxu1 %vm243_vm0, %v27272_v25  ;;  %22963 = vmatmul.mubr.msk.f32.gmra.mrb[4].mxu0 %vm243_vm0, %v27144_v7  ;;  %v27300_v7 = vld [vmem:[%s26609_s26 + $0x19f] sm:$0xff] }
 0x2a4   : >> { %22523 = vmatprep.mubr.msk.f32.mxu1 %vm243_vm0, %v27275_v1  ;;  %22965 = vmatprep.mubr.msk.f32.mxu0 %vm243_vm0, %v27150_v60  ;;  %32668 = vst [vmem:[#allocation64_spill] sm:$0xff] %v27300_v7  ;;  %v27303_v60 = vld [vmem:[%s26609_s26 + $0x1a7] sm:$0xff] }
 0x2a5   : >> { %32669 = vst [vmem:[#allocation65_spill] sm:$0xff] %v27303_v60 }
 0x2a7   : >> { %22524 = vmatmul.mubr.msk.f32.gmra.mrb[38].mxu1 %vm243_vm0, %v27286_v47  ;;  %22966 = vmatmul.mubr.msk.f32.gmra.mrb[6].mxu0 %vm243_vm0, %v27164_v11  ;;  %v27314_v11 = vld [vmem:[%s26609_s26 + $0x1af] sm:$0xff] }
 0x2a8   : >> { %22526 = vmatprep.mubr.msk.f32.mxu1 %vm243_vm0, %v27289_v15  ;;  %22968 = vmatprep.mubr.msk.f32.mxu0 %vm243_vm0, %v27170_v18  ;;  %32670 = vst [vmem:[#allocation66_spill] sm:$0xff] %v27314_v11  ;;  %v27317_v18 = vld [vmem:[%s26609_s26 + $0x1b7] sm:$0xff] }
 0x2a9   : >> { %32671 = vst [vmem:[#allocation67_spill] sm:$0xff] %v27317_v18 }
 0x2ab   : >> { %22527 = vmatmul.mubr.msk.f32.gmra.mrb[40].mxu1 %vm243_vm0, %v27300_v7  ;;  %22969 = vmatmul.mubr.msk.f32.gmra.mrb[8].mxu0 %vm243_vm0, %v27181_v36  ;;  %v27328_v36 = vld [vmem:[%s26609_s26 + $0x1bf] sm:$0xff] }
 0x2ac   : >> { %22529 = vmatprep.mubr.msk.f32.mxu1 %vm243_vm0, %v27303_v60  ;;  %22971 = vmatprep.mubr.msk.f32.mxu0 %vm243_vm0, %v27185_v49  ;;  %32672 = vst [vmem:[#allocation68_spill] sm:$0xff] %v27328_v36  ;;  %v27331_v49 = vld [vmem:[%s26609_s26 + $0x1c7] sm:$0xff] }
 0x2af   : >> { %22530 = vmatmul.mubr.msk.f32.gmra.mrb[42].mxu1 %vm243_vm0, %v27314_v11  ;;  %22972 = vmatmul.mubr.msk.f32.gmra.mrb[10].mxu0 %vm243_vm0, %v27195_v56  ;;  %v27342_v56 = vld [vmem:[%s26609_s26 + $0x1cf] sm:$0xff] }
 0x2b0   : >> { %22532 = vmatprep.mubr.msk.f32.mxu1 %vm243_vm0, %v27317_v18  ;;  %22974 = vmatprep.mubr.msk.f32.mxu0 %vm243_vm0, %v27199_v31  ;;  %32673 = vst [vmem:[#allocation69_spill] sm:$0xff] %v27342_v56  ;;  %v27345_v31 = vld [vmem:[%s26609_s26 + $0x1e7] sm:$0xff] }
 0x2b3   : >> { %22533 = vmatmul.mubr.msk.f32.gmra.mrb[44].mxu1 %vm243_vm0, %v27328_v36  ;;  %22975 = vmatmul.mubr.msk.f32.gmra.mrb[12].mxu0 %vm243_vm0, %v27209_v5  ;;  %v27356_v5 = vld [vmem:[%s26609_s26 + $0x1ef] sm:$0xff] }
 0x2b4   : >> { %22535 = vmatprep.mubr.msk.f32.mxu1 %vm243_vm0, %v27331_v49  ;;  %22977 = vmatprep.mubr.msk.f32.mxu0 %vm243_vm0, %v27213_v13  ;;  %v27359_v13 = vld [vmem:[%s26609_s26 + $0x1f7] sm:$0xff] }
 0x2b7   : >> { %22536 = vmatmul.mubr.msk.f32.gmra.mrb[46].mxu1 %vm243_vm0, %v27342_v56  ;;  %22978 = vmatmul.mubr.msk.f32.gmra.mrb[14].mxu0 %vm243_vm0, %v27223_v17  ;;  %v27370_v17 = vld [vmem:[%s26609_s26 + $0x1ff] sm:$0xff] }
 0x2b8   : >> { %22538 = vmatprep.mubr.msk.f32.mxu1 %vm243_vm0, %v27345_v31  ;;  %22980 = vmatprep.mubr.msk.f32.mxu0 %vm243_vm0, %v27227_v2  ;;  %v27373_v2 = vld [vmem:[%s26609_s26 + $0x207] sm:$0xff] }
 0x2bb   : >> { %22539 = vmatmul.mubr.msk.f32.gmra.mrb[48].mxu1 %vm243_vm0, %v27356_v5  ;;  %22981 = vmatmul.mubr.msk.f32.gmra.mrb[16].mxu0 %vm243_vm0, %v27237_v43  ;;  %v27384_v43 = vld [vmem:[%s26609_s26 + $0x20f] sm:$0xff] }
 0x2bc   : >> { %22541 = vmatprep.mubr.msk.f32.mxu1 %vm243_vm0, %v27359_v13  ;;  %22983 = vmatprep.mubr.msk.f32.mxu0 %vm243_vm0, %v27240_v9  ;;  %v27387_v9 = vld [vmem:[%s26609_s26 + $0x217] sm:$0xff] }
 0x2bf   : >> { %22542 = vmatmul.mubr.msk.f32.gmra.mrb[50].mxu1 %vm243_vm0, %v27370_v17  ;;  %22984 = vmatmul.mubr.msk.f32.gmra.mrb[18].mxu0 %vm243_vm0, %v27255_v20  ;;  %v27398_v20 = vld [vmem:[%s26609_s26 + $0x21f] sm:$0xff] }
 0x2c0   : >> { %22544 = vmatprep.mubr.msk.f32.mxu1 %vm243_vm0, %v27373_v2  ;;  %22986 = vmatprep.mubr.msk.f32.mxu0 %vm243_vm0, %v27260_v53  ;;  %v27401_v53 = vld [vmem:[%s26609_s26 + $0x237] sm:$0xff] }
 0x2c3   : >> { %22545 = vmatmul.mubr.msk.f32.gmra.mrb[52].mxu1 %vm243_vm0, %v27384_v43  ;;  %22987 = vmatmul.mubr.msk.f32.gmra.mrb[20].mxu0 %vm243_vm0, %v27272_v25  ;;  %v27412_v25 = vld [vmem:[%s26609_s26 + $0x23f] sm:$0xff] }
 0x2c4   : >> { %22547 = vmatprep.mubr.msk.f32.mxu1 %vm243_vm0, %v27387_v9  ;;  %22989 = vmatprep.mubr.msk.f32.mxu0 %vm243_vm0, %v27275_v1  ;;  %v27415_v1 = vld [vmem:[%s26609_s26 + $0x247] sm:$0xff] }
 0x2c7   : >> { %22548 = vmatmul.mubr.msk.f32.gmra.mrb[54].mxu1 %vm243_vm0, %v27398_v20  ;;  %22990 = vmatmul.mubr.msk.f32.gmra.mrb[22].mxu0 %vm243_vm0, %v27286_v47  ;;  %v27426_v47 = vld [vmem:[%s26609_s26 + $0x24f] sm:$0xff] }
 0x2c8   : >> { %22550 = vmatprep.mubr.msk.f32.mxu1 %vm243_vm0, %v27401_v53  ;;  %22992 = vmatprep.mubr.msk.f32.mxu0 %vm243_vm0, %v27289_v15  ;;  %v27429_v15 = vld [vmem:[%s26609_s26 + $0x257] sm:$0xff] }
 0x2cb   : >> { %22551 = vmatmul.mubr.msk.f32.gmra.mrb[56].mxu1 %vm243_vm0, %v27412_v25  ;;  %22993 = vmatmul.mubr.msk.f32.gmra.mrb[24].mxu0 %vm243_vm0, %v27300_v7  ;;  %v27440_v7 = vld [vmem:[%s26609_s26 + $0x25f] sm:$0xff] }
 0x2cc   : >> { %22553 = vmatprep.mubr.msk.f32.mxu1 %vm243_vm0, %v27415_v1  ;;  %22995 = vmatprep.mubr.msk.f32.mxu0 %vm243_vm0, %v27303_v60  ;;  %v27443_v60 = vld [vmem:[%s26609_s26 + $0x267] sm:$0xff] }
 0x2cf   : >> { %22554 = vmatmul.mubr.msk.f32.gmra.mrb[58].mxu1 %vm243_vm0, %v27426_v47  ;;  %22996 = vmatmul.mubr.msk.f32.gmra.mrb[26].mxu0 %vm243_vm0, %v27314_v11  ;;  %v27454_v11 = vld [vmem:[%s26609_s26 + $0x26f] sm:$0xff] }
 0x2d0   : >> { %22556 = vmatprep.mubr.msk.f32.mxu1 %vm243_vm0, %v27429_v15  ;;  %22998 = vmatprep.mubr.msk.f32.mxu0 %vm243_vm0, %v27317_v18  ;;  %v3190_v18 = vld [vmem:[%s26609_s26 + $0x9] sm:$0xff] }
 0x2d3   : >> { %22557 = vmatmul.mubr.msk.f32.gmra.mrb[60].mxu1 %vm243_vm0, %v27440_v7  ;;  %22999 = vmatmul.mubr.msk.f32.gmra.mrb[28].mxu0 %vm243_vm0, %v27328_v36  ;;  %v3191_v36 = vld [vmem:[%s26609_s26 + $0x11] sm:$0xff] }
 0x2d4   : >> { %22559 = vmatprep.mubr.msk.f32.mxu1 %vm243_vm0, %v27443_v60  ;;  %23001 = vmatprep.mubr.msk.f32.mxu0 %vm243_vm0, %v27331_v49 }
 0x2d7   : >> { %22560 = vmatmul.mubr.msk.f32.gmra.mrb[62].mxu1 %vm243_vm0, %v27454_v11  ;;  %23002 = vmatmul.mubr.msk.f32.gmra.mrb[30].mxu0 %vm243_vm0, %v27342_v56  ;;  %v3193_v56 = vld [vmem:[%s26609_s26 + $0x21] sm:$0xff] }
 0x2d8   : >> { %22564 = vmatprep.mubr.msk.f32.mxu1 %vm243_vm0, %v3190_v18  ;;  %23004 = vmatprep.mubr.msk.f32.mxu0 %vm243_vm0, %v27345_v31  ;;  %v3194_v18 = vld [vmem:[%s26609_s26 + $0x29] sm:$0xff] }
 0x2db   : >> { %22565 = vmatmul.mubr.msk.f32.vlgmr.msra.gmra.mrb[0].mxu1 %vm243_vm0, %v3191_v36  ;;  %23005 = vmatmul.mubr.msk.f32.gmra.mrb[32].mxu0 %vm243_vm0, %v27356_v5  ;;  %v3196_v36 = vld [vmem:[%s26609_s26 + $0x39] sm:$0xff] }
 0x2dc   : >> { %22661 = vmatpush3.msra.mxu1 %v26968_v41  ;;  %22567 = vmatprep.mubr.msk.f32.mxu1 %vm243_vm0, %v3192_v35  ;;  %v3195_v41 = vld [vmem:[%s26609_s26 + $0x31] sm:$0xff]  ;;  %v3197_v35 = vld [vmem:[%s26609_s26 + $0x41] sm:$0xff] }
 0x2dd   : >> { %23007 = vmatprep.mubr.msk.f32.mxu0 %vm243_vm0, %v27359_v13  ;;  %24130 = vmatprep.subr.mxu1 %v26596_v39  ;;  %v27523_v39 = vld [vmem:[%s26609_s26 + $0x287] sm:$0xff] }
 0x2df   : >> { %22568 = vmatmul.mubr.msk.f32.gmra.mrb[2].mxu1 %vm243_vm0, %v3193_v56  ;;  %23008 = vmatmul.mubr.msk.f32.gmra.mrb[34].mxu0 %vm243_vm0, %v27370_v17  ;;  %v19634_v56 = vld [vmem:[%s26609_s26 + $0x170] sm:$0xff] }
 0x2e0   : >> { %22570 = vmatprep.mubr.msk.f32.mxu1 %vm243_vm0, %v3194_v18  ;;  %23010 = vmatprep.mubr.msk.f32.mxu0 %vm243_vm0, %v27373_v2  ;;  %v19635_v18 = vld [vmem:[%s26609_s26 + $0x178] sm:$0xff] }
 0x2e3   : >> { %22571 = vmatmul.mubr.msk.f32.gmra.mrb[4].mxu1 %vm243_vm0, %v3195_v41  ;;  %23011 = vmatmul.mubr.msk.f32.gmra.mrb[36].mxu0 %vm243_vm0, %v27384_v43  ;;  %v32679_v41 = vld [vmem:[#allocation26_spill] sm:$0xff] }
 0x2e4   : >> { %22573 = vmatprep.mubr.msk.f32.mxu1 %vm243_vm0, %v3196_v36  ;;  %23013 = vmatprep.mubr.msk.f32.mxu0 %vm243_vm0, %v27387_v9  ;;  %v32680_v36 = vld [vmem:[#allocation28_spill] sm:$0xff] }
 0x2e7   : >> { %22574 = vmatmul.mubr.msk.f32.gmra.mrb[6].mxu1 %vm243_vm0, %v3197_v35  ;;  %23014 = vmatmul.mubr.msk.f32.gmra.mrb[38].mxu0 %vm243_vm0, %v27398_v20  ;;  %v19636_v35 = vld [vmem:[%s26609_s26 + $0x180] sm:$0xff] }
 0x2e8   : >> { %22576 = vmatprep.mubr.msk.f32.mxu1 %vm243_vm0, %v26726_v22  ;;  %23016 = vmatprep.mubr.msk.f32.mxu0 %vm243_vm0, %v27401_v53  ;;  %v27534_v22 = vld [vmem:[%s26609_s26 + $0x28f] sm:$0xff] }
 0x2eb   : >> { %22577 = vmatmul.mubr.msk.f32.gmra.mrb[8].mxu1 %vm243_vm0, %v26734_v23  ;;  %23017 = vmatmul.mubr.msk.f32.gmra.mrb[40].mxu0 %vm243_vm0, %v27412_v25  ;;  %v27537_v23 = vld [vmem:[%s26609_s26 + $0x297] sm:$0xff] }
 0x2ec   : >> { %22579 = vmatprep.mubr.msk.f32.mxu1 %vm243_vm0, %v26737_v24  ;;  %23019 = vmatprep.mubr.msk.f32.mxu0 %vm243_vm0, %v27415_v1  ;;  %v27548_v24 = vld [vmem:[%s26609_s26 + $0x29f] sm:$0xff] }
 0x2ef   : >> { %22580 = vmatmul.mubr.msk.f32.gmra.mrb[10].mxu1 %vm243_vm0, %v26750_v26  ;;  %23020 = vmatmul.mubr.msk.f32.gmra.mrb[42].mxu0 %vm243_vm0, %v27426_v47  ;;  %v27551_v26 = vld [vmem:[%s26609_s26 + $0x2a7] sm:$0xff] }
 0x2f0   : >> { %22582 = vmatprep.mubr.msk.f32.mxu1 %vm243_vm0, %v26755_v27  ;;  %23022 = vmatprep.mubr.msk.f32.mxu0 %vm243_vm0, %v27429_v15  ;;  %v27562_v27 = vld [vmem:[%s26609_s26 + $0x2af] sm:$0xff] }
 0x2f3   : >> { %22583 = vmatmul.mubr.msk.f32.gmra.mrb[12].mxu1 %vm243_vm0, %v26765_v28  ;;  %23023 = vmatmul.mubr.msk.f32.gmra.mrb[44].mxu0 %vm243_vm0, %v27440_v7  ;;  %v27565_v28 = vld [vmem:[%s26609_s26 + $0x2b7] sm:$0xff] }
 0x2f4   : >> { %22585 = vmatprep.mubr.msk.f32.mxu1 %vm243_vm0, %v26768_v29  ;;  %23025 = vmatprep.mubr.msk.f32.mxu0 %vm243_vm0, %v27443_v60  ;;  %v27576_v29 = vld [vmem:[%s26609_s26 + $0x2bf] sm:$0xff] }
 0x2f7   : >> { %22586 = vmatmul.mubr.msk.f32.gmra.mrb[14].mxu1 %vm243_vm0, %v26777_v30  ;;  %23026 = vmatmul.mubr.msk.f32.gmra.mrb[46].mxu0 %vm243_vm0, %v27454_v11  ;;  %v19540_v30 = vld [vmem:[%s26609_s26 + $0x2d7] sm:$0xff] }
 0x2f8   : >> { %22588 = vmatprep.mubr.msk.f32.mxu1 %vm243_vm0, %v26781_v32  ;;  %23028 = vmatprep.mubr.msk.f32.mxu0 %vm243_vm0, %v27523_v39  ;;  %v19541_v32 = vld [vmem:[%s26609_s26 + $0x2df] sm:$0xff] }
 0x2fb   : >> { %22589 = vmatmul.mubr.msk.f32.gmra.mrb[16].mxu1 %vm243_vm0, %v26791_v34  ;;  %23029 = vmatmul.mubr.msk.f32.gmra.mrb[48].mxu0 %vm243_vm0, %v27534_v22  ;;  %v19542_v34 = vld [vmem:[%s26609_s26 + $0x2e7] sm:$0xff] }
 0x2fc   : >> { %22591 = vmatprep.mubr.msk.f32.mxu1 %vm243_vm0, %v26795_v37  ;;  %23031 = vmatprep.mubr.msk.f32.mxu0 %vm243_vm0, %v27537_v23  ;;  %v19543_v37 = vld [vmem:[%s26609_s26 + $0x2ef] sm:$0xff] }
 0x2ff   : >> { %22592 = vmatmul.mubr.msk.f32.gmra.mrb[18].mxu1 %vm243_vm0, %v26805_v40  ;;  %23032 = vmatmul.mubr.msk.f32.gmra.mrb[50].mxu0 %vm243_vm0, %v27548_v24  ;;  %v19544_v40 = vld [vmem:[%s26609_s26 + $0x2f7] sm:$0xff] }
 0x300   : >> { %22594 = vmatprep.mubr.msk.f32.mxu1 %vm243_vm0, %v26809_v42  ;;  %23034 = vmatprep.mubr.msk.f32.mxu0 %vm243_vm0, %v27551_v26  ;;  %v19545_v42 = vld [vmem:[%s26609_s26 + $0x2ff] sm:$0xff] }
 0x303   : >> { %22595 = vmatmul.mubr.msk.f32.gmra.mrb[20].mxu1 %vm243_vm0, %v26819_v44  ;;  %23035 = vmatmul.mubr.msk.f32.gmra.mrb[52].mxu0 %vm243_vm0, %v27562_v27  ;;  %v19546_v44 = vld [vmem:[%s26609_s26 + $0x307] sm:$0xff] }
 0x304   : >> { %22597 = vmatprep.mubr.msk.f32.mxu1 %vm243_vm0, %v26823_v46  ;;  %23037 = vmatprep.mubr.msk.f32.mxu0 %vm243_vm0, %v27565_v28  ;;  %v19547_v46 = vld [vmem:[%s26609_s26 + $0x30f] sm:$0xff] }
 0x307   : >> { %22598 = vmatmul.mubr.msk.f32.gmra.mrb[22].mxu1 %vm243_vm0, %v26833_v48  ;;  %23038 = vmatmul.mubr.msk.f32.gmra.mrb[54].mxu0 %vm243_vm0, %v27576_v29  ;;  %v19613_v48 = vld [vmem:[%s26609_s26 + $0xa8] sm:$0xff] }
 0x308   : >> { %22600 = vmatprep.mubr.msk.f32.mxu1 %vm243_vm0, %v26837_v51  ;;  %23040 = vmatprep.mubr.msk.f32.mxu0 %vm243_vm0, %v19540_v30  ;;  %v19614_v51 = vld [vmem:[%s26609_s26 + $0xb0] sm:$0xff]  ;;  %v27709_v30 = vld [vmem:[%s26609_s26 + $0x198] sm:$0xff] }
 0x30b   : >> { %22601 = vmatmul.mubr.msk.f32.gmra.mrb[24].mxu1 %vm243_vm0, %v26847_v4  ;;  %23041 = vmatmul.mubr.msk.f32.gmra.mrb[56].mxu0 %vm243_vm0, %v19541_v32  ;;  %v19615_v4 = vld [vmem:[%s26609_s26 + $0xb8] sm:$0xff]  ;;  %v32681_v32 = vld [vmem:[#allocation30_spill] sm:$0xff] }
 0x30c   : >> { %22603 = vmatprep.mubr.msk.f32.mxu1 %vm243_vm0, %v26851_v3  ;;  %23043 = vmatprep.mubr.msk.f32.mxu0 %vm243_vm0, %v19542_v34  ;;  %v19616_v3 = vld [vmem:[%s26609_s26 + $0xc0] sm:$0xff] }
 0x30d   : >> { %v32682_v34 = vld [vmem:[#allocation32_spill] sm:$0xff] }
 0x30f   : >> { %22604 = vmatmul.mubr.msk.f32.gmra.mrb[26].mxu1 %vm243_vm0, %v26861_v55  ;;  %23044 = vmatmul.mubr.msk.f32.gmra.mrb[58].mxu0 %vm243_vm0, %v19543_v37  ;;  %v19617_v55 = vld [vmem:[%s26609_s26 + $0xc8] sm:$0xff]  ;;  %v27719_v37 = vld [vmem:[%s26609_s26 + $0x1a0] sm:$0xff] }
 0x310   : >> { %22606 = vmatprep.mubr.msk.f32.mxu1 %vm243_vm0, %v26865_v57  ;;  %23046 = vmatprep.mubr.msk.f32.mxu0 %vm243_vm0, %v19544_v40  ;;  %v19618_v57 = vld [vmem:[%s26609_s26 + $0xd0] sm:$0xff]  ;;  %v27722_v40 = vld [vmem:[%s26609_s26 + $0x1a8] sm:$0xff] }
 0x313   : >> { %22607 = vmatmul.mubr.msk.f32.gmra.mrb[28].mxu1 %vm243_vm0, %v26875_v59  ;;  %23047 = vmatmul.mubr.msk.f32.gmra.mrb[60].mxu0 %vm243_vm0, %v19545_v42  ;;  %v19619_v59 = vld [vmem:[%s26609_s26 + $0xd8] sm:$0xff]  ;;  %v32683_v42 = vld [vmem:[#allocation34_spill] sm:$0xff] }
 0x314   : >> { %22609 = vmatprep.mubr.msk.f32.mxu1 %vm243_vm0, %v26879_v61  ;;  %23049 = vmatprep.mubr.msk.f32.mxu0 %vm243_vm0, %v19546_v44  ;;  %v19620_v61 = vld [vmem:[%s26609_s26 + $0xe0] sm:$0xff] }
 0x315   : >> { %v32684_v44 = vld [vmem:[#allocation36_spill] sm:$0xff] }
 0x317   : >> { %22610 = vmatmul.mubr.msk.f32.gmra.mrb[30].mxu1 %vm243_vm0, %v26889_v63  ;;  %23050 = vmatmul.mubr.msk.f32.gmra.mrb[62].mxu0 %vm243_vm0, %v19547_v46  ;;  %v19621_v63 = vld [vmem:[%s26609_s26 + $0xf8] sm:$0xff]  ;;  %v27733_v46 = vld [vmem:[%s26609_s26 + $0x1b0] sm:$0xff] }
 0x318   : >> { %22612 = vmatprep.mubr.msk.f32.mxu1 %vm243_vm0, %v26893_v0  ;;  %23054 = vmatprep.mubr.msk.f32.mxu0 %vm243_vm0, %v19613_v48  ;;  %v19622_v0 = vld [vmem:[%s26609_s26 + $0x100] sm:$0xff]  ;;  %v27736_v48 = vld [vmem:[%s26609_s26 + $0x1b8] sm:$0xff] }
 0x31b   : >> { %22613 = vmatmul.mubr.msk.f32.gmra.mrb[32].mxu1 %vm243_vm0, %v26903_v6  ;;  %23055 = vmatmul.mubr.msk.f32.vlgmr.msra.gmra.mrb[0].mxu0 %vm243_vm0, %v19614_v51  ;;  %v19623_v6 = vld [vmem:[%s26609_s26 + $0x108] sm:$0xff]  ;;  %v32685_v51 = vld [vmem:[#allocation38_spill] sm:$0xff] }
 0x31c   : >> { %23151 = vmatpush3.msra.mxu0 %v27245_v62  ;;  %22615 = vmatprep.mubr.msk.f32.mxu1 %vm243_vm0, %v26907_v8  ;;  %v19624_v8 = vld [vmem:[%s26609_s26 + $0x110] sm:$0xff]  ;;  %v32678_v62 = vld [vmem:[#allocation24_spill] sm:$0xff] }
 0x31d   : >> { %23057 = vmatprep.mubr.msk.f32.mxu0 %vm243_vm0, %v19615_v4  ;;  %v32686_v4 = vld [vmem:[#allocation40_spill] sm:$0xff] }
 0x31f   : >> { %22616 = vmatmul.mubr.msk.f32.gmra.mrb[34].mxu1 %vm243_vm0, %v26917_v10  ;;  %23058 = vmatmul.mubr.msk.f32.gmra.mrb[2].mxu0 %vm243_vm0, %v19616_v3  ;;  %v19625_v10 = vld [vmem:[%s26609_s26 + $0x118] sm:$0xff]  ;;  %v27747_v3 = vld [vmem:[%s26609_s26 + $0x1c0] sm:$0xff] }
 0x320   : >> { %22618 = vmatprep.mubr.msk.f32.mxu1 %vm243_vm0, %v26921_v12  ;;  %23060 = vmatprep.mubr.msk.f32.mxu0 %vm243_vm0, %v19617_v55  ;;  %v19626_v12 = vld [vmem:[%s26609_s26 + $0x120] sm:$0xff]  ;;  %v27750_v55 = vld [vmem:[%s26609_s26 + $0x1c8] sm:$0xff] }
 0x323   : >> { %22619 = vmatmul.mubr.msk.f32.gmra.mrb[36].mxu1 %vm243_vm0, %v26931_v14  ;;  %23061 = vmatmul.mubr.msk.f32.gmra.mrb[4].mxu0 %vm243_vm0, %v19618_v57  ;;  %v19627_v14 = vld [vmem:[%s26609_s26 + $0x128] sm:$0xff]  ;;  %v32687_v57 = vld [vmem:[#allocation42_spill] sm:$0xff] }
 0x324   : >> { %22621 = vmatprep.mubr.msk.f32.mxu1 %vm243_vm0, %v26935_v16  ;;  %23063 = vmatprep.mubr.msk.f32.mxu0 %vm243_vm0, %v19619_v59  ;;  %v19628_v16 = vld [vmem:[%s26609_s26 + $0x130] sm:$0xff]  ;;  %v32688_v59 = vld [vmem:[#allocation44_spill] sm:$0xff] }
 0x327   : >> { %22622 = vmatmul.mubr.msk.f32.gmra.mrb[38].mxu1 %vm243_vm0, %v26945_v19  ;;  %23064 = vmatmul.mubr.msk.f32.gmra.mrb[6].mxu0 %vm243_vm0, %v19620_v61  ;;  %v19629_v19 = vld [vmem:[%s26609_s26 + $0x148] sm:$0xff]  ;;  %v27761_v61 = vld [vmem:[%s26609_s26 + $0x1d0] sm:$0xff] }
 0x328   : >> { %22624 = vmatprep.mubr.msk.f32.mxu1 %vm243_vm0, %v26949_v21  ;;  %23066 = vmatprep.mubr.msk.f32.mxu0 %vm243_vm0, %v19621_v63  ;;  %v32674_v21 = vld [vmem:[#allocation16_spill] sm:$0xff]  ;;  %v27764_v63 = vld [vmem:[%s26609_s26 + $0x1e8] sm:$0xff] }
 0x32b   : >> { %22625 = vmatmul.mubr.msk.f32.gmra.mrb[40].mxu1 %vm243_vm0, %v26959_v33  ;;  %23067 = vmatmul.mubr.msk.f32.gmra.mrb[8].mxu0 %vm243_vm0, %v19622_v0  ;;  %v19630_v33 = vld [vmem:[%s26609_s26 + $0x150] sm:$0xff] }
 0x32c   : >> { %22627 = vmatprep.mubr.msk.f32.mxu1 %vm243_vm0, %v26963_v38  ;;  %23069 = vmatprep.mubr.msk.f32.mxu0 %vm243_vm0, %v19623_v6  ;;  %v19631_v38 = vld [vmem:[%s26609_s26 + $0x158] sm:$0xff]  ;;  %v32689_v0 = vld [vmem:[#allocation46_spill] sm:$0xff] }
 0x32d   : >> { %v32690_v6 = vld [vmem:[#allocation15_spill] sm:$0xff] }
 0x32f   : >> { %22628 = vmatmul.mubr.msk.f32.gmra.mrb[42].mxu1 %vm243_vm0, %v26977_v45  ;;  %23070 = vmatmul.mubr.msk.f32.gmra.mrb[10].mxu0 %vm243_vm0, %v19624_v8  ;;  %v32675_v45 = vld [vmem:[#allocation18_spill] sm:$0xff] }
 0x330   : >> { %22630 = vmatprep.mubr.msk.f32.mxu1 %vm243_vm0, %v26983_v50  ;;  %23072 = vmatprep.mubr.msk.f32.mxu0 %vm243_vm0, %v19625_v10  ;;  %v32676_v50 = vld [vmem:[#allocation20_spill] sm:$0xff]  ;;  %v27775_v8 = vld [vmem:[%s26609_s26 + $0x1f0] sm:$0xff]  ;;  %v27778_v10 = vld [vmem:[%s26609_s26 + $0x1f8] sm:$0xff] }
 0x333   : >> { %22631 = vmatmul.mubr.msk.f32.gmra.mrb[44].mxu1 %vm243_vm0, %v26994_v52  ;;  %23073 = vmatmul.mubr.msk.f32.gmra.mrb[12].mxu0 %vm243_vm0, %v19626_v12  ;;  %v19632_v52 = vld [vmem:[%s26609_s26 + $0x160] sm:$0xff]  ;;  %v32691_v12 = vld [vmem:[#allocation17_spill] sm:$0xff] }
 0x334   : >> { %22633 = vmatprep.mubr.msk.f32.mxu1 %vm243_vm0, %v26998_v54  ;;  %23075 = vmatprep.mubr.msk.f32.mxu0 %vm243_vm0, %v19627_v14  ;;  %v19633_v54 = vld [vmem:[%s26609_s26 + $0x168] sm:$0xff]  ;;  %v25265_v14 = vld [vmem:[%s32306_s1 + $0x20] sm:$0xff] }
 0x337   : >> { %22634 = vmatmul.mubr.msk.f32.gmra.mrb[46].mxu1 %vm243_vm0, %v27008_v58  ;;  %23076 = vmatmul.mubr.msk.f32.gmra.mrb[14].mxu0 %vm243_vm0, %v19628_v16  ;;  %v32677_v58 = vld [vmem:[#allocation22_spill] sm:$0xff]  ;;  %v32692_v16 = vld [vmem:[#allocation19_spill] sm:$0xff] }
 0x338   : >> { %22636 = vmatprep.mubr.msk.f32.mxu1 %vm243_vm0, %v32674_v21  ;;  %23078 = vmatprep.mubr.msk.f32.mxu0 %vm243_vm0, %v19629_v19  ;;  %v27790_v19 = vld [vmem:[%s26609_s26 + $0x200] sm:$0xff]  ;;  %v27795_v21 = vld [vmem:[%s26609_s26 + $0x208] sm:$0xff] }
 0x33b   : >> { %22637 = vmatmul.mubr.msk.f32.gmra.mrb[48].mxu1 %vm243_vm0, %v32675_v45  ;;  %23079 = vmatmul.mubr.msk.f32.gmra.mrb[16].mxu0 %vm243_vm0, %v19630_v33  ;;  %v32693_v33 = vld [vmem:[#allocation21_spill] sm:$0xff]  ;;  %v27806_v45 = vld [vmem:[%s26609_s26 + $0x210] sm:$0xff] }
 0x33c   : >> { %22639 = vmatprep.mubr.msk.f32.mxu1 %vm243_vm0, %v32676_v50  ;;  %23081 = vmatprep.mubr.msk.f32.mxu0 %vm243_vm0, %v19631_v38  ;;  %v32694_v38 = vld [vmem:[#allocation23_spill] sm:$0xff] }
 0x33d   : >> { %v27809_v50 = vld [vmem:[%s26609_s26 + $0x218] sm:$0xff] }
 0x33f   : >> { %22640 = vmatmul.mubr.msk.f32.gmra.mrb[50].mxu1 %vm243_vm0, %v32677_v58  ;;  %23082 = vmatmul.mubr.msk.f32.gmra.mrb[18].mxu0 %vm243_vm0, %v19632_v52  ;;  %v32695_v52 = vld [vmem:[#allocation25_spill] sm:$0xff]  ;;  %v27820_v58 = vld [vmem:[%s26609_s26 + $0x220] sm:$0xff] }
 0x340   : >> { %22642 = vmatprep.mubr.msk.f32.mxu1 %vm243_vm0, %v32678_v62  ;;  %23084 = vmatprep.mubr.msk.f32.mxu0 %vm243_vm0, %v19633_v54  ;;  %v32696_v54 = vld [vmem:[#allocation27_spill] sm:$0xff] }
 0x341   : >> { %v27823_v62 = vld [vmem:[%s26609_s26 + $0x238] sm:$0xff] }
 0x343   : >> { %22643 = vmatmul.mubr.msk.f32.gmra.mrb[52].mxu1 %vm243_vm0, %v32679_v41  ;;  %23085 = vmatmul.mubr.msk.f32.gmra.mrb[20].mxu0 %vm243_vm0, %v19634_v56  ;;  %v32697_v56 = vld [vmem:[#allocation29_spill] sm:$0xff]  ;;  %v27834_v41 = vld [vmem:[%s26609_s26 + $0x240] sm:$0xff] }
 0x344   : >> { %22645 = vmatprep.mubr.msk.f32.mxu1 %vm243_vm0, %v32680_v36  ;;  %23087 = vmatprep.mubr.msk.f32.mxu0 %vm243_vm0, %v19635_v18  ;;  %v32698_v18 = vld [vmem:[#allocation31_spill] sm:$0xff]  ;;  %v27837_v36 = vld [vmem:[%s26609_s26 + $0x248] sm:$0xff] }
 0x347   : >> { %22646 = vmatmul.mubr.msk.f32.gmra.mrb[54].mxu1 %vm243_vm0, %v32681_v32  ;;  %23088 = vmatmul.mubr.msk.f32.gmra.mrb[22].mxu0 %vm243_vm0, %v19636_v35  ;;  %v32699_v35 = vld [vmem:[#allocation33_spill] sm:$0xff]  ;;  %v32700_v32 = vld [vmem:[#allocation35_spill] sm:$0xff] }
 0x348   : >> { %22648 = vmatprep.mubr.msk.f32.mxu1 %vm243_vm0, %v32682_v34  ;;  %23090 = vmatprep.mubr.msk.f32.mxu0 %vm243_vm0, %v27709_v30  ;;  %v27848_v34 = vld [vmem:[%s26609_s26 + $0x250] sm:$0xff] }
 0x34b   : >> { %22649 = vmatmul.mubr.msk.f32.gmra.mrb[56].mxu1 %vm243_vm0, %v32683_v42  ;;  %23091 = vmatmul.mubr.msk.f32.gmra.mrb[24].mxu0 %vm243_vm0, %v27719_v37  ;;  %v27851_v42 = vld [vmem:[%s26609_s26 + $0x258] sm:$0xff] }
 0x34c   : >> { %22651 = vmatprep.mubr.msk.f32.mxu1 %vm243_vm0, %v32684_v44  ;;  %23093 = vmatprep.mubr.msk.f32.mxu0 %vm243_vm0, %v27722_v40  ;;  %v32701_v44 = vld [vmem:[#allocation37_spill] sm:$0xff] }
 0x34f   : >> { %22652 = vmatmul.mubr.msk.f32.gmra.mrb[58].mxu1 %vm243_vm0, %v32685_v51  ;;  %23094 = vmatmul.mubr.msk.f32.gmra.mrb[26].mxu0 %vm243_vm0, %v27733_v46  ;;  %v32702_v51 = vld [vmem:[#allocation39_spill] sm:$0xff] }
 0x350   : >> { %22654 = vmatprep.mubr.msk.f32.mxu1 %vm243_vm0, %v32686_v4  ;;  %23096 = vmatprep.mubr.msk.f32.mxu0 %vm243_vm0, %v27736_v48  ;;  %v27862_v4 = vld [vmem:[%s26609_s26 + $0x260] sm:$0xff] }
 0x353   : >> { %22655 = vmatmul.mubr.msk.f32.gmra.mrb[60].mxu1 %vm243_vm0, %v32687_v57  ;;  %23097 = vmatmul.mubr.msk.f32.gmra.mrb[28].mxu0 %vm243_vm0, %v27747_v3  ;;  %v27865_v57 = vld [vmem:[%s26609_s26 + $0x268] sm:$0xff] }
 0x354   : >> { %22657 = vmatprep.mubr.msk.f32.mxu1 %vm243_vm0, %v32688_v59  ;;  %23099 = vmatprep.mubr.msk.f32.mxu0 %vm243_vm0, %v27750_v55  ;;  %v32703_v59 = vld [vmem:[#allocation41_spill] sm:$0xff] }
 0x357   : >> { %22658 = vmatmul.mubr.msk.f32.gmra.mrb[62].mxu1 %vm243_vm0, %v32689_v0  ;;  %23100 = vmatmul.mubr.msk.f32.gmra.mrb[30].mxu0 %vm243_vm0, %v27761_v61  ;;  %v32704_v0 = vld [vmem:[#allocation43_spill] sm:$0xff] }
 0x358   : >> { %22662 = vmatprep.mubr.msk.f32.mxu1 %vm243_vm0, %v32690_v6  ;;  %23102 = vmatprep.mubr.msk.f32.mxu0 %vm243_vm0, %v27764_v63  ;;  %v27876_v6 = vld [vmem:[%s26609_s26 + $0x270] sm:$0xff] }
 0x35b   : >> { %22663 = vmatmul.mubr.msk.f32.vlgmr.msra.gmra.mrb[0].mxu1 %vm243_vm0, %v32691_v12  ;;  %23103 = vmatmul.mubr.msk.f32.gmra.mrb[32].mxu0 %vm243_vm0, %v27775_v8  ;;  %v27879_v12 = vld [vmem:[%s26609_s26 + $0x288] sm:$0xff] }
 0x35c   : >> { %24131 = vmatpush3.msra.mxu1 %v25265_v14  ;;  %22665 = vmatprep.mubr.msk.f32.mxu1 %vm243_vm0, %v32692_v16  ;;  %v32705_v14 = vld [vmem:[#allocation45_spill] sm:$0xff]  ;;  %v32706_v16 = vld [vmem:[#allocation47_spill] sm:$0xff] }
 0x35d   : >> { %23105 = vmatprep.mubr.msk.f32.mxu0 %vm243_vm0, %v27778_v10 }
 0x35f   : >> { %22666 = vmatmul.mubr.msk.f32.gmra.mrb[2].mxu1 %vm243_vm0, %v32693_v33  ;;  %23106 = vmatmul.mubr.msk.f32.gmra.mrb[34].mxu0 %vm243_vm0, %v27790_v19  ;;  %v27890_v33 = vld [vmem:[%s26609_s26 + $0x290] sm:$0xff] }
 0x360   : >> { %22668 = vmatprep.mubr.msk.f32.mxu1 %vm243_vm0, %v32694_v38  ;;  %23108 = vmatprep.mubr.msk.f32.mxu0 %vm243_vm0, %v27795_v21  ;;  %v27893_v38 = vld [vmem:[%s26609_s26 + $0x298] sm:$0xff] }
 0x363   : >> { %22669 = vmatmul.mubr.msk.f32.gmra.mrb[4].mxu1 %vm243_vm0, %v32695_v52  ;;  %23109 = vmatmul.mubr.msk.f32.gmra.mrb[36].mxu0 %vm243_vm0, %v27806_v45  ;;  %v32707_v52 = vld [vmem:[#allocation48_spill] sm:$0xff] }
 0x364   : >> { %22671 = vmatprep.mubr.msk.f32.mxu1 %vm243_vm0, %v32696_v54  ;;  %23111 = vmatprep.mubr.msk.f32.mxu0 %vm243_vm0, %v27809_v50  ;;  %v32708_v54 = vld [vmem:[#allocation49_spill] sm:$0xff] }
 0x367   : >> { %22672 = vmatmul.mubr.msk.f32.gmra.mrb[6].mxu1 %vm243_vm0, %v32697_v56  ;;  %23112 = vmatmul.mubr.msk.f32.gmra.mrb[38].mxu0 %vm243_vm0, %v27820_v58  ;;  %v27904_v56 = vld [vmem:[%s26609_s26 + $0x2a0] sm:$0xff] }
 0x368   : >> { %22674 = vmatprep.mubr.msk.f32.mxu1 %vm243_vm0, %v32698_v18  ;;  %23114 = vmatprep.mubr.msk.f32.mxu0 %vm243_vm0, %v27823_v62  ;;  %v27907_v18 = vld [vmem:[%s26609_s26 + $0x2a8] sm:$0xff] }
 0x36b   : >> { %22675 = vmatmul.mubr.msk.f32.gmra.mrb[8].mxu1 %vm243_vm0, %v32699_v35  ;;  %23115 = vmatmul.mubr.msk.f32.gmra.mrb[40].mxu0 %vm243_vm0, %v27834_v41  ;;  %v32709_v35 = vld [vmem:[#allocation50_spill] sm:$0xff] }
 0x36c   : >> { %22677 = vmatprep.mubr.msk.f32.mxu1 %vm243_vm0, %v32700_v32  ;;  %23117 = vmatprep.mubr.msk.f32.mxu0 %vm243_vm0, %v27837_v36  ;;  %v32710_v32 = vld [vmem:[#allocation51_spill] sm:$0xff] }
 0x36f   : >> { %22678 = vmatmul.mubr.msk.f32.gmra.mrb[10].mxu1 %vm243_vm0, %v32701_v44  ;;  %23118 = vmatmul.mubr.msk.f32.gmra.mrb[42].mxu0 %vm243_vm0, %v27848_v34  ;;  %v27918_v44 = vld [vmem:[%s26609_s26 + $0x2b0] sm:$0xff] }
 0x370   : >> { %22680 = vmatprep.mubr.msk.f32.mxu1 %vm243_vm0, %v32702_v51  ;;  %23120 = vmatprep.mubr.msk.f32.mxu0 %vm243_vm0, %v27851_v42  ;;  %v27921_v51 = vld [vmem:[%s26609_s26 + $0x2b8] sm:$0xff] }
 0x371   : >> { %32711 = vst [vmem:[#allocation16_spill] sm:$0xff] %v27921_v51 }
 0x373   : >> { %22681 = vmatmul.mubr.msk.f32.gmra.mrb[12].mxu1 %vm243_vm0, %v32703_v59  ;;  %23121 = vmatmul.mubr.msk.f32.gmra.mrb[44].mxu0 %vm243_vm0, %v27862_v4  ;;  %v32712_v59 = vld [vmem:[#allocation52_spill] sm:$0xff] }
 0x374   : >> { %22683 = vmatprep.mubr.msk.f32.mxu1 %vm243_vm0, %v32704_v0  ;;  %23123 = vmatprep.mubr.msk.f32.mxu0 %vm243_vm0, %v27865_v57  ;;  %v32713_v0 = vld [vmem:[#allocation53_spill] sm:$0xff] }
 0x377   : >> { %22684 = vmatmul.mubr.msk.f32.gmra.mrb[14].mxu1 %vm243_vm0, %v32705_v14  ;;  %23124 = vmatmul.mubr.msk.f32.gmra.mrb[46].mxu0 %vm243_vm0, %v27876_v6  ;;  %v27932_v14 = vld [vmem:[%s26609_s26 + $0x2c0] sm:$0xff] }
 0x378   : >> { %22686 = vmatprep.mubr.msk.f32.mxu1 %vm243_vm0, %v32706_v16  ;;  %23126 = vmatprep.mubr.msk.f32.mxu0 %vm243_vm0, %v27879_v12  ;;  %32714 = vst [vmem:[#allocation18_spill] sm:$0xff] %v27932_v14  ;;  %v19669_v16 = vld [vmem:[%s26609_s26 + $0x2d8] sm:$0xff] }
 0x37b   : >> { %22687 = vmatmul.mubr.msk.f32.gmra.mrb[16].mxu1 %vm243_vm0, %v32707_v52  ;;  %23127 = vmatmul.mubr.msk.f32.gmra.mrb[48].mxu0 %vm243_vm0, %v27890_v33  ;;  %v32715_v52 = vld [vmem:[#allocation54_spill] sm:$0xff] }
 0x37c   : >> { %22689 = vmatprep.mubr.msk.f32.mxu1 %vm243_vm0, %v32708_v54  ;;  %23129 = vmatprep.mubr.msk.f32.mxu0 %vm243_vm0, %v27893_v38  ;;  %v32716_v54 = vld [vmem:[#allocation55_spill] sm:$0xff] }
 0x37f   : >> { %22690 = vmatmul.mubr.msk.f32.gmra.mrb[18].mxu1 %vm243_vm0, %v32709_v35  ;;  %23130 = vmatmul.mubr.msk.f32.gmra.mrb[50].mxu0 %vm243_vm0, %v27904_v56  ;;  %v19670_v35 = vld [vmem:[%s26609_s26 + $0x2e0] sm:$0xff] }
 0x380   : >> { %22692 = vmatprep.mubr.msk.f32.mxu1 %vm243_vm0, %v32710_v32  ;;  %23132 = vmatprep.mubr.msk.f32.mxu0 %vm243_vm0, %v27907_v18  ;;  %v19671_v32 = vld [vmem:[%s26609_s26 + $0x2e8] sm:$0xff] }
 0x383   : >> { %22693 = vmatmul.mubr.msk.f32.gmra.mrb[20].mxu1 %vm243_vm0, %v32712_v59  ;;  %23133 = vmatmul.mubr.msk.f32.gmra.mrb[52].mxu0 %vm243_vm0, %v27918_v44  ;;  %v32717_v59 = vld [vmem:[#allocation56_spill] sm:$0xff] }
 0x384   : >> { %22695 = vmatprep.mubr.msk.f32.mxu1 %vm243_vm0, %v32713_v0  ;;  %23135 = vmatprep.mubr.msk.f32.mxu0 %vm243_vm0, %v27921_v51  ;;  %v32718_v0 = vld [vmem:[#allocation57_spill] sm:$0xff]  ;;  %v32719_v51 = vld [vmem:[#allocation58_spill] sm:$0xff] }
 0x387   : >> { %22696 = vmatmul.mubr.msk.f32.gmra.mrb[22].mxu1 %vm243_vm0, %v32715_v52  ;;  %23136 = vmatmul.mubr.msk.f32.gmra.mrb[54].mxu0 %vm243_vm0, %v27932_v14  ;;  %v19672_v52 = vld [vmem:[%s26609_s26 + $0x2f0] sm:$0xff]  ;;  %v19673_v14 = vld [vmem:[%s26609_s26 + $0x2f8] sm:$0xff] }
 0x388   : >> { %22698 = vmatprep.mubr.msk.f32.mxu1 %vm243_vm0, %v32716_v54  ;;  %23138 = vmatprep.mubr.msk.f32.mxu0 %vm243_vm0, %v19669_v16  ;;  %v32720_v16 = vld [vmem:[#allocation59_spill] sm:$0xff]  ;;  %v19674_v54 = vld [vmem:[%s26609_s26 + $0x300] sm:$0xff] }
 0x38b   : >> { %22699 = vmatmul.mubr.msk.f32.gmra.mrb[24].mxu1 %vm243_vm0, %v32717_v59  ;;  %23139 = vmatmul.mubr.msk.f32.gmra.mrb[56].mxu0 %vm243_vm0, %v19670_v35  ;;  %v19675_v35 = vld [vmem:[%s26609_s26 + $0x308] sm:$0xff]  ;;  %v32721_v59 = vld [vmem:[#allocation60_spill] sm:$0xff] }
 0x38c   : >> { %22701 = vmatprep.mubr.msk.f32.mxu1 %vm243_vm0, %v32718_v0  ;;  %23141 = vmatprep.mubr.msk.f32.mxu0 %vm243_vm0, %v19671_v32  ;;  %v32722_v32 = vld [vmem:[#allocation61_spill] sm:$0xff] }
 0x38d   : >> { %v19742_v0 = vld [vmem:[%s26609_s26 + $0xa9] sm:$0xff] }
 0x38f   : >> { %22702 = vmatmul.mubr.msk.f32.gmra.mrb[26].mxu1 %vm243_vm0, %v32719_v51  ;;  %23142 = vmatmul.mubr.msk.f32.gmra.mrb[58].mxu0 %vm243_vm0, %v19672_v52  ;;  %v19676_v51 = vld [vmem:[%s26609_s26 + $0x310] sm:$0xff] }
 0x390   : >> { %22704 = vmatprep.mubr.msk.f32.mxu1 %vm243_vm0, %v32720_v16  ;;  %23144 = vmatprep.mubr.msk.f32.mxu0 %vm243_vm0, %v19673_v14  ;;  %v32723_v52 = vld [vmem:[#allocation62_spill] sm:$0xff]  ;;  %v32724_v14 = vld [vmem:[#allocation63_spill] sm:$0xff] }
 0x391   : >> { %v19743_v16 = vld [vmem:[%s26609_s26 + $0xb1] sm:$0xff] }
 0x393   : >> { %22705 = vmatmul.mubr.msk.f32.gmra.mrb[28].mxu1 %vm243_vm0, %v32721_v59  ;;  %23145 = vmatmul.mubr.msk.f32.gmra.mrb[60].mxu0 %vm243_vm0, %v19674_v54  ;;  %v19744_v54 = vld [vmem:[%s26609_s26 + $0xb9] sm:$0xff] }
 0x394   : >> { %22707 = vmatprep.mubr.msk.f32.mxu1 %vm243_vm0, %v32722_v32  ;;  %23147 = vmatprep.mubr.msk.f32.mxu0 %vm243_vm0, %v19675_v35  ;;  %v32725_v59 = vld [vmem:[#allocation64_spill] sm:$0xff]  ;;  %v32726_v35 = vld [vmem:[#allocation65_spill] sm:$0xff] }
 0x395   : >> { %v19745_v32 = vld [vmem:[%s26609_s26 + $0xc1] sm:$0xff] }
 0x397   : >> { %22708 = vmatmul.mubr.msk.f32.gmra.mrb[30].mxu1 %vm243_vm0, %v32723_v52  ;;  %23148 = vmatmul.mubr.msk.f32.gmra.mrb[62].mxu0 %vm243_vm0, %v19676_v51  ;;  %v19746_v51 = vld [vmem:[%s26609_s26 + $0xc9] sm:$0xff] }
 0x398   : >> { %22710 = vmatprep.mubr.msk.f32.mxu1 %vm243_vm0, %v32724_v14  ;;  %23152 = vmatprep.mubr.msk.f32.mxu0 %vm243_vm0, %v19742_v0  ;;  %v32727_v52 = vld [vmem:[#allocation66_spill] sm:$0xff]  ;;  %v32728_v0 = vld [vmem:[#allocation67_spill] sm:$0xff] }
 0x399   : >> { %v19747_v14 = vld [vmem:[%s26609_s26 + $0xd1] sm:$0xff] }
 0x39b   : >> { %22711 = vmatmul.mubr.msk.f32.gmra.mrb[32].mxu1 %vm243_vm0, %v32725_v59  ;;  %23153 = vmatmul.mubr.msk.f32.vlgmr.msra.gmra.mrb[0].mxu0 %vm243_vm0, %v19743_v16  ;;  %v19748_v16 = vld [vmem:[%s26609_s26 + $0xd9] sm:$0xff] }
 0x39c   : >> { %22713 = vmatprep.mubr.msk.f32.mxu1 %vm243_vm0, %v32726_v35  ;;  %23155 = vmatprep.mubr.msk.f32.mxu0 %vm243_vm0, %v19744_v54  ;;  %v32729_v59 = vld [vmem:[#allocation68_spill] sm:$0xff] }
 0x39d   : >> { %v19749_v54 = vld [vmem:[%s26609_s26 + $0xe1] sm:$0xff]  ;;  %v19750_v35 = vld [vmem:[%s26609_s26 + $0xf9] sm:$0xff] }
 0x39f   : >> { %22714 = vmatmul.mubr.msk.f32.gmra.mrb[34].mxu1 %vm243_vm0, %v32727_v52  ;;  %23156 = vmatmul.mubr.msk.f32.gmra.mrb[2].mxu0 %vm243_vm0, %v19745_v32  ;;  %v32730_v32 = vld [vmem:[#allocation69_spill] sm:$0xff] }
 0x3a0   : >> { %22716 = vmatprep.mubr.msk.f32.mxu1 %vm243_vm0, %v32728_v0  ;;  %23158 = vmatprep.mubr.msk.f32.mxu0 %vm243_vm0, %v19746_v51  ;;  %v19751_v51 = vld [vmem:[%s26609_s26 + $0x101] sm:$0xff]  ;;  %v19752_v52 = vld [vmem:[%s26609_s26 + $0x109] sm:$0xff]  ;;  %v19754_v0 = vld [vmem:[%s26609_s26 + $0x119] sm:$0xff] }
 0x3a3   : >> { %22717 = vmatmul.mubr.msk.f32.gmra.mrb[36].mxu1 %vm243_vm0, %v32729_v59  ;;  %23159 = vmatmul.mubr.msk.f32.gmra.mrb[4].mxu0 %vm243_vm0, %v19747_v14  ;;  %v32732_v14 = vld [vmem:[#allocation18_spill] sm:$0xff] }
 0x3a4   : >> { %22719 = vmatprep.mubr.msk.f32.mxu1 %vm243_vm0, %v27331_v49  ;;  %23161 = vmatprep.mubr.msk.f32.mxu0 %vm243_vm0, %v19748_v16  ;;  %v19753_v49 = vld [vmem:[%s26609_s26 + $0x111] sm:$0xff] }
 0x3a7   : >> { %22720 = vmatmul.mubr.msk.f32.gmra.mrb[38].mxu1 %vm243_vm0, %v32730_v32  ;;  %23162 = vmatmul.mubr.msk.f32.gmra.mrb[6].mxu0 %vm243_vm0, %v19749_v54 }
 0x3a8   : >> { %22722 = vmatprep.mubr.msk.f32.mxu1 %vm243_vm0, %v27345_v31  ;;  %23164 = vmatprep.mubr.msk.f32.mxu0 %vm243_vm0, %v19750_v35  ;;  %v19755_v31 = vld [vmem:[%s26609_s26 + $0x121] sm:$0xff] }
 0x3ab   : >> { %22723 = vmatmul.mubr.msk.f32.gmra.mrb[40].mxu1 %vm243_vm0, %v27356_v5  ;;  %23165 = vmatmul.mubr.msk.f32.gmra.mrb[8].mxu0 %vm243_vm0, %v19751_v51  ;;  %v19756_v5 = vld [vmem:[%s26609_s26 + $0x129] sm:$0xff] }
 0x3ac   : >> { %22725 = vmatprep.mubr.msk.f32.mxu1 %vm243_vm0, %v27359_v13  ;;  %23167 = vmatprep.mubr.msk.f32.mxu0 %vm243_vm0, %v19752_v52  ;;  %v19757_v13 = vld [vmem:[%s26609_s26 + $0x131] sm:$0xff] }
 0x3af   : >> { %22726 = vmatmul.mubr.msk.f32.gmra.mrb[42].mxu1 %vm243_vm0, %v27370_v17  ;;  %23168 = vmatmul.mubr.msk.f32.gmra.mrb[10].mxu0 %vm243_vm0, %v19753_v49  ;;  %v19758_v17 = vld [vmem:[%s26609_s26 + $0x149] sm:$0xff] }
 0x3b0   : >> { %22728 = vmatprep.mubr.msk.f32.mxu1 %vm243_vm0, %v27373_v2  ;;  %23170 = vmatprep.mubr.msk.f32.mxu0 %vm243_vm0, %v19754_v0  ;;  %v19759_v2 = vld [vmem:[%s26609_s26 + $0x151] sm:$0xff] }
 0x3b3   : >> { %22729 = vmatmul.mubr.msk.f32.gmra.mrb[44].mxu1 %vm243_vm0, %v27384_v43  ;;  %23171 = vmatmul.mubr.msk.f32.gmra.mrb[12].mxu0 %vm243_vm0, %v19755_v31  ;;  %v19760_v43 = vld [vmem:[%s26609_s26 + $0x159] sm:$0xff] }
 0x3b4   : >> { %22731 = vmatprep.mubr.msk.f32.mxu1 %vm243_vm0, %v27387_v9  ;;  %23173 = vmatprep.mubr.msk.f32.mxu0 %vm243_vm0, %v19756_v5  ;;  %v19761_v9 = vld [vmem:[%s26609_s26 + $0x161] sm:$0xff] }
 0x3b7   : >> { %22732 = vmatmul.mubr.msk.f32.gmra.mrb[46].mxu1 %vm243_vm0, %v27398_v20  ;;  %23174 = vmatmul.mubr.msk.f32.gmra.mrb[14].mxu0 %vm243_vm0, %v19757_v13  ;;  %v19762_v20 = vld [vmem:[%s26609_s26 + $0x169] sm:$0xff] }
 0x3b8   : >> { %22734 = vmatprep.mubr.msk.f32.mxu1 %vm243_vm0, %v27401_v53  ;;  %23176 = vmatprep.mubr.msk.f32.mxu0 %vm243_vm0, %v19758_v17  ;;  %v19763_v53 = vld [vmem:[%s26609_s26 + $0x171] sm:$0xff] }
 0x3bb   : >> { %22735 = vmatmul.mubr.msk.f32.gmra.mrb[48].mxu1 %vm243_vm0, %v27412_v25  ;;  %23177 = vmatmul.mubr.msk.f32.gmra.mrb[16].mxu0 %vm243_vm0, %v19759_v2  ;;  %v19764_v25 = vld [vmem:[%s26609_s26 + $0x179] sm:$0xff] }
 0x3bc   : >> { %22737 = vmatprep.mubr.msk.f32.mxu1 %vm243_vm0, %v27415_v1  ;;  %23179 = vmatprep.mubr.msk.f32.mxu0 %vm243_vm0, %v19760_v43  ;;  %v19765_v1 = vld [vmem:[%s26609_s26 + $0x181] sm:$0xff] }
 0x3bf   : >> { %22738 = vmatmul.mubr.msk.f32.gmra.mrb[50].mxu1 %vm243_vm0, %v27426_v47  ;;  %23180 = vmatmul.mubr.msk.f32.gmra.mrb[18].mxu0 %vm243_vm0, %v19761_v9  ;;  %v19766_v47 = vld [vmem:[%s26609_s26 + $0x199] sm:$0xff] }
 0x3c0   : >> { %22740 = vmatprep.mubr.msk.f32.mxu1 %vm243_vm0, %v27429_v15  ;;  %23182 = vmatprep.mubr.msk.f32.mxu0 %vm243_vm0, %v19762_v20  ;;  %v19768_v15 = vld [vmem:[%s26609_s26 + $0x1a9] sm:$0xff] }
 0x3c3   : >> { %22741 = vmatmul.mubr.msk.f32.gmra.mrb[52].mxu1 %vm243_vm0, %v27440_v7  ;;  %23183 = vmatmul.mubr.msk.f32.gmra.mrb[20].mxu0 %vm243_vm0, %v19763_v53  ;;  %v19767_v7 = vld [vmem:[%s26609_s26 + $0x1a1] sm:$0xff] }
 0x3c4   : >> { %22743 = vmatprep.mubr.msk.f32.mxu1 %vm243_vm0, %v27443_v60  ;;  %23185 = vmatprep.mubr.msk.f32.mxu0 %vm243_vm0, %v19764_v25  ;;  %v19769_v60 = vld [vmem:[%s26609_s26 + $0x1b1] sm:$0xff] }
 0x3c7   : >> { %22744 = vmatmul.mubr.msk.f32.gmra.mrb[54].mxu1 %vm243_vm0, %v27454_v11  ;;  %23186 = vmatmul.mubr.msk.f32.gmra.mrb[22].mxu0 %vm243_vm0, %v19765_v1  ;;  %v19770_v11 = vld [vmem:[%s26609_s26 + $0x1b9] sm:$0xff] }
 0x3c8   : >> { %22746 = vmatprep.mubr.msk.f32.mxu1 %vm243_vm0, %v27523_v39  ;;  %23188 = vmatprep.mubr.msk.f32.mxu0 %vm243_vm0, %v19766_v47  ;;  %v19771_v39 = vld [vmem:[%s26609_s26 + $0x1c1] sm:$0xff] }
 0x3cb   : >> { %22747 = vmatmul.mubr.msk.f32.gmra.mrb[56].mxu1 %vm243_vm0, %v27534_v22  ;;  %23189 = vmatmul.mubr.msk.f32.gmra.mrb[24].mxu0 %vm243_vm0, %v19767_v7  ;;  %v19772_v22 = vld [vmem:[%s26609_s26 + $0x1c9] sm:$0xff] }
 0x3cc   : >> { %22749 = vmatprep.mubr.msk.f32.mxu1 %vm243_vm0, %v27537_v23  ;;  %23191 = vmatprep.mubr.msk.f32.mxu0 %vm243_vm0, %v19768_v15  ;;  %v19773_v23 = vld [vmem:[%s26609_s26 + $0x1d1] sm:$0xff] }
 0x3cf   : >> { %22750 = vmatmul.mubr.msk.f32.gmra.mrb[58].mxu1 %vm243_vm0, %v27548_v24  ;;  %23192 = vmatmul.mubr.msk.f32.gmra.mrb[26].mxu0 %vm243_vm0, %v19769_v60  ;;  %v19774_v24 = vld [vmem:[%s26609_s26 + $0x1e9] sm:$0xff] }
 0x3d0   : >> { %22752 = vmatprep.mubr.msk.f32.mxu1 %vm243_vm0, %v27551_v26  ;;  %23194 = vmatprep.mubr.msk.f32.mxu0 %vm243_vm0, %v19770_v11  ;;  %v19775_v26 = vld [vmem:[%s26609_s26 + $0x1f1] sm:$0xff] }
 0x3d3   : >> { %22753 = vmatmul.mubr.msk.f32.gmra.mrb[60].mxu1 %vm243_vm0, %v27562_v27  ;;  %23195 = vmatmul.mubr.msk.f32.gmra.mrb[28].mxu0 %vm243_vm0, %v19771_v39  ;;  %v19776_v27 = vld [vmem:[%s26609_s26 + $0x1f9] sm:$0xff] }
 0x3d4   : >> { %22755 = vmatprep.mubr.msk.f32.mxu1 %vm243_vm0, %v27565_v28  ;;  %23197 = vmatprep.mubr.msk.f32.mxu0 %vm243_vm0, %v19772_v22  ;;  %v19777_v28 = vld [vmem:[%s26609_s26 + $0x201] sm:$0xff] }
 0x3d7   : >> { %22756 = vmatmul.mubr.msk.f32.gmra.mrb[62].mxu1 %vm243_vm0, %v27576_v29  ;;  %23198 = vmatmul.mubr.msk.f32.gmra.mrb[30].mxu0 %vm243_vm0, %v19773_v23  ;;  %v19778_v29 = vld [vmem:[%s26609_s26 + $0x209] sm:$0xff] }
 0x3d8   : >> { %22808 = vmatprep.mubr.msk.f32.mxu1 %vm243_vm0, %v27709_v30  ;;  %23200 = vmatprep.mubr.msk.f32.mxu0 %vm243_vm0, %v19774_v24  ;;  %v19779_v30 = vld [vmem:[%s26609_s26 + $0x211] sm:$0xff] }
 0x3db   : >> { %22809 = vmatmul.mubr.msk.f32.vlgmr.msra.gmra.mrb[32].mxu1 %vm243_vm0, %v27719_v37  ;;  %23201 = vmatmul.mubr.msk.f32.gmra.mrb[32].mxu0 %vm243_vm0, %v19775_v26  ;;  %v19780_v37 = vld [vmem:[%s26609_s26 + $0x219] sm:$0xff] }
 0x3dc   : >> { %22811 = vmatprep.mubr.msk.f32.mxu1 %vm243_vm0, %v27722_v40  ;;  %23203 = vmatprep.mubr.msk.f32.mxu0 %vm243_vm0, %v19776_v27  ;;  %v19781_v40 = vld [vmem:[%s26609_s26 + $0x221] sm:$0xff] }
 0x3df   : >> { %22812 = vmatmul.mubr.msk.f32.gmra.mrb[34].mxu1 %vm243_vm0, %v27733_v46  ;;  %23204 = vmatmul.mubr.msk.f32.gmra.mrb[34].mxu0 %vm243_vm0, %v19777_v28  ;;  %v19782_v46 = vld [vmem:[%s26609_s26 + $0x239] sm:$0xff] }
 0x3e0   : >> { %22814 = vmatprep.mubr.msk.f32.mxu1 %vm243_vm0, %v27736_v48  ;;  %23206 = vmatprep.mubr.msk.f32.mxu0 %vm243_vm0, %v19778_v29  ;;  %v19783_v48 = vld [vmem:[%s26609_s26 + $0x241] sm:$0xff] }
 0x3e3   : >> { %22815 = vmatmul.mubr.msk.f32.gmra.mrb[36].mxu1 %vm243_vm0, %v27747_v3  ;;  %23207 = vmatmul.mubr.msk.f32.gmra.mrb[36].mxu0 %vm243_vm0, %v19779_v30  ;;  %v19784_v3 = vld [vmem:[%s26609_s26 + $0x249] sm:$0xff] }
 0x3e4   : >> { %22817 = vmatprep.mubr.msk.f32.mxu1 %vm243_vm0, %v27750_v55  ;;  %23209 = vmatprep.mubr.msk.f32.mxu0 %vm243_vm0, %v19780_v37  ;;  %v19785_v55 = vld [vmem:[%s26609_s26 + $0x251] sm:$0xff]  ;;  %v32733_v37 = vld [vmem:[#allocation12_spill] sm:$0xff] }
 0x3e7   : >> { %22818 = vmatmul.mubr.msk.f32.gmra.mrb[38].mxu1 %vm243_vm0, %v27761_v61  ;;  %23210 = vmatmul.mubr.msk.f32.gmra.mrb[38].mxu0 %vm243_vm0, %v19781_v40  ;;  %v19786_v61 = vld [vmem:[%s26609_s26 + $0x259] sm:$0xff] }
 0x3e8   : >> { %22820 = vmatprep.mubr.msk.f32.mxu1 %vm243_vm0, %v27764_v63  ;;  %23212 = vmatprep.mubr.msk.f32.mxu0 %vm243_vm0, %v19782_v46  ;;  %v19787_v63 = vld [vmem:[%s26609_s26 + $0x261] sm:$0xff] }
 0x3eb   : >> { %22821 = vmatmul.mubr.msk.f32.gmra.mrb[40].mxu1 %vm243_vm0, %v27775_v8  ;;  %23213 = vmatmul.mubr.msk.f32.gmra.mrb[40].mxu0 %vm243_vm0, %v19783_v48  ;;  %v19788_v8 = vld [vmem:[%s26609_s26 + $0x269] sm:$0xff] }
 0x3ec   : >> { %22823 = vmatprep.mubr.msk.f32.mxu1 %vm243_vm0, %v27778_v10  ;;  %23215 = vmatprep.mubr.msk.f32.mxu0 %vm243_vm0, %v19784_v3  ;;  %v19789_v10 = vld [vmem:[%s26609_s26 + $0x271] sm:$0xff] }
 0x3ef   : >> { %22824 = vmatmul.mubr.msk.f32.gmra.mrb[42].mxu1 %vm243_vm0, %v27790_v19  ;;  %23216 = vmatmul.mubr.msk.f32.gmra.mrb[42].mxu0 %vm243_vm0, %v19785_v55  ;;  %v19790_v19 = vld [vmem:[%s26609_s26 + $0x289] sm:$0xff] }
 0x3f0   : >> { %22826 = vmatprep.mubr.msk.f32.mxu1 %vm243_vm0, %v27795_v21  ;;  %23218 = vmatprep.mubr.msk.f32.mxu0 %vm243_vm0, %v19786_v61  ;;  %v19791_v21 = vld [vmem:[%s26609_s26 + $0x291] sm:$0xff] }
 0x3f3   : >> { %22827 = vmatmul.mubr.msk.f32.gmra.mrb[44].mxu1 %vm243_vm0, %v27806_v45  ;;  %23219 = vmatmul.mubr.msk.f32.gmra.mrb[44].mxu0 %vm243_vm0, %v19787_v63  ;;  %v19792_v45 = vld [vmem:[%s26609_s26 + $0x299] sm:$0xff] }
 0x3f4   : >> { %22829 = vmatprep.mubr.msk.f32.mxu1 %vm243_vm0, %v27809_v50  ;;  %23221 = vmatprep.mubr.msk.f32.mxu0 %vm243_vm0, %v19788_v8  ;;  %v19793_v50 = vld [vmem:[%s26609_s26 + $0x2a1] sm:$0xff] }
 0x3f7   : >> { %22830 = vmatmul.mubr.msk.f32.gmra.mrb[46].mxu1 %vm243_vm0, %v27820_v58  ;;  %23222 = vmatmul.mubr.msk.f32.gmra.mrb[46].mxu0 %vm243_vm0, %v19789_v10  ;;  %v19794_v58 = vld [vmem:[%s26609_s26 + $0x2a9] sm:$0xff] }
 0x3f8   : >> { %22832 = vmatprep.mubr.msk.f32.mxu1 %vm243_vm0, %v27823_v62  ;;  %23224 = vmatprep.mubr.msk.f32.mxu0 %vm243_vm0, %v19790_v19  ;;  %v19795_v62 = vld [vmem:[%s26609_s26 + $0x2b1] sm:$0xff] }
 0x3fb   : >> { %22833 = vmatmul.mubr.msk.f32.gmra.mrb[48].mxu1 %vm243_vm0, %v27834_v41  ;;  %23225 = vmatmul.mubr.msk.f32.gmra.mrb[48].mxu0 %vm243_vm0, %v19791_v21  ;;  %v19796_v41 = vld [vmem:[%s26609_s26 + $0x2b9] sm:$0xff] }
 0x3fc   : >> { %22835 = vmatprep.mubr.msk.f32.mxu1 %vm243_vm0, %v27837_v36  ;;  %23227 = vmatprep.mubr.msk.f32.mxu0 %vm243_vm0, %v19792_v45  ;;  %v19797_v36 = vld [vmem:[%s26609_s26 + $0x2c1] sm:$0xff] }
 0x3ff   : >> { %22836 = vmatmul.mubr.msk.f32.gmra.mrb[50].mxu1 %vm243_vm0, %v27848_v34  ;;  %23228 = vmatmul.mubr.msk.f32.gmra.mrb[50].mxu0 %vm243_vm0, %v19793_v50  ;;  %v19798_v34 = vld [vmem:[%s26609_s26 + $0x2d9] sm:$0xff] }
 0x400   : >> { %22838 = vmatprep.mubr.msk.f32.mxu1 %vm243_vm0, %v27851_v42  ;;  %23230 = vmatprep.mubr.msk.f32.mxu0 %vm243_vm0, %v19794_v58  ;;  %v19799_v42 = vld [vmem:[%s26609_s26 + $0x2e1] sm:$0xff] }
 0x403   : >> { %22839 = vmatmul.mubr.msk.f32.gmra.mrb[52].mxu1 %vm243_vm0, %v27862_v4  ;;  %23231 = vmatmul.mubr.msk.f32.gmra.mrb[52].mxu0 %vm243_vm0, %v19795_v62  ;;  %v19800_v4 = vld [vmem:[%s26609_s26 + $0x2e9] sm:$0xff] }
 0x404   : >> { %22841 = vmatprep.mubr.msk.f32.mxu1 %vm243_vm0, %v27865_v57  ;;  %23233 = vmatprep.mubr.msk.f32.mxu0 %vm243_vm0, %v19796_v41  ;;  %v19801_v57 = vld [vmem:[%s26609_s26 + $0x2f1] sm:$0xff] }
 0x407   : >> { %22842 = vmatmul.mubr.msk.f32.gmra.mrb[54].mxu1 %vm243_vm0, %v27876_v6  ;;  %23234 = vmatmul.mubr.msk.f32.gmra.mrb[54].mxu0 %vm243_vm0, %v19797_v36  ;;  %v19802_v6 = vld [vmem:[%s26609_s26 + $0x2f9] sm:$0xff] }
 0x408   : >> { %22844 = vmatprep.mubr.msk.f32.mxu1 %vm243_vm0, %v27879_v12  ;;  %23236 = vmatprep.mubr.msk.f32.mxu0 %vm243_vm0, %v19798_v34  ;;  %v19803_v12 = vld [vmem:[%s26609_s26 + $0x301] sm:$0xff] }
 0x40b   : >> { %22845 = vmatmul.mubr.msk.f32.gmra.mrb[56].mxu1 %vm243_vm0, %v27890_v33  ;;  %23237 = vmatmul.mubr.msk.f32.gmra.mrb[56].mxu0 %vm243_vm0, %v19799_v42  ;;  %v19804_v33 = vld [vmem:[%s26609_s26 + $0x309] sm:$0xff] }
 0x40c   : >> { %22847 = vmatprep.mubr.msk.f32.mxu1 %vm243_vm0, %v27893_v38  ;;  %23239 = vmatprep.mubr.msk.f32.mxu0 %vm243_vm0, %v19800_v4  ;;  %v32731_v38 = vld [vmem:[#allocation16_spill] sm:$0xff] }
 0x40f   : >> { %22848 = vmatmul.mubr.msk.f32.gmra.mrb[58].mxu1 %vm243_vm0, %v27904_v56  ;;  %23240 = vmatmul.mubr.msk.f32.gmra.mrb[58].mxu0 %vm243_vm0, %v19801_v57  ;;  %v19805_v56 = vld [vmem:[%s26609_s26 + $0x311] sm:$0xff]  ;;  %s28502_s26 = smov (%p1898_p11), 0  }
 0x410   : >> { %22850 = vmatprep.mubr.msk.f32.mxu1 %vm243_vm0, %v27907_v18  ;;  %23242 = vmatprep.mubr.msk.f32.mxu0 %vm243_vm0, %v19802_v6 }
 0x413   : >> { %22851 = vmatmul.mubr.msk.f32.gmra.mrb[60].mxu1 %vm243_vm0, %v27918_v44  ;;  %23243 = vmatmul.mubr.msk.f32.gmra.mrb[60].mxu0 %vm243_vm0, %v19803_v12 }
 0x414   : >> { %22853 = vmatprep.mubr.msk.f32.mxu1 %vm243_vm0, %v32731_v38  ;;  %23245 = vmatprep.mubr.msk.f32.mxu0 %vm243_vm0, %v19804_v33 }
 0x417   : >> { %22854 = vmatmul.mubr.msk.f32.gmra.mrb[62].mxu1 %vm243_vm0, %v32732_v14  ;;  %23246 = vmatmul.mubr.msk.f32.gmra.mrb[62].mxu0 %vm243_vm0, %v19805_v56 }
 0x42e   : >> { %v22664_v18 = vpop.f32.mrb[0].mxu1 }
 0x42f   : >> { %v4224_v16 = vpop.f32.mrb[1].mxu1 }
 0x432   : >> { %v22667_v59 = vpop.f32.mrb[2].mxu1 }
 0x433   : >> { %v4234_v54 = vpop.f32.mrb[3].mxu1 }
 0x436   : >> { %v22670_v35 = vpop.f32.mrb[4].mxu1 }
 0x437   : >> { %v4244_v32 = vpop.f32.mrb[5].mxu1 }
 0x43a   : >> { %v22673_v44 = vpop.f32.mrb[6].mxu1 }
 0x43b   : >> { %v4254_v51 = vpop.f32.mrb[7].mxu1 }
 0x43e   : >> { %v28226_v52 = vpop.f32.mrb[8].mxu1 }
 0x43f   : >> { %v28228_v49 = vpop.f32.mrb[9].mxu1 }
 0x442   : >> { %v28230_v0 = vpop.f32.mrb[10].mxu1 }
 0x443   : >> { %v28232_v31 = vpop.f32.mrb[11].mxu1 }
 0x446   : >> { %v28234_v5 = vpop.f32.mrb[12].mxu1 }
 0x447   : >> { %v28236_v13 = vpop.f32.mrb[13].mxu1 }
 0x44a   : >> { %v28238_v17 = vpop.f32.mrb[14].mxu1 }
 0x44b   : >> { %v28240_v2 = vpop.f32.mrb[15].mxu1 }
 0x44e   : >> { %v28242_v43 = vpop.f32.mrb[16].mxu1 }
 0x44f   : >> { %v28244_v9 = vpop.f32.mrb[17].mxu1 }
 0x452   : >> { %v28246_v20 = vpop.f32.mrb[18].mxu1 }
 0x453   : >> { %v28248_v53 = vpop.f32.mrb[19].mxu1 }
 0x456   : >> { %v28250_v25 = vpop.f32.mrb[20].mxu1 }
 0x457   : >> { %v28252_v1 = vpop.f32.mrb[21].mxu1 }
 0x45a   : >> { %v28254_v47 = vpop.f32.mrb[22].mxu1 }
 0x45b   : >> { %v28256_v7 = vpop.f32.mrb[23].mxu1 }
 0x45e   : >> { %v28258_v15 = vpop.f32.mrb[24].mxu1 }
 0x45f   : >> { %v28260_v60 = vpop.f32.mrb[25].mxu1 }
 0x462   : >> { %v28262_v11 = vpop.f32.mrb[26].mxu1 }
 0x463   : >> { %v28264_v39 = vpop.f32.mrb[27].mxu1 }
 0x466   : >> { %v28266_v22 = vpop.f32.mrb[28].mxu1 }
 0x467   : >> { %v28268_v23 = vpop.f32.mrb[29].mxu1 }
 0x46a   : >> { %v28270_v24 = vpop.f32.mrb[30].mxu1 }
 0x46b   : >> { %v28272_v26 = vpop.f32.mrb[31].mxu1 }
 0x46e   : >> { %v23154_v27 = vpop.f32.mrb[0].mxu0 }
 0x46f   : >> { %v24132_v28 = vadd.f32 %v23154_v27, %v22664_v18  ;;  %v7762_v29 = vpop.f32.mrb[1].mxu0 }
 0x470   : >> { %v24133_v30 = vadd.f32 %v7762_v29, %v4224_v16 }
 0x471   : >> { %v8152_v40 = vadd.f32 %v24132_v28, %v32733_v37 }
 0x472   : >> { %v8151_v46 = vadd.f32 %v24133_v30, %v32733_v37  ;;  %v23157_v48 = vpop.f32.mrb[2].mxu0 }
 0x473   : >> { %v8216_v3 = vmax.f32 %v8152_v40, 0.0  ;;  %v24134_v55 = vadd.f32 %v23157_v48, %v22667_v59  ;;  %v7772_v61 = vpop.f32.mrb[3].mxu0 }
 0x474   : >> { %v8215_v63 = vmax.f32 %v8151_v46, 0.0  ;;  %v24135_v8 = vadd.f32 %v7772_v61, %v4234_v54 }
 0x475   : >> { %19875 = vst.msk [vmem:[%s28278_s13 + $0x60] sm:$0xff] %vm243_vm0, %v8216_v3  ;;  %v8154_v10 = vadd.f32 %v24134_v55, %v32733_v37 }
 0x476   : >> { %19874 = vst.msk [vmem:[%s28278_s13 + $0x58] sm:$0xff] %vm243_vm0, %v8215_v63  ;;  %v8153_v19 = vadd.f32 %v24135_v8, %v32733_v37  ;;  %v23160_v21 = vpop.f32.mrb[4].mxu0 }
 0x477   : >> { %v8218_v45 = vmax.f32 %v8154_v10, 0.0  ;;  %v24136_v50 = vadd.f32 %v23160_v21, %v22670_v35  ;;  %v7782_v58 = vpop.f32.mrb[5].mxu0 }
 0x478   : >> { %v8217_v62 = vmax.f32 %v8153_v19, 0.0  ;;  %v24137_v41 = vadd.f32 %v7782_v58, %v4244_v32 }
 0x479   : >> { %19877 = vst.msk [vmem:[%s28278_s13 + $0x70] sm:$0xff] %vm243_vm0, %v8218_v45  ;;  %v8156_v36 = vadd.f32 %v24136_v50, %v32733_v37 }
 0x47a   : >> { %19876 = vst.msk [vmem:[%s28278_s13 + $0x68] sm:$0xff] %vm243_vm0, %v8217_v62  ;;  %v8155_v34 = vadd.f32 %v24137_v41, %v32733_v37  ;;  %v23163_v42 = vpop.f32.mrb[6].mxu0 }
 0x47b   : >> { %v8220_v4 = vmax.f32 %v8156_v36, 0.0  ;;  %v24138_v57 = vadd.f32 %v23163_v42, %v22673_v44  ;;  %v7792_v6 = vpop.f32.mrb[7].mxu0 }
 0x47c   : >> { %v8219_v12 = vmax.f32 %v8155_v34, 0.0  ;;  %v24139_v33 = vadd.f32 %v7792_v6, %v4254_v51 }
 0x47d   : >> { %19879 = vst.msk [vmem:[%s28278_s13 + $0x80] sm:$0xff] %vm243_vm0, %v8220_v4  ;;  %v8158_v38 = vadd.f32 %v24138_v57, %v32733_v37 }
 0x47e   : >> { %19878 = vst.msk [vmem:[%s28278_s13 + $0x78] sm:$0xff] %vm243_vm0, %v8219_v12  ;;  %v8157_v56 = vadd.f32 %v24139_v33, %v32733_v37  ;;  %v23166_v14 = vpop.f32.mrb[8].mxu0 }
 0x47f   : >> { %v8222_v18 = vmax.f32 %v8158_v38, 0.0  ;;  %v24140_v16 = vadd.f32 %v23166_v14, %v28226_v52  ;;  %v7802_v59 = vpop.f32.mrb[9].mxu0 }
 0x480   : >> { %v8221_v54 = vmax.f32 %v8157_v56, 0.0  ;;  %v24141_v35 = vadd.f32 %v7802_v59, %v28228_v49 }
 0x481   : >> { %19881 = vst.msk [vmem:[%s28278_s13 + $0x90] sm:$0xff] %vm243_vm0, %v8222_v18  ;;  %v8160_v32 = vadd.f32 %v24140_v16, %v32733_v37 }
 0x482   : >> { %19880 = vst.msk [vmem:[%s28278_s13 + $0x88] sm:$0xff] %vm243_vm0, %v8221_v54  ;;  %v8159_v44 = vadd.f32 %v24141_v35, %v32733_v37  ;;  %v23169_v51 = vpop.f32.mrb[10].mxu0 }
 0x483   : >> { %v8224_v27 = vmax.f32 %v8160_v32, 0.0  ;;  %v24142_v28 = vadd.f32 %v23169_v51, %v28230_v0  ;;  %v7812_v52 = vpop.f32.mrb[11].mxu0 }
 0x484   : >> { %v8223_v29 = vmax.f32 %v8159_v44, 0.0  ;;  %v24143_v30 = vadd.f32 %v7812_v52, %v28232_v31 }
 0x485   : >> { %19883 = vst.msk [vmem:[%s28278_s13 + $0xb0] sm:$0xff] %vm243_vm0, %v8224_v27  ;;  %v8162_v49 = vadd.f32 %v24142_v28, %v32733_v37 }
 0x486   : >> { %19882 = vst.msk [vmem:[%s28278_s13 + $0xa8] sm:$0xff] %vm243_vm0, %v8223_v29  ;;  %v8161_v40 = vadd.f32 %v24143_v30, %v32733_v37  ;;  %v23172_v46 = vpop.f32.mrb[12].mxu0 }
 0x487   : >> { %v8226_v48 = vmax.f32 %v8162_v49, 0.0  ;;  %v24144_v3 = vadd.f32 %v23172_v46, %v28234_v5  ;;  %v7822_v0 = vpop.f32.mrb[13].mxu0 }
 0x488   : >> { %v8225_v55 = vmax.f32 %v8161_v40, 0.0  ;;  %v24145_v61 = vadd.f32 %v7822_v0, %v28236_v13 }
 0x489   : >> { %19885 = vst.msk [vmem:[%s28278_s13 + $0xc0] sm:$0xff] %vm243_vm0, %v8226_v48  ;;  %v8164_v31 = vadd.f32 %v24144_v3, %v32733_v37 }
 0x48a   : >> { %19884 = vst.msk [vmem:[%s28278_s13 + $0xb8] sm:$0xff] %vm243_vm0, %v8225_v55  ;;  %v8163_v63 = vadd.f32 %v24145_v61, %v32733_v37  ;;  %v23175_v8 = vpop.f32.mrb[14].mxu0 }
 0x48b   : >> { %v8228_v10 = vmax.f32 %v8164_v31, 0.0  ;;  %v24146_v19 = vadd.f32 %v23175_v8, %v28238_v17  ;;  %v7832_v5 = vpop.f32.mrb[15].mxu0 }
 0x48c   : >> { %v8227_v21 = vmax.f32 %v8163_v63, 0.0  ;;  %v24147_v45 = vadd.f32 %v7832_v5, %v28240_v2 }
 0x48d   : >> { %19887 = vst.msk [vmem:[%s28278_s13 + $0xd0] sm:$0xff] %vm243_vm0, %v8228_v10  ;;  %v8166_v13 = vadd.f32 %v24146_v19, %v32733_v37 }
 0x48e   : >> { %19886 = vst.msk [vmem:[%s28278_s13 + $0xc8] sm:$0xff] %vm243_vm0, %v8227_v21  ;;  %v8165_v50 = vadd.f32 %v24147_v45, %v32733_v37  ;;  %v23178_v58 = vpop.f32.mrb[16].mxu0 }
 0x48f   : >> { %v8230_v62 = vmax.f32 %v8166_v13, 0.0  ;;  %v24148_v41 = vadd.f32 %v23178_v58, %v28242_v43  ;;  %v7842_v17 = vpop.f32.mrb[17].mxu0 }
 0x490   : >> { %v8229_v36 = vmax.f32 %v8165_v50, 0.0  ;;  %v24149_v34 = vadd.f32 %v7842_v17, %v28244_v9 }
 0x491   : >> { %19889 = vst.msk [vmem:[%s28278_s13 + $0xe0] sm:$0xff] %vm243_vm0, %v8230_v62  ;;  %v8168_v2 = vadd.f32 %v24148_v41, %v32733_v37 }
 0x492   : >> { %19888 = vst.msk [vmem:[%s28278_s13 + $0xd8] sm:$0xff] %vm243_vm0, %v8229_v36  ;;  %v8167_v42 = vadd.f32 %v24149_v34, %v32733_v37  ;;  %v23181_v4 = vpop.f32.mrb[18].mxu0 }
 0x493   : >> { %v8232_v57 = vmax.f32 %v8168_v2, 0.0  ;;  %v24150_v6 = vadd.f32 %v23181_v4, %v28246_v20  ;;  %v7852_v43 = vpop.f32.mrb[19].mxu0 }
 0x494   : >> { %v8231_v12 = vmax.f32 %v8167_v42, 0.0  ;;  %v24151_v33 = vadd.f32 %v7852_v43, %v28248_v53 }
 0x495   : >> { %19891 = vst.msk [vmem:[%s28278_s13 + $0x100] sm:$0xff] %vm243_vm0, %v8232_v57  ;;  %v8170_v9 = vadd.f32 %v24150_v6, %v32733_v37 }
 0x496   : >> { %19890 = vst.msk [vmem:[%s28278_s13 + $0xf8] sm:$0xff] %vm243_vm0, %v8231_v12  ;;  %v8169_v38 = vadd.f32 %v24151_v33, %v32733_v37  ;;  %v23184_v56 = vpop.f32.mrb[20].mxu0 }
 0x497   : >> { %v8234_v14 = vmax.f32 %v8170_v9, 0.0  ;;  %v24152_v18 = vadd.f32 %v23184_v56, %v28250_v25  ;;  %v7862_v20 = vpop.f32.mrb[21].mxu0 }
 0x498   : >> { %v8233_v16 = vmax.f32 %v8169_v38, 0.0  ;;  %v24153_v59 = vadd.f32 %v7862_v20, %v28252_v1 }
 0x499   : >> { %19893 = vst.msk [vmem:[%s28278_s13 + $0x110] sm:$0xff] %vm243_vm0, %v8234_v14  ;;  %v8172_v53 = vadd.f32 %v24152_v18, %v32733_v37 }
 0x49a   : >> { %19892 = vst.msk [vmem:[%s28278_s13 + $0x108] sm:$0xff] %vm243_vm0, %v8233_v16  ;;  %v8171_v54 = vadd.f32 %v24153_v59, %v32733_v37  ;;  %v23187_v35 = vpop.f32.mrb[22].mxu0 }
 0x49b   : >> { %v8236_v32 = vmax.f32 %v8172_v53, 0.0  ;;  %v24154_v44 = vadd.f32 %v23187_v35, %v28254_v47  ;;  %v7872_v25 = vpop.f32.mrb[23].mxu0 }
 0x49c   : >> { %v8235_v51 = vmax.f32 %v8171_v54, 0.0  ;;  %v24155_v27 = vadd.f32 %v7872_v25, %v28256_v7 }
 0x49d   : >> { %19895 = vst.msk [vmem:[%s28278_s13 + $0x120] sm:$0xff] %vm243_vm0, %v8236_v32  ;;  %v8174_v1 = vadd.f32 %v24154_v44, %v32733_v37 }
 0x49e   : >> { %19894 = vst.msk [vmem:[%s28278_s13 + $0x118] sm:$0xff] %vm243_vm0, %v8235_v51  ;;  %v8173_v28 = vadd.f32 %v24155_v27, %v32733_v37  ;;  %v23190_v52 = vpop.f32.mrb[24].mxu0 }
 0x49f   : >> { %v8238_v29 = vmax.f32 %v8174_v1, 0.0  ;;  %v24156_v30 = vadd.f32 %v23190_v52, %v28258_v15  ;;  %v7882_v47 = vpop.f32.mrb[25].mxu0 }
 0x4a0   : >> { %v8237_v49 = vmax.f32 %v8173_v28, 0.0  ;;  %v24157_v40 = vadd.f32 %v7882_v47, %v28260_v60 }
 0x4a1   : >> { %19897 = vst.msk [vmem:[%s28278_s13 + $0x130] sm:$0xff] %vm243_vm0, %v8238_v29  ;;  %v8176_v7 = vadd.f32 %v24156_v30, %v32733_v37 }
 0x4a2   : >> { %19896 = vst.msk [vmem:[%s28278_s13 + $0x128] sm:$0xff] %vm243_vm0, %v8237_v49  ;;  %v8175_v46 = vadd.f32 %v24157_v40, %v32733_v37  ;;  %v23193_v48 = vpop.f32.mrb[26].mxu0 }
 0x4a3   : >> { %v8240_v3 = vmax.f32 %v8176_v7, 0.0  ;;  %v24158_v0 = vadd.f32 %v23193_v48, %v28262_v11  ;;  %v7892_v15 = vpop.f32.mrb[27].mxu0 }
 0x4a4   : >> { %v8239_v55 = vmax.f32 %v8175_v46, 0.0  ;;  %v24159_v61 = vadd.f32 %v7892_v15, %v28264_v39 }
 0x4a5   : >> { %19899 = vst.msk [vmem:[%s28278_s13 + $0x150] sm:$0xff] %vm243_vm0, %v8240_v3  ;;  %v8178_v60 = vadd.f32 %v24158_v0, %v32733_v37 }
 0x4a6   : >> { %19898 = vst.msk [vmem:[%s28278_s13 + $0x148] sm:$0xff] %vm243_vm0, %v8239_v55  ;;  %v8177_v31 = vadd.f32 %v24159_v61, %v32733_v37  ;;  %v23196_v63 = vpop.f32.mrb[28].mxu0 }
 0x4a7   : >> { %v8242_v8 = vmax.f32 %v8178_v60, 0.0  ;;  %v24160_v10 = vadd.f32 %v23196_v63, %v28266_v22  ;;  %v7902_v11 = vpop.f32.mrb[29].mxu0 }
 0x4a8   : >> { %v8241_v19 = vmax.f32 %v8177_v31, 0.0  ;;  %v24161_v5 = vadd.f32 %v7902_v11, %v28268_v23 }
 0x4a9   : >> { %19901 = vst.msk [vmem:[%s28278_s13 + $0x160] sm:$0xff] %vm243_vm0, %v8242_v8  ;;  %v8180_v39 = vadd.f32 %v24160_v10, %v32733_v37 }
 0x4aa   : >> { %19900 = vst.msk [vmem:[%s28278_s13 + $0x158] sm:$0xff] %vm243_vm0, %v8241_v19  ;;  %v8179_v21 = vadd.f32 %v24161_v5, %v32733_v37  ;;  %v23199_v45 = vpop.f32.mrb[30].mxu0 }
 0x4ab   : >> { %v8244_v13 = vmax.f32 %v8180_v39, 0.0  ;;  %v24162_v50 = vadd.f32 %v23199_v45, %v28270_v24  ;;  %v7912_v58 = vpop.f32.mrb[31].mxu0 }
 0x4ac   : >> { %v8243_v22 = vmax.f32 %v8179_v21, 0.0  ;;  %v24163_v62 = vadd.f32 %v7912_v58, %v28272_v26 }
 0x4ad   : >> { %19903 = vst.msk [vmem:[%s28278_s13 + $0x170] sm:$0xff] %vm243_vm0, %v8244_v13  ;;  %v8182_v23 = vadd.f32 %v24162_v50, %v32733_v37 }
 0x4ae   : >> { %19902 = vst.msk [vmem:[%s28278_s13 + $0x168] sm:$0xff] %vm243_vm0, %v8243_v22  ;;  %v8181_v41 = vadd.f32 %v24163_v62, %v32733_v37  ;;  %v22810_v17 = vpop.f32.mrb[32].mxu1  ;;  %v23202_v36 = vpop.f32.mrb[32].mxu0 }
 0x4af   : >> { %v8246_v34 = vmax.f32 %v8182_v23, 0.0  ;;  %v24164_v2 = vadd.f32 %v23202_v36, %v22810_v17  ;;  %v5091_v42 = vpop.f32.mrb[33].mxu1  ;;  %v7922_v24 = vpop.f32.mrb[33].mxu0 }
 0x4b0   : >> { %v8245_v4 = vmax.f32 %v8181_v41, 0.0  ;;  %v24165_v57 = vadd.f32 %v7922_v24, %v5091_v42 }
 0x4b1   : >> { %19905 = vst.msk [vmem:[%s28278_s13 + $0x180] sm:$0xff] %vm243_vm0, %v8246_v34  ;;  %v8184_v26 = vadd.f32 %v24164_v2, %v32733_v37 }
 0x4b2   : >> { %19904 = vst.msk [vmem:[%s28278_s13 + $0x178] sm:$0xff] %vm243_vm0, %v8245_v4  ;;  %v8183_v6 = vadd.f32 %v24165_v57, %v32733_v37  ;;  %v22813_v43 = vpop.f32.mrb[34].mxu1  ;;  %v23205_v12 = vpop.f32.mrb[34].mxu0 }
 0x4b3   : >> { %v8248_v33 = vmax.f32 %v8184_v26, 0.0  ;;  %v24166_v9 = vadd.f32 %v23205_v12, %v22813_v43  ;;  %v5101_v38 = vpop.f32.mrb[35].mxu1  ;;  %v7932_v56 = vpop.f32.mrb[35].mxu0 }
 0x4b4   : >> { %v8247_v14 = vmax.f32 %v8183_v6, 0.0  ;;  %v24167_v18 = vadd.f32 %v7932_v56, %v5101_v38 }
 0x4b5   : >> { %19907 = vst.msk [vmem:[%s28278_s13 + $0x1a0] sm:$0xff] %vm243_vm0, %v8248_v33  ;;  %v8186_v20 = vadd.f32 %v24166_v9, %v32733_v37 }
 0x4b6   : >> { %19906 = vst.msk [vmem:[%s28278_s13 + $0x198] sm:$0xff] %vm243_vm0, %v8247_v14  ;;  %v8185_v16 = vadd.f32 %v24167_v18, %v32733_v37  ;;  %v22816_v59 = vpop.f32.mrb[36].mxu1  ;;  %v23208_v53 = vpop.f32.mrb[36].mxu0 }
 0x4b7   : >> { %v8250_v54 = vmax.f32 %v8186_v20, 0.0  ;;  %v24168_v35 = vadd.f32 %v23208_v53, %v22816_v59  ;;  %v5111_v32 = vpop.f32.mrb[37].mxu1  ;;  %v7942_v44 = vpop.f32.mrb[37].mxu0 }
 0x4b8   : >> { %v8249_v25 = vmax.f32 %v8185_v16, 0.0  ;;  %v24169_v51 = vadd.f32 %v7942_v44, %v5111_v32 }
 0x4b9   : >> { %19909 = vst.msk [vmem:[%s28278_s13 + $0x1b0] sm:$0xff] %vm243_vm0, %v8250_v54  ;;  %v8188_v27 = vadd.f32 %v24168_v35, %v32733_v37 }
 0x4ba   : >> { %19908 = vst.msk [vmem:[%s28278_s13 + $0x1a8] sm:$0xff] %vm243_vm0, %v8249_v25  ;;  %v8187_v1 = vadd.f32 %v24169_v51, %v32733_v37  ;;  %v22819_v28 = vpop.f32.mrb[38].mxu1  ;;  %v23211_v52 = vpop.f32.mrb[38].mxu0 }
 0x4bb   : >> { %v8252_v29 = vmax.f32 %v8188_v27, 0.0  ;;  %v24170_v30 = vadd.f32 %v23211_v52, %v22819_v28  ;;  %v5121_v47 = vpop.f32.mrb[39].mxu1  ;;  %v7952_v49 = vpop.f32.mrb[39].mxu0 }
 0x4bc   : >> { %v8251_v40 = vmax.f32 %v8187_v1, 0.0  ;;  %v24171_v7 = vadd.f32 %v7952_v49, %v5121_v47 }
 0x4bd   : >> { %19911 = vst.msk [vmem:[%s28278_s13 + $0x1c0] sm:$0xff] %vm243_vm0, %v8252_v29  ;;  %v8190_v46 = vadd.f32 %v24170_v30, %v32733_v37 }
 0x4be   : >> { %19910 = vst.msk [vmem:[%s28278_s13 + $0x1b8] sm:$0xff] %vm243_vm0, %v8251_v40  ;;  %v8189_v48 = vadd.f32 %v24171_v7, %v32733_v37  ;;  %v22822_v3 = vpop.f32.mrb[40].mxu1  ;;  %v23214_v0 = vpop.f32.mrb[40].mxu0 }
 0x4bf   : >> { %v8254_v15 = vmax.f32 %v8190_v46, 0.0  ;;  %v24172_v55 = vadd.f32 %v23214_v0, %v22822_v3  ;;  %v5131_v61 = vpop.f32.mrb[41].mxu1  ;;  %v7962_v60 = vpop.f32.mrb[41].mxu0 }
 0x4c0   : >> { %v8253_v31 = vmax.f32 %v8189_v48, 0.0  ;;  %v24173_v63 = vadd.f32 %v7962_v60, %v5131_v61 }
 0x4c1   : >> { %19913 = vst.msk [vmem:[%s28278_s13 + $0x1d0] sm:$0xff] %vm243_vm0, %v8254_v15  ;;  %v8192_v8 = vadd.f32 %v24172_v55, %v32733_v37 }
 0x4c2   : >> { %19912 = vst.msk [vmem:[%s28278_s13 + $0x1c8] sm:$0xff] %vm243_vm0, %v8253_v31  ;;  %v8191_v10 = vadd.f32 %v24173_v63, %v32733_v37  ;;  %v22825_v11 = vpop.f32.mrb[42].mxu1  ;;  %v23217_v19 = vpop.f32.mrb[42].mxu0 }
 0x4c3   : >> { %v8256_v5 = vmax.f32 %v8192_v8, 0.0  ;;  %v24174_v39 = vadd.f32 %v23217_v19, %v22825_v11  ;;  %v5141_v21 = vpop.f32.mrb[43].mxu1  ;;  %v7972_v45 = vpop.f32.mrb[43].mxu0 }
 0x4c4   : >> { %v8255_v13 = vmax.f32 %v8191_v10, 0.0  ;;  %v24175_v50 = vadd.f32 %v7972_v45, %v5141_v21 }
 0x4c5   : >> { %19915 = vst.msk [vmem:[%s28278_s13 + $0x1f0] sm:$0xff] %vm243_vm0, %v8256_v5  ;;  %v8194_v58 = vadd.f32 %v24174_v39, %v32733_v37 }
 0x4c6   : >> { %19914 = vst.msk [vmem:[%s28278_s13 + $0x1e8] sm:$0xff] %vm243_vm0, %v8255_v13  ;;  %v8193_v22 = vadd.f32 %v24175_v50, %v32733_v37  ;;  %v22828_v62 = vpop.f32.mrb[44].mxu1  ;;  %v23220_v23 = vpop.f32.mrb[44].mxu0 }
 0x4c7   : >> { %v8258_v41 = vmax.f32 %v8194_v58, 0.0  ;;  %v24176_v17 = vadd.f32 %v23220_v23, %v22828_v62  ;;  %v5151_v36 = vpop.f32.mrb[45].mxu1  ;;  %v7982_v34 = vpop.f32.mrb[45].mxu0 }
 0x4c8   : >> { %v8257_v2 = vmax.f32 %v8193_v22, 0.0  ;;  %v24177_v42 = vadd.f32 %v7982_v34, %v5151_v36 }
 0x4c9   : >> { %19917 = vst.msk [vmem:[%s28278_s13 + $0x200] sm:$0xff] %vm243_vm0, %v8258_v41  ;;  %v8196_v24 = vadd.f32 %v24176_v17, %v32733_v37 }
 0x4ca   : >> { %19916 = vst.msk [vmem:[%s28278_s13 + $0x1f8] sm:$0xff] %vm243_vm0, %v8257_v2  ;;  %v8195_v4 = vadd.f32 %v24177_v42, %v32733_v37  ;;  %v22831_v57 = vpop.f32.mrb[46].mxu1  ;;  %v23223_v26 = vpop.f32.mrb[46].mxu0 }
 0x4cb   : >> { %v8260_v6 = vmax.f32 %v8196_v24, 0.0  ;;  %v24178_v43 = vadd.f32 %v23223_v26, %v22831_v57  ;;  %v5161_v12 = vpop.f32.mrb[47].mxu1  ;;  %v7992_v33 = vpop.f32.mrb[47].mxu0 }
 0x4cc   : >> { %v8259_v9 = vmax.f32 %v8195_v4, 0.0  ;;  %v24179_v38 = vadd.f32 %v7992_v33, %v5161_v12 }
 0x4cd   : >> { %19919 = vst.msk [vmem:[%s28278_s13 + $0x210] sm:$0xff] %vm243_vm0, %v8260_v6  ;;  %v8198_v56 = vadd.f32 %v24178_v43, %v32733_v37 }
 0x4ce   : >> { %19918 = vst.msk [vmem:[%s28278_s13 + $0x208] sm:$0xff] %vm243_vm0, %v8259_v9  ;;  %v8197_v14 = vadd.f32 %v24179_v38, %v32733_v37  ;;  %v22834_v18 = vpop.f32.mrb[48].mxu1  ;;  %v23226_v20 = vpop.f32.mrb[48].mxu0 }
 0x4cf   : >> { %v8262_v16 = vmax.f32 %v8198_v56, 0.0  ;;  %v24180_v59 = vadd.f32 %v23226_v20, %v22834_v18  ;;  %v5171_v53 = vpop.f32.mrb[49].mxu1  ;;  %v8002_v54 = vpop.f32.mrb[49].mxu0 }
 0x4d0   : >> { %v8261_v35 = vmax.f32 %v8197_v14, 0.0  ;;  %v24181_v32 = vadd.f32 %v8002_v54, %v5171_v53 }
 0x4d1   : >> { %19921 = vst.msk [vmem:[%s28278_s13 + $0x220] sm:$0xff] %vm243_vm0, %v8262_v16  ;;  %v8200_v44 = vadd.f32 %v24180_v59, %v32733_v37 }
 0x4d2   : >> { %19920 = vst.msk [vmem:[%s28278_s13 + $0x218] sm:$0xff] %vm243_vm0, %v8261_v35  ;;  %v8199_v25 = vadd.f32 %v24181_v32, %v32733_v37  ;;  %v22837_v51 = vpop.f32.mrb[50].mxu1  ;;  %v23229_v27 = vpop.f32.mrb[50].mxu0 }
 0x4d3   : >> { %v8264_v1 = vmax.f32 %v8200_v44, 0.0  ;;  %v24182_v28 = vadd.f32 %v23229_v27, %v22837_v51  ;;  %v5181_v52 = vpop.f32.mrb[51].mxu1  ;;  %v8012_v29 = vpop.f32.mrb[51].mxu0 }
 0x4d4   : >> { %v8263_v30 = vmax.f32 %v8199_v25, 0.0  ;;  %v24183_v47 = vadd.f32 %v8012_v29, %v5181_v52 }
 0x4d5   : >> { %19923 = vst.msk [vmem:[%s28278_s13 + $0x240] sm:$0xff] %vm243_vm0, %v8264_v1  ;;  %v8202_v49 = vadd.f32 %v24182_v28, %v32733_v37 }
 0x4d6   : >> { %19922 = vst.msk [vmem:[%s28278_s13 + $0x238] sm:$0xff] %vm243_vm0, %v8263_v30  ;;  %v8201_v40 = vadd.f32 %v24183_v47, %v32733_v37  ;;  %v22840_v7 = vpop.f32.mrb[52].mxu1  ;;  %v23232_v46 = vpop.f32.mrb[52].mxu0 }
 0x4d7   : >> { %v8266_v48 = vmax.f32 %v8202_v49, 0.0  ;;  %v24184_v3 = vadd.f32 %v23232_v46, %v22840_v7  ;;  %v5191_v0 = vpop.f32.mrb[53].mxu1  ;;  %v8022_v15 = vpop.f32.mrb[53].mxu0 }
 0x4d8   : >> { %v8265_v55 = vmax.f32 %v8201_v40, 0.0  ;;  %v24185_v61 = vadd.f32 %v8022_v15, %v5191_v0  ;;  %v28500_v40 = vld [vmem:[%s32309_s4] ss:$0 sm:$0xff] (%p1898_p11) }
 0x4d9   : >> { %19925 = vst.msk [vmem:[%s28278_s13 + $0x250] sm:$0xff] %vm243_vm0, %v8266_v48  ;;  %v8204_v60 = vadd.f32 %v24184_v3, %v32733_v37  ;;  %32734 = vst [vmem:[#allocation12_spill] sm:$0xff] (%p1898_p11), %v28500_v40 }
 0x4da   : >> { %19924 = vst.msk [vmem:[%s28278_s13 + $0x248] sm:$0xff] %vm243_vm0, %v8265_v55  ;;  %v8203_v31 = vadd.f32 %v24185_v61, %v32733_v37  ;;  %v22843_v63 = vpop.f32.mrb[54].mxu1  ;;  %v23235_v8 = vpop.f32.mrb[54].mxu0 }
 0x4db   : >> { %v8268_v10 = vmax.f32 %v8204_v60, 0.0  ;;  %v24186_v11 = vadd.f32 %v23235_v8, %v22843_v63  ;;  %v5201_v19 = vpop.f32.mrb[55].mxu1  ;;  %v8032_v5 = vpop.f32.mrb[55].mxu0 }
 0x4dc   : >> { %v8267_v39 = vmax.f32 %v8203_v31, 0.0  ;;  %v24187_v21 = vadd.f32 %v8032_v5, %v5201_v19 }
 0x4dd   : >> { %19927 = vst.msk [vmem:[%s28278_s13 + $0x260] sm:$0xff] %vm243_vm0, %v8268_v10  ;;  %v8206_v45 = vadd.f32 %v24186_v11, %v32733_v37 }
 0x4de   : >> { %19926 = vst.msk [vmem:[%s28278_s13 + $0x258] sm:$0xff] %vm243_vm0, %v8267_v39  ;;  %v8205_v13 = vadd.f32 %v24187_v21, %v32733_v37  ;;  %v22846_v50 = vpop.f32.mrb[56].mxu1  ;;  %v23238_v58 = vpop.f32.mrb[56].mxu0 }
 0x4df   : >> { %v8270_v22 = vmax.f32 %v8206_v45, 0.0  ;;  %v24188_v62 = vadd.f32 %v23238_v58, %v22846_v50  ;;  %v5211_v23 = vpop.f32.mrb[57].mxu1  ;;  %v8042_v41 = vpop.f32.mrb[57].mxu0 }
 0x4e0   : >> { %v8269_v17 = vmax.f32 %v8205_v13, 0.0  ;;  %v24189_v36 = vadd.f32 %v8042_v41, %v5211_v23 }
 0x4e1   : >> { %19929 = vst.msk [vmem:[%s28278_s13 + $0x270] sm:$0xff] %vm243_vm0, %v8270_v22  ;;  %v8208_v34 = vadd.f32 %v24188_v62, %v32733_v37 }
 0x4e2   : >> { %19928 = vst.msk [vmem:[%s28278_s13 + $0x268] sm:$0xff] %vm243_vm0, %v8269_v17  ;;  %v8207_v2 = vadd.f32 %v24189_v36, %v32733_v37  ;;  %v22849_v42 = vpop.f32.mrb[58].mxu1  ;;  %v23241_v24 = vpop.f32.mrb[58].mxu0 }
 0x4e3   : >> { %v8272_v4 = vmax.f32 %v8208_v34, 0.0  ;;  %v24190_v57 = vadd.f32 %v23241_v24, %v22849_v42  ;;  %v5221_v26 = vpop.f32.mrb[59].mxu1  ;;  %v8052_v6 = vpop.f32.mrb[59].mxu0 }
 0x4e4   : >> { %v8271_v43 = vmax.f32 %v8207_v2, 0.0  ;;  %v24191_v12 = vadd.f32 %v8052_v6, %v5221_v26 }
 0x4e5   : >> { %19931 = vst.msk [vmem:[%s28278_s13 + $0x290] sm:$0xff] %vm243_vm0, %v8272_v4  ;;  %v8210_v33 = vadd.f32 %v24190_v57, %v32733_v37 }
 0x4e6   : >> { %19930 = vst.msk [vmem:[%s28278_s13 + $0x288] sm:$0xff] %vm243_vm0, %v8271_v43  ;;  %v8209_v9 = vadd.f32 %v24191_v12, %v32733_v37  ;;  %v22852_v38 = vpop.f32.mrb[60].mxu1  ;;  %v23244_v56 = vpop.f32.mrb[60].mxu0 }
 0x4e7   : >> { %v8274_v14 = vmax.f32 %v8210_v33, 0.0  ;;  %v24192_v18 = vadd.f32 %v23244_v56, %v22852_v38  ;;  %v5231_v20 = vpop.f32.mrb[61].mxu1  ;;  %v8062_v16 = vpop.f32.mrb[61].mxu0 }
 0x4e8   : >> { %v8273_v59 = vmax.f32 %v8209_v9, 0.0  ;;  %v24193_v53 = vadd.f32 %v8062_v16, %v5231_v20 }
 0x4e9   : >> { %19933 = vst.msk [vmem:[%s28278_s13 + $0x2a0] sm:$0xff] %vm243_vm0, %v8274_v14  ;;  %v8212_v54 = vadd.f32 %v24192_v18, %v32733_v37 }
 0x4ea   : >> { %19932 = vst.msk [vmem:[%s28278_s13 + $0x298] sm:$0xff] %vm243_vm0, %v8273_v59  ;;  %v8211_v35 = vadd.f32 %v24193_v53, %v32733_v37  ;;  %v22855_v32 = vpop.f32.mrb[62].mxu1  ;;  %v23247_v44 = vpop.f32.mrb[62].mxu0 }
 0x4eb   : >> { %v8276_v25 = vmax.f32 %v8212_v54, 0.0  ;;  %v24194_v51 = vadd.f32 %v23247_v44, %v22855_v32  ;;  %v5241_v27 = vpop.f32.mrb[63].mxu1  ;;  %v8072_v1 = vpop.f32.mrb[63].mxu0 }
 0x4ec   : >> { %v8275_v28 = vmax.f32 %v8211_v35, 0.0  ;;  %v24195_v52 = vadd.f32 %v8072_v1, %v5241_v27  ;;  %1900 = sbr.rel (!%p1898_p11) target bundleno = 467 (0x1d3), region = 147 }
 0x4ed   : >> { %19935 = vst.msk [vmem:[%s28278_s13 + $0x2b0] sm:$0xff] %vm243_vm0, %v8276_v25  ;;  %v8214_v29 = vadd.f32 %v24194_v51, %v32733_v37 }
 0x4ee   : >> { %19934 = vst.msk [vmem:[%s28278_s13 + $0x2a8] sm:$0xff] %vm243_vm0, %v8275_v28  ;;  %v8213_v30 = vadd.f32 %v24195_v52, %v32733_v37 }
 0x4ef   : >> { %v8278_v47 = vmax.f32 %v8214_v29, 0.0 }
 0x4f0   : >> { %v8277_v49 = vmax.f32 %v8213_v30, 0.0 }
 0x4f1   : >> { %19937 = vst.msk [vmem:[%s28278_s13 + $0x2c0] sm:$0xff] %vm243_vm0, %v8278_v47 }
 0x4f2   : >> { %19936 = vst.msk [vmem:[%s28278_s13 + $0x2b8] sm:$0xff] %vm243_vm0, %v8277_v49 }
 0x4f3 LB: >> { %v19940_v7 = vld [vmem:[%s32308_s3 + $0x8] sm:$0xff]  ;;  %v28513_v37 = vld [vmem:[%s32308_s3 + $0x20] sm:$0xff]  ;;  %s19939_s7 = smul.u32 640, %s25387_s26  ;;  %v28539_v31 = vld [vmem:[%s32308_s3 + $0x30] sm:$0xff]  ;;  %vm17421_vm3 = vcmask 1041409   ;;  %vm17423_vm4 = vcmask 1043459   ;;  %s25387_s26 = sphi %s28502_s26, %s8350_s26  }
 0x4f4   : >> { %v8418_v46 = vld [vmem:[%s32308_s3] sm:$0xff]  ;;  %23248 = vmatprep.subr.mxu1 %v19940_v7  ;;  %23640 = vmatprep.subr.mxu0 %v28513_v37  ;;  %v20458_v48 = vld [vmem:[%s32308_s3 + $0x28] sm:$0xff]  ;;  %v28544_v63 = vld [vmem:[%s32308_s3 + $0x10] sm:$0xff]  ;;  %vm17425_vm5 = vcmask 1045509   ;;  %vm17427_vm6 = vcmask 1047559   ;;  %s25410_s2 = smov 32  }
 0x4f5   : >> { %23249 = vmatpush3.msra.mxu1 %v19940_v7  ;;  %23641 = vmatpush3.msra.mxu0 %v28513_v37  ;;  %s28524_s9 = scalar_lea.vmem [#allocation3], %s19939_s7  ;;  %v28657_v54 = vld [vmem:[%s32308_s3 + $0x38] sm:$0xff]  ;;  %s25411_s28 = smov 40   ;;  %vm18635_vm7 = vcmask 130048   ;;  %vm18637_vm8 = vcmask 195584   ;;  %vm18639_vm9 = vcmask 261120  }
 0x4f6   : >> { %23346 = vmatprep.subr.mxu1 %v8418_v46  ;;  %23738 = vmatprep.subr.mxu0 %v20458_v48  ;;  %s25412_s7 = smov 16   ;;  %s25414_s10 = smov 48   ;;  %vm18641_vm10 = vcmask 326656   ;;  %vm18643_vm11 = vcmask 392192   ;;  %vm18645_vm12 = vcmask 457728   ;;  %vm18647_vm13 = vcmask 523264  }
 0x4f7   : >> { %s25415_s16 = smov 56   ;;  %s25416_s11 = smov 24   ;;  %vm18649_vm14 = vcmask 588800   ;;  %vm18651_vm15 = vcmask 654336   ;;  %vm18653_vm1 = vcmask 719872   ;;  %vm18655_vm2 = vcmask 785408  }
 0x4f8   : >> { %s25417_s13 = smov 64   ;;  %s25418_s17 = smov 72  }
 0x4f9   : >> { %v8419_v3 = vld [vmem:[%s28524_s9 + $0x8] sm:$0xff]  ;;  %v20265_v0 = vld [vmem:[%s28524_s9 + $0x58] sm:$0xff]  ;;  %v8420_v15 = vld [vmem:[%s28524_s9 + $0x10] sm:$0xff]  ;;  %s25419_s25 = smov 80   ;;  %s25420_s12 = smov 96  }
 0x4fa   : >> { %23250 = vmatprep.mubr.msk.f32.mxu1 %vm243_vm0, %v8419_v3  ;;  %23642 = vmatprep.mubr.msk.f32.mxu0 %vm243_vm0, %v20265_v0  ;;  %v20266_v55 = vld [vmem:[%s28524_s9 + $0x60] sm:$0xff]  ;;  %v8421_v61 = vld [vmem:[%s28524_s9 + $0x18] sm:$0xff]  ;;  %v20267_v60 = vld [vmem:[%s28524_s9 + $0x68] sm:$0xff]  ;;  %s25421_s29 = smov 88   ;;  %s25422_s14 = smov 104  }
 0x4fb   : >> { %23251 = vmatmul.mubr.msk.f32.vlgmr.msra.gmra.mrb[0].mxu1 %vm243_vm0, %v8420_v15  ;;  %23643 = vmatmul.mubr.msk.f32.vlgmr.msra.gmra.mrb[0].mxu0 %vm243_vm0, %v20266_v55  ;;  %v8422_v8 = vld [vmem:[%s28524_s9 + $0x20] sm:$0xff]  ;;  %v20268_v10 = vld [vmem:[%s28524_s9 + $0x70] sm:$0xff]  ;;  %v8423_v11 = vld [vmem:[%s28524_s9 + $0x28] sm:$0xff]  ;;  %s25423_s27 = smov 112   ;;  %s25424_s8 = smov 120  }
 0x4fc   : >> { %23347 = vmatpush3.msra.mxu1 %v8418_v46  ;;  %23739 = vmatpush3.msra.mxu0 %v20458_v48  ;;  %v20269_v19 = vld [vmem:[%s28524_s9 + $0x78] sm:$0xff]  ;;  %v8424_v5 = vld [vmem:[%s28524_s9 + $0x30] sm:$0xff]  ;;  %v20270_v39 = vld [vmem:[%s28524_s9 + $0x80] sm:$0xff]  ;;  %s21194_s0 = sshll.u32 %s25387_s26, 3  ;;  %s8350_s26 = sadd.s32 1, %s25387_s26  }
 0x4fd   : >> { %23253 = vmatprep.mubr.msk.f32.mxu1 %vm243_vm0, %v8421_v61  ;;  %23645 = vmatprep.mubr.msk.f32.mxu0 %vm243_vm0, %v20267_v60  ;;  %v8425_v21 = vld [vmem:[%s28524_s9 + $0x38] sm:$0xff]  ;;  %v20271_v45 = vld [vmem:[%s28524_s9 + $0x88] sm:$0xff]  ;;  %v8426_v13 = vld [vmem:[%s28524_s9 + $0x40] sm:$0xff]  ;;  %p8347_p12 = scmp.ge.s32.totalorder %s8350_s26, 8  }
 0x4fe   : >> { %23836 = vmatprep.subr.mxu0 %v28539_v31  ;;  %23444 = vmatprep.subr.mxu1 %v28544_v63  ;;  %v20272_v50 = vld [vmem:[%s28524_s9 + $0x90] sm:$0xff]  ;;  %v20273_v58 = vld [vmem:[%s28524_s9 + $0xa8] sm:$0xff]  ;;  %v20275_v62 = vld [vmem:[%s28524_s9 + $0xb8] sm:$0xff]  ;;  %p33329_p8 = scmp.ne.s32.totalorder (%p8347_p12), %s32594_s30, 0  ;;  %s25425_s26 = smov (%p8347_p12), [#allocation7]  }
 0x4ff   : >> { %23254 = vmatmul.mubr.msk.f32.gmra.mrb[2].mxu1 %vm243_vm0, %v8422_v8  ;;  %23646 = vmatmul.mubr.msk.f32.gmra.mrb[2].mxu0 %vm243_vm0, %v20268_v10  ;;  %v20274_v22 = vld [vmem:[%s28524_s9 + $0xb0] sm:$0xff]  ;;  %v20276_v23 = vld [vmem:[%s28524_s9 + $0xc0] sm:$0xff]  ;;  %v20277_v41 = vld [vmem:[%s28524_s9 + $0xc8] sm:$0xff] }
 0x500   : >> { %23256 = vmatprep.mubr.msk.f32.mxu1 %vm243_vm0, %v8423_v11  ;;  %23648 = vmatprep.mubr.msk.f32.mxu0 %vm243_vm0, %v20269_v19  ;;  %v20278_v17 = vld [vmem:[%s28524_s9 + $0xd0] sm:$0xff]  ;;  %v20279_v36 = vld [vmem:[%s28524_s9 + $0xd8] sm:$0xff]  ;;  %v20280_v34 = vld [vmem:[%s28524_s9 + $0xe0] sm:$0xff] }
 0x501   : >> { %v20281_v2 = vld [vmem:[%s28524_s9 + $0xf8] sm:$0xff]  ;;  %v20282_v42 = vld [vmem:[%s28524_s9 + $0x100] sm:$0xff]  ;;  %v20283_v24 = vld [vmem:[%s28524_s9 + $0x108] sm:$0xff] }
 0x502   : >> { %v20284_v4 = vld [vmem:[%s28524_s9 + $0x110] sm:$0xff]  ;;  %v20285_v57 = vld [vmem:[%s28524_s9 + $0x118] sm:$0xff]  ;;  %v20286_v26 = vld [vmem:[%s28524_s9 + $0x120] sm:$0xff] }
 0x503   : >> { %23257 = vmatmul.mubr.msk.f32.gmra.mrb[4].mxu1 %vm243_vm0, %v8424_v5  ;;  %23649 = vmatmul.mubr.msk.f32.gmra.mrb[4].mxu0 %vm243_vm0, %v20270_v39  ;;  %v20287_v6 = vld [vmem:[%s28524_s9 + $0x128] sm:$0xff]  ;;  %v20288_v43 = vld [vmem:[%s28524_s9 + $0x130] sm:$0xff]  ;;  %v20291_v9 = vld [vmem:[%s28524_s9 + $0x158] sm:$0xff] }
 0x504   : >> { %23259 = vmatprep.mubr.msk.f32.mxu1 %vm243_vm0, %v8425_v21  ;;  %23651 = vmatprep.mubr.msk.f32.mxu0 %vm243_vm0, %v20271_v45  ;;  %v20289_v12 = vld [vmem:[%s28524_s9 + $0x148] sm:$0xff]  ;;  %v20290_v33 = vld [vmem:[%s28524_s9 + $0x150] sm:$0xff]  ;;  %v20292_v38 = vld [vmem:[%s28524_s9 + $0x160] sm:$0xff] }
 0x505   : >> { %v20293_v56 = vld [vmem:[%s28524_s9 + $0x168] sm:$0xff]  ;;  %v20294_v14 = vld [vmem:[%s28524_s9 + $0x170] sm:$0xff]  ;;  %v20295_v18 = vld [vmem:[%s28524_s9 + $0x178] sm:$0xff] }
 0x506   : >> { %v20296_v20 = vld [vmem:[%s28524_s9 + $0x180] sm:$0xff]  ;;  %v28652_v53 = vld [vmem:[%s28524_s9 + $0x69] sm:$0xff]  ;;  %v28665_v35 = vld [vmem:[%s28524_s9 + $0x71] sm:$0xff] }
 0x507   : >> { %23260 = vmatmul.mubr.msk.f32.gmra.mrb[6].mxu1 %vm243_vm0, %v8426_v13  ;;  %23652 = vmatmul.mubr.msk.f32.gmra.mrb[6].mxu0 %vm243_vm0, %v20272_v50  ;;  %v28641_v16 = vld [vmem:[%s28524_s9 + $0x59] sm:$0xff]  ;;  %v28649_v59 = vld [vmem:[%s28524_s9 + $0x61] sm:$0xff]  ;;  %v28683_v25 = vld [vmem:[%s28524_s9 + $0x89] sm:$0xff] }
 0x508   : >> { %23262 = vmatprep.mubr.msk.f32.mxu1 %vm243_vm0, %v20265_v0  ;;  %23654 = vmatprep.mubr.msk.f32.mxu0 %vm243_vm0, %v20273_v58  ;;  %v28670_v32 = vld [vmem:[%s28524_s9 + $0x79] sm:$0xff]  ;;  %v28680_v44 = vld [vmem:[%s28524_s9 + $0x81] sm:$0xff]  ;;  %v28692_v51 = vld [vmem:[%s28524_s9 + $0x91] sm:$0xff] }
 0x509   : >> { %v8459_v27 = vld [vmem:[%s28524_s9 + $0x198] sm:$0xff]  ;;  %v28696_v1 = vld [vmem:[%s28524_s9 + $0xa9] sm:$0xff]  ;;  %v8460_v28 = vld [vmem:[%s28524_s9 + $0x1a0] sm:$0xff] }
 0x50a   : >> { %v28706_v52 = vld [vmem:[%s28524_s9 + $0xb1] sm:$0xff]  ;;  %v8461_v29 = vld [vmem:[%s28524_s9 + $0x1a8] sm:$0xff]  ;;  %v28710_v30 = vld [vmem:[%s28524_s9 + $0xb9] sm:$0xff] }
 0x50b   : >> { %23263 = vmatmul.mubr.msk.f32.gmra.mrb[8].mxu1 %vm243_vm0, %v20266_v55  ;;  %23655 = vmatmul.mubr.msk.f32.gmra.mrb[8].mxu0 %vm243_vm0, %v20274_v22  ;;  %v8462_v47 = vld [vmem:[%s28524_s9 + $0x1b0] sm:$0xff]  ;;  %v28720_v49 = vld [vmem:[%s28524_s9 + $0xc1] sm:$0xff]  ;;  %v8463_v7 = vld [vmem:[%s28524_s9 + $0x1b8] sm:$0xff] }
 0x50c   : >> { %23265 = vmatprep.mubr.msk.f32.mxu1 %vm243_vm0, %v20267_v60  ;;  %23657 = vmatprep.mubr.msk.f32.mxu0 %vm243_vm0, %v20275_v62  ;;  %v28724_v46 = vld [vmem:[%s28524_s9 + $0xc9] sm:$0xff]  ;;  %v8464_v48 = vld [vmem:[%s28524_s9 + $0x1c0] sm:$0xff]  ;;  %v28734_v3 = vld [vmem:[%s28524_s9 + $0xd1] sm:$0xff] }
 0x50d   : >> { %v8465_v0 = vld [vmem:[%s28524_s9 + $0x1c8] sm:$0xff]  ;;  %v28738_v15 = vld [vmem:[%s28524_s9 + $0xd9] sm:$0xff]  ;;  %v8466_v55 = vld [vmem:[%s28524_s9 + $0x1d0] sm:$0xff] }
 0x50e   : >> { %v28748_v61 = vld [vmem:[%s28524_s9 + $0xe1] sm:$0xff]  ;;  %v8468_v8 = vld [vmem:[%s28524_s9 + $0x1f0] sm:$0xff]  ;;  %v8469_v11 = vld [vmem:[%s28524_s9 + $0x1f8] sm:$0xff] }
 0x50f   : >> { %23266 = vmatmul.mubr.msk.f32.gmra.mrb[10].mxu1 %vm243_vm0, %v20268_v10  ;;  %23658 = vmatmul.mubr.msk.f32.gmra.mrb[10].mxu0 %vm243_vm0, %v20276_v23  ;;  %v8467_v60 = vld [vmem:[%s28524_s9 + $0x1e8] sm:$0xff]  ;;  %v8470_v5 = vld [vmem:[%s28524_s9 + $0x200] sm:$0xff]  ;;  %v8472_v13 = vld [vmem:[%s28524_s9 + $0x210] sm:$0xff] }
 0x510   : >> { %23268 = vmatprep.mubr.msk.f32.mxu1 %vm243_vm0, %v20269_v19  ;;  %23660 = vmatprep.mubr.msk.f32.mxu0 %vm243_vm0, %v20277_v41  ;;  %v28762_v10 = vld [vmem:[%s28524_s9 + $0x101] sm:$0xff]  ;;  %v28766_v19 = vld [vmem:[%s28524_s9 + $0x109] sm:$0xff]  ;;  %v29025_v40 = vld [vmem:[%s28524_s9 + $0xb7] sm:$0xff] }
 0x511   : >> { %v8471_v21 = vld [vmem:[%s28524_s9 + $0x208] sm:$0xff]  ;;  %32755 = vst [vmem:[#allocation90_spill] sm:$0xff] %v29025_v40 }
 0x513   : >> { %23269 = vmatmul.mubr.msk.f32.gmra.mrb[12].mxu1 %vm243_vm0, %v20270_v39  ;;  %23661 = vmatmul.mubr.msk.f32.gmra.mrb[12].mxu0 %vm243_vm0, %v20278_v17  ;;  %v28776_v39 = vld [vmem:[%s28524_s9 + $0x111] sm:$0xff] }
 0x514   : >> { %23271 = vmatprep.mubr.msk.f32.mxu1 %vm243_vm0, %v20271_v45  ;;  %23663 = vmatprep.mubr.msk.f32.mxu0 %vm243_vm0, %v20279_v36  ;;  %v28780_v45 = vld [vmem:[%s28524_s9 + $0x119] sm:$0xff] }
 0x517   : >> { %23272 = vmatmul.mubr.msk.f32.gmra.mrb[14].mxu1 %vm243_vm0, %v20272_v50  ;;  %23664 = vmatmul.mubr.msk.f32.gmra.mrb[14].mxu0 %vm243_vm0, %v20280_v34  ;;  %v28790_v50 = vld [vmem:[%s28524_s9 + $0x121] sm:$0xff] }
 0x518   : >> { %23274 = vmatprep.mubr.msk.f32.mxu1 %vm243_vm0, %v20273_v58  ;;  %23666 = vmatprep.mubr.msk.f32.mxu0 %vm243_vm0, %v20281_v2  ;;  %v8473_v58 = vld [vmem:[%s28524_s9 + $0x218] sm:$0xff] }
 0x51b   : >> { %23275 = vmatmul.mubr.msk.f32.gmra.mrb[16].mxu1 %vm243_vm0, %v20274_v22  ;;  %23667 = vmatmul.mubr.msk.f32.gmra.mrb[16].mxu0 %vm243_vm0, %v20282_v42  ;;  %v28794_v22 = vld [vmem:[%s28524_s9 + $0x129] sm:$0xff] }
 0x51c   : >> { %23277 = vmatprep.mubr.msk.f32.mxu1 %vm243_vm0, %v20275_v62  ;;  %23669 = vmatprep.mubr.msk.f32.mxu0 %vm243_vm0, %v20283_v24  ;;  %v8474_v62 = vld [vmem:[%s28524_s9 + $0x220] sm:$0xff] }
 0x51f   : >> { %23278 = vmatmul.mubr.msk.f32.gmra.mrb[18].mxu1 %vm243_vm0, %v20276_v23  ;;  %23670 = vmatmul.mubr.msk.f32.gmra.mrb[18].mxu0 %vm243_vm0, %v20284_v4  ;;  %v28804_v23 = vld [vmem:[%s28524_s9 + $0x131] sm:$0xff] }
 0x520   : >> { %23280 = vmatprep.mubr.msk.f32.mxu1 %vm243_vm0, %v20277_v41  ;;  %23672 = vmatprep.mubr.msk.f32.mxu0 %vm243_vm0, %v20285_v57  ;;  %v8475_v41 = vld [vmem:[%s28524_s9 + $0x238] sm:$0xff] }
 0x523   : >> { %23281 = vmatmul.mubr.msk.f32.gmra.mrb[20].mxu1 %vm243_vm0, %v20278_v17  ;;  %23673 = vmatmul.mubr.msk.f32.gmra.mrb[20].mxu0 %vm243_vm0, %v20286_v26  ;;  %v28808_v17 = vld [vmem:[%s28524_s9 + $0x149] sm:$0xff] }
 0x524   : >> { %23283 = vmatprep.mubr.msk.f32.mxu1 %vm243_vm0, %v20279_v36  ;;  %23675 = vmatprep.mubr.msk.f32.mxu0 %vm243_vm0, %v20287_v6  ;;  %v8476_v36 = vld [vmem:[%s28524_s9 + $0x240] sm:$0xff] }
 0x527   : >> { %23284 = vmatmul.mubr.msk.f32.gmra.mrb[22].mxu1 %vm243_vm0, %v20280_v34  ;;  %23676 = vmatmul.mubr.msk.f32.gmra.mrb[22].mxu0 %vm243_vm0, %v20288_v43  ;;  %v28818_v34 = vld [vmem:[%s28524_s9 + $0x151] sm:$0xff] }
 0x528   : >> { %23286 = vmatprep.mubr.msk.f32.mxu1 %vm243_vm0, %v20281_v2  ;;  %23678 = vmatprep.mubr.msk.f32.mxu0 %vm243_vm0, %v20289_v12  ;;  %v8477_v2 = vld [vmem:[%s28524_s9 + $0x248] sm:$0xff] }
 0x52b   : >> { %23287 = vmatmul.mubr.msk.f32.gmra.mrb[24].mxu1 %vm243_vm0, %v20282_v42  ;;  %23679 = vmatmul.mubr.msk.f32.gmra.mrb[24].mxu0 %vm243_vm0, %v20290_v33  ;;  %v28822_v42 = vld [vmem:[%s28524_s9 + $0x159] sm:$0xff] }
 0x52c   : >> { %23289 = vmatprep.mubr.msk.f32.mxu1 %vm243_vm0, %v20283_v24  ;;  %23681 = vmatprep.mubr.msk.f32.mxu0 %vm243_vm0, %v20291_v9  ;;  %v8478_v24 = vld [vmem:[%s28524_s9 + $0x250] sm:$0xff] }
 0x52f   : >> { %23290 = vmatmul.mubr.msk.f32.gmra.mrb[26].mxu1 %vm243_vm0, %v20284_v4  ;;  %23682 = vmatmul.mubr.msk.f32.gmra.mrb[26].mxu0 %vm243_vm0, %v20292_v38  ;;  %v28832_v4 = vld [vmem:[%s28524_s9 + $0x161] sm:$0xff] }
 0x530   : >> { %23292 = vmatprep.mubr.msk.f32.mxu1 %vm243_vm0, %v20285_v57  ;;  %23684 = vmatprep.mubr.msk.f32.mxu0 %vm243_vm0, %v20293_v56  ;;  %v8479_v57 = vld [vmem:[%s28524_s9 + $0x258] sm:$0xff] }
 0x533   : >> { %23293 = vmatmul.mubr.msk.f32.gmra.mrb[28].mxu1 %vm243_vm0, %v20286_v26  ;;  %23685 = vmatmul.mubr.msk.f32.gmra.mrb[28].mxu0 %vm243_vm0, %v20294_v14  ;;  %v28836_v26 = vld [vmem:[%s28524_s9 + $0x169] sm:$0xff] }
 0x534   : >> { %23295 = vmatprep.mubr.msk.f32.mxu1 %vm243_vm0, %v20287_v6  ;;  %23687 = vmatprep.mubr.msk.f32.mxu0 %vm243_vm0, %v20295_v18  ;;  %v8480_v6 = vld [vmem:[%s28524_s9 + $0x260] sm:$0xff] }
 0x537   : >> { %23296 = vmatmul.mubr.msk.f32.gmra.mrb[30].mxu1 %vm243_vm0, %v20288_v43  ;;  %23688 = vmatmul.mubr.msk.f32.gmra.mrb[30].mxu0 %vm243_vm0, %v20296_v20  ;;  %v28846_v43 = vld [vmem:[%s28524_s9 + $0x171] sm:$0xff] }
 0x538   : >> { %23298 = vmatprep.mubr.msk.f32.mxu1 %vm243_vm0, %v20289_v12  ;;  %23740 = vmatprep.mubr.msk.f32.mxu0 %vm243_vm0, %v28641_v16  ;;  %v8481_v12 = vld [vmem:[%s28524_s9 + $0x268] sm:$0xff] }
 0x53b   : >> { %23299 = vmatmul.mubr.msk.f32.gmra.mrb[32].mxu1 %vm243_vm0, %v20290_v33  ;;  %23741 = vmatmul.mubr.msk.f32.vlgmr.msra.gmra.mrb[0].mxu0 %vm243_vm0, %v28649_v59  ;;  %v28850_v33 = vld [vmem:[%s28524_s9 + $0x179] sm:$0xff] }
 0x53c   : >> { %23837 = vmatpush3.msra.mxu0 %v28539_v31  ;;  %23301 = vmatprep.mubr.msk.f32.mxu1 %vm243_vm0, %v20291_v9  ;;  %v28752_v31 = vld [vmem:[%s28524_s9 + $0xf9] sm:$0xff]  ;;  %v8482_v9 = vld [vmem:[%s28524_s9 + $0x270] sm:$0xff] }
 0x53d   : >> { %23743 = vmatprep.mubr.msk.f32.mxu0 %vm243_vm0, %v28652_v53  ;;  %23934 = vmatprep.subr.mxu0 %v28657_v54 }
 0x53f   : >> { %23302 = vmatmul.mubr.msk.f32.gmra.mrb[34].mxu1 %vm243_vm0, %v20292_v38  ;;  %23744 = vmatmul.mubr.msk.f32.gmra.mrb[2].mxu0 %vm243_vm0, %v28665_v35  ;;  %v28860_v38 = vld [vmem:[%s28524_s9 + $0x181] sm:$0xff] }
 0x540   : >> { %23304 = vmatprep.mubr.msk.f32.mxu1 %vm243_vm0, %v20293_v56  ;;  %23746 = vmatprep.mubr.msk.f32.mxu0 %vm243_vm0, %v28670_v32  ;;  %v8354_v56 = vld [vmem:[%s28524_s9 + $0x7] sm:$0xff] }
 0x543   : >> { %23305 = vmatmul.mubr.msk.f32.gmra.mrb[36].mxu1 %vm243_vm0, %v20294_v14  ;;  %23747 = vmatmul.mubr.msk.f32.gmra.mrb[4].mxu0 %vm243_vm0, %v28680_v44  ;;  %v28864_v14 = vld [vmem:[%s28524_s9 + $0x199] sm:$0xff] }
 0x544   : >> { %23307 = vmatprep.mubr.msk.f32.mxu1 %vm243_vm0, %v20295_v18  ;;  %23749 = vmatprep.mubr.msk.f32.mxu0 %vm243_vm0, %v28683_v25  ;;  %v8355_v18 = vld [vmem:[%s28524_s9 + $0xf] sm:$0xff] }
 0x547   : >> { %23308 = vmatmul.mubr.msk.f32.gmra.mrb[38].mxu1 %vm243_vm0, %v20296_v20  ;;  %23750 = vmatmul.mubr.msk.f32.gmra.mrb[6].mxu0 %vm243_vm0, %v28692_v51  ;;  %v28874_v20 = vld [vmem:[%s28524_s9 + $0x1a1] sm:$0xff] }
 0x548   : >> { %23310 = vmatprep.mubr.msk.f32.mxu1 %vm243_vm0, %v8459_v27  ;;  %23752 = vmatprep.mubr.msk.f32.mxu0 %vm243_vm0, %v28696_v1  ;;  %v8356_v27 = vld [vmem:[%s28524_s9 + $0x17] sm:$0xff] }
 0x54b   : >> { %23311 = vmatmul.mubr.msk.f32.gmra.mrb[40].mxu1 %vm243_vm0, %v8460_v28  ;;  %23753 = vmatmul.mubr.msk.f32.gmra.mrb[8].mxu0 %vm243_vm0, %v28706_v52  ;;  %v28878_v28 = vld [vmem:[%s28524_s9 + $0x1a9] sm:$0xff] }
 0x54c   : >> { %23313 = vmatprep.mubr.msk.f32.mxu1 %vm243_vm0, %v8461_v29  ;;  %23755 = vmatprep.mubr.msk.f32.mxu0 %vm243_vm0, %v28710_v30  ;;  %v28883_v29 = vld [vmem:[%s32308_s3 + $0x18] sm:$0xff] }
 0x54f   : >> { %23314 = vmatmul.mubr.msk.f32.gmra.mrb[42].mxu1 %vm243_vm0, %v8462_v47  ;;  %23756 = vmatmul.mubr.msk.f32.gmra.mrb[10].mxu0 %vm243_vm0, %v28720_v49  ;;  %v8357_v47 = vld [vmem:[%s28524_s9 + $0x1f] sm:$0xff] }
 0x550   : >> { %23316 = vmatprep.mubr.msk.f32.mxu1 %vm243_vm0, %v8463_v7  ;;  %23758 = vmatprep.mubr.msk.f32.mxu0 %vm243_vm0, %v28724_v46  ;;  %v28892_v7 = vld [vmem:[%s28524_s9 + $0x1b1] sm:$0xff] }
 0x553   : >> { %23317 = vmatmul.mubr.msk.f32.gmra.mrb[44].mxu1 %vm243_vm0, %v8464_v48  ;;  %23759 = vmatmul.mubr.msk.f32.gmra.mrb[12].mxu0 %vm243_vm0, %v28734_v3  ;;  %v8358_v48 = vld [vmem:[%s28524_s9 + $0x27] sm:$0xff] }
 0x554   : >> { %23319 = vmatprep.mubr.msk.f32.mxu1 %vm243_vm0, %v8465_v0  ;;  %23761 = vmatprep.mubr.msk.f32.mxu0 %vm243_vm0, %v28738_v15  ;;  %v28898_v0 = vld [vmem:[%s28524_s9 + $0x1b9] sm:$0xff] }
 0x557   : >> { %23320 = vmatmul.mubr.msk.f32.gmra.mrb[46].mxu1 %vm243_vm0, %v8466_v55  ;;  %23762 = vmatmul.mubr.msk.f32.gmra.mrb[14].mxu0 %vm243_vm0, %v28748_v61  ;;  %v28909_v55 = vld [vmem:[%s28524_s9 + $0x1c1] sm:$0xff] }
 0x558   : >> { %23322 = vmatprep.mubr.msk.f32.mxu1 %vm243_vm0, %v8467_v60  ;;  %23764 = vmatprep.mubr.msk.f32.mxu0 %vm243_vm0, %v28752_v31  ;;  %v8360_v60 = vld [vmem:[%s28524_s9 + $0x37] sm:$0xff] }
 0x55b   : >> { %23323 = vmatmul.mubr.msk.f32.gmra.mrb[48].mxu1 %vm243_vm0, %v8468_v8  ;;  %23765 = vmatmul.mubr.msk.f32.gmra.mrb[16].mxu0 %vm243_vm0, %v28762_v10  ;;  %v28913_v8 = vld [vmem:[%s28524_s9 + $0x1c9] sm:$0xff] }
 0x55c   : >> { %23325 = vmatprep.mubr.msk.f32.mxu1 %vm243_vm0, %v8469_v11  ;;  %23767 = vmatprep.mubr.msk.f32.mxu0 %vm243_vm0, %v28766_v19  ;;  %v8361_v11 = vld [vmem:[%s28524_s9 + $0x3f] sm:$0xff] }
 0x55f   : >> { %23326 = vmatmul.mubr.msk.f32.gmra.mrb[50].mxu1 %vm243_vm0, %v8470_v5  ;;  %23768 = vmatmul.mubr.msk.f32.gmra.mrb[18].mxu0 %vm243_vm0, %v28776_v39  ;;  %v28923_v5 = vld [vmem:[%s28524_s9 + $0x1d1] sm:$0xff] }
 0x560   : >> { %23328 = vmatprep.mubr.msk.f32.mxu1 %vm243_vm0, %v8471_v21  ;;  %23770 = vmatprep.mubr.msk.f32.mxu0 %vm243_vm0, %v28780_v45  ;;  %v28926_v21 = vld [vmem:[%s28524_s9 + $0x57] sm:$0xff] }
 0x561   : >> { %32735 = vst [vmem:[#allocation70_spill] sm:$0xff] %v28926_v21 }
 0x563   : >> { %23329 = vmatmul.mubr.msk.f32.gmra.mrb[52].mxu1 %vm243_vm0, %v8472_v13  ;;  %23771 = vmatmul.mubr.msk.f32.gmra.mrb[20].mxu0 %vm243_vm0, %v28790_v50  ;;  %v28929_v13 = vld [vmem:[%s28524_s9 + $0x1e9] sm:$0xff] }
 0x564   : >> { %23331 = vmatprep.mubr.msk.f32.mxu1 %vm243_vm0, %v8473_v58  ;;  %23773 = vmatprep.mubr.msk.f32.mxu0 %vm243_vm0, %v28794_v22  ;;  %32736 = vst [vmem:[#allocation71_spill] sm:$0xff] %v28929_v13  ;;  %v28939_v58 = vld [vmem:[%s28524_s9 + $0x5f] sm:$0xff] }
 0x565   : >> { %32737 = vst [vmem:[#allocation72_spill] sm:$0xff] %v28939_v58 }
 0x567   : >> { %23332 = vmatmul.mubr.msk.f32.gmra.mrb[54].mxu1 %vm243_vm0, %v8474_v62  ;;  %23774 = vmatmul.mubr.msk.f32.gmra.mrb[22].mxu0 %vm243_vm0, %v28804_v23  ;;  %v28942_v62 = vld [vmem:[%s28524_s9 + $0x1f1] sm:$0xff] }
 0x568   : >> { %23334 = vmatprep.mubr.msk.f32.mxu1 %vm243_vm0, %v8475_v41  ;;  %23776 = vmatprep.mubr.msk.f32.mxu0 %vm243_vm0, %v28808_v17  ;;  %32738 = vst [vmem:[#allocation73_spill] sm:$0xff] %v28942_v62  ;;  %v28945_v41 = vld [vmem:[%s28524_s9 + $0x67] sm:$0xff] }
 0x569   : >> { %32739 = vst [vmem:[#allocation74_spill] sm:$0xff] %v28945_v41 }
 0x56b   : >> { %23335 = vmatmul.mubr.msk.f32.gmra.mrb[56].mxu1 %vm243_vm0, %v8476_v36  ;;  %23777 = vmatmul.mubr.msk.f32.gmra.mrb[24].mxu0 %vm243_vm0, %v28818_v34  ;;  %v28948_v36 = vld [vmem:[%s28524_s9 + $0x1f9] sm:$0xff] }
 0x56c   : >> { %23337 = vmatprep.mubr.msk.f32.mxu1 %vm243_vm0, %v8477_v2  ;;  %23779 = vmatprep.mubr.msk.f32.mxu0 %vm243_vm0, %v28822_v42  ;;  %32740 = vst [vmem:[#allocation75_spill] sm:$0xff] %v28948_v36  ;;  %v28959_v2 = vld [vmem:[%s28524_s9 + $0x6f] sm:$0xff] }
 0x56d   : >> { %32741 = vst [vmem:[#allocation76_spill] sm:$0xff] %v28959_v2 }
 0x56f   : >> { %23338 = vmatmul.mubr.msk.f32.gmra.mrb[58].mxu1 %vm243_vm0, %v8478_v24  ;;  %23780 = vmatmul.mubr.msk.f32.gmra.mrb[26].mxu0 %vm243_vm0, %v28832_v4  ;;  %v28962_v24 = vld [vmem:[%s28524_s9 + $0x201] sm:$0xff] }
 0x570   : >> { %23340 = vmatprep.mubr.msk.f32.mxu1 %vm243_vm0, %v8479_v57  ;;  %23782 = vmatprep.mubr.msk.f32.mxu0 %vm243_vm0, %v28836_v26  ;;  %32742 = vst [vmem:[#allocation77_spill] sm:$0xff] %v28962_v24  ;;  %v28965_v57 = vld [vmem:[%s28524_s9 + $0x77] sm:$0xff] }
 0x571   : >> { %32743 = vst [vmem:[#allocation78_spill] sm:$0xff] %v28965_v57 }
 0x573   : >> { %23341 = vmatmul.mubr.msk.f32.gmra.mrb[60].mxu1 %vm243_vm0, %v8480_v6  ;;  %23783 = vmatmul.mubr.msk.f32.gmra.mrb[28].mxu0 %vm243_vm0, %v28846_v43  ;;  %v28968_v6 = vld [vmem:[%s28524_s9 + $0x209] sm:$0xff] }
 0x574   : >> { %23343 = vmatprep.mubr.msk.f32.mxu1 %vm243_vm0, %v8481_v12  ;;  %23785 = vmatprep.mubr.msk.f32.mxu0 %vm243_vm0, %v28850_v33  ;;  %32744 = vst [vmem:[#allocation79_spill] sm:$0xff] %v28968_v6  ;;  %v28979_v12 = vld [vmem:[%s28524_s9 + $0x7f] sm:$0xff] }
 0x575   : >> { %32745 = vst [vmem:[#allocation80_spill] sm:$0xff] %v28979_v12 }
 0x577   : >> { %23344 = vmatmul.mubr.msk.f32.gmra.mrb[62].mxu1 %vm243_vm0, %v8482_v9  ;;  %23786 = vmatmul.mubr.msk.f32.gmra.mrb[30].mxu0 %vm243_vm0, %v28860_v38  ;;  %v28982_v9 = vld [vmem:[%s28524_s9 + $0x211] sm:$0xff] }
 0x578   : >> { %23348 = vmatprep.mubr.msk.f32.mxu1 %vm243_vm0, %v8354_v56  ;;  %23788 = vmatprep.mubr.msk.f32.mxu0 %vm243_vm0, %v28864_v14  ;;  %32746 = vst [vmem:[#allocation81_spill] sm:$0xff] %v28982_v9  ;;  %v28985_v56 = vld [vmem:[%s28524_s9 + $0x87] sm:$0xff] }
 0x579   : >> { %32747 = vst [vmem:[#allocation82_spill] sm:$0xff] %v28985_v56 }
 0x57b   : >> { %23349 = vmatmul.mubr.msk.f32.vlgmr.msra.gmra.mrb[0].mxu1 %vm243_vm0, %v8355_v18  ;;  %23789 = vmatmul.mubr.msk.f32.gmra.mrb[32].mxu0 %vm243_vm0, %v28874_v20  ;;  %v28988_v18 = vld [vmem:[%s28524_s9 + $0x219] sm:$0xff] }
 0x57c   : >> { %23445 = vmatpush3.msra.mxu1 %v28544_v63  ;;  %23351 = vmatprep.mubr.msk.f32.mxu1 %vm243_vm0, %v8356_v27  ;;  %v8359_v63 = vld [vmem:[%s28524_s9 + $0x2f] sm:$0xff]  ;;  %32748 = vst [vmem:[#allocation83_spill] sm:$0xff] %v28988_v18 }
 0x57d   : >> { %23791 = vmatprep.mubr.msk.f32.mxu0 %vm243_vm0, %v28878_v28  ;;  %23542 = vmatprep.subr.mxu1 %v28883_v29  ;;  %v28999_v27 = vld [vmem:[%s28524_s9 + $0x8f] sm:$0xff] }
 0x57e   : >> { %32749 = vst [vmem:[#allocation84_spill] sm:$0xff] %v28999_v27 }
 0x57f   : >> { %23352 = vmatmul.mubr.msk.f32.gmra.mrb[2].mxu1 %vm243_vm0, %v8357_v47  ;;  %23792 = vmatmul.mubr.msk.f32.gmra.mrb[34].mxu0 %vm243_vm0, %v28892_v7  ;;  %v29002_v47 = vld [vmem:[%s28524_s9 + $0x221] sm:$0xff] }
 0x580   : >> { %23354 = vmatprep.mubr.msk.f32.mxu1 %vm243_vm0, %v8358_v48  ;;  %23794 = vmatprep.mubr.msk.f32.mxu0 %vm243_vm0, %v28898_v0  ;;  %32750 = vst [vmem:[#allocation85_spill] sm:$0xff] %v29002_v47  ;;  %v29005_v48 = vld [vmem:[%s28524_s9 + $0xa7] sm:$0xff] }
 0x581   : >> { %32751 = vst [vmem:[#allocation86_spill] sm:$0xff] %v29005_v48 }
 0x583   : >> { %23355 = vmatmul.mubr.msk.f32.gmra.mrb[4].mxu1 %vm243_vm0, %v8359_v63  ;;  %23795 = vmatmul.mubr.msk.f32.gmra.mrb[36].mxu0 %vm243_vm0, %v28909_v55  ;;  %v29008_v63 = vld [vmem:[%s28524_s9 + $0x239] sm:$0xff] }
 0x584   : >> { %23357 = vmatprep.mubr.msk.f32.mxu1 %vm243_vm0, %v8360_v60  ;;  %23797 = vmatprep.mubr.msk.f32.mxu0 %vm243_vm0, %v28913_v8  ;;  %32752 = vst [vmem:[#allocation87_spill] sm:$0xff] %v29008_v63  ;;  %v29019_v60 = vld [vmem:[%s28524_s9 + $0xaf] sm:$0xff] }
 0x585   : >> { %32753 = vst [vmem:[#allocation88_spill] sm:$0xff] %v29019_v60 }
 0x587   : >> { %23358 = vmatmul.mubr.msk.f32.gmra.mrb[6].mxu1 %vm243_vm0, %v8361_v11  ;;  %23798 = vmatmul.mubr.msk.f32.gmra.mrb[38].mxu0 %vm243_vm0, %v28923_v5  ;;  %v29022_v11 = vld [vmem:[%s28524_s9 + $0x241] sm:$0xff] }
 0x588   : >> { %23360 = vmatprep.mubr.msk.f32.mxu1 %vm243_vm0, %v28926_v21  ;;  %23800 = vmatprep.mubr.msk.f32.mxu0 %vm243_vm0, %v28929_v13  ;;  %32754 = vst [vmem:[#allocation89_spill] sm:$0xff] %v29022_v11  ;;  %v29065_v21 = vld [vmem:[%s28524_s9 + $0xd7] sm:$0xff]  ;;  %v29160_v13 = vld [vmem:[%s32308_s3 + $0x40] sm:$0xff] }
 0x589   : >> { %32763 = vst [vmem:[#allocation98_spill] sm:$0xff] %v29065_v21 }
 0x58b   : >> { %23361 = vmatmul.mubr.msk.f32.gmra.mrb[8].mxu1 %vm243_vm0, %v28939_v58  ;;  %23801 = vmatmul.mubr.msk.f32.gmra.mrb[40].mxu0 %vm243_vm0, %v28942_v62  ;;  %v29062_v58 = vld [vmem:[%s28524_s9 + $0x261] sm:$0xff] }
 0x58c   : >> { %23363 = vmatprep.mubr.msk.f32.mxu1 %vm243_vm0, %v28945_v41  ;;  %23803 = vmatprep.mubr.msk.f32.mxu0 %vm243_vm0, %v28948_v36  ;;  %v29059_v41 = vld [vmem:[%s28524_s9 + $0xcf] sm:$0xff]  ;;  %32762 = vst [vmem:[#allocation97_spill] sm:$0xff] %v29062_v58  ;;  %v20456_v36 = vld [vmem:[%s28524_s9 + $0x2b9] sm:$0xff]  ;;  %v29142_v62 = vld [vmem:[%s28524_s9 + $0x147] sm:$0xff] }
 0x58d   : >> { %32761 = vst [vmem:[#allocation96_spill] sm:$0xff] %v29059_v41  ;;  %32775 = vst [vmem:[#allocation110_spill] sm:$0xff] %v29142_v62 }
 0x58f   : >> { %23364 = vmatmul.mubr.msk.f32.gmra.mrb[10].mxu1 %vm243_vm0, %v28959_v2  ;;  %23804 = vmatmul.mubr.msk.f32.gmra.mrb[42].mxu0 %vm243_vm0, %v28962_v24  ;;  %v29048_v2 = vld [vmem:[%s28524_s9 + $0x259] sm:$0xff]  ;;  %v29128_v24 = vld [vmem:[%s28524_s9 + $0x127] sm:$0xff] }
 0x590   : >> { %23366 = vmatprep.mubr.msk.f32.mxu1 %vm243_vm0, %v28965_v57  ;;  %23806 = vmatprep.mubr.msk.f32.mxu0 %vm243_vm0, %v28968_v6  ;;  %v29045_v57 = vld [vmem:[%s28524_s9 + $0xc7] sm:$0xff]  ;;  %32760 = vst [vmem:[#allocation95_spill] sm:$0xff] %v29048_v2  ;;  %32773 = vst [vmem:[#allocation108_spill] sm:$0xff] %v29128_v24 }
 0x591   : >> { %32759 = vst [vmem:[#allocation94_spill] sm:$0xff] %v29045_v57  ;;  %v20454_v6 = vld [vmem:[%s28524_s9 + $0x2a9] sm:$0xff] }
 0x593   : >> { %23367 = vmatmul.mubr.msk.f32.gmra.mrb[12].mxu1 %vm243_vm0, %v28979_v12  ;;  %23807 = vmatmul.mubr.msk.f32.gmra.mrb[44].mxu0 %vm243_vm0, %v28982_v9  ;;  %v29042_v12 = vld [vmem:[%s28524_s9 + $0x251] sm:$0xff] }
 0x594   : >> { %23369 = vmatprep.mubr.msk.f32.mxu1 %vm243_vm0, %v28985_v56  ;;  %23809 = vmatprep.mubr.msk.f32.mxu0 %vm243_vm0, %v28988_v18  ;;  %v29028_v56 = vld [vmem:[%s28524_s9 + $0x249] sm:$0xff]  ;;  %32758 = vst [vmem:[#allocation93_spill] sm:$0xff] %v29042_v12  ;;  %v20452_v18 = vld [vmem:[%s28524_s9 + $0x299] sm:$0xff] }
 0x595   : >> { %32756 = vst [vmem:[#allocation91_spill] sm:$0xff] %v29028_v56  ;;  %v29114_v9 = vld [vmem:[%s28524_s9 + $0x117] sm:$0xff] }
 0x596   : >> { %32771 = vst [vmem:[#allocation106_spill] sm:$0xff] %v29114_v9 }
 0x597   : >> { %23370 = vmatmul.mubr.msk.f32.gmra.mrb[14].mxu1 %vm243_vm0, %v28999_v27  ;;  %23810 = vmatmul.mubr.msk.f32.gmra.mrb[46].mxu0 %vm243_vm0, %v29002_v47  ;;  %v29039_v27 = vld [vmem:[%s28524_s9 + $0xbf] sm:$0xff]  ;;  %v29100_v47 = vld [vmem:[%s28524_s9 + $0x107] sm:$0xff] }
 0x598   : >> { %23372 = vmatprep.mubr.msk.f32.mxu1 %vm243_vm0, %v29005_v48  ;;  %23812 = vmatprep.mubr.msk.f32.mxu0 %vm243_vm0, %v29008_v63  ;;  %32757 = vst [vmem:[#allocation92_spill] sm:$0xff] %v29039_v27  ;;  %v20450_v63 = vld [vmem:[%s28524_s9 + $0x289] sm:$0xff]  ;;  %32769 = vst [vmem:[#allocation104_spill] sm:$0xff] %v29100_v47 }
 0x59b   : >> { %23373 = vmatmul.mubr.msk.f32.gmra.mrb[16].mxu1 %vm243_vm0, %v29019_v60  ;;  %23813 = vmatmul.mubr.msk.f32.gmra.mrb[48].mxu0 %vm243_vm0, %v29022_v11  ;;  %v29085_v11 = vld [vmem:[%s28524_s9 + $0xf7] sm:$0xff] }
 0x59c   : >> { %23375 = vmatprep.mubr.msk.f32.mxu1 %vm243_vm0, %v29025_v40  ;;  %23815 = vmatprep.mubr.msk.f32.mxu0 %vm243_vm0, %v29028_v56  ;;  %v29068_v56 = vld [vmem:[%s28524_s9 + $0x269] sm:$0xff]  ;;  %32767 = vst [vmem:[#allocation102_spill] sm:$0xff] %v29085_v11 }
 0x59d   : >> { %32764 = vst [vmem:[#allocation99_spill] sm:$0xff] %v29068_v56 }
 0x59f   : >> { %23376 = vmatmul.mubr.msk.f32.gmra.mrb[18].mxu1 %vm243_vm0, %v29039_v27  ;;  %23816 = vmatmul.mubr.msk.f32.gmra.mrb[50].mxu0 %vm243_vm0, %v29042_v12  ;;  %v29082_v12 = vld [vmem:[%s28524_s9 + $0x271] sm:$0xff] }
 0x5a0   : >> { %23378 = vmatprep.mubr.msk.f32.mxu1 %vm243_vm0, %v29045_v57  ;;  %23818 = vmatprep.mubr.msk.f32.mxu0 %vm243_vm0, %v29048_v2  ;;  %v29079_v2 = vld [vmem:[%s28524_s9 + $0xdf] sm:$0xff]  ;;  %32766 = vst [vmem:[#allocation101_spill] sm:$0xff] %v29082_v12 }
 0x5a1   : >> { %32765 = vst [vmem:[#allocation100_spill] sm:$0xff] %v29079_v2 }
 0x5a3   : >> { %23379 = vmatmul.mubr.msk.f32.gmra.mrb[20].mxu1 %vm243_vm0, %v29059_v41  ;;  %23819 = vmatmul.mubr.msk.f32.gmra.mrb[52].mxu0 %vm243_vm0, %v29062_v58  ;;  %v20451_v58 = vld [vmem:[%s28524_s9 + $0x291] sm:$0xff] }
 0x5a4   : >> { %23381 = vmatprep.mubr.msk.f32.mxu1 %vm243_vm0, %v29065_v21  ;;  %23821 = vmatprep.mubr.msk.f32.mxu0 %vm243_vm0, %v29068_v56  ;;  %v29096_v56 = vld [vmem:[%s28524_s9 + $0xff] sm:$0xff] }
 0x5a5   : >> { %32768 = vst [vmem:[#allocation103_spill] sm:$0xff] %v29096_v56 }
 0x5a7   : >> { %23382 = vmatmul.mubr.msk.f32.gmra.mrb[22].mxu1 %vm243_vm0, %v29079_v2  ;;  %23822 = vmatmul.mubr.msk.f32.gmra.mrb[54].mxu0 %vm243_vm0, %v29082_v12  ;;  %v20453_v12 = vld [vmem:[%s28524_s9 + $0x2a1] sm:$0xff] }
 0x5a8   : >> { %23384 = vmatprep.mubr.msk.f32.mxu1 %vm243_vm0, %v29085_v11  ;;  %23824 = vmatprep.mubr.msk.f32.mxu0 %vm243_vm0, %v20450_v63  ;;  %v29110_v63 = vld [vmem:[%s28524_s9 + $0x10f] sm:$0xff] }
 0x5a9   : >> { %32770 = vst [vmem:[#allocation105_spill] sm:$0xff] %v29110_v63 }
 0x5ab   : >> { %23385 = vmatmul.mubr.msk.f32.gmra.mrb[24].mxu1 %vm243_vm0, %v29096_v56  ;;  %23825 = vmatmul.mubr.msk.f32.gmra.mrb[56].mxu0 %vm243_vm0, %v20451_v58  ;;  %v29124_v58 = vld [vmem:[%s28524_s9 + $0x11f] sm:$0xff] }
 0x5ac   : >> { %23387 = vmatprep.mubr.msk.f32.mxu1 %vm243_vm0, %v29100_v47  ;;  %23827 = vmatprep.mubr.msk.f32.mxu0 %vm243_vm0, %v20452_v18  ;;  %32772 = vst [vmem:[#allocation107_spill] sm:$0xff] %v29124_v58  ;;  %v20455_v18 = vld [vmem:[%s28524_s9 + $0x2b1] sm:$0xff] }
 0x5af   : >> { %23388 = vmatmul.mubr.msk.f32.gmra.mrb[26].mxu1 %vm243_vm0, %v29110_v63  ;;  %23828 = vmatmul.mubr.msk.f32.gmra.mrb[58].mxu0 %vm243_vm0, %v20453_v12  ;;  %v20457_v12 = vld [vmem:[%s28524_s9 + $0x2c1] sm:$0xff] }
 0x5b0   : >> { %23390 = vmatprep.mubr.msk.f32.mxu1 %vm243_vm0, %v29114_v9  ;;  %23830 = vmatprep.mubr.msk.f32.mxu0 %vm243_vm0, %v20454_v6  ;;  %v29138_v6 = vld [vmem:[%s28524_s9 + $0x12f] sm:$0xff] }
 0x5b1   : >> { %32774 = vst [vmem:[#allocation109_spill] sm:$0xff] %v29138_v6 }
 0x5b3   : >> { %23391 = vmatmul.mubr.msk.f32.gmra.mrb[28].mxu1 %vm243_vm0, %v29124_v58  ;;  %23831 = vmatmul.mubr.msk.f32.gmra.mrb[60].mxu0 %vm243_vm0, %v20455_v18  ;;  %v29152_v18 = vld [vmem:[%s28524_s9 + $0x14f] sm:$0xff] }
 0x5b4   : >> { %23393 = vmatprep.mubr.msk.f32.mxu1 %vm243_vm0, %v29128_v24  ;;  %23833 = vmatprep.mubr.msk.f32.mxu0 %vm243_vm0, %v20456_v36  ;;  %32776 = vst [vmem:[#allocation111_spill] sm:$0xff] %v29152_v18  ;;  %v29155_v36 = vld [vmem:[%s28524_s9 + $0x157] sm:$0xff] }
 0x5b5   : >> { %32777 = vst [vmem:[#allocation112_spill] sm:$0xff] %v29155_v36 }
 0x5b7   : >> { %23394 = vmatmul.mubr.msk.f32.gmra.mrb[30].mxu1 %vm243_vm0, %v29138_v6  ;;  %23834 = vmatmul.mubr.msk.f32.gmra.mrb[62].mxu0 %vm243_vm0, %v20457_v12  ;;  %v29170_v12 = vld [vmem:[%s28524_s9 + $0x15f] sm:$0xff] }
 0x5b8   : >> { %23396 = vmatprep.mubr.msk.f32.mxu1 %vm243_vm0, %v29142_v62  ;;  %23838 = vmatprep.mubr.msk.f32.mxu0 %vm243_vm0, %v29005_v48  ;;  %32778 = vst [vmem:[#allocation113_spill] sm:$0xff] %v29170_v12  ;;  %v29175_v48 = vld [vmem:[%s28524_s9 + $0x167] sm:$0xff] }
 0x5b9   : >> { %32779 = vst [vmem:[#allocation114_spill] sm:$0xff] %v29175_v48 }
 0x5bb   : >> { %23397 = vmatmul.mubr.msk.f32.gmra.mrb[32].mxu1 %vm243_vm0, %v29152_v18  ;;  %23839 = vmatmul.mubr.msk.f32.vlgmr.msra.gmra.mrb[0].mxu0 %vm243_vm0, %v29019_v60  ;;  %v9641_v60 = vld [vmem:[%s28524_s9 + $0x19] sm:$0xff] }
 0x5bc   : >> { %23935 = vmatpush3.msra.mxu0 %v28657_v54  ;;  %23399 = vmatprep.mubr.msk.f32.mxu1 %vm243_vm0, %v29155_v36  ;;  %v29187_v54 = vld [vmem:[%s28524_s9 + $0x16f] sm:$0xff] }
 0x5bd   : >> { %23841 = vmatprep.mubr.msk.f32.mxu0 %vm243_vm0, %v29025_v40  ;;  %24032 = vmatprep.subr.mxu0 %v29160_v13  ;;  %32780 = vst [vmem:[#allocation115_spill] sm:$0xff] %v29187_v54  ;;  %v29190_v40 = vld [vmem:[%s28524_s9 + $0x177] sm:$0xff] }
 0x5be   : >> { %32781 = vst [vmem:[#allocation116_spill] sm:$0xff] %v29190_v40 }
 0x5bf   : >> { %23400 = vmatmul.mubr.msk.f32.gmra.mrb[34].mxu1 %vm243_vm0, %v29170_v12  ;;  %23842 = vmatmul.mubr.msk.f32.gmra.mrb[2].mxu0 %vm243_vm0, %v29039_v27  ;;  %v29201_v27 = vld [vmem:[%s28524_s9 + $0x17f] sm:$0xff] }
 0x5c0   : >> { %23402 = vmatprep.mubr.msk.f32.mxu1 %vm243_vm0, %v29175_v48  ;;  %23844 = vmatprep.mubr.msk.f32.mxu0 %vm243_vm0, %v29045_v57  ;;  %32782 = vst [vmem:[#allocation117_spill] sm:$0xff] %v29201_v27  ;;  %v29204_v57 = vld [vmem:[%s28524_s9 + $0x197] sm:$0xff] }
 0x5c1   : >> { %32783 = vst [vmem:[#allocation118_spill] sm:$0xff] %v29204_v57 }
 0x5c3   : >> { %23403 = vmatmul.mubr.msk.f32.gmra.mrb[36].mxu1 %vm243_vm0, %v29187_v54  ;;  %23845 = vmatmul.mubr.msk.f32.gmra.mrb[4].mxu0 %vm243_vm0, %v29059_v41  ;;  %v29215_v41 = vld [vmem:[%s28524_s9 + $0x19f] sm:$0xff] }
 0x5c4   : >> { %23405 = vmatprep.mubr.msk.f32.mxu1 %vm243_vm0, %v29190_v40  ;;  %23847 = vmatprep.mubr.msk.f32.mxu0 %vm243_vm0, %v29065_v21  ;;  %32784 = vst [vmem:[#allocation119_spill] sm:$0xff] %v29215_v41  ;;  %v29218_v21 = vld [vmem:[%s28524_s9 + $0x1a7] sm:$0xff] }
 0x5c5   : >> { %32785 = vst [vmem:[#allocation120_spill] sm:$0xff] %v29218_v21 }
 0x5c7   : >> { %23406 = vmatmul.mubr.msk.f32.gmra.mrb[38].mxu1 %vm243_vm0, %v29201_v27  ;;  %23848 = vmatmul.mubr.msk.f32.gmra.mrb[6].mxu0 %vm243_vm0, %v29079_v2  ;;  %v29229_v2 = vld [vmem:[%s28524_s9 + $0x1af] sm:$0xff] }
 0x5c8   : >> { %23408 = vmatprep.mubr.msk.f32.mxu1 %vm243_vm0, %v29204_v57  ;;  %23850 = vmatprep.mubr.msk.f32.mxu0 %vm243_vm0, %v29085_v11  ;;  %32786 = vst [vmem:[#allocation121_spill] sm:$0xff] %v29229_v2  ;;  %v29232_v11 = vld [vmem:[%s28524_s9 + $0x1b7] sm:$0xff] }
 0x5c9   : >> { %32787 = vst [vmem:[#allocation122_spill] sm:$0xff] %v29232_v11 }
 0x5cb   : >> { %23409 = vmatmul.mubr.msk.f32.gmra.mrb[40].mxu1 %vm243_vm0, %v29215_v41  ;;  %23851 = vmatmul.mubr.msk.f32.gmra.mrb[8].mxu0 %vm243_vm0, %v29096_v56  ;;  %v29243_v56 = vld [vmem:[%s28524_s9 + $0x1bf] sm:$0xff] }
 0x5cc   : >> { %23411 = vmatprep.mubr.msk.f32.mxu1 %vm243_vm0, %v29218_v21  ;;  %23853 = vmatprep.mubr.msk.f32.mxu0 %vm243_vm0, %v29100_v47  ;;  %32788 = vst [vmem:[#allocation123_spill] sm:$0xff] %v29243_v56  ;;  %v29246_v47 = vld [vmem:[%s28524_s9 + $0x1c7] sm:$0xff] }
 0x5cf   : >> { %23412 = vmatmul.mubr.msk.f32.gmra.mrb[42].mxu1 %vm243_vm0, %v29229_v2  ;;  %23854 = vmatmul.mubr.msk.f32.gmra.mrb[10].mxu0 %vm243_vm0, %v29110_v63  ;;  %v29257_v63 = vld [vmem:[%s28524_s9 + $0x1cf] sm:$0xff] }
 0x5d0   : >> { %23414 = vmatprep.mubr.msk.f32.mxu1 %vm243_vm0, %v29232_v11  ;;  %23856 = vmatprep.mubr.msk.f32.mxu0 %vm243_vm0, %v29114_v9  ;;  %32789 = vst [vmem:[#allocation124_spill] sm:$0xff] %v29257_v63  ;;  %v29260_v9 = vld [vmem:[%s28524_s9 + $0x1e7] sm:$0xff] }
 0x5d3   : >> { %23415 = vmatmul.mubr.msk.f32.gmra.mrb[44].mxu1 %vm243_vm0, %v29243_v56  ;;  %23857 = vmatmul.mubr.msk.f32.gmra.mrb[12].mxu0 %vm243_vm0, %v29124_v58  ;;  %v29271_v58 = vld [vmem:[%s28524_s9 + $0x1ef] sm:$0xff] }
 0x5d4   : >> { %23417 = vmatprep.mubr.msk.f32.mxu1 %vm243_vm0, %v29246_v47  ;;  %23859 = vmatprep.mubr.msk.f32.mxu0 %vm243_vm0, %v29128_v24  ;;  %v29274_v24 = vld [vmem:[%s28524_s9 + $0x1f7] sm:$0xff] }
 0x5d7   : >> { %23418 = vmatmul.mubr.msk.f32.gmra.mrb[46].mxu1 %vm243_vm0, %v29257_v63  ;;  %23860 = vmatmul.mubr.msk.f32.gmra.mrb[14].mxu0 %vm243_vm0, %v29138_v6  ;;  %v29285_v6 = vld [vmem:[%s28524_s9 + $0x1ff] sm:$0xff] }
 0x5d8   : >> { %23420 = vmatprep.mubr.msk.f32.mxu1 %vm243_vm0, %v29260_v9  ;;  %23862 = vmatprep.mubr.msk.f32.mxu0 %vm243_vm0, %v29142_v62  ;;  %v29288_v62 = vld [vmem:[%s28524_s9 + $0x207] sm:$0xff] }
 0x5db   : >> { %23421 = vmatmul.mubr.msk.f32.gmra.mrb[48].mxu1 %vm243_vm0, %v29271_v58  ;;  %23863 = vmatmul.mubr.msk.f32.gmra.mrb[16].mxu0 %vm243_vm0, %v29152_v18  ;;  %v29299_v18 = vld [vmem:[%s28524_s9 + $0x20f] sm:$0xff] }
 0x5dc   : >> { %23423 = vmatprep.mubr.msk.f32.mxu1 %vm243_vm0, %v29274_v24  ;;  %23865 = vmatprep.mubr.msk.f32.mxu0 %vm243_vm0, %v29155_v36  ;;  %v29302_v36 = vld [vmem:[%s28524_s9 + $0x217] sm:$0xff] }
 0x5df   : >> { %23424 = vmatmul.mubr.msk.f32.gmra.mrb[50].mxu1 %vm243_vm0, %v29285_v6  ;;  %23866 = vmatmul.mubr.msk.f32.gmra.mrb[18].mxu0 %vm243_vm0, %v29170_v12  ;;  %v29313_v12 = vld [vmem:[%s28524_s9 + $0x21f] sm:$0xff] }
 0x5e0   : >> { %23426 = vmatprep.mubr.msk.f32.mxu1 %vm243_vm0, %v29288_v62  ;;  %23868 = vmatprep.mubr.msk.f32.mxu0 %vm243_vm0, %v29175_v48  ;;  %v29316_v48 = vld [vmem:[%s28524_s9 + $0x237] sm:$0xff] }
 0x5e3   : >> { %23427 = vmatmul.mubr.msk.f32.gmra.mrb[52].mxu1 %vm243_vm0, %v29299_v18  ;;  %23869 = vmatmul.mubr.msk.f32.gmra.mrb[20].mxu0 %vm243_vm0, %v29187_v54  ;;  %v29327_v54 = vld [vmem:[%s28524_s9 + $0x23f] sm:$0xff] }
 0x5e4   : >> { %23429 = vmatprep.mubr.msk.f32.mxu1 %vm243_vm0, %v29302_v36  ;;  %23871 = vmatprep.mubr.msk.f32.mxu0 %vm243_vm0, %v29190_v40  ;;  %v29330_v40 = vld [vmem:[%s28524_s9 + $0x247] sm:$0xff] }
 0x5e7   : >> { %23430 = vmatmul.mubr.msk.f32.gmra.mrb[54].mxu1 %vm243_vm0, %v29313_v12  ;;  %23872 = vmatmul.mubr.msk.f32.gmra.mrb[22].mxu0 %vm243_vm0, %v29201_v27  ;;  %v29341_v27 = vld [vmem:[%s28524_s9 + $0x24f] sm:$0xff] }
 0x5e8   : >> { %23432 = vmatprep.mubr.msk.f32.mxu1 %vm243_vm0, %v29316_v48  ;;  %23874 = vmatprep.mubr.msk.f32.mxu0 %vm243_vm0, %v29204_v57  ;;  %v29344_v57 = vld [vmem:[%s28524_s9 + $0x257] sm:$0xff] }
 0x5eb   : >> { %23433 = vmatmul.mubr.msk.f32.gmra.mrb[56].mxu1 %vm243_vm0, %v29327_v54  ;;  %23875 = vmatmul.mubr.msk.f32.gmra.mrb[24].mxu0 %vm243_vm0, %v29215_v41  ;;  %v29355_v41 = vld [vmem:[%s28524_s9 + $0x25f] sm:$0xff] }
 0x5ec   : >> { %23435 = vmatprep.mubr.msk.f32.mxu1 %vm243_vm0, %v29330_v40  ;;  %23877 = vmatprep.mubr.msk.f32.mxu0 %vm243_vm0, %v29218_v21  ;;  %v29358_v21 = vld [vmem:[%s28524_s9 + $0x267] sm:$0xff] }
 0x5ef   : >> { %23436 = vmatmul.mubr.msk.f32.gmra.mrb[58].mxu1 %vm243_vm0, %v29341_v27  ;;  %23878 = vmatmul.mubr.msk.f32.gmra.mrb[26].mxu0 %vm243_vm0, %v29229_v2  ;;  %v29369_v2 = vld [vmem:[%s28524_s9 + $0x26f] sm:$0xff] }
 0x5f0   : >> { %23438 = vmatprep.mubr.msk.f32.mxu1 %vm243_vm0, %v29344_v57  ;;  %23880 = vmatprep.mubr.msk.f32.mxu0 %vm243_vm0, %v29232_v11  ;;  %v9639_v11 = vld [vmem:[%s28524_s9 + $0x9] sm:$0xff] }
 0x5f3   : >> { %23439 = vmatmul.mubr.msk.f32.gmra.mrb[60].mxu1 %vm243_vm0, %v29355_v41  ;;  %23881 = vmatmul.mubr.msk.f32.gmra.mrb[28].mxu0 %vm243_vm0, %v29243_v56  ;;  %v9640_v56 = vld [vmem:[%s28524_s9 + $0x11] sm:$0xff] }
 0x5f4   : >> { %23441 = vmatprep.mubr.msk.f32.mxu1 %vm243_vm0, %v29358_v21  ;;  %23883 = vmatprep.mubr.msk.f32.mxu0 %vm243_vm0, %v29246_v47 }
 0x5f7   : >> { %23442 = vmatmul.mubr.msk.f32.gmra.mrb[62].mxu1 %vm243_vm0, %v29369_v2  ;;  %23884 = vmatmul.mubr.msk.f32.gmra.mrb[30].mxu0 %vm243_vm0, %v29257_v63  ;;  %v9642_v63 = vld [vmem:[%s28524_s9 + $0x21] sm:$0xff] }
 0x5f8   : >> { %23446 = vmatprep.mubr.msk.f32.mxu1 %vm243_vm0, %v9639_v11  ;;  %23886 = vmatprep.mubr.msk.f32.mxu0 %vm243_vm0, %v29260_v9  ;;  %v9643_v11 = vld [vmem:[%s28524_s9 + $0x29] sm:$0xff] }
 0x5fb   : >> { %23447 = vmatmul.mubr.msk.f32.vlgmr.msra.gmra.mrb[0].mxu1 %vm243_vm0, %v9640_v56  ;;  %23887 = vmatmul.mubr.msk.f32.gmra.mrb[32].mxu0 %vm243_vm0, %v29271_v58  ;;  %v9645_v56 = vld [vmem:[%s28524_s9 + $0x39] sm:$0xff] }
 0x5fc   : >> { %23543 = vmatpush3.msra.mxu1 %v28883_v29  ;;  %23449 = vmatprep.mubr.msk.f32.mxu1 %vm243_vm0, %v9641_v60  ;;  %v9644_v29 = vld [vmem:[%s28524_s9 + $0x31] sm:$0xff]  ;;  %v32794_v60 = vld [vmem:[#allocation79_spill] sm:$0xff] }
 0x5fd   : >> { %23889 = vmatprep.mubr.msk.f32.mxu0 %vm243_vm0, %v29274_v24  ;;  %24644 = vmatprep.subr.mxu1 %v28513_v37  ;;  %v9646_v37 = vld [vmem:[%s28524_s9 + $0x41] sm:$0xff] }
 0x5ff   : >> { %23450 = vmatmul.mubr.msk.f32.gmra.mrb[2].mxu1 %vm243_vm0, %v9642_v63  ;;  %23890 = vmatmul.mubr.msk.f32.gmra.mrb[34].mxu0 %vm243_vm0, %v29285_v6  ;;  %v20675_v63 = vld [vmem:[%s28524_s9 + $0x170] sm:$0xff] }
 0x600   : >> { %23452 = vmatprep.mubr.msk.f32.mxu1 %vm243_vm0, %v9643_v11  ;;  %23892 = vmatprep.mubr.msk.f32.mxu0 %vm243_vm0, %v29288_v62  ;;  %v20676_v11 = vld [vmem:[%s28524_s9 + $0x178] sm:$0xff] }
 0x603   : >> { %23453 = vmatmul.mubr.msk.f32.gmra.mrb[4].mxu1 %vm243_vm0, %v9644_v29  ;;  %23893 = vmatmul.mubr.msk.f32.gmra.mrb[36].mxu0 %vm243_vm0, %v29299_v18  ;;  %v32795_v29 = vld [vmem:[#allocation81_spill] sm:$0xff] }
 0x604   : >> { %23455 = vmatprep.mubr.msk.f32.mxu1 %vm243_vm0, %v9645_v56  ;;  %23895 = vmatprep.mubr.msk.f32.mxu0 %vm243_vm0, %v29302_v36  ;;  %v32796_v56 = vld [vmem:[#allocation83_spill] sm:$0xff] }
 0x607   : >> { %23456 = vmatmul.mubr.msk.f32.gmra.mrb[6].mxu1 %vm243_vm0, %v9646_v37  ;;  %23896 = vmatmul.mubr.msk.f32.gmra.mrb[38].mxu0 %vm243_vm0, %v29313_v12  ;;  %v20677_v37 = vld [vmem:[%s28524_s9 + $0x180] sm:$0xff] }
 0x608   : >> { %23458 = vmatprep.mubr.msk.f32.mxu1 %vm243_vm0, %v28641_v16  ;;  %23898 = vmatprep.mubr.msk.f32.mxu0 %vm243_vm0, %v29316_v48  ;;  %v29438_v16 = vld [vmem:[%s28524_s9 + $0x287] sm:$0xff] }
 0x60b   : >> { %23459 = vmatmul.mubr.msk.f32.gmra.mrb[8].mxu1 %vm243_vm0, %v28649_v59  ;;  %23899 = vmatmul.mubr.msk.f32.gmra.mrb[40].mxu0 %vm243_vm0, %v29327_v54  ;;  %v29449_v59 = vld [vmem:[%s28524_s9 + $0x28f] sm:$0xff] }
 0x60c   : >> { %23461 = vmatprep.mubr.msk.f32.mxu1 %vm243_vm0, %v28652_v53  ;;  %23901 = vmatprep.mubr.msk.f32.mxu0 %vm243_vm0, %v29330_v40  ;;  %v29452_v53 = vld [vmem:[%s28524_s9 + $0x297] sm:$0xff] }
 0x60f   : >> { %23462 = vmatmul.mubr.msk.f32.gmra.mrb[10].mxu1 %vm243_vm0, %v28665_v35  ;;  %23902 = vmatmul.mubr.msk.f32.gmra.mrb[42].mxu0 %vm243_vm0, %v29341_v27  ;;  %v29463_v35 = vld [vmem:[%s28524_s9 + $0x29f] sm:$0xff] }
 0x610   : >> { %23464 = vmatprep.mubr.msk.f32.mxu1 %vm243_vm0, %v28670_v32  ;;  %23904 = vmatprep.mubr.msk.f32.mxu0 %vm243_vm0, %v29344_v57  ;;  %v29466_v32 = vld [vmem:[%s28524_s9 + $0x2a7] sm:$0xff] }
 0x613   : >> { %23465 = vmatmul.mubr.msk.f32.gmra.mrb[12].mxu1 %vm243_vm0, %v28680_v44  ;;  %23905 = vmatmul.mubr.msk.f32.gmra.mrb[44].mxu0 %vm243_vm0, %v29355_v41  ;;  %v29477_v44 = vld [vmem:[%s28524_s9 + $0x2af] sm:$0xff] }
 0x614   : >> { %23467 = vmatprep.mubr.msk.f32.mxu1 %vm243_vm0, %v28683_v25  ;;  %23907 = vmatprep.mubr.msk.f32.mxu0 %vm243_vm0, %v29358_v21  ;;  %v29480_v25 = vld [vmem:[%s28524_s9 + $0x2b7] sm:$0xff] }
 0x617   : >> { %23468 = vmatmul.mubr.msk.f32.gmra.mrb[14].mxu1 %vm243_vm0, %v28692_v51  ;;  %23908 = vmatmul.mubr.msk.f32.gmra.mrb[46].mxu0 %vm243_vm0, %v29369_v2  ;;  %v29491_v51 = vld [vmem:[%s28524_s9 + $0x2bf] sm:$0xff] }
 0x618   : >> { %23470 = vmatprep.mubr.msk.f32.mxu1 %vm243_vm0, %v28696_v1  ;;  %23910 = vmatprep.mubr.msk.f32.mxu0 %vm243_vm0, %v29438_v16  ;;  %v20581_v1 = vld [vmem:[%s28524_s9 + $0x2d7] sm:$0xff] }
 0x61b   : >> { %23471 = vmatmul.mubr.msk.f32.gmra.mrb[16].mxu1 %vm243_vm0, %v28706_v52  ;;  %23911 = vmatmul.mubr.msk.f32.gmra.mrb[48].mxu0 %vm243_vm0, %v29449_v59  ;;  %v20582_v52 = vld [vmem:[%s28524_s9 + $0x2df] sm:$0xff] }
 0x61c   : >> { %23473 = vmatprep.mubr.msk.f32.mxu1 %vm243_vm0, %v28710_v30  ;;  %23913 = vmatprep.mubr.msk.f32.mxu0 %vm243_vm0, %v29452_v53  ;;  %v20583_v30 = vld [vmem:[%s28524_s9 + $0x2e7] sm:$0xff] }
 0x61f   : >> { %23474 = vmatmul.mubr.msk.f32.gmra.mrb[18].mxu1 %vm243_vm0, %v28720_v49  ;;  %23914 = vmatmul.mubr.msk.f32.gmra.mrb[50].mxu0 %vm243_vm0, %v29463_v35  ;;  %v20584_v49 = vld [vmem:[%s28524_s9 + $0x2ef] sm:$0xff] }
 0x620   : >> { %23476 = vmatprep.mubr.msk.f32.mxu1 %vm243_vm0, %v28724_v46  ;;  %23916 = vmatprep.mubr.msk.f32.mxu0 %vm243_vm0, %v29466_v32  ;;  %v20585_v46 = vld [vmem:[%s28524_s9 + $0x2f7] sm:$0xff] }
 0x623   : >> { %23477 = vmatmul.mubr.msk.f32.gmra.mrb[20].mxu1 %vm243_vm0, %v28734_v3  ;;  %23917 = vmatmul.mubr.msk.f32.gmra.mrb[52].mxu0 %vm243_vm0, %v29477_v44  ;;  %v20586_v3 = vld [vmem:[%s28524_s9 + $0x2ff] sm:$0xff] }
 0x624   : >> { %23479 = vmatprep.mubr.msk.f32.mxu1 %vm243_vm0, %v28738_v15  ;;  %23919 = vmatprep.mubr.msk.f32.mxu0 %vm243_vm0, %v29480_v25  ;;  %v20587_v15 = vld [vmem:[%s28524_s9 + $0x307] sm:$0xff] }
 0x627   : >> { %23480 = vmatmul.mubr.msk.f32.gmra.mrb[22].mxu1 %vm243_vm0, %v28748_v61  ;;  %23920 = vmatmul.mubr.msk.f32.gmra.mrb[54].mxu0 %vm243_vm0, %v29491_v51  ;;  %v20588_v61 = vld [vmem:[%s28524_s9 + $0x30f] sm:$0xff] }
 0x628   : >> { %23482 = vmatprep.mubr.msk.f32.mxu1 %vm243_vm0, %v28752_v31  ;;  %23922 = vmatprep.mubr.msk.f32.mxu0 %vm243_vm0, %v20581_v1  ;;  %v20654_v31 = vld [vmem:[%s28524_s9 + $0xa8] sm:$0xff]  ;;  %v29624_v1 = vld [vmem:[%s28524_s9 + $0x198] sm:$0xff] }
 0x62b   : >> { %23483 = vmatmul.mubr.msk.f32.gmra.mrb[24].mxu1 %vm243_vm0, %v28762_v10  ;;  %23923 = vmatmul.mubr.msk.f32.gmra.mrb[56].mxu0 %vm243_vm0, %v20582_v52  ;;  %v20655_v10 = vld [vmem:[%s28524_s9 + $0xb0] sm:$0xff] }
 0x62c   : >> { %23485 = vmatprep.mubr.msk.f32.mxu1 %vm243_vm0, %v28766_v19  ;;  %23925 = vmatprep.mubr.msk.f32.mxu0 %vm243_vm0, %v20583_v30  ;;  %v20656_v19 = vld [vmem:[%s28524_s9 + $0xb8] sm:$0xff]  ;;  %v32797_v52 = vld [vmem:[#allocation85_spill] sm:$0xff]  ;;  %v32798_v30 = vld [vmem:[#allocation87_spill] sm:$0xff] }
 0x62f   : >> { %23486 = vmatmul.mubr.msk.f32.gmra.mrb[26].mxu1 %vm243_vm0, %v28776_v39  ;;  %23926 = vmatmul.mubr.msk.f32.gmra.mrb[58].mxu0 %vm243_vm0, %v20584_v49  ;;  %v20657_v39 = vld [vmem:[%s28524_s9 + $0xc0] sm:$0xff] }
 0x630   : >> { %23488 = vmatprep.mubr.msk.f32.mxu1 %vm243_vm0, %v28780_v45  ;;  %23928 = vmatprep.mubr.msk.f32.mxu0 %vm243_vm0, %v20585_v46  ;;  %v20658_v45 = vld [vmem:[%s28524_s9 + $0xc8] sm:$0xff]  ;;  %v29634_v49 = vld [vmem:[%s28524_s9 + $0x1a0] sm:$0xff] }
 0x631   : >> { %v29637_v46 = vld [vmem:[%s28524_s9 + $0x1a8] sm:$0xff] }
 0x633   : >> { %23489 = vmatmul.mubr.msk.f32.gmra.mrb[28].mxu1 %vm243_vm0, %v28790_v50  ;;  %23929 = vmatmul.mubr.msk.f32.gmra.mrb[60].mxu0 %vm243_vm0, %v20586_v3  ;;  %v20659_v50 = vld [vmem:[%s28524_s9 + $0xd0] sm:$0xff] }
 0x634   : >> { %23491 = vmatprep.mubr.msk.f32.mxu1 %vm243_vm0, %v28794_v22  ;;  %23931 = vmatprep.mubr.msk.f32.mxu0 %vm243_vm0, %v20587_v15  ;;  %v20660_v22 = vld [vmem:[%s28524_s9 + $0xd8] sm:$0xff]  ;;  %v32799_v3 = vld [vmem:[#allocation89_spill] sm:$0xff]  ;;  %v32800_v15 = vld [vmem:[#allocation91_spill] sm:$0xff] }
 0x637   : >> { %23492 = vmatmul.mubr.msk.f32.gmra.mrb[30].mxu1 %vm243_vm0, %v28804_v23  ;;  %23932 = vmatmul.mubr.msk.f32.gmra.mrb[62].mxu0 %vm243_vm0, %v20588_v61  ;;  %v20661_v23 = vld [vmem:[%s28524_s9 + $0xe0] sm:$0xff]  ;;  %v29648_v61 = vld [vmem:[%s28524_s9 + $0x1b0] sm:$0xff] }
 0x638   : >> { %23494 = vmatprep.mubr.msk.f32.mxu1 %vm243_vm0, %v28808_v17  ;;  %23936 = vmatprep.mubr.msk.f32.mxu0 %vm243_vm0, %v20654_v31  ;;  %v20662_v17 = vld [vmem:[%s28524_s9 + $0xf8] sm:$0xff] }
 0x639   : >> { %v29651_v31 = vld [vmem:[%s28524_s9 + $0x1b8] sm:$0xff] }
 0x63b   : >> { %23495 = vmatmul.mubr.msk.f32.gmra.mrb[32].mxu1 %vm243_vm0, %v28818_v34  ;;  %23937 = vmatmul.mubr.msk.f32.vlgmr.msra.gmra.mrb[0].mxu0 %vm243_vm0, %v20655_v10  ;;  %v20663_v34 = vld [vmem:[%s28524_s9 + $0x100] sm:$0xff]  ;;  %v32801_v10 = vld [vmem:[#allocation93_spill] sm:$0xff] }
 0x63c   : >> { %24033 = vmatpush3.msra.mxu0 %v29160_v13  ;;  %23497 = vmatprep.mubr.msk.f32.mxu1 %vm243_vm0, %v28822_v42  ;;  %v20664_v42 = vld [vmem:[%s28524_s9 + $0x108] sm:$0xff]  ;;  %v32793_v13 = vld [vmem:[#allocation77_spill] sm:$0xff] }
 0x63d   : >> { %23939 = vmatprep.mubr.msk.f32.mxu0 %vm243_vm0, %v20656_v19  ;;  %v32802_v19 = vld [vmem:[#allocation95_spill] sm:$0xff] }
 0x63f   : >> { %23498 = vmatmul.mubr.msk.f32.gmra.mrb[34].mxu1 %vm243_vm0, %v28832_v4  ;;  %23940 = vmatmul.mubr.msk.f32.gmra.mrb[2].mxu0 %vm243_vm0, %v20657_v39  ;;  %v20665_v4 = vld [vmem:[%s28524_s9 + $0x110] sm:$0xff]  ;;  %v29662_v39 = vld [vmem:[%s28524_s9 + $0x1c0] sm:$0xff] }
 0x640   : >> { %23500 = vmatprep.mubr.msk.f32.mxu1 %vm243_vm0, %v28836_v26  ;;  %23942 = vmatprep.mubr.msk.f32.mxu0 %vm243_vm0, %v20658_v45  ;;  %v20666_v26 = vld [vmem:[%s28524_s9 + $0x118] sm:$0xff]  ;;  %v29665_v45 = vld [vmem:[%s28524_s9 + $0x1c8] sm:$0xff] }
 0x643   : >> { %23501 = vmatmul.mubr.msk.f32.gmra.mrb[36].mxu1 %vm243_vm0, %v28846_v43  ;;  %23943 = vmatmul.mubr.msk.f32.gmra.mrb[4].mxu0 %vm243_vm0, %v20659_v50  ;;  %v20667_v43 = vld [vmem:[%s28524_s9 + $0x120] sm:$0xff]  ;;  %v32803_v50 = vld [vmem:[#allocation97_spill] sm:$0xff] }
 0x644   : >> { %23503 = vmatprep.mubr.msk.f32.mxu1 %vm243_vm0, %v28850_v33  ;;  %23945 = vmatprep.mubr.msk.f32.mxu0 %vm243_vm0, %v20660_v22  ;;  %v20668_v33 = vld [vmem:[%s28524_s9 + $0x128] sm:$0xff]  ;;  %v32804_v22 = vld [vmem:[#allocation99_spill] sm:$0xff] }
 0x647   : >> { %23504 = vmatmul.mubr.msk.f32.gmra.mrb[38].mxu1 %vm243_vm0, %v28860_v38  ;;  %23946 = vmatmul.mubr.msk.f32.gmra.mrb[6].mxu0 %vm243_vm0, %v20661_v23  ;;  %v20669_v38 = vld [vmem:[%s28524_s9 + $0x130] sm:$0xff] }
 0x648   : >> { %23506 = vmatprep.mubr.msk.f32.mxu1 %vm243_vm0, %v28864_v14  ;;  %23948 = vmatprep.mubr.msk.f32.mxu0 %vm243_vm0, %v20662_v17  ;;  %v20670_v14 = vld [vmem:[%s28524_s9 + $0x148] sm:$0xff]  ;;  %v29676_v23 = vld [vmem:[%s28524_s9 + $0x1d0] sm:$0xff] }
 0x649   : >> { %v29679_v17 = vld [vmem:[%s28524_s9 + $0x1e8] sm:$0xff] }
 0x64b   : >> { %23507 = vmatmul.mubr.msk.f32.gmra.mrb[40].mxu1 %vm243_vm0, %v28874_v20  ;;  %23949 = vmatmul.mubr.msk.f32.gmra.mrb[8].mxu0 %vm243_vm0, %v20663_v34  ;;  %v32790_v20 = vld [vmem:[#allocation71_spill] sm:$0xff]  ;;  %v32805_v34 = vld [vmem:[#allocation101_spill] sm:$0xff] }
 0x64c   : >> { %23509 = vmatprep.mubr.msk.f32.mxu1 %vm243_vm0, %v28878_v28  ;;  %23951 = vmatprep.mubr.msk.f32.mxu0 %vm243_vm0, %v20664_v42  ;;  %v20671_v28 = vld [vmem:[%s28524_s9 + $0x150] sm:$0xff]  ;;  %v32806_v42 = vld [vmem:[#allocation70_spill] sm:$0xff] }
 0x64f   : >> { %23510 = vmatmul.mubr.msk.f32.gmra.mrb[42].mxu1 %vm243_vm0, %v28892_v7  ;;  %23952 = vmatmul.mubr.msk.f32.gmra.mrb[10].mxu0 %vm243_vm0, %v20665_v4  ;;  %v20672_v7 = vld [vmem:[%s28524_s9 + $0x158] sm:$0xff]  ;;  %v29690_v4 = vld [vmem:[%s28524_s9 + $0x1f0] sm:$0xff] }
 0x650   : >> { %23512 = vmatprep.mubr.msk.f32.mxu1 %vm243_vm0, %v28898_v0  ;;  %23954 = vmatprep.mubr.msk.f32.mxu0 %vm243_vm0, %v20666_v26  ;;  %v32791_v0 = vld [vmem:[#allocation73_spill] sm:$0xff]  ;;  %v29693_v26 = vld [vmem:[%s28524_s9 + $0x1f8] sm:$0xff] }
 0x653   : >> { %23513 = vmatmul.mubr.msk.f32.gmra.mrb[44].mxu1 %vm243_vm0, %v28909_v55  ;;  %23955 = vmatmul.mubr.msk.f32.gmra.mrb[12].mxu0 %vm243_vm0, %v20667_v43  ;;  %v32792_v55 = vld [vmem:[#allocation75_spill] sm:$0xff]  ;;  %v32807_v43 = vld [vmem:[#allocation72_spill] sm:$0xff] }
 0x654   : >> { %23515 = vmatprep.mubr.msk.f32.mxu1 %vm243_vm0, %v28913_v8  ;;  %23957 = vmatprep.mubr.msk.f32.mxu0 %vm243_vm0, %v20668_v33  ;;  %v20673_v8 = vld [vmem:[%s28524_s9 + $0x160] sm:$0xff] }
 0x655   : >> { %v25266_v33 = vld [vmem:[%s32308_s3 + $0x20] sm:$0xff] }
 0x657   : >> { %23516 = vmatmul.mubr.msk.f32.gmra.mrb[46].mxu1 %vm243_vm0, %v28923_v5  ;;  %23958 = vmatmul.mubr.msk.f32.gmra.mrb[14].mxu0 %vm243_vm0, %v20669_v38  ;;  %v20674_v5 = vld [vmem:[%s28524_s9 + $0x168] sm:$0xff]  ;;  %v32808_v38 = vld [vmem:[#allocation74_spill] sm:$0xff] }
 0x658   : >> { %23518 = vmatprep.mubr.msk.f32.mxu1 %vm243_vm0, %v32790_v20  ;;  %23960 = vmatprep.mubr.msk.f32.mxu0 %vm243_vm0, %v20670_v14  ;;  %v29705_v14 = vld [vmem:[%s28524_s9 + $0x200] sm:$0xff]  ;;  %v29710_v20 = vld [vmem:[%s28524_s9 + $0x208] sm:$0xff] }
 0x65b   : >> { %23519 = vmatmul.mubr.msk.f32.gmra.mrb[48].mxu1 %vm243_vm0, %v32791_v0  ;;  %23961 = vmatmul.mubr.msk.f32.gmra.mrb[16].mxu0 %vm243_vm0, %v20671_v28  ;;  %v32809_v28 = vld [vmem:[#allocation76_spill] sm:$0xff]  ;;  %v29721_v0 = vld [vmem:[%s28524_s9 + $0x210] sm:$0xff] }
 0x65c   : >> { %23521 = vmatprep.mubr.msk.f32.mxu1 %vm243_vm0, %v32792_v55  ;;  %23963 = vmatprep.mubr.msk.f32.mxu0 %vm243_vm0, %v20672_v7  ;;  %v32810_v7 = vld [vmem:[#allocation78_spill] sm:$0xff] }
 0x65d   : >> { %v29724_v55 = vld [vmem:[%s28524_s9 + $0x218] sm:$0xff] }
 0x65f   : >> { %23522 = vmatmul.mubr.msk.f32.gmra.mrb[50].mxu1 %vm243_vm0, %v32793_v13  ;;  %23964 = vmatmul.mubr.msk.f32.gmra.mrb[18].mxu0 %vm243_vm0, %v20673_v8  ;;  %v32811_v8 = vld [vmem:[#allocation80_spill] sm:$0xff]  ;;  %v29735_v13 = vld [vmem:[%s28524_s9 + $0x220] sm:$0xff] }
 0x660   : >> { %23524 = vmatprep.mubr.msk.f32.mxu1 %vm243_vm0, %v32794_v60  ;;  %23966 = vmatprep.mubr.msk.f32.mxu0 %vm243_vm0, %v20674_v5  ;;  %v32812_v5 = vld [vmem:[#allocation82_spill] sm:$0xff] }
 0x661   : >> { %v29738_v60 = vld [vmem:[%s28524_s9 + $0x238] sm:$0xff] }
 0x663   : >> { %23525 = vmatmul.mubr.msk.f32.gmra.mrb[52].mxu1 %vm243_vm0, %v32795_v29  ;;  %23967 = vmatmul.mubr.msk.f32.gmra.mrb[20].mxu0 %vm243_vm0, %v20675_v63  ;;  %v32813_v63 = vld [vmem:[#allocation84_spill] sm:$0xff]  ;;  %v29749_v29 = vld [vmem:[%s28524_s9 + $0x240] sm:$0xff] }
 0x664   : >> { %23527 = vmatprep.mubr.msk.f32.mxu1 %vm243_vm0, %v32796_v56  ;;  %23969 = vmatprep.mubr.msk.f32.mxu0 %vm243_vm0, %v20676_v11  ;;  %v32814_v11 = vld [vmem:[#allocation86_spill] sm:$0xff]  ;;  %v29752_v56 = vld [vmem:[%s28524_s9 + $0x248] sm:$0xff] }
 0x667   : >> { %23528 = vmatmul.mubr.msk.f32.gmra.mrb[54].mxu1 %vm243_vm0, %v32797_v52  ;;  %23970 = vmatmul.mubr.msk.f32.gmra.mrb[22].mxu0 %vm243_vm0, %v20677_v37  ;;  %v32815_v37 = vld [vmem:[#allocation88_spill] sm:$0xff]  ;;  %v32816_v52 = vld [vmem:[#allocation90_spill] sm:$0xff] }
 0x668   : >> { %23530 = vmatprep.mubr.msk.f32.mxu1 %vm243_vm0, %v32798_v30  ;;  %23972 = vmatprep.mubr.msk.f32.mxu0 %vm243_vm0, %v29624_v1  ;;  %v29763_v30 = vld [vmem:[%s28524_s9 + $0x250] sm:$0xff] }
 0x66b   : >> { %23531 = vmatmul.mubr.msk.f32.gmra.mrb[56].mxu1 %vm243_vm0, %v32799_v3  ;;  %23973 = vmatmul.mubr.msk.f32.gmra.mrb[24].mxu0 %vm243_vm0, %v29634_v49  ;;  %v29766_v3 = vld [vmem:[%s28524_s9 + $0x258] sm:$0xff] }
 0x66c   : >> { %23533 = vmatprep.mubr.msk.f32.mxu1 %vm243_vm0, %v32800_v15  ;;  %23975 = vmatprep.mubr.msk.f32.mxu0 %vm243_vm0, %v29637_v46  ;;  %v32817_v15 = vld [vmem:[#allocation92_spill] sm:$0xff] }
 0x66f   : >> { %23534 = vmatmul.mubr.msk.f32.gmra.mrb[58].mxu1 %vm243_vm0, %v32801_v10  ;;  %23976 = vmatmul.mubr.msk.f32.gmra.mrb[26].mxu0 %vm243_vm0, %v29648_v61  ;;  %v32818_v10 = vld [vmem:[#allocation94_spill] sm:$0xff] }
 0x670   : >> { %23536 = vmatprep.mubr.msk.f32.mxu1 %vm243_vm0, %v32802_v19  ;;  %23978 = vmatprep.mubr.msk.f32.mxu0 %vm243_vm0, %v29651_v31  ;;  %v29777_v19 = vld [vmem:[%s28524_s9 + $0x260] sm:$0xff] }
 0x673   : >> { %23537 = vmatmul.mubr.msk.f32.gmra.mrb[60].mxu1 %vm243_vm0, %v32803_v50  ;;  %23979 = vmatmul.mubr.msk.f32.gmra.mrb[28].mxu0 %vm243_vm0, %v29662_v39  ;;  %v29780_v50 = vld [vmem:[%s28524_s9 + $0x268] sm:$0xff] }
 0x674   : >> { %23539 = vmatprep.mubr.msk.f32.mxu1 %vm243_vm0, %v32804_v22  ;;  %23981 = vmatprep.mubr.msk.f32.mxu0 %vm243_vm0, %v29665_v45  ;;  %v32819_v22 = vld [vmem:[#allocation96_spill] sm:$0xff] }
 0x677   : >> { %23540 = vmatmul.mubr.msk.f32.gmra.mrb[62].mxu1 %vm243_vm0, %v32805_v34  ;;  %23982 = vmatmul.mubr.msk.f32.gmra.mrb[30].mxu0 %vm243_vm0, %v29676_v23  ;;  %v32820_v34 = vld [vmem:[#allocation98_spill] sm:$0xff] }
 0x678   : >> { %23544 = vmatprep.mubr.msk.f32.mxu1 %vm243_vm0, %v32806_v42  ;;  %23984 = vmatprep.mubr.msk.f32.mxu0 %vm243_vm0, %v29679_v17  ;;  %v29791_v42 = vld [vmem:[%s28524_s9 + $0x270] sm:$0xff] }
 0x67b   : >> { %23545 = vmatmul.mubr.msk.f32.vlgmr.msra.gmra.mrb[0].mxu1 %vm243_vm0, %v32807_v43  ;;  %23985 = vmatmul.mubr.msk.f32.gmra.mrb[32].mxu0 %vm243_vm0, %v29690_v4  ;;  %v29794_v43 = vld [vmem:[%s28524_s9 + $0x288] sm:$0xff] }
 0x67c   : >> { %24645 = vmatpush3.msra.mxu1 %v25266_v33  ;;  %23547 = vmatprep.mubr.msk.f32.mxu1 %vm243_vm0, %v32808_v38  ;;  %v32821_v33 = vld [vmem:[#allocation100_spill] sm:$0xff]  ;;  %v32822_v38 = vld [vmem:[#allocation102_spill] sm:$0xff] }
 0x67d   : >> { %23987 = vmatprep.mubr.msk.f32.mxu0 %vm243_vm0, %v29693_v26 }
 0x67f   : >> { %23548 = vmatmul.mubr.msk.f32.gmra.mrb[2].mxu1 %vm243_vm0, %v32809_v28  ;;  %23988 = vmatmul.mubr.msk.f32.gmra.mrb[34].mxu0 %vm243_vm0, %v29705_v14  ;;  %v29805_v28 = vld [vmem:[%s28524_s9 + $0x290] sm:$0xff] }
 0x680   : >> { %23550 = vmatprep.mubr.msk.f32.mxu1 %vm243_vm0, %v32810_v7  ;;  %23990 = vmatprep.mubr.msk.f32.mxu0 %vm243_vm0, %v29710_v20  ;;  %v29808_v7 = vld [vmem:[%s28524_s9 + $0x298] sm:$0xff] }
 0x683   : >> { %23551 = vmatmul.mubr.msk.f32.gmra.mrb[4].mxu1 %vm243_vm0, %v32811_v8  ;;  %23991 = vmatmul.mubr.msk.f32.gmra.mrb[36].mxu0 %vm243_vm0, %v29721_v0  ;;  %v32823_v8 = vld [vmem:[#allocation103_spill] sm:$0xff] }
 0x684   : >> { %23553 = vmatprep.mubr.msk.f32.mxu1 %vm243_vm0, %v32812_v5  ;;  %23993 = vmatprep.mubr.msk.f32.mxu0 %vm243_vm0, %v29724_v55  ;;  %v32824_v5 = vld [vmem:[#allocation104_spill] sm:$0xff] }
 0x687   : >> { %23554 = vmatmul.mubr.msk.f32.gmra.mrb[6].mxu1 %vm243_vm0, %v32813_v63  ;;  %23994 = vmatmul.mubr.msk.f32.gmra.mrb[38].mxu0 %vm243_vm0, %v29735_v13  ;;  %v29819_v63 = vld [vmem:[%s28524_s9 + $0x2a0] sm:$0xff] }
 0x688   : >> { %23556 = vmatprep.mubr.msk.f32.mxu1 %vm243_vm0, %v32814_v11  ;;  %23996 = vmatprep.mubr.msk.f32.mxu0 %vm243_vm0, %v29738_v60  ;;  %v29822_v11 = vld [vmem:[%s28524_s9 + $0x2a8] sm:$0xff] }
 0x68b   : >> { %23557 = vmatmul.mubr.msk.f32.gmra.mrb[8].mxu1 %vm243_vm0, %v32815_v37  ;;  %23997 = vmatmul.mubr.msk.f32.gmra.mrb[40].mxu0 %vm243_vm0, %v29749_v29  ;;  %v32825_v37 = vld [vmem:[#allocation105_spill] sm:$0xff] }
 0x68c   : >> { %23559 = vmatprep.mubr.msk.f32.mxu1 %vm243_vm0, %v32816_v52  ;;  %23999 = vmatprep.mubr.msk.f32.mxu0 %vm243_vm0, %v29752_v56  ;;  %v32826_v52 = vld [vmem:[#allocation106_spill] sm:$0xff] }
 0x68f   : >> { %23560 = vmatmul.mubr.msk.f32.gmra.mrb[10].mxu1 %vm243_vm0, %v32817_v15  ;;  %24000 = vmatmul.mubr.msk.f32.gmra.mrb[42].mxu0 %vm243_vm0, %v29763_v30  ;;  %v29833_v15 = vld [vmem:[%s28524_s9 + $0x2b0] sm:$0xff] }
 0x690   : >> { %23562 = vmatprep.mubr.msk.f32.mxu1 %vm243_vm0, %v32818_v10  ;;  %24002 = vmatprep.mubr.msk.f32.mxu0 %vm243_vm0, %v29766_v3  ;;  %v29836_v10 = vld [vmem:[%s28524_s9 + $0x2b8] sm:$0xff] }
 0x691   : >> { %32827 = vst [vmem:[#allocation71_spill] sm:$0xff] %v29836_v10 }
 0x693   : >> { %23563 = vmatmul.mubr.msk.f32.gmra.mrb[12].mxu1 %vm243_vm0, %v32819_v22  ;;  %24003 = vmatmul.mubr.msk.f32.gmra.mrb[44].mxu0 %vm243_vm0, %v29777_v19  ;;  %v32828_v22 = vld [vmem:[#allocation107_spill] sm:$0xff] }
 0x694   : >> { %23565 = vmatprep.mubr.msk.f32.mxu1 %vm243_vm0, %v32820_v34  ;;  %24005 = vmatprep.mubr.msk.f32.mxu0 %vm243_vm0, %v29780_v50  ;;  %v32829_v34 = vld [vmem:[#allocation108_spill] sm:$0xff] }
 0x697   : >> { %23566 = vmatmul.mubr.msk.f32.gmra.mrb[14].mxu1 %vm243_vm0, %v32821_v33  ;;  %24006 = vmatmul.mubr.msk.f32.gmra.mrb[46].mxu0 %vm243_vm0, %v29791_v42  ;;  %v29847_v33 = vld [vmem:[%s28524_s9 + $0x2c0] sm:$0xff] }
 0x698   : >> { %23568 = vmatprep.mubr.msk.f32.mxu1 %vm243_vm0, %v32822_v38  ;;  %24008 = vmatprep.mubr.msk.f32.mxu0 %vm243_vm0, %v29794_v43  ;;  %32830 = vst [vmem:[#allocation73_spill] sm:$0xff] %v29847_v33  ;;  %v20710_v38 = vld [vmem:[%s28524_s9 + $0x2d8] sm:$0xff] }
 0x69b   : >> { %23569 = vmatmul.mubr.msk.f32.gmra.mrb[16].mxu1 %vm243_vm0, %v32823_v8  ;;  %24009 = vmatmul.mubr.msk.f32.gmra.mrb[48].mxu0 %vm243_vm0, %v29805_v28  ;;  %v32831_v8 = vld [vmem:[#allocation109_spill] sm:$0xff] }
 0x69c   : >> { %23571 = vmatprep.mubr.msk.f32.mxu1 %vm243_vm0, %v32824_v5  ;;  %24011 = vmatprep.mubr.msk.f32.mxu0 %vm243_vm0, %v29808_v7  ;;  %v32832_v5 = vld [vmem:[#allocation110_spill] sm:$0xff] }
 0x69f   : >> { %23572 = vmatmul.mubr.msk.f32.gmra.mrb[18].mxu1 %vm243_vm0, %v32825_v37  ;;  %24012 = vmatmul.mubr.msk.f32.gmra.mrb[50].mxu0 %vm243_vm0, %v29819_v63  ;;  %v20711_v37 = vld [vmem:[%s28524_s9 + $0x2e0] sm:$0xff] }
 0x6a0   : >> { %23574 = vmatprep.mubr.msk.f32.mxu1 %vm243_vm0, %v32826_v52  ;;  %24014 = vmatprep.mubr.msk.f32.mxu0 %vm243_vm0, %v29822_v11  ;;  %v20712_v52 = vld [vmem:[%s28524_s9 + $0x2e8] sm:$0xff] }
 0x6a3   : >> { %23575 = vmatmul.mubr.msk.f32.gmra.mrb[20].mxu1 %vm243_vm0, %v32828_v22  ;;  %24015 = vmatmul.mubr.msk.f32.gmra.mrb[52].mxu0 %vm243_vm0, %v29833_v15  ;;  %v32833_v22 = vld [vmem:[#allocation111_spill] sm:$0xff] }
 0x6a4   : >> { %23577 = vmatprep.mubr.msk.f32.mxu1 %vm243_vm0, %v32829_v34  ;;  %24017 = vmatprep.mubr.msk.f32.mxu0 %vm243_vm0, %v29836_v10  ;;  %v32834_v34 = vld [vmem:[#allocation112_spill] sm:$0xff]  ;;  %v32835_v10 = vld [vmem:[#allocation113_spill] sm:$0xff] }
 0x6a7   : >> { %23578 = vmatmul.mubr.msk.f32.gmra.mrb[22].mxu1 %vm243_vm0, %v32831_v8  ;;  %24018 = vmatmul.mubr.msk.f32.gmra.mrb[54].mxu0 %vm243_vm0, %v29847_v33  ;;  %v20713_v8 = vld [vmem:[%s28524_s9 + $0x2f0] sm:$0xff]  ;;  %v20714_v33 = vld [vmem:[%s28524_s9 + $0x2f8] sm:$0xff] }
 0x6a8   : >> { %23580 = vmatprep.mubr.msk.f32.mxu1 %vm243_vm0, %v32832_v5  ;;  %24020 = vmatprep.mubr.msk.f32.mxu0 %vm243_vm0, %v20710_v38  ;;  %v32836_v38 = vld [vmem:[#allocation114_spill] sm:$0xff]  ;;  %v20715_v5 = vld [vmem:[%s28524_s9 + $0x300] sm:$0xff] }
 0x6ab   : >> { %23581 = vmatmul.mubr.msk.f32.gmra.mrb[24].mxu1 %vm243_vm0, %v32833_v22  ;;  %24021 = vmatmul.mubr.msk.f32.gmra.mrb[56].mxu0 %vm243_vm0, %v20711_v37  ;;  %v20716_v37 = vld [vmem:[%s28524_s9 + $0x308] sm:$0xff]  ;;  %v32837_v22 = vld [vmem:[#allocation115_spill] sm:$0xff] }
 0x6ac   : >> { %23583 = vmatprep.mubr.msk.f32.mxu1 %vm243_vm0, %v32834_v34  ;;  %24023 = vmatprep.mubr.msk.f32.mxu0 %vm243_vm0, %v20712_v52  ;;  %v32838_v52 = vld [vmem:[#allocation116_spill] sm:$0xff] }
 0x6ad   : >> { %v20783_v34 = vld [vmem:[%s28524_s9 + $0xa9] sm:$0xff] }
 0x6af   : >> { %23584 = vmatmul.mubr.msk.f32.gmra.mrb[26].mxu1 %vm243_vm0, %v32835_v10  ;;  %24024 = vmatmul.mubr.msk.f32.gmra.mrb[58].mxu0 %vm243_vm0, %v20713_v8  ;;  %v20717_v10 = vld [vmem:[%s28524_s9 + $0x310] sm:$0xff] }
 0x6b0   : >> { %23586 = vmatprep.mubr.msk.f32.mxu1 %vm243_vm0, %v32836_v38  ;;  %24026 = vmatprep.mubr.msk.f32.mxu0 %vm243_vm0, %v20714_v33  ;;  %v32839_v8 = vld [vmem:[#allocation117_spill] sm:$0xff]  ;;  %v32840_v33 = vld [vmem:[#allocation118_spill] sm:$0xff] }
 0x6b1   : >> { %v20784_v38 = vld [vmem:[%s28524_s9 + $0xb1] sm:$0xff] }
 0x6b3   : >> { %23587 = vmatmul.mubr.msk.f32.gmra.mrb[28].mxu1 %vm243_vm0, %v32837_v22  ;;  %24027 = vmatmul.mubr.msk.f32.gmra.mrb[60].mxu0 %vm243_vm0, %v20715_v5  ;;  %v20785_v5 = vld [vmem:[%s28524_s9 + $0xb9] sm:$0xff] }
 0x6b4   : >> { %23589 = vmatprep.mubr.msk.f32.mxu1 %vm243_vm0, %v32838_v52  ;;  %24029 = vmatprep.mubr.msk.f32.mxu0 %vm243_vm0, %v20716_v37  ;;  %v32841_v22 = vld [vmem:[#allocation119_spill] sm:$0xff]  ;;  %v32842_v37 = vld [vmem:[#allocation120_spill] sm:$0xff] }
 0x6b5   : >> { %v20786_v52 = vld [vmem:[%s28524_s9 + $0xc1] sm:$0xff] }
 0x6b7   : >> { %23590 = vmatmul.mubr.msk.f32.gmra.mrb[30].mxu1 %vm243_vm0, %v32839_v8  ;;  %24030 = vmatmul.mubr.msk.f32.gmra.mrb[62].mxu0 %vm243_vm0, %v20717_v10  ;;  %v20787_v10 = vld [vmem:[%s28524_s9 + $0xc9] sm:$0xff] }
 0x6b8   : >> { %23592 = vmatprep.mubr.msk.f32.mxu1 %vm243_vm0, %v32840_v33  ;;  %24034 = vmatprep.mubr.msk.f32.mxu0 %vm243_vm0, %v20783_v34  ;;  %v32843_v8 = vld [vmem:[#allocation121_spill] sm:$0xff]  ;;  %v32844_v34 = vld [vmem:[#allocation122_spill] sm:$0xff] }
 0x6b9   : >> { %v20788_v33 = vld [vmem:[%s28524_s9 + $0xd1] sm:$0xff] }
 0x6bb   : >> { %23593 = vmatmul.mubr.msk.f32.gmra.mrb[32].mxu1 %vm243_vm0, %v32841_v22  ;;  %24035 = vmatmul.mubr.msk.f32.vlgmr.msra.gmra.mrb[0].mxu0 %vm243_vm0, %v20784_v38  ;;  %v20789_v38 = vld [vmem:[%s28524_s9 + $0xd9] sm:$0xff] }
 0x6bc   : >> { %23595 = vmatprep.mubr.msk.f32.mxu1 %vm243_vm0, %v32842_v37  ;;  %24037 = vmatprep.mubr.msk.f32.mxu0 %vm243_vm0, %v20785_v5  ;;  %v32845_v22 = vld [vmem:[#allocation123_spill] sm:$0xff] }
 0x6bd   : >> { %v20790_v5 = vld [vmem:[%s28524_s9 + $0xe1] sm:$0xff]  ;;  %v20791_v37 = vld [vmem:[%s28524_s9 + $0xf9] sm:$0xff] }
 0x6bf   : >> { %23596 = vmatmul.mubr.msk.f32.gmra.mrb[34].mxu1 %vm243_vm0, %v32843_v8  ;;  %24038 = vmatmul.mubr.msk.f32.gmra.mrb[2].mxu0 %vm243_vm0, %v20786_v52  ;;  %v32846_v52 = vld [vmem:[#allocation124_spill] sm:$0xff] }
 0x6c0   : >> { %23598 = vmatprep.mubr.msk.f32.mxu1 %vm243_vm0, %v32844_v34  ;;  %24040 = vmatprep.mubr.msk.f32.mxu0 %vm243_vm0, %v20787_v10  ;;  %v20792_v10 = vld [vmem:[%s28524_s9 + $0x101] sm:$0xff]  ;;  %v20793_v8 = vld [vmem:[%s28524_s9 + $0x109] sm:$0xff]  ;;  %v20795_v34 = vld [vmem:[%s28524_s9 + $0x119] sm:$0xff] }
 0x6c3   : >> { %23599 = vmatmul.mubr.msk.f32.gmra.mrb[36].mxu1 %vm243_vm0, %v32845_v22  ;;  %24041 = vmatmul.mubr.msk.f32.gmra.mrb[4].mxu0 %vm243_vm0, %v20788_v33  ;;  %v32848_v33 = vld [vmem:[#allocation73_spill] sm:$0xff] }
 0x6c4   : >> { %23601 = vmatprep.mubr.msk.f32.mxu1 %vm243_vm0, %v29246_v47  ;;  %24043 = vmatprep.mubr.msk.f32.mxu0 %vm243_vm0, %v20789_v38  ;;  %v20794_v47 = vld [vmem:[%s28524_s9 + $0x111] sm:$0xff] }
 0x6c7   : >> { %23602 = vmatmul.mubr.msk.f32.gmra.mrb[38].mxu1 %vm243_vm0, %v32846_v52  ;;  %24044 = vmatmul.mubr.msk.f32.gmra.mrb[6].mxu0 %vm243_vm0, %v20790_v5 }
 0x6c8   : >> { %23604 = vmatprep.mubr.msk.f32.mxu1 %vm243_vm0, %v29260_v9  ;;  %24046 = vmatprep.mubr.msk.f32.mxu0 %vm243_vm0, %v20791_v37  ;;  %v20796_v9 = vld [vmem:[%s28524_s9 + $0x121] sm:$0xff] }
 0x6cb   : >> { %23605 = vmatmul.mubr.msk.f32.gmra.mrb[40].mxu1 %vm243_vm0, %v29271_v58  ;;  %24047 = vmatmul.mubr.msk.f32.gmra.mrb[8].mxu0 %vm243_vm0, %v20792_v10  ;;  %v20797_v58 = vld [vmem:[%s28524_s9 + $0x129] sm:$0xff] }
 0x6cc   : >> { %23607 = vmatprep.mubr.msk.f32.mxu1 %vm243_vm0, %v29274_v24  ;;  %24049 = vmatprep.mubr.msk.f32.mxu0 %vm243_vm0, %v20793_v8  ;;  %v20798_v24 = vld [vmem:[%s28524_s9 + $0x131] sm:$0xff] }
 0x6cf   : >> { %23608 = vmatmul.mubr.msk.f32.gmra.mrb[42].mxu1 %vm243_vm0, %v29285_v6  ;;  %24050 = vmatmul.mubr.msk.f32.gmra.mrb[10].mxu0 %vm243_vm0, %v20794_v47  ;;  %v20799_v6 = vld [vmem:[%s28524_s9 + $0x149] sm:$0xff] }
 0x6d0   : >> { %23610 = vmatprep.mubr.msk.f32.mxu1 %vm243_vm0, %v29288_v62  ;;  %24052 = vmatprep.mubr.msk.f32.mxu0 %vm243_vm0, %v20795_v34  ;;  %v20800_v62 = vld [vmem:[%s28524_s9 + $0x151] sm:$0xff] }
 0x6d3   : >> { %23611 = vmatmul.mubr.msk.f32.gmra.mrb[44].mxu1 %vm243_vm0, %v29299_v18  ;;  %24053 = vmatmul.mubr.msk.f32.gmra.mrb[12].mxu0 %vm243_vm0, %v20796_v9  ;;  %v20801_v18 = vld [vmem:[%s28524_s9 + $0x159] sm:$0xff] }
 0x6d4   : >> { %23613 = vmatprep.mubr.msk.f32.mxu1 %vm243_vm0, %v29302_v36  ;;  %24055 = vmatprep.mubr.msk.f32.mxu0 %vm243_vm0, %v20797_v58  ;;  %v20802_v36 = vld [vmem:[%s28524_s9 + $0x161] sm:$0xff] }
 0x6d7   : >> { %23614 = vmatmul.mubr.msk.f32.gmra.mrb[46].mxu1 %vm243_vm0, %v29313_v12  ;;  %24056 = vmatmul.mubr.msk.f32.gmra.mrb[14].mxu0 %vm243_vm0, %v20798_v24  ;;  %v20803_v12 = vld [vmem:[%s28524_s9 + $0x169] sm:$0xff] }
 0x6d8   : >> { %23616 = vmatprep.mubr.msk.f32.mxu1 %vm243_vm0, %v29316_v48  ;;  %24058 = vmatprep.mubr.msk.f32.mxu0 %vm243_vm0, %v20799_v6  ;;  %v20804_v48 = vld [vmem:[%s28524_s9 + $0x171] sm:$0xff] }
 0x6db   : >> { %23617 = vmatmul.mubr.msk.f32.gmra.mrb[48].mxu1 %vm243_vm0, %v29327_v54  ;;  %24059 = vmatmul.mubr.msk.f32.gmra.mrb[16].mxu0 %vm243_vm0, %v20800_v62  ;;  %v20805_v54 = vld [vmem:[%s28524_s9 + $0x179] sm:$0xff] }
 0x6dc   : >> { %23619 = vmatprep.mubr.msk.f32.mxu1 %vm243_vm0, %v29330_v40  ;;  %24061 = vmatprep.mubr.msk.f32.mxu0 %vm243_vm0, %v20801_v18  ;;  %v20806_v40 = vld [vmem:[%s28524_s9 + $0x181] sm:$0xff] }
 0x6df   : >> { %23620 = vmatmul.mubr.msk.f32.gmra.mrb[50].mxu1 %vm243_vm0, %v29341_v27  ;;  %24062 = vmatmul.mubr.msk.f32.gmra.mrb[18].mxu0 %vm243_vm0, %v20802_v36  ;;  %v20807_v27 = vld [vmem:[%s28524_s9 + $0x199] sm:$0xff] }
 0x6e0   : >> { %23622 = vmatprep.mubr.msk.f32.mxu1 %vm243_vm0, %v29344_v57  ;;  %24064 = vmatprep.mubr.msk.f32.mxu0 %vm243_vm0, %v20803_v12  ;;  %v20809_v57 = vld [vmem:[%s28524_s9 + $0x1a9] sm:$0xff] }
 0x6e3   : >> { %23623 = vmatmul.mubr.msk.f32.gmra.mrb[52].mxu1 %vm243_vm0, %v29355_v41  ;;  %24065 = vmatmul.mubr.msk.f32.gmra.mrb[20].mxu0 %vm243_vm0, %v20804_v48  ;;  %v20808_v41 = vld [vmem:[%s28524_s9 + $0x1a1] sm:$0xff] }
 0x6e4   : >> { %23625 = vmatprep.mubr.msk.f32.mxu1 %vm243_vm0, %v29358_v21  ;;  %24067 = vmatprep.mubr.msk.f32.mxu0 %vm243_vm0, %v20805_v54  ;;  %v20810_v21 = vld [vmem:[%s28524_s9 + $0x1b1] sm:$0xff] }
 0x6e7   : >> { %23626 = vmatmul.mubr.msk.f32.gmra.mrb[54].mxu1 %vm243_vm0, %v29369_v2  ;;  %24068 = vmatmul.mubr.msk.f32.gmra.mrb[22].mxu0 %vm243_vm0, %v20806_v40  ;;  %v20811_v2 = vld [vmem:[%s28524_s9 + $0x1b9] sm:$0xff] }
 0x6e8   : >> { %23628 = vmatprep.mubr.msk.f32.mxu1 %vm243_vm0, %v29438_v16  ;;  %24070 = vmatprep.mubr.msk.f32.mxu0 %vm243_vm0, %v20807_v27  ;;  %v20812_v16 = vld [vmem:[%s28524_s9 + $0x1c1] sm:$0xff] }
 0x6eb   : >> { %23629 = vmatmul.mubr.msk.f32.gmra.mrb[56].mxu1 %vm243_vm0, %v29449_v59  ;;  %24071 = vmatmul.mubr.msk.f32.gmra.mrb[24].mxu0 %vm243_vm0, %v20808_v41  ;;  %v20813_v59 = vld [vmem:[%s28524_s9 + $0x1c9] sm:$0xff] }
 0x6ec   : >> { %23631 = vmatprep.mubr.msk.f32.mxu1 %vm243_vm0, %v29452_v53  ;;  %24073 = vmatprep.mubr.msk.f32.mxu0 %vm243_vm0, %v20809_v57  ;;  %v20814_v53 = vld [vmem:[%s28524_s9 + $0x1d1] sm:$0xff] }
 0x6ef   : >> { %23632 = vmatmul.mubr.msk.f32.gmra.mrb[58].mxu1 %vm243_vm0, %v29463_v35  ;;  %24074 = vmatmul.mubr.msk.f32.gmra.mrb[26].mxu0 %vm243_vm0, %v20810_v21  ;;  %v20815_v35 = vld [vmem:[%s28524_s9 + $0x1e9] sm:$0xff] }
 0x6f0   : >> { %23634 = vmatprep.mubr.msk.f32.mxu1 %vm243_vm0, %v29466_v32  ;;  %24076 = vmatprep.mubr.msk.f32.mxu0 %vm243_vm0, %v20811_v2  ;;  %v20816_v32 = vld [vmem:[%s28524_s9 + $0x1f1] sm:$0xff] }
 0x6f3   : >> { %23635 = vmatmul.mubr.msk.f32.gmra.mrb[60].mxu1 %vm243_vm0, %v29477_v44  ;;  %24077 = vmatmul.mubr.msk.f32.gmra.mrb[28].mxu0 %vm243_vm0, %v20812_v16  ;;  %v20817_v44 = vld [vmem:[%s28524_s9 + $0x1f9] sm:$0xff] }
 0x6f4   : >> { %23637 = vmatprep.mubr.msk.f32.mxu1 %vm243_vm0, %v29480_v25  ;;  %24079 = vmatprep.mubr.msk.f32.mxu0 %vm243_vm0, %v20813_v59  ;;  %v20818_v25 = vld [vmem:[%s28524_s9 + $0x201] sm:$0xff] }
 0x6f7   : >> { %23638 = vmatmul.mubr.msk.f32.gmra.mrb[62].mxu1 %vm243_vm0, %v29491_v51  ;;  %24080 = vmatmul.mubr.msk.f32.gmra.mrb[30].mxu0 %vm243_vm0, %v20814_v53  ;;  %v20819_v51 = vld [vmem:[%s28524_s9 + $0x209] sm:$0xff] }
 0x6f8   : >> { %23690 = vmatprep.mubr.msk.f32.mxu1 %vm243_vm0, %v29624_v1  ;;  %24082 = vmatprep.mubr.msk.f32.mxu0 %vm243_vm0, %v20815_v35  ;;  %v20820_v1 = vld [vmem:[%s28524_s9 + $0x211] sm:$0xff] }
 0x6fb   : >> { %23691 = vmatmul.mubr.msk.f32.vlgmr.msra.gmra.mrb[32].mxu1 %vm243_vm0, %v29634_v49  ;;  %24083 = vmatmul.mubr.msk.f32.gmra.mrb[32].mxu0 %vm243_vm0, %v20816_v32  ;;  %v20821_v49 = vld [vmem:[%s28524_s9 + $0x219] sm:$0xff] }
 0x6fc   : >> { %23693 = vmatprep.mubr.msk.f32.mxu1 %vm243_vm0, %v29637_v46  ;;  %24085 = vmatprep.mubr.msk.f32.mxu0 %vm243_vm0, %v20817_v44  ;;  %v20822_v46 = vld [vmem:[%s28524_s9 + $0x221] sm:$0xff] }
 0x6ff   : >> { %23694 = vmatmul.mubr.msk.f32.gmra.mrb[34].mxu1 %vm243_vm0, %v29648_v61  ;;  %24086 = vmatmul.mubr.msk.f32.gmra.mrb[34].mxu0 %vm243_vm0, %v20818_v25  ;;  %v20823_v61 = vld [vmem:[%s28524_s9 + $0x239] sm:$0xff] }
 0x700   : >> { %23696 = vmatprep.mubr.msk.f32.mxu1 %vm243_vm0, %v29651_v31  ;;  %24088 = vmatprep.mubr.msk.f32.mxu0 %vm243_vm0, %v20819_v51  ;;  %v20824_v31 = vld [vmem:[%s28524_s9 + $0x241] sm:$0xff] }
 0x703   : >> { %23697 = vmatmul.mubr.msk.f32.gmra.mrb[36].mxu1 %vm243_vm0, %v29662_v39  ;;  %24089 = vmatmul.mubr.msk.f32.gmra.mrb[36].mxu0 %vm243_vm0, %v20820_v1  ;;  %v20825_v39 = vld [vmem:[%s28524_s9 + $0x249] sm:$0xff] }
 0x704   : >> { %23699 = vmatprep.mubr.msk.f32.mxu1 %vm243_vm0, %v29665_v45  ;;  %24091 = vmatprep.mubr.msk.f32.mxu0 %vm243_vm0, %v20821_v49  ;;  %v20826_v45 = vld [vmem:[%s28524_s9 + $0x251] sm:$0xff]  ;;  %v32864_v49 = vld [vmem:[#allocation12_spill] sm:$0xff] }
 0x707   : >> { %23700 = vmatmul.mubr.msk.f32.gmra.mrb[38].mxu1 %vm243_vm0, %v29676_v23  ;;  %24092 = vmatmul.mubr.msk.f32.gmra.mrb[38].mxu0 %vm243_vm0, %v20822_v46  ;;  %v20827_v23 = vld [vmem:[%s28524_s9 + $0x259] sm:$0xff] }
 0x708   : >> { %23702 = vmatprep.mubr.msk.f32.mxu1 %vm243_vm0, %v29679_v17  ;;  %24094 = vmatprep.mubr.msk.f32.mxu0 %vm243_vm0, %v20823_v61  ;;  %v20828_v17 = vld [vmem:[%s28524_s9 + $0x261] sm:$0xff] }
 0x70b   : >> { %23703 = vmatmul.mubr.msk.f32.gmra.mrb[40].mxu1 %vm243_vm0, %v29690_v4  ;;  %24095 = vmatmul.mubr.msk.f32.gmra.mrb[40].mxu0 %vm243_vm0, %v20824_v31  ;;  %v20829_v4 = vld [vmem:[%s28524_s9 + $0x269] sm:$0xff] }
 0x70c   : >> { %23705 = vmatprep.mubr.msk.f32.mxu1 %vm243_vm0, %v29693_v26  ;;  %24097 = vmatprep.mubr.msk.f32.mxu0 %vm243_vm0, %v20825_v39  ;;  %v20830_v26 = vld [vmem:[%s28524_s9 + $0x271] sm:$0xff] }
 0x70f   : >> { %23706 = vmatmul.mubr.msk.f32.gmra.mrb[42].mxu1 %vm243_vm0, %v29705_v14  ;;  %24098 = vmatmul.mubr.msk.f32.gmra.mrb[42].mxu0 %vm243_vm0, %v20826_v45  ;;  %v20831_v14 = vld [vmem:[%s28524_s9 + $0x289] sm:$0xff] }
 0x710   : >> { %23708 = vmatprep.mubr.msk.f32.mxu1 %vm243_vm0, %v29710_v20  ;;  %24100 = vmatprep.mubr.msk.f32.mxu0 %vm243_vm0, %v20827_v23  ;;  %v20832_v20 = vld [vmem:[%s28524_s9 + $0x291] sm:$0xff] }
 0x713   : >> { %23709 = vmatmul.mubr.msk.f32.gmra.mrb[44].mxu1 %vm243_vm0, %v29721_v0  ;;  %24101 = vmatmul.mubr.msk.f32.gmra.mrb[44].mxu0 %vm243_vm0, %v20828_v17  ;;  %v20833_v0 = vld [vmem:[%s28524_s9 + $0x299] sm:$0xff] }
 0x714   : >> { %23711 = vmatprep.mubr.msk.f32.mxu1 %vm243_vm0, %v29724_v55  ;;  %24103 = vmatprep.mubr.msk.f32.mxu0 %vm243_vm0, %v20829_v4  ;;  %v20834_v55 = vld [vmem:[%s28524_s9 + $0x2a1] sm:$0xff] }
 0x717   : >> { %23712 = vmatmul.mubr.msk.f32.gmra.mrb[46].mxu1 %vm243_vm0, %v29735_v13  ;;  %24104 = vmatmul.mubr.msk.f32.gmra.mrb[46].mxu0 %vm243_vm0, %v20830_v26  ;;  %v20835_v13 = vld [vmem:[%s28524_s9 + $0x2a9] sm:$0xff] }
 0x718   : >> { %23714 = vmatprep.mubr.msk.f32.mxu1 %vm243_vm0, %v29738_v60  ;;  %24106 = vmatprep.mubr.msk.f32.mxu0 %vm243_vm0, %v20831_v14  ;;  %v20836_v60 = vld [vmem:[%s28524_s9 + $0x2b1] sm:$0xff]  ;;  %v32865_v14 = vld [vmem:[#allocation13_spill] sm:$0xff] }
 0x71b   : >> { %23715 = vmatmul.mubr.msk.f32.gmra.mrb[48].mxu1 %vm243_vm0, %v29749_v29  ;;  %24107 = vmatmul.mubr.msk.f32.gmra.mrb[48].mxu0 %vm243_vm0, %v20832_v20  ;;  %v20837_v29 = vld [vmem:[%s28524_s9 + $0x2b9] sm:$0xff] }
 0x71c   : >> { %23717 = vmatprep.mubr.msk.f32.mxu1 %vm243_vm0, %v29752_v56  ;;  %24109 = vmatprep.mubr.msk.f32.mxu0 %vm243_vm0, %v20833_v0  ;;  %v20838_v56 = vld [vmem:[%s28524_s9 + $0x2c1] sm:$0xff] }
 0x71f   : >> { %23718 = vmatmul.mubr.msk.f32.gmra.mrb[50].mxu1 %vm243_vm0, %v29763_v30  ;;  %24110 = vmatmul.mubr.msk.f32.gmra.mrb[50].mxu0 %vm243_vm0, %v20834_v55  ;;  %v20839_v30 = vld [vmem:[%s28524_s9 + $0x2d9] sm:$0xff] }
 0x720   : >> { %23720 = vmatprep.mubr.msk.f32.mxu1 %vm243_vm0, %v29766_v3  ;;  %24112 = vmatprep.mubr.msk.f32.mxu0 %vm243_vm0, %v20835_v13  ;;  %v20840_v3 = vld [vmem:[%s28524_s9 + $0x2e1] sm:$0xff] }
 0x723   : >> { %23721 = vmatmul.mubr.msk.f32.gmra.mrb[52].mxu1 %vm243_vm0, %v29777_v19  ;;  %24113 = vmatmul.mubr.msk.f32.gmra.mrb[52].mxu0 %vm243_vm0, %v20836_v60  ;;  %v20841_v19 = vld [vmem:[%s28524_s9 + $0x2e9] sm:$0xff] }
 0x724   : >> { %23723 = vmatprep.mubr.msk.f32.mxu1 %vm243_vm0, %v29780_v50  ;;  %24115 = vmatprep.mubr.msk.f32.mxu0 %vm243_vm0, %v20837_v29  ;;  %v20842_v50 = vld [vmem:[%s28524_s9 + $0x2f1] sm:$0xff] }
 0x727   : >> { %23724 = vmatmul.mubr.msk.f32.gmra.mrb[54].mxu1 %vm243_vm0, %v29791_v42  ;;  %24116 = vmatmul.mubr.msk.f32.gmra.mrb[54].mxu0 %vm243_vm0, %v20838_v56  ;;  %v20843_v42 = vld [vmem:[%s28524_s9 + $0x2f9] sm:$0xff] }
 0x728   : >> { %23726 = vmatprep.mubr.msk.f32.mxu1 %vm243_vm0, %v29794_v43  ;;  %24118 = vmatprep.mubr.msk.f32.mxu0 %vm243_vm0, %v20839_v30  ;;  %v20844_v43 = vld [vmem:[%s28524_s9 + $0x301] sm:$0xff] }
 0x72b   : >> { %23727 = vmatmul.mubr.msk.f32.gmra.mrb[56].mxu1 %vm243_vm0, %v29805_v28  ;;  %24119 = vmatmul.mubr.msk.f32.gmra.mrb[56].mxu0 %vm243_vm0, %v20840_v3  ;;  %v20845_v28 = vld [vmem:[%s28524_s9 + $0x309] sm:$0xff] }
 0x72c   : >> { %23729 = vmatprep.mubr.msk.f32.mxu1 %vm243_vm0, %v29808_v7  ;;  %24121 = vmatprep.mubr.msk.f32.mxu0 %vm243_vm0, %v20841_v19  ;;  %v32847_v7 = vld [vmem:[#allocation71_spill] sm:$0xff] }
 0x72f   : >> { %23730 = vmatmul.mubr.msk.f32.gmra.mrb[58].mxu1 %vm243_vm0, %v29819_v63  ;;  %24122 = vmatmul.mubr.msk.f32.gmra.mrb[58].mxu0 %vm243_vm0, %v20842_v50  ;;  %v20846_v63 = vld [vmem:[%s28524_s9 + $0x311] sm:$0xff]  ;;  %s25413_s9 = smov 8  }
 0x730   : >> { %23732 = vmatprep.mubr.msk.f32.mxu1 %vm243_vm0, %v29822_v11  ;;  %24124 = vmatprep.mubr.msk.f32.mxu0 %vm243_vm0, %v20843_v42 }
 0x733   : >> { %23733 = vmatmul.mubr.msk.f32.gmra.mrb[60].mxu1 %vm243_vm0, %v29833_v15  ;;  %24125 = vmatmul.mubr.msk.f32.gmra.mrb[60].mxu0 %vm243_vm0, %v20844_v43 }
 0x734   : >> { %23735 = vmatprep.mubr.msk.f32.mxu1 %vm243_vm0, %v32847_v7  ;;  %24127 = vmatprep.mubr.msk.f32.mxu0 %vm243_vm0, %v20845_v28 }
 0x737   : >> { %23736 = vmatmul.mubr.msk.f32.gmra.mrb[62].mxu1 %vm243_vm0, %v32848_v33  ;;  %24128 = vmatmul.mubr.msk.f32.gmra.mrb[62].mxu0 %vm243_vm0, %v20846_v63 }
 0x74e   : >> { %v23546_v11 = vpop.f32.mrb[0].mxu1 }
 0x74f   : >> { %v10673_v38 = vpop.f32.mrb[1].mxu1 }
 0x752   : >> { %v23549_v22 = vpop.f32.mrb[2].mxu1 }
 0x753   : >> { %v10683_v5 = vpop.f32.mrb[3].mxu1 }
 0x756   : >> { %v30141_v37 = vpop.f32.mrb[4].mxu1 }
 0x757   : >> { %v30143_v15 = vpop.f32.mrb[5].mxu1 }
 0x75a   : >> { %v30145_v52 = vpop.f32.mrb[6].mxu1 }
 0x75b   : >> { %v30147_v10 = vpop.f32.mrb[7].mxu1 }
 0x75e   : >> { %v30149_v8 = vpop.f32.mrb[8].mxu1 }
 0x75f   : >> { %v30151_v47 = vpop.f32.mrb[9].mxu1 }
 0x762   : >> { %v30153_v34 = vpop.f32.mrb[10].mxu1 }
 0x763   : >> { %v30155_v9 = vpop.f32.mrb[11].mxu1 }
 0x766   : >> { %v30157_v58 = vpop.f32.mrb[12].mxu1 }
 0x767   : >> { %v30159_v24 = vpop.f32.mrb[13].mxu1 }
 0x76a   : >> { %v30161_v6 = vpop.f32.mrb[14].mxu1 }
 0x76b   : >> { %v30163_v62 = vpop.f32.mrb[15].mxu1 }
 0x76e   : >> { %v30165_v18 = vpop.f32.mrb[16].mxu1 }
 0x76f   : >> { %v30167_v36 = vpop.f32.mrb[17].mxu1 }
 0x770   : >> { %32849 = vst [vmem:[#allocation75_spill] sm:$0xff] %v30167_v36 }
 0x772   : >> { %v30169_v12 = vpop.f32.mrb[18].mxu1 }
 0x773   : >> { %32850 = vst [vmem:[#allocation77_spill] sm:$0xff] %v30169_v12  ;;  %v30171_v48 = vpop.f32.mrb[19].mxu1 }
 0x774   : >> { %32851 = vst [vmem:[#allocation79_spill] sm:$0xff] %v30171_v48 }
 0x776   : >> { %v30173_v54 = vpop.f32.mrb[20].mxu1 }
 0x777   : >> { %32852 = vst [vmem:[#allocation81_spill] sm:$0xff] %v30173_v54  ;;  %v30175_v40 = vpop.f32.mrb[21].mxu1 }
 0x778   : >> { %32853 = vst [vmem:[#allocation83_spill] sm:$0xff] %v30175_v40 }
 0x77a   : >> { %v30177_v27 = vpop.f32.mrb[22].mxu1 }
 0x77b   : >> { %32854 = vst [vmem:[#allocation85_spill] sm:$0xff] %v30177_v27  ;;  %v30179_v41 = vpop.f32.mrb[23].mxu1 }
 0x77c   : >> { %32855 = vst [vmem:[#allocation87_spill] sm:$0xff] %v30179_v41 }
 0x77e   : >> { %v30181_v57 = vpop.f32.mrb[24].mxu1 }
 0x77f   : >> { %32856 = vst [vmem:[#allocation89_spill] sm:$0xff] %v30181_v57  ;;  %v30183_v21 = vpop.f32.mrb[25].mxu1 }
 0x780   : >> { %32857 = vst [vmem:[#allocation91_spill] sm:$0xff] %v30183_v21 }
 0x782   : >> { %v30185_v2 = vpop.f32.mrb[26].mxu1 }
 0x783   : >> { %32858 = vst [vmem:[#allocation93_spill] sm:$0xff] %v30185_v2  ;;  %v30187_v16 = vpop.f32.mrb[27].mxu1 }
 0x784   : >> { %32859 = vst [vmem:[#allocation95_spill] sm:$0xff] %v30187_v16 }
 0x786   : >> { %v30189_v59 = vpop.f32.mrb[28].mxu1 }
 0x787   : >> { %32860 = vst [vmem:[#allocation97_spill] sm:$0xff] %v30189_v59  ;;  %v30191_v53 = vpop.f32.mrb[29].mxu1 }
 0x788   : >> { %32861 = vst [vmem:[#allocation99_spill] sm:$0xff] %v30191_v53 }
 0x78a   : >> { %v30193_v35 = vpop.f32.mrb[30].mxu1 }
 0x78b   : >> { %32862 = vst [vmem:[#allocation101_spill] sm:$0xff] %v30193_v35  ;;  %v30195_v32 = vpop.f32.mrb[31].mxu1 }
 0x78c   : >> { %32863 = vst [vmem:[#allocation70_spill] sm:$0xff] %v30195_v32 }
 0x78e   : >> { %v24036_v44 = vpop.f32.mrb[0].mxu0 }
 0x78f   : >> { %v24646_v25 = vadd.f32 %v24036_v44, %v23546_v11  ;;  %v14211_v51 = vpop.f32.mrb[1].mxu0 }
 0x790   : >> { %v24647_v1 = vadd.f32 %v14211_v51, %v10673_v38 }
 0x791   : >> { %v14601_v46 = vadd.f32 %v24646_v25, %v32864_v49 }
 0x792   : >> { %v14600_v61 = vadd.f32 %v24647_v1, %v32864_v49  ;;  %v24039_v31 = vpop.f32.mrb[2].mxu0 }
 0x793   : >> { %v14665_v39 = vmax.f32 %v14601_v46, 0.0  ;;  %v24648_v45 = vadd.f32 %v24039_v31, %v23549_v22  ;;  %v14221_v23 = vpop.f32.mrb[3].mxu0 }
 0x794   : >> { %v14664_v17 = vmax.f32 %v14600_v61, 0.0  ;;  %v24649_v4 = vadd.f32 %v14221_v23, %v10683_v5 }
 0x795   : >> { %v14809_v26 = vcombine.high %v14665_v39, %v14665_v39  ;;  %v14816_v20 = vrot.slane %v14665_v39, %v32865_v14  ;;  %v14603_v0 = vadd.f32 %v24648_v45, %v32864_v49 }
 0x796   : >> { %v14792_v55 = vcombine.high %v14664_v17, %v14664_v17  ;;  %v14799_v13 = vrot.slane %v14664_v17, %v32865_v14  ;;  %v14602_v60 = vadd.f32 %v24649_v4, %v32864_v49  ;;  %v24042_v29 = vpop.f32.mrb[4].mxu0 }
 0x797   : >> { %v14823_v56 = vrot.slane %v14809_v26, %v32865_v14  ;;  %v14824_v30 = vcombine.high %v14816_v20, %v14816_v20  ;;  %v20917_v3 = vrot.slane %v14816_v20, 9  ;;  %v14667_v19 = vmax.f32 %v14603_v0, 0.0  ;;  %v14231_v50 = vpop.f32.mrb[5].mxu0 }
 0x798   : >> { %v14806_v42 = vrot.slane %v14792_v55, %v32865_v14  ;;  %v14807_v43 = vcombine.high %v14799_v13, %v14799_v13  ;;  %v20913_v28 = vrot.slane %v14799_v13, 9  ;;  %v14666_v11 = vmax.f32 %v14602_v60, 0.0 }
 0x799   : >> { %v14825_v7 = vcombine.high %v14823_v56, %v14823_v56  ;;  %v20918_v63 = vrot.slane %v14824_v30, 9  ;;  %v20919_v33 = vrot.slane %v14823_v56, 9  ;;  %v30205_v44 = vmax.f32 %v14816_v20, %v20917_v3 }
 0x79a   : >> { %v14808_v38 = vcombine.high %v14806_v42, %v14806_v42  ;;  %v20914_v22 = vrot.slane %v14807_v43, 9  ;;  %v24045_v5 = vpop.f32.mrb[6].mxu0  ;;  %v20915_v25 = vrot.slane %v14806_v42, 9  ;;  %v30207_v51 = vmax.f32 %v14799_v13, %v20913_v28 }
 0x79b   : >> { %32866 = vst [vmem:[#allocation72_spill] sm:$0xff] %v30205_v44  ;;  %v14843_v1 = vcombine.high %v14667_v19, %v14667_v19  ;;  %v14241_v46 = vpop.f32.mrb[7].mxu0  ;;  %v20920_v61 = vrot.slane %v14825_v7, 9  ;;  %v30209_v31 = vmax.f32 %v14824_v30, %v20918_v63  ;;  %v30211_v39 = vmax.f32 %v14823_v56, %v20919_v33 }
 0x79c   : >> { %v14850_v45 = vrot.slane %v14667_v19, %v32865_v14  ;;  %v20916_v23 = vrot.slane %v14808_v38, 9  ;;  %v14826_v4 = vcombine.high %v14666_v11, %v14666_v11  ;;  %v14833_v26 = vrot.slane %v14666_v11, %v32865_v14 }
 0x79d   : >> { %32867 = vst [vmem:[#allocation74_spill] sm:$0xff] %v30211_v39  ;;  %v14857_v17 = vrot.slane %v14843_v1, %v32865_v14  ;;  %v30216_v20 = vmax.f32 %v14807_v43, %v20914_v22  ;;  %v24650_v13 = vadd.f32 %v24042_v29, %v30141_v37  ;;  %v30220_v19 = vmax.f32 %v14806_v42, %v20915_v25 }
 0x79e   : >> { %v14858_v0 = vcombine.high %v14850_v45, %v14850_v45  ;;  %v20925_v55 = vrot.slane %v14850_v45, 9  ;;  %v24048_v60 = vpop.f32.mrb[8].mxu0  ;;  %v14840_v56 = vrot.slane %v14826_v4, %v32865_v14  ;;  %v14841_v28 = vcombine.high %v14833_v26, %v14833_v26 }
 0x79f   : >> { %v14859_v3 = vcombine.high %v14857_v17, %v14857_v17  ;;  %v20927_v30 = vrot.slane %v14857_v17, 9  ;;  %v14251_v63 = vpop.f32.mrb[9].mxu0  ;;  %32868 = vst [vmem:[#allocation76_spill] sm:$0xff] %v30220_v19  ;;  %v20921_v1 = vrot.slane %v14833_v26, 9  ;;  %v14605_v32 = vadd.f32 %v24650_v13, %v32864_v49 }
 0x7a0   : >> { %v20926_v33 = vrot.slane %v14858_v0, 9  ;;  %v30223_v11 = vmax.f32 %v14825_v7, %v20920_v61  ;;  %v30225_v43 = vmax.f32 %v14808_v38, %v20916_v23  ;;  %v14842_v35 = vcombine.high %v14840_v56, %v14840_v56 }
 0x7a1   : >> { %v20928_v22 = vrot.slane %v14859_v3, 9  ;;  %v30227_v37 = vmax.f32 %v14850_v45, %v20925_v55  ;;  %v30229_v29 = vmax.f32 %v14857_v17, %v20927_v30  ;;  %v20922_v53 = vrot.slane %v14841_v28, 9 }
 0x7a2   : >> { %v14669_v4 = vmax.f32 %v14605_v32, 0.0  ;;  %v30231_v59 = vpop.f32.mrb[10].mxu0  ;;  %v30233_v42 = vmax.f32 %v14858_v0, %v20926_v33  ;;  %v20923_v25 = vrot.slane %v14840_v56, 9  ;;  %v30235_v16 = vmax.f32 %v14833_v26, %v20921_v1 }
 0x7a3   : >> { %32869 = vst [vmem:[#allocation78_spill] sm:$0xff] %v30229_v29  ;;  %v24651_v7 = vadd.f32 %v14231_v50, %v30143_v15  ;;  %v30238_v61 = vpop.f32.mrb[11].mxu0  ;;  %v30240_v38 = vmax.f32 %v14859_v3, %v20928_v22  ;;  %v24652_v17 = vadd.f32 %v24045_v5, %v30145_v52  ;;  %v20924_v55 = vrot.slane %v14842_v35, 9 }
 0x7a4   : >> { %v14877_v23 = vcombine.high %v14669_v4, %v14669_v4  ;;  %v14884_v45 = vrot.slane %v14669_v4, %v32865_v14  ;;  %v24653_v0 = vadd.f32 %v14241_v46, %v30147_v10  ;;  %v24654_v13 = vadd.f32 %v24048_v60, %v30149_v8 }
 0x7a5   : >> { %v14604_v32 = vadd.f32 %v24651_v7, %v32864_v49  ;;  %v14607_v50 = vadd.f32 %v24652_v17, %v32864_v49  ;;  %v30251_v33 = vmax.f32 %v14841_v28, %v20922_v53  ;;  %v24655_v5 = vadd.f32 %v14251_v63, %v30151_v47 }
 0x7a6   : >> { %v14891_v26 = vrot.slane %v14877_v23, %v32865_v14  ;;  %v14892_v30 = vcombine.high %v14884_v45, %v14884_v45  ;;  %v20933_v15 = vrot.slane %v14884_v45, 9  ;;  %v30249_v3 = vpop.f32.mrb[12].mxu0  ;;  %v14606_v52 = vadd.f32 %v24653_v0, %v32864_v49 }
 0x7a7   : >> { %v14668_v1 = vmax.f32 %v14604_v32, 0.0  ;;  %v30255_v22 = vpop.f32.mrb[13].mxu0  ;;  %v30257_v10 = vmax.f32 %v14840_v56, %v20923_v25  ;;  %v14671_v23 = vmax.f32 %v14607_v50, 0.0  ;;  %v30260_v2 = vmax.f32 %v14842_v35, %v20924_v55 }
 0x7a8   : >> { %v14893_v8 = vcombine.high %v14891_v26, %v14891_v26  ;;  %v20934_v46 = vrot.slane %v14892_v30, 9  ;;  %v20935_v60 = vrot.slane %v14891_v26, 9  ;;  %v14670_v17 = vmax.f32 %v14606_v52, 0.0 }
 0x7a9   : >> { %32870 = vst [vmem:[#allocation80_spill] sm:$0xff] %v30257_v10  ;;  %v14860_v4 = vcombine.high %v14668_v1, %v14668_v1  ;;  %v14867_v7 = vrot.slane %v14668_v1, %v32865_v14  ;;  %v30262_v28 = vmax.f32 %v14884_v45, %v20933_v15  ;;  %v14609_v32 = vadd.f32 %v24654_v13, %v32864_v49 }
 0x7aa   : >> { %v20936_v53 = vrot.slane %v14893_v8, 9  ;;  %v30265_v47 = vpop.f32.mrb[14].mxu0  ;;  %v30267_v63 = vmax.f32 %v14892_v30, %v20934_v46  ;;  %v14911_v0 = vcombine.high %v14671_v23, %v14671_v23  ;;  %v14918_v50 = vrot.slane %v14671_v23, %v32865_v14 }
 0x7ab   : >> { %v14874_v56 = vrot.slane %v14860_v4, %v32865_v14  ;;  %v14875_v25 = vcombine.high %v14867_v7, %v14867_v7  ;;  %v30270_v21 = vpop.f32.mrb[15].mxu0  ;;  %v20929_v1 = vrot.slane %v14867_v7, 9  ;;  %v14894_v35 = vcombine.high %v14670_v17, %v14670_v17 }
 0x7ac   : >> { %32871 = vst [vmem:[#allocation82_spill] sm:$0xff] %v30267_v63  ;;  %v14901_v55 = vrot.slane %v14670_v17, %v32865_v14  ;;  %v30274_v45 = vmax.f32 %v14891_v26, %v20935_v60  ;;  %v14925_v30 = vrot.slane %v14911_v0, %v32865_v14  ;;  %v14926_v46 = vcombine.high %v14918_v50, %v14918_v50 }
 0x7ad   : >> { %v14876_v15 = vcombine.high %v14874_v56, %v14874_v56  ;;  %v20930_v13 = vrot.slane %v14875_v25, 9  ;;  %v20931_v52 = vrot.slane %v14874_v56, 9  ;;  %v20941_v57 = vrot.slane %v14918_v50, 9 }
 0x7ae   : >> { %32872 = vst [vmem:[#allocation84_spill] sm:$0xff] %v30274_v45  ;;  %v30278_v4 = vrot.slane %v14894_v35, %v32865_v14  ;;  %v30280_v41 = vpop.f32.mrb[16].mxu0  ;;  %v30282_v27 = vmax.f32 %v14893_v8, %v20936_v53  ;;  %v14909_v40 = vcombine.high %v14901_v55, %v14901_v55  ;;  %v14673_v54 = vmax.f32 %v14609_v32, 0.0 }
 0x7af   : >> { %v20932_v23 = vrot.slane %v14876_v15, 9  ;;  %v30284_v17 = vpop.f32.mrb[17].mxu0  ;;  %v30286_v26 = vmax.f32 %v14867_v7, %v20929_v1  ;;  %v14927_v60 = vcombine.high %v14925_v30, %v14925_v30  ;;  %v20942_v48 = vrot.slane %v14926_v46, 9 }
 0x7b0   : >> { %32873 = vst [vmem:[#allocation86_spill] sm:$0xff] %v30282_v27  ;;  %32874 = vst [vmem:[#allocation88_spill] sm:$0xff] %v30284_v17  ;;  %v20943_v12 = vrot.slane %v14925_v30, 9  ;;  %v30288_v0 = vmax.f32 %v14875_v25, %v20930_v13  ;;  %v30292_v35 = vcombine.high %v30278_v4, %v30278_v4  ;;  %v20937_v36 = vrot.slane %v14901_v55, 9 }
 0x7b1   : >> { %32875 = vst [vmem:[#allocation90_spill] sm:$0xff] %v30286_v26  ;;  %v20938_v63 = vrot.slane %v14909_v40, 9  ;;  %v30294_v8 = vmax.f32 %v14874_v56, %v20931_v52  ;;  %v30296_v53 = vmax.f32 %v14876_v15, %v20932_v23  ;;  %v20944_v32 = vrot.slane %v14927_v60, 9 }
 0x7b2   : >> { %32876 = vst [vmem:[#allocation92_spill] sm:$0xff] %v30288_v0  ;;  %v30298_v27 = vmax.f32 %v14918_v50, %v20941_v57  ;;  %v30300_v7 = vpop.f32.mrb[18].mxu0  ;;  %v30302_v1 = vmax.f32 %v14926_v46, %v20942_v48  ;;  %v30304_v17 = vmax.f32 %v14925_v30, %v20943_v12  ;;  %v20939_v25 = vrot.slane %v30278_v4, 9 }
 0x7b3   : >> { %32877 = vst [vmem:[#allocation94_spill] sm:$0xff] %v30294_v8  ;;  %v14945_v13 = vcombine.high %v14673_v54, %v14673_v54  ;;  %v30307_v0 = vpop.f32.mrb[19].mxu0  ;;  %v30310_v56 = vmax.f32 %v14901_v55, %v20937_v36  ;;  %v14952_v15 = vrot.slane %v14673_v54, %v32865_v14  ;;  %v14608_v57 = vadd.f32 %v24655_v5, %v32864_v49 }
 0x7b4   : >> { %32878 = vst [vmem:[#allocation96_spill] sm:$0xff] %v30304_v17  ;;  %32879 = vst [vmem:[#allocation98_spill] sm:$0xff] %v30307_v0  ;;  %v30314_v50 = vmax.f32 %v14909_v40, %v20938_v63  ;;  %v24656_v12 = vadd.f32 %v30231_v59, %v30153_v34  ;;  %v24657_v52 = vadd.f32 %v30238_v61, %v30155_v9 }
 0x7b5   : >> { %v14959_v48 = vrot.slane %v14945_v13, %v32865_v14  ;;  %v14960_v30 = vcombine.high %v14952_v15, %v14952_v15  ;;  %v20949_v46 = vrot.slane %v14952_v15, 9  ;;  %v14672_v23 = vmax.f32 %v14608_v57, 0.0 }
 0x7b6   : >> { %v30323_v36 = vadd.f32 %v30249_v3, %v30157_v58  ;;  %v30325_v54 = vpop.f32.mrb[20].mxu0  ;;  %v14611_v63 = vadd.f32 %v24656_v12, %v32864_v49  ;;  %v14610_v55 = vadd.f32 %v24657_v52, %v32864_v49 }
 0x7b7   : >> { %32880 = vst [vmem:[#allocation100_spill] sm:$0xff] %v30325_v54  ;;  %v14961_v5 = vcombine.high %v14959_v48, %v14959_v48  ;;  %v20951_v40 = vrot.slane %v14959_v48, 9  ;;  %v30329_v13 = vpop.f32.mrb[21].mxu0  ;;  %v20950_v34 = vrot.slane %v14960_v30, 9  ;;  %v30331_v59 = vmax.f32 %v14952_v15, %v20949_v46 }
 0x7b8   : >> { %32881 = vst [vmem:[#allocation102_spill] sm:$0xff] %v30329_v13  ;;  %v14928_v9 = vcombine.high %v14672_v23, %v14672_v23  ;;  %v14935_v61 = vrot.slane %v14672_v23, %v32865_v14  ;;  %v14675_v58 = vmax.f32 %v14611_v63, 0.0  ;;  %v14674_v3 = vmax.f32 %v14610_v55, 0.0 }
 0x7b9   : >> { %32882 = vst [vmem:[#allocation103_spill] sm:$0xff] %v30331_v59  ;;  %v20952_v57 = vrot.slane %v14961_v5, 9  ;;  %v30334_v26 = vmax.f32 %v14959_v48, %v20951_v40  ;;  %v16941_v54 = vmax.f32 %v14960_v30, %v20950_v34 }
 0x7ba   : >> { %v14942_v52 = vrot.slane %v14928_v9, %v32865_v14  ;;  %v14943_v0 = vcombine.high %v14935_v61, %v14935_v61  ;;  %v30339_v13 = vpop.f32.mrb[22].mxu0  ;;  %v20945_v23 = vrot.slane %v14935_v61, 9  ;;  %v14979_v48 = vcombine.high %v14675_v58, %v14675_v58 }
 0x7bb   : >> { %32883 = vst [vmem:[#allocation104_spill] sm:$0xff] %v30334_v26  ;;  %v30341_v15 = vmax.f32 %v14961_v5, %v20952_v57  ;;  %v30345_v40 = vpop.f32.mrb[23].mxu0  ;;  %v17165_v63 = vmax.f32 %v30209_v31, %v16941_v54  ;;  %v14986_v59 = vrot.slane %v14675_v58, %v32865_v14  ;;  %v30352_v57 = vmax.f32 %v14927_v60, %v20944_v32 }
 0x7bc   : >> { %32884 = vst [vmem:[#allocation105_spill] sm:$0xff] %v30345_v40  ;;  %v14944_v30 = vcombine.high %v14942_v52, %v14942_v52  ;;  %v20946_v55 = vrot.slane %v14943_v0, 9  ;;  %v20947_v34 = vrot.slane %v14942_v52, 9  ;;  %v16936_v12 = vmax.f32 %v14935_v61, %v20945_v23 }
 0x7bd   : >> { %v14993_v5 = vrot.slane %v14979_v48, %v32865_v14  ;;  %v30359_v31 = vmax.f32 %v30278_v4, %v20939_v25  ;;  %v14994_v40 = vcombine.high %v14986_v59, %v14986_v59  ;;  %v20957_v32 = vrot.slane %v14986_v59, 9 }
 0x7be   : >> { %v20948_v46 = vrot.slane %v14944_v30, 9  ;;  %v16937_v26 = vmax.f32 %v14943_v0, %v20946_v55  ;;  %v30354_v39 = vmax.f32 %v14942_v52, %v20947_v34  ;;  %v30356_v44 = vpop.f32.mrb[24].mxu0  ;;  %v17160_v54 = vmax.f32 %v30207_v51, %v16936_v12 }
 0x7bf   : >> { %32886 = vst [vmem:[#allocation107_spill] sm:$0xff] %v30359_v31  ;;  %v14995_v9 = vcombine.high %v14993_v5, %v14993_v5  ;;  %v30362_v61 = vpop.f32.mrb[25].mxu0  ;;  %v20958_v52 = vrot.slane %v14994_v40, 9  ;;  %v20959_v23 = vrot.slane %v14993_v5, 9  ;;  %v14962_v55 = vcombine.high %v14674_v3, %v14674_v3 }
 0x7c0   : >> { %32885 = vst [vmem:[#allocation106_spill] sm:$0xff] %v30354_v39  ;;  %v30364_v58 = vmax.f32 %v14944_v30, %v20948_v46  ;;  %v17161_v60 = vmax.f32 %v30216_v20, %v16937_v26  ;;  %v16948_v25 = vmax.f32 %v14986_v59, %v20957_v32  ;;  %v14969_v12 = vrot.slane %v14674_v3, %v32865_v14 }
 0x7c1   : >> { %v20960_v48 = vrot.slane %v14995_v9, 9  ;;  %v16949_v30 = vmax.f32 %v14994_v40, %v20958_v52  ;;  %v30376_v20 = vmax.f32 %v14993_v5, %v20959_v23  ;;  %v14976_v34 = vrot.slane %v14962_v55, %v32865_v14 }
 0x7c2   : >> { %v30371_v51 = vrot.slane %v17161_v60, 7  ;;  %v30374_v46 = vpop.f32.mrb[26].mxu0  ;;  %v32889_v39 = vrot.slane %v30292_v35, 9  ;;  %v17172_v3 = vmax.f32 %v30227_v37, %v16948_v25  ;;  %v14977_v40 = vcombine.high %v14969_v12, %v14969_v12 }
 0x7c3   : >> { %32888 = vst [vmem:[#allocation109_spill] sm:$0xff] %v30376_v20  ;;  %v30378_v26 = vmax.f32 %v14995_v9, %v20960_v48  ;;  %v30381_v0 = vpop.f32.mrb[27].mxu0  ;;  %v17173_v5 = vmax.f32 %v30233_v42, %v16949_v30  ;;  %v14978_v32 = vcombine.high %v14976_v34, %v14976_v34  ;;  %v20953_v52 = vrot.slane %v14969_v12, 9 }
 0x7c4   : >> { %32887 = vst [vmem:[#allocation108_spill] sm:$0xff] %v30371_v51  ;;  %v30386_v4 = vmax.f32 %v30292_v35, %v32889_v39  ;;  %v30390_v59 = vsel %vm17421_vm3, %v30371_v51, %v17160_v54  ;;  %v20954_v23 = vrot.slane %v14977_v40, 9  ;;  %v20955_v39 = vrot.slane %v14976_v34, 9 }
 0x7c5   : >> { %32890 = vst [vmem:[#allocation110_spill] sm:$0xff] %v30390_v59  ;;  %v14613_v35 = vadd.f32 %v30323_v36, %v32864_v49  ;;  %v30402_v48 = vrot.slane %v17165_v63, 7  ;;  %v30404_v37 = vrot.slane %v17173_v5, 7  ;;  %v20956_v42 = vrot.slane %v14978_v32, 9  ;;  %v32915_v59 = vld [vmem:[#allocation92_spill] sm:$0xff] }
 0x7c6   : >> { %v30400_v54 = vpop.f32.mrb[28].mxu0  ;;  %v24659_v55 = vadd.f32 %v30255_v22, %v30159_v24  ;;  %v16944_v30 = vmax.f32 %v14969_v12, %v20953_v52  ;;  %v16945_v9 = vmax.f32 %v14977_v40, %v20954_v23  ;;  %v30410_v60 = vmax.f32 %v14976_v34, %v20955_v39 }
 0x7c7   : >> { %32891 = vst [vmem:[#allocation111_spill] sm:$0xff] %v30402_v48  ;;  %32892 = vst [vmem:[#allocation112_spill] sm:$0xff] %v30404_v37  ;;  %v30408_v25 = vpop.f32.mrb[29].mxu0  ;;  %v14677_v20 = vmax.f32 %v14613_v35, 0.0  ;;  %v30414_v36 = vsel %vm17421_vm3, %v30404_v37, %v17172_v3  ;;  %v30416_v29 = vmax.f32 %v14978_v32, %v20956_v42  ;;  %v24660_v5 = vadd.f32 %v30265_v47, %v30161_v6 }
 0x7c8   : >> { %32893 = vst [vmem:[#allocation113_spill] sm:$0xff] %v30410_v60  ;;  %32894 = vst [vmem:[#allocation114_spill] sm:$0xff] %v30414_v36  ;;  %v14612_v63 = vadd.f32 %v24659_v55, %v32864_v49  ;;  %v17168_v24 = vmax.f32 %v30235_v16, %v16944_v30  ;;  %v17169_v22 = vmax.f32 %v30251_v33, %v16945_v9 }
 0x7c9   : >> { %v15013_v34 = vcombine.high %v14677_v20, %v14677_v20  ;;  %v15020_v32 = vrot.slane %v14677_v20, %v32865_v14  ;;  %v14615_v23 = vadd.f32 %v24660_v5, %v32864_v49  ;;  %v24661_v33 = vadd.f32 %v30270_v21, %v30163_v62 }
 0x7ca   : >> { %v30425_v40 = vpop.f32.mrb[30].mxu0  ;;  %v14676_v52 = vmax.f32 %v14612_v63, 0.0  ;;  %v30433_v6 = vrot.slane %v17169_v22, 7  ;;  %v30440_v47 = vadd.f32 %v30280_v41, %v30165_v18  ;;  %v32896_v9 = vmax.f32 %v30223_v11, %v30341_v15 }
 0x7cb   : >> { %v30431_v39 = vpop.f32.mrb[31].mxu0  ;;  %v15027_v16 = vrot.slane %v15013_v34, %v32865_v14  ;;  %v15028_v35 = vcombine.high %v15020_v32, %v15020_v32  ;;  %v20965_v42 = vrot.slane %v15020_v32, 9  ;;  %v14679_v15 = vmax.f32 %v14615_v23, 0.0 }
 0x7cc   : >> { %32895 = vst [vmem:[#allocation115_spill] sm:$0xff] %v30433_v6  ;;  %v30445_v20 = vrot.slane %v32896_v9, 7  ;;  %v14996_v55 = vcombine.high %v14676_v52, %v14676_v52  ;;  %v30449_v30 = vsel %vm17421_vm3, %v30433_v6, %v17168_v24  ;;  %v15003_v62 = vrot.slane %v14676_v52, %v32865_v14 }
 0x7cd   : >> { %32898 = vst [vmem:[#allocation117_spill] sm:$0xff] %v30449_v30  ;;  %v15029_v63 = vcombine.high %v15027_v16, %v15027_v16  ;;  %v20967_v5 = vrot.slane %v15027_v16, 9  ;;  %v20966_v41 = vrot.slane %v15028_v35, 9  ;;  %v16956_v22 = vmax.f32 %v15020_v32, %v20965_v42  ;;  %v32911_v32 = vld [vmem:[#allocation90_spill] sm:$0xff] }
 0x7ce   : >> { %32897 = vst [vmem:[#allocation116_spill] sm:$0xff] %v30445_v20  ;;  %v30452_v21 = vpop.f32.mrb[32].mxu1  ;;  %v30454_v18 = vpop.f32.mrb[32].mxu0  ;;  %v15010_v11 = vrot.slane %v14996_v55, %v32865_v14  ;;  %v15011_v3 = vcombine.high %v15003_v62, %v15003_v62  ;;  %v20961_v37 = vrot.slane %v15003_v62, 9 }
 0x7cf   : >> { %32899 = vst [vmem:[#allocation118_spill] sm:$0xff] %v30452_v21  ;;  %32900 = vst [vmem:[#allocation119_spill] sm:$0xff] %v30454_v18  ;;  %v30457_v34 = vpop.f32.mrb[33].mxu1  ;;  %v30459_v9 = vpop.f32.mrb[33].mxu0  ;;  %v20968_v12 = vrot.slane %v15029_v63, 9  ;;  %v30461_v24 = vmax.f32 %v15027_v16, %v20967_v5  ;;  %v16957_v36 = vmax.f32 %v15028_v35, %v20966_v41  ;;  %v17180_v52 = vmax.f32 %v30262_v28, %v16956_v22  ;;  %v32906_v16 = vld [vmem:[#allocation82_spill] sm:$0xff] }
 0x7d0   : >> { %32901 = vst [vmem:[#allocation120_spill] sm:$0xff] %v30457_v34  ;;  %32902 = vst [vmem:[#allocation121_spill] sm:$0xff] %v30459_v9  ;;  %v15012_v60 = vcombine.high %v15010_v11, %v15010_v11  ;;  %v20963_v10 = vrot.slane %v15010_v11, 9  ;;  %v20962_v23 = vrot.slane %v15011_v3, 9  ;;  %v16952_v42 = vmax.f32 %v15003_v62, %v20961_v37 }
 0x7d1   : >> { %32903 = vst [vmem:[#allocation122_spill] sm:$0xff] %v30461_v24  ;;  %v30464_v6 = vmax.f32 %v15029_v63, %v20968_v12  ;;  %v17181_v5 = vmax.f32 %v32906_v16, %v16957_v36  ;;  %v15047_v35 = vcombine.high %v14679_v15, %v14679_v15  ;;  %v32910_v12 = vld [vmem:[#allocation86_spill] sm:$0xff]  ;;  %v15054_v62 = vrot.slane %v14679_v15, %v32865_v14 }
 0x7d2   : >> { %v30468_v55 = vpop.f32.mrb[34].mxu1  ;;  %v30470_v30 = vpop.f32.mrb[34].mxu0  ;;  %v20964_v20 = vrot.slane %v15012_v60, 9  ;;  %v30473_v51 = vmax.f32 %v15010_v11, %v20963_v10  ;;  %v16953_v22 = vmax.f32 %v15011_v3, %v20962_v23  ;;  %v17176_v37 = vmax.f32 %v32911_v32, %v16952_v42 }
 0x7d3   : >> { %32904 = vst [vmem:[#allocation123_spill] sm:$0xff] %v30468_v55  ;;  %32905 = vst [vmem:[#allocation124_spill] sm:$0xff] %v30470_v30  ;;  %v30475_v28 = vpop.f32.mrb[35].mxu1  ;;  %v30477_v41 = vpop.f32.mrb[35].mxu0  ;;  %v30483_v24 = vrot.slane %v17181_v5, 7  ;;  %v15061_v36 = vrot.slane %v15047_v35, %v32865_v14  ;;  %v32913_v11 = vmax.f32 %v30225_v43, %v30364_v58  ;;  %v15062_v3 = vcombine.high %v15054_v62, %v15054_v62 }
 0x7d4   : >> { %32907 = vst [vmem:[#allocation71_spill] sm:$0xff] %v30473_v51  ;;  %32908 = vst [vmem:[#allocation73_spill] sm:$0xff] %v30475_v28  ;;  %v16955_v45 = vmax.f32 %v15012_v60, %v20964_v20  ;;  %v17177_v63 = vmax.f32 %v32915_v59, %v16953_v22  ;;  %v20973_v23 = vrot.slane %v15054_v62, 9  ;;  %v32922_v10 = vmax.f32 %v30240_v38, %v30378_v26 }
 0x7d5   : >> { %32909 = vst [vmem:[#allocation82_spill] sm:$0xff] %v30477_v41  ;;  %32912 = vst [vmem:[#allocation86_spill] sm:$0xff] %v30483_v24  ;;  %v30491_v16 = vrot.slane %v32913_v11, 7  ;;  %v30500_v60 = vsel %vm17421_vm3, %v30483_v24, %v17180_v52  ;;  %v15063_v42 = vcombine.high %v15061_v36, %v15061_v36  ;;  %v20975_v5 = vrot.slane %v15061_v36, 9 }
 0x7d6   : >> { %v30494_v32 = vpop.f32.mrb[36].mxu1  ;;  %v30496_v15 = vpop.f32.mrb[36].mxu0  ;;  %32918 = vst [vmem:[#allocation126_spill] sm:$0xff] %v30500_v60  ;;  %v17179_v20 = vmax.f32 %v30296_v53, %v16955_v45  ;;  %v30507_v58 = vrot.slane %v17177_v63, 7  ;;  %v20974_v59 = vrot.slane %v15062_v3, 9  ;;  %v16964_v22 = vmax.f32 %v15054_v62, %v20973_v23 }
 0x7d7   : >> { %32914 = vst [vmem:[#allocation90_spill] sm:$0xff] %v30491_v16  ;;  %32916 = vst [vmem:[#allocation92_spill] sm:$0xff] %v30494_v32  ;;  %v30503_v35 = vpop.f32.mrb[37].mxu1  ;;  %v30505_v43 = vpop.f32.mrb[37].mxu0  ;;  %v14614_v11 = vadd.f32 %v24661_v33, %v32864_v49  ;;  %v30513_v51 = vrot.slane %v32922_v10, 7  ;;  %v20976_v52 = vrot.slane %v15063_v42, 9  ;;  %v30515_v8 = vmax.f32 %v15061_v36, %v20975_v5 }
 0x7d8   : >> { %32917 = vst [vmem:[#allocation125_spill] sm:$0xff] %v30496_v15  ;;  %32919 = vst [vmem:[#allocation127_spill] sm:$0xff] %v30503_v35  ;;  %v14617_v45 = vadd.f32 %v30440_v47, %v32864_v49  ;;  %v30521_v53 = vsel %vm17421_vm3, %v30507_v58, %v17176_v37  ;;  %v16965_v63 = vmax.f32 %v15062_v3, %v20974_v59  ;;  %v32928_v36 = vld [vmem:[#allocation75_spill] sm:$0xff]  ;;  %v32929_v5 = vld [vmem:[#allocation88_spill] sm:$0xff] }
 0x7d9   : >> { %32920 = vst [vmem:[#allocation128_spill] sm:$0xff] %v30505_v43  ;;  %32921 = vst [vmem:[#allocation129_spill] sm:$0xff] %v30507_v58  ;;  %v17188_v62 = vmax.f32 %v30298_v27, %v16964_v22  ;;  %v14678_v23 = vmax.f32 %v14614_v11, 0.0  ;;  %v16967_v38 = vmax.f32 %v15063_v42, %v20976_v52  ;;  %v24663_v47 = vadd.f32 %v32929_v5, %v32928_v36  ;;  %v32932_v22 = vld [vmem:[#allocation77_spill] sm:$0xff] }
 0x7da   : >> { %32923 = vst [vmem:[#allocation130_spill] sm:$0xff] %v30513_v51  ;;  %32924 = vst [vmem:[#allocation131_spill] sm:$0xff] %v30515_v8  ;;  %v30524_v33 = vpop.f32.mrb[38].mxu1  ;;  %v30526_v24 = vpop.f32.mrb[38].mxu0  ;;  %v14681_v10 = vmax.f32 %v14617_v45, 0.0  ;;  %v17189_v3 = vmax.f32 %v30302_v1, %v16965_v63  ;;  %v24664_v11 = vadd.f32 %v30300_v7, %v32932_v22  ;;  %v32933_v42 = vmax.f32 %v30260_v2, %v30416_v29 }
 0x7db   : >> { %32925 = vst [vmem:[#allocation132_spill] sm:$0xff] %v30521_v53  ;;  %32926 = vst [vmem:[#allocation133_spill] sm:$0xff] %v30524_v33  ;;  %v30532_v51 = vpop.f32.mrb[39].mxu1  ;;  %v30534_v37 = vpop.f32.mrb[39].mxu0  ;;  %v15030_v27 = vcombine.high %v14678_v23, %v14678_v23  ;;  %v15037_v59 = vrot.slane %v14678_v23, %v32865_v14  ;;  %v17191_v45 = vmax.f32 %v30352_v57, %v16967_v38 }
 0x7dc   : >> { %32927 = vst [vmem:[#allocation134_spill] sm:$0xff] %v30526_v24  ;;  %32930 = vst [vmem:[#allocation75_spill] sm:$0xff] %v30532_v51  ;;  %v30543_v52 = vrot.slane %v32933_v42, 7  ;;  %v15081_v36 = vcombine.high %v14681_v10, %v14681_v10  ;;  %v15088_v5 = vrot.slane %v14681_v10, %v32865_v14  ;;  %v30547_v26 = vrot.slane %v17189_v3, 7  ;;  %v32978_v24 = vld [vmem:[#allocation91_spill] sm:$0xff] }
 0x7dd   : >> { %32931 = vst [vmem:[#allocation88_spill] sm:$0xff] %v30534_v37  ;;  %v15044_v1 = vrot.slane %v15030_v27, %v32865_v14  ;;  %v15045_v63 = vcombine.high %v15037_v59, %v15037_v59  ;;  %v20969_v8 = vrot.slane %v15037_v59, 9  ;;  %v14616_v22 = vadd.f32 %v24663_v47, %v32864_v49 }
 0x7de   : >> { %32934 = vst [vmem:[#allocation77_spill] sm:$0xff] %v30543_v52  ;;  %32935 = vst [vmem:[#allocation135_spill] sm:$0xff] %v30547_v26  ;;  %v30550_v23 = vpop.f32.mrb[40].mxu1  ;;  %v30552_v17 = vpop.f32.mrb[40].mxu0  ;;  %v15095_v7 = vrot.slane %v15081_v36, %v32865_v14  ;;  %v15096_v2 = vcombine.high %v15088_v5, %v15088_v5  ;;  %v20981_v29 = vrot.slane %v15088_v5, 9  ;;  %v30562_v10 = vsel %vm17421_vm3, %v30547_v26, %v17188_v62 }
 0x7df   : >> { %32936 = vst [vmem:[#allocation136_spill] sm:$0xff] %v30550_v23  ;;  %32937 = vst [vmem:[#allocation137_spill] sm:$0xff] %v30552_v17  ;;  %v30556_v57 = vpop.f32.mrb[41].mxu1  ;;  %v30558_v38 = vpop.f32.mrb[41].mxu0  ;;  %v15046_v3 = vcombine.high %v15044_v1, %v15044_v1  ;;  %v20970_v27 = vrot.slane %v15045_v63, 9  ;;  %v20971_v42 = vrot.slane %v15044_v1, 9  ;;  %v32941_v58 = vmax.f32 %v32910_v12, %v30464_v6 }
 0x7e0   : >> { %32938 = vst [vmem:[#allocation138_spill] sm:$0xff] %v30556_v57  ;;  %32939 = vst [vmem:[#allocation139_spill] sm:$0xff] %v30558_v38  ;;  %v30569_v36 = vrot.slane %v17179_v20, 7  ;;  %v16960_v52 = vmax.f32 %v15037_v59, %v20969_v8  ;;  %v15097_v47 = vcombine.high %v15095_v7, %v15095_v7  ;;  %v30571_v60 = vrot.slane %v17191_v45, 7 }
 0x7e1   : >> { %32940 = vst [vmem:[#allocation140_spill] sm:$0xff] %v30562_v10  ;;  %v30567_v53 = vrot.slane %v32941_v58, 7  ;;  %v20972_v16 = vrot.slane %v15046_v3, 9  ;;  %v16961_v19 = vmax.f32 %v15045_v63, %v20970_v27  ;;  %v30573_v48 = vmax.f32 %v15044_v1, %v20971_v42  ;;  %v32951_v42 = vld [vmem:[#allocation79_spill] sm:$0xff] }
 0x7e2   : >> { %32943 = vst [vmem:[#allocation142_spill] sm:$0xff] %v30569_v36  ;;  %32944 = vst [vmem:[#allocation143_spill] sm:$0xff] %v30571_v60  ;;  %v30575_v62 = vpop.f32.mrb[42].mxu1  ;;  %v30577_v26 = vpop.f32.mrb[42].mxu0  ;;  %v17184_v10 = vmax.f32 %v30310_v56, %v16960_v52  ;;  %v20982_v38 = vrot.slane %v15096_v2, 9  ;;  %v20983_v6 = vrot.slane %v15095_v7, 9  ;;  %v30580_v12 = vmax.f32 %v15088_v5, %v20981_v29 }
 0x7e3   : >> { %32942 = vst [vmem:[#allocation141_spill] sm:$0xff] %v30567_v53  ;;  %32945 = vst [vmem:[#allocation144_spill] sm:$0xff] %v30573_v48  ;;  %v30582_v20 = vpop.f32.mrb[43].mxu1  ;;  %v30584_v8 = vpop.f32.mrb[43].mxu0  ;;  %v16963_v58 = vmax.f32 %v15046_v3, %v20972_v16  ;;  %v17185_v59 = vmax.f32 %v30314_v50, %v16961_v19  ;;  %v14680_v1 = vmax.f32 %v14616_v22, 0.0  ;;  %v20984_v63 = vrot.slane %v15097_v47, 9 }
 0x7e4   : >> { %32946 = vst [vmem:[#allocation145_spill] sm:$0xff] %v30575_v62  ;;  %32947 = vst [vmem:[#allocation146_spill] sm:$0xff] %v30577_v26  ;;  %v14619_v27 = vadd.f32 %v24664_v11, %v32864_v49  ;;  %v32952_v56 = vld [vmem:[#allocation98_spill] sm:$0xff]  ;;  %v32953_v60 = vld [vmem:[#allocation81_spill] sm:$0xff] }
 0x7e5   : >> { %32948 = vst [vmem:[#allocation147_spill] sm:$0xff] %v30580_v12  ;;  %32949 = vst [vmem:[#allocation148_spill] sm:$0xff] %v30582_v20  ;;  %v24665_v52 = vadd.f32 %v32952_v56, %v32951_v42  ;;  %v32954_v5 = vld [vmem:[#allocation100_spill] sm:$0xff]  ;;  %v17187_v36 = vmax.f32 %v30386_v4, %v16963_v58  ;;  %v30595_v53 = vrot.slane %v17185_v59, 7  ;;  %v15064_v16 = vcombine.high %v14680_v1, %v14680_v1  ;;  %v32958_v42 = vld [vmem:[#allocation83_spill] sm:$0xff] }
 0x7e6   : >> { %32950 = vst [vmem:[#allocation149_spill] sm:$0xff] %v30584_v8  ;;  %v24666_v29 = vadd.f32 %v32954_v5, %v32953_v60  ;;  %v15071_v19 = vrot.slane %v14680_v1, %v32865_v14  ;;  %v30598_v50 = vpop.f32.mrb[44].mxu1  ;;  %v30600_v3 = vpop.f32.mrb[44].mxu0  ;;  %v14683_v22 = vmax.f32 %v14619_v27, 0.0  ;;  %v32959_v56 = vld [vmem:[#allocation102_spill] sm:$0xff]  ;;  %v30614_v59 = vmax.f32 %v15096_v2, %v20982_v38  ;;  %v33076_v12 = vld [vmem:[#allocation75_spill] sm:$0xff] }
 0x7e7   : >> { %32955 = vst [vmem:[#allocation79_spill] sm:$0xff] %v30595_v53  ;;  %32956 = vst [vmem:[#allocation98_spill] sm:$0xff] %v30598_v50  ;;  %v14618_v11 = vadd.f32 %v24665_v52, %v32864_v49  ;;  %v24667_v48 = vadd.f32 %v32959_v56, %v32958_v42  ;;  %v30606_v60 = vpop.f32.mrb[45].mxu1  ;;  %v30608_v4 = vpop.f32.mrb[45].mxu0  ;;  %v30612_v58 = vsel %vm17421_vm3, %v30595_v53, %v17184_v10 }
 0x7e8   : >> { %32957 = vst [vmem:[#allocation81_spill] sm:$0xff] %v30600_v3  ;;  %v14621_v45 = vadd.f32 %v24666_v29, %v32864_v49  ;;  %32960 = vst [vmem:[#allocation100_spill] sm:$0xff] %v30606_v60  ;;  %v15078_v1 = vrot.slane %v15064_v16, %v32865_v14  ;;  %v15079_v27 = vcombine.high %v15071_v19, %v15071_v19  ;;  %v20977_v5 = vrot.slane %v15071_v19, 9 }
 0x7e9   : >> { %32961 = vst [vmem:[#allocation83_spill] sm:$0xff] %v30608_v4  ;;  %32962 = vst [vmem:[#allocation102_spill] sm:$0xff] %v30612_v58  ;;  %v15115_v52 = vcombine.high %v14683_v22, %v14683_v22  ;;  %v15122_v29 = vrot.slane %v14683_v22, %v32865_v14  ;;  %v14682_v31 = vmax.f32 %v14618_v11, 0.0  ;;  %v30618_v3 = vmax.f32 %v15095_v7, %v20983_v6 }
 0x7ea   : >> { %v15080_v42 = vcombine.high %v15078_v1, %v15078_v1  ;;  %v20978_v56 = vrot.slane %v15079_v27, 9  ;;  %v14685_v60 = vmax.f32 %v14621_v45, 0.0  ;;  %v30620_v4 = vpop.f32.mrb[46].mxu1  ;;  %v30622_v50 = vpop.f32.mrb[46].mxu0  ;;  %v20979_v10 = vrot.slane %v15078_v1, 9 }
 0x7eb   : >> { %32963 = vst [vmem:[#allocation150_spill] sm:$0xff] %v30618_v3  ;;  %32964 = vst [vmem:[#allocation151_spill] sm:$0xff] %v30620_v4  ;;  %v15129_v2 = vrot.slane %v15115_v52, %v32865_v14  ;;  %v15130_v38 = vcombine.high %v15122_v29, %v15122_v29  ;;  %v20989_v16 = vrot.slane %v15122_v29, 9  ;;  %v30625_v53 = vpop.f32.mrb[47].mxu1  ;;  %v30627_v58 = vpop.f32.mrb[47].mxu0  ;;  %v30629_v22 = vrot.slane %v17187_v36, 7 }
 0x7ec   : >> { %32965 = vst [vmem:[#allocation152_spill] sm:$0xff] %v30622_v50  ;;  %32966 = vst [vmem:[#allocation153_spill] sm:$0xff] %v30625_v53  ;;  %v30631_v7 = vmax.f32 %v15097_v47, %v20984_v63  ;;  %v30633_v6 = vmax.f32 %v15071_v19, %v20977_v5  ;;  %v15098_v45 = vcombine.high %v14682_v31, %v14682_v31  ;;  %v20980_v11 = vrot.slane %v15080_v42, 9 }
 0x7ed   : >> { %32967 = vst [vmem:[#allocation154_spill] sm:$0xff] %v30627_v58  ;;  %32968 = vst [vmem:[#allocation155_spill] sm:$0xff] %v30629_v22  ;;  %v30635_v4 = vmax.f32 %v15079_v27, %v20978_v56  ;;  %v15131_v50 = vcombine.high %v15129_v2, %v15129_v2  ;;  %v20990_v8 = vrot.slane %v15130_v38, 9  ;;  %v20991_v20 = vrot.slane %v15129_v2, 9 }
 0x7ee   : >> { %v15105_v52 = vrot.slane %v14682_v31, %v32865_v14  ;;  %v15112_v26 = vrot.slane %v15098_v45, %v32865_v14  ;;  %v15149_v53 = vcombine.high %v14685_v60, %v14685_v60  ;;  %v30639_v62 = vmax.f32 %v15078_v1, %v20979_v10  ;;  %v30653_v10 = vpop.f32.mrb[48].mxu1 }
 0x7ef   : >> { %v20992_v36 = vrot.slane %v15131_v50, 9  ;;  %v30641_v22 = vmax.f32 %v15122_v29, %v20989_v16  ;;  %v15156_v47 = vrot.slane %v14685_v60, %v32865_v14  ;;  %v30644_v56 = vmax.f32 %v15080_v42, %v20980_v11  ;;  %32971 = vst [vmem:[#allocation158_spill] sm:$0xff] %v30653_v10  ;;  %v30655_v60 = vpop.f32.mrb[48].mxu0  ;;  %v32975_v10 = vld [vmem:[#allocation87_spill] sm:$0xff]  ;;  %v30675_v33 = vpop.f32.mrb[49].mxu1 }
 0x7f0   : >> { %32969 = vst [vmem:[#allocation156_spill] sm:$0xff] %v30639_v62  ;;  %v15113_v63 = vcombine.high %v15105_v52, %v15105_v52  ;;  %v15114_v19 = vcombine.high %v15112_v26, %v15112_v26  ;;  %v20985_v5 = vrot.slane %v15105_v52, 9  ;;  %v20987_v27 = vrot.slane %v15112_v26, 9  ;;  %32972 = vst [vmem:[#allocation159_spill] sm:$0xff] %v30655_v60  ;;  %v32976_v60 = vld [vmem:[#allocation105_spill] sm:$0xff] }
 0x7f1   : >> { %v15163_v58 = vrot.slane %v15149_v53, %v32865_v14  ;;  %v15164_v57 = vcombine.high %v15156_v47, %v15156_v47  ;;  %v20997_v31 = vrot.slane %v15156_v47, 9  ;;  %v30647_v17 = vmax.f32 %v15130_v38, %v20990_v8  ;;  %v32974_v38 = vld [vmem:[#allocation85_spill] sm:$0xff] }
 0x7f2   : >> { %v30649_v45 = vmax.f32 %v15129_v2, %v20991_v20  ;;  %v30651_v1 = vmax.f32 %v15131_v50, %v20992_v36  ;;  %v20986_v29 = vrot.slane %v15113_v63, 9  ;;  %v20988_v16 = vrot.slane %v15114_v19, 9  ;;  %32979 = vst [vmem:[#allocation85_spill] sm:$0xff] %v30675_v33 }
 0x7f3   : >> { %v30657_v23 = vmax.f32 %v15105_v52, %v20985_v5  ;;  %v30659_v42 = vmax.f32 %v15112_v26, %v20987_v27  ;;  %v15165_v11 = vcombine.high %v15163_v58, %v15163_v58  ;;  %v20998_v53 = vrot.slane %v15164_v57, 9  ;;  %v32977_v5 = vld [vmem:[#allocation89_spill] sm:$0xff] }
 0x7f4   : >> { %32970 = vst [vmem:[#allocation157_spill] sm:$0xff] %v30649_v45  ;;  %v20999_v37 = vrot.slane %v15163_v58, 9  ;;  %v14620_v8 = vadd.f32 %v24667_v48, %v32864_v49  ;;  %v24668_v20 = vadd.f32 %v30339_v13, %v32974_v38  ;;  %v30664_v50 = vmax.f32 %v15113_v63, %v20986_v29  ;;  %v30677_v13 = vpop.f32.mrb[49].mxu0 }
 0x7f5   : >> { %32973 = vst [vmem:[#allocation160_spill] sm:$0xff] %v30659_v42  ;;  %v21000_v2 = vrot.slane %v15165_v11, 9  ;;  %v30666_v36 = vmax.f32 %v15156_v47, %v20997_v31  ;;  %v24669_v51 = vadd.f32 %v32976_v60, %v32975_v10  ;;  %v24670_v27 = vadd.f32 %v30356_v44, %v32977_v5  ;;  %32980 = vst [vmem:[#allocation87_spill] sm:$0xff] %v30677_v13  ;;  %v32981_v31 = vld [vmem:[#allocation93_spill] sm:$0xff]  ;;  %v32982_v10 = vld [vmem:[#allocation95_spill] sm:$0xff] }
 0x7f6   : >> { %v14684_v52 = vmax.f32 %v14620_v8, 0.0  ;;  %v14623_v26 = vadd.f32 %v24668_v20, %v32864_v49  ;;  %v24671_v48 = vadd.f32 %v30362_v61, %v32978_v24  ;;  %v30679_v63 = vmax.f32 %v15114_v19, %v20988_v16 }
 0x7f7   : >> { %v14622_v47 = vadd.f32 %v24669_v51, %v32864_v49  ;;  %v24672_v29 = vadd.f32 %v30374_v46, %v32981_v31  ;;  %v24673_v60 = vadd.f32 %v30381_v0, %v32982_v10  ;;  %v30686_v8 = vmax.f32 %v15164_v57, %v20998_v53 }
 0x7f8   : >> { %v15132_v44 = vcombine.high %v14684_v52, %v14684_v52  ;;  %v15139_v38 = vrot.slane %v14684_v52, %v32865_v14  ;;  %v14687_v61 = vmax.f32 %v14623_v26, 0.0  ;;  %v30689_v24 = vmax.f32 %v15163_v58, %v20999_v37 }
 0x7f9   : >> { %v30691_v20 = vmax.f32 %v15165_v11, %v21000_v2  ;;  %v14686_v19 = vmax.f32 %v14622_v47, 0.0  ;;  %v14625_v16 = vadd.f32 %v24670_v27, %v32864_v49  ;;  %v14624_v31 = vadd.f32 %v24671_v48, %v32864_v49  ;;  %v30699_v2 = vpop.f32.mrb[50].mxu1  ;;  %v30701_v27 = vpop.f32.mrb[50].mxu0 }
 0x7fa   : >> { %32983 = vst [vmem:[#allocation105_spill] sm:$0xff] %v30689_v24  ;;  %v15146_v51 = vrot.slane %v15132_v44, %v32865_v14  ;;  %v15147_v5 = vcombine.high %v15139_v38, %v15139_v38  ;;  %v15183_v46 = vcombine.high %v14687_v61, %v14687_v61  ;;  %v20993_v0 = vrot.slane %v15139_v38, 9  ;;  %32984 = vst [vmem:[#allocation89_spill] sm:$0xff] %v30699_v2  ;;  %v30718_v41 = vpop.f32.mrb[51].mxu0 }
 0x7fb   : >> { %v15190_v57 = vrot.slane %v14687_v61, %v32865_v14  ;;  %v15166_v53 = vcombine.high %v14686_v19, %v14686_v19  ;;  %v15173_v52 = vrot.slane %v14686_v19, %v32865_v14  ;;  %v14627_v11 = vadd.f32 %v24672_v29, %v32864_v49  ;;  %32985 = vst [vmem:[#allocation91_spill] sm:$0xff] %v30701_v27 }
 0x7fc   : >> { %v15148_v26 = vcombine.high %v15146_v51, %v15146_v51  ;;  %v20994_v37 = vrot.slane %v15147_v5, 9  ;;  %v20995_v58 = vrot.slane %v15146_v51, 9  ;;  %v15197_v47 = vrot.slane %v15183_v46, %v32865_v14  ;;  %32987 = vst [vmem:[#allocation95_spill] sm:$0xff] %v30718_v41 }
 0x7fd   : >> { %v15198_v10 = vcombine.high %v15190_v57, %v15190_v57  ;;  %v21005_v44 = vrot.slane %v15190_v57, 9  ;;  %v30705_v48 = vrot.slane %v15166_v53, %v32865_v14  ;;  %v15181_v13 = vcombine.high %v15173_v52, %v15173_v52  ;;  %v30716_v53 = vpop.f32.mrb[51].mxu1 }
 0x7fe   : >> { %v20996_v61 = vrot.slane %v15148_v26, 9  ;;  %v14689_v33 = vmax.f32 %v14625_v16, 0.0  ;;  %v14626_v19 = vadd.f32 %v24673_v60, %v32864_v49  ;;  %v30708_v43 = vmax.f32 %v15139_v38, %v20993_v0  ;;  %32986 = vst [vmem:[#allocation93_spill] sm:$0xff] %v30716_v53 }
 0x7ff   : >> { %v15199_v35 = vcombine.high %v15197_v47, %v15197_v47  ;;  %v21006_v29 = vrot.slane %v15198_v10, 9  ;;  %v21007_v15 = vrot.slane %v15197_v47, 9  ;;  %v30710_v2 = vmax.f32 %v15147_v5, %v20994_v37 }
 0x800   : >> { %v30714_v46 = vcombine.high %v30705_v48, %v30705_v48  ;;  %v21001_v27 = vrot.slane %v15173_v52, 9  ;;  %v21002_v32 = vrot.slane %v15181_v13, 9  ;;  %v30720_v16 = vmax.f32 %v15146_v51, %v20995_v58 }
 0x801   : >> { %v30722_v60 = vmax.f32 %v15148_v26, %v20996_v61  ;;  %v21008_v38 = vrot.slane %v15199_v35, 9  ;;  %v30724_v0 = vmax.f32 %v15190_v57, %v21005_v44  ;;  %v30726_v28 = vmax.f32 %v15198_v10, %v21006_v29 }
 0x802   : >> { %32988 = vst [vmem:[#allocation161_spill] sm:$0xff] %v30720_v16  ;;  %v30728_v5 = vmax.f32 %v15197_v47, %v21007_v15  ;;  %v21003_v37 = vrot.slane %v30705_v48, 9  ;;  %v15217_v30 = vcombine.high %v14689_v33, %v14689_v33  ;;  %v30732_v9 = vmax.f32 %v15173_v52, %v21001_v27  ;;  %v30742_v27 = vpop.f32.mrb[52].mxu1 }
 0x803   : >> { %v15224_v41 = vrot.slane %v14689_v33, %v32865_v14  ;;  %v14688_v51 = vmax.f32 %v14624_v31, 0.0  ;;  %v30735_v58 = vmax.f32 %v15181_v13, %v21002_v32  ;;  %v14691_v57 = vmax.f32 %v14627_v11, 0.0  ;;  %32992 = vst [vmem:[#allocation165_spill] sm:$0xff] %v30742_v27  ;;  %v30744_v33 = vpop.f32.mrb[52].mxu0  ;;  %v30749_v11 = vpop.f32.mrb[53].mxu1 }
 0x804   : >> { %32989 = vst [vmem:[#allocation162_spill] sm:$0xff] %v30728_v5  ;;  %32990 = vst [vmem:[#allocation163_spill] sm:$0xff] %v30732_v9  ;;  %v15231_v26 = vrot.slane %v15217_v30, %v32865_v14  ;;  %v30738_v44 = vmax.f32 %v14626_v19, 0.0  ;;  %v30751_v19 = vpop.f32.mrb[53].mxu0 }
 0x805   : >> { %32991 = vst [vmem:[#allocation164_spill] sm:$0xff] %v30735_v58  ;;  %v15232_v10 = vcombine.high %v15224_v41, %v15224_v41  ;;  %v21013_v15 = vrot.slane %v15224_v41, 9  ;;  %v15200_v47 = vcombine.high %v14688_v51, %v14688_v51  ;;  %v15207_v61 = vrot.slane %v14688_v51, %v32865_v14  ;;  %32993 = vst [vmem:[#allocation166_spill] sm:$0xff] %v30744_v33 }
 0x806   : >> { %v15233_v29 = vcombine.high %v15231_v26, %v15231_v26  ;;  %v21015_v53 = vrot.slane %v15231_v26, 9  ;;  %v15251_v55 = vcombine.high %v14691_v57, %v14691_v57  ;;  %v15258_v52 = vrot.slane %v14691_v57, %v32865_v14  ;;  %32995 = vst [vmem:[#allocation168_spill] sm:$0xff] %v30749_v11  ;;  %32996 = vst [vmem:[#allocation169_spill] sm:$0xff] %v30751_v19 }
 0x807   : >> { %v21014_v32 = vrot.slane %v15232_v10, 9  ;;  %v30746_v13 = vmax.f32 %v15224_v41, %v21013_v15  ;;  %v15214_v30 = vrot.slane %v15200_v47, %v32865_v14  ;;  %v15215_v31 = vcombine.high %v15207_v61, %v15207_v61 }
 0x808   : >> { %v21016_v51 = vrot.slane %v15233_v29, 9  ;;  %v30753_v34 = vmax.f32 %v15231_v26, %v21015_v53  ;;  %v21009_v58 = vrot.slane %v15207_v61, 9  ;;  %v15265_v57 = vrot.slane %v15251_v55, %v32865_v14 }
 0x809   : >> { %32994 = vst [vmem:[#allocation167_spill] sm:$0xff] %v30746_v13  ;;  %v17005_v18 = vmax.f32 %v15232_v10, %v21014_v32  ;;  %v15216_v27 = vcombine.high %v15214_v30, %v15214_v30  ;;  %v21010_v41 = vrot.slane %v15215_v31, 9  ;;  %v21011_v11 = vrot.slane %v15214_v30, 9 }
 0x80a   : >> { %32997 = vst [vmem:[#allocation170_spill] sm:$0xff] %v30753_v34  ;;  %v30758_v15 = vmax.f32 %v15233_v29, %v21016_v51  ;;  %v17000_v21 = vmax.f32 %v15207_v61, %v21009_v58  ;;  %v15266_v9 = vcombine.high %v15258_v52, %v15258_v52  ;;  %v15267_v33 = vcombine.high %v15265_v57, %v15265_v57 }
 0x80b   : >> { %v17197_v19 = vmax.f32 %v30614_v59, %v17005_v18  ;;  %v21012_v53 = vrot.slane %v15216_v27, 9  ;;  %v17001_v26 = vmax.f32 %v15215_v31, %v21010_v41  ;;  %v30765_v10 = vmax.f32 %v15214_v30, %v21011_v11  ;;  %v30778_v30 = vpop.f32.mrb[54].mxu1  ;;  %v30780_v11 = vpop.f32.mrb[54].mxu0  ;;  %v33005_v59 = vld [vmem:[#allocation97_spill] sm:$0xff] }
 0x80c   : >> { %v17192_v32 = vmax.f32 %v30633_v6, %v17000_v21  ;;  %v30768_v29 = vmax.f32 %v15199_v35, %v21008_v38  ;;  %v21021_v58 = vrot.slane %v15258_v52, 9  ;;  %v30774_v18 = vmax.f32 %v30705_v48, %v21003_v37  ;;  %v30786_v38 = vpop.f32.mrb[55].mxu1  ;;  %v30788_v48 = vpop.f32.mrb[55].mxu0  ;;  %v33006_v21 = vld [vmem:[#allocation99_spill] sm:$0xff] }
 0x80d   : >> { %32998 = vst [vmem:[#allocation171_spill] sm:$0xff] %v30765_v10  ;;  %v30770_v51 = vmax.f32 %v15216_v27, %v21012_v53  ;;  %v17193_v47 = vmax.f32 %v30635_v4, %v17001_v26  ;;  %v21022_v61 = vrot.slane %v15266_v9, 9  ;;  %v21023_v31 = vrot.slane %v15265_v57, 9  ;;  %33001 = vst [vmem:[#allocation174_spill] sm:$0xff] %v30788_v48 }
 0x80e   : >> { %32999 = vst [vmem:[#allocation172_spill] sm:$0xff] %v30774_v18  ;;  %v21024_v6 = vrot.slane %v15267_v33, 9  ;;  %v17012_v4 = vmax.f32 %v15258_v52, %v21021_v58  ;;  %v15234_v41 = vcombine.high %v30738_v44, %v30738_v44  ;;  %v15241_v53 = vrot.slane %v30738_v44, %v32865_v14 }
 0x80f   : >> { %v30784_v35 = vrot.slane %v17193_v47, 7  ;;  %v17013_v37 = vmax.f32 %v15266_v9, %v21022_v61  ;;  %v30790_v27 = vmax.f32 %v15265_v57, %v21023_v31  ;;  %v33003_v26 = vrot.slane %v30714_v46, 9 }
 0x810   : >> { %v30805_v58 = vmax.f32 %v15267_v33, %v21024_v6  ;;  %v17204_v9 = vmax.f32 %v30641_v22, %v17012_v4  ;;  %v15248_v44 = vrot.slane %v15234_v41, %v32865_v14  ;;  %v15249_v31 = vcombine.high %v15241_v53, %v15241_v53 }
 0x811   : >> { %33000 = vst [vmem:[#allocation173_spill] sm:$0xff] %v30784_v35  ;;  %33002 = vst [vmem:[#allocation175_spill] sm:$0xff] %v30790_v27  ;;  %v30799_v47 = vmax.f32 %v30714_v46, %v33003_v26  ;;  %v30803_v52 = vsel %vm17421_vm3, %v30784_v35, %v17192_v32  ;;  %v17205_v57 = vmax.f32 %v30647_v17, %v17013_v37  ;;  %v21017_v26 = vrot.slane %v15241_v53, 9  ;;  %v30824_v46 = vpop.f32.mrb[56].mxu1  ;;  %v30826_v27 = vpop.f32.mrb[56].mxu0 }
 0x812   : >> { %33004 = vst [vmem:[#allocation176_spill] sm:$0xff] %v30803_v52  ;;  %v24674_v32 = vadd.f32 %v30400_v54, %v33005_v59  ;;  %v24675_v33 = vadd.f32 %v30408_v25, %v33006_v21  ;;  %v15250_v22 = vcombine.high %v15248_v44, %v15248_v44  ;;  %v21018_v17 = vrot.slane %v15249_v31, 9  ;;  %33009 = vst [vmem:[#allocation177_spill] sm:$0xff] %v30824_v46  ;;  %v30839_v45 = vpop.f32.mrb[57].mxu0 }
 0x813   : >> { %v30818_v6 = vrot.slane %v17205_v57, 7  ;;  %v21019_v4 = vrot.slane %v15248_v44, 9  ;;  %v30820_v37 = vrot.slane %v17197_v19, 7  ;;  %v17008_v61 = vmax.f32 %v15241_v53, %v21017_v26  ;;  %33010 = vst [vmem:[#allocation178_spill] sm:$0xff] %v30826_v27  ;;  %v33013_v26 = vld [vmem:[#allocation101_spill] sm:$0xff]  ;;  %33015 = vst [vmem:[#allocation181_spill] sm:$0xff] %v30839_v45 }
 0x814   : >> { %v14629_v41 = vadd.f32 %v24674_v32, %v32864_v49  ;;  %v14628_v55 = vadd.f32 %v24675_v33, %v32864_v49  ;;  %v21020_v25 = vrot.slane %v15250_v22, 9  ;;  %v17009_v59 = vmax.f32 %v15249_v31, %v21018_v17  ;;  %v30837_v33 = vpop.f32.mrb[57].mxu1 }
 0x815   : >> { %33007 = vst [vmem:[#allocation97_spill] sm:$0xff] %v30818_v6  ;;  %33008 = vst [vmem:[#allocation99_spill] sm:$0xff] %v30820_v37  ;;  %v30830_v54 = vsel %vm17421_vm3, %v30818_v6, %v17204_v9  ;;  %v30832_v21 = vmax.f32 %v15248_v44, %v21019_v4  ;;  %v17200_v19 = vmax.f32 %v30657_v23, %v17008_v61  ;;  %v33016_v44 = vld [vmem:[#allocation70_spill] sm:$0xff]  ;;  %v30867_v6 = vpop.f32.mrb[58].mxu1 }
 0x816   : >> { %33011 = vst [vmem:[#allocation179_spill] sm:$0xff] %v30830_v54  ;;  %v14693_v57 = vmax.f32 %v14629_v41, 0.0  ;;  %v14692_v53 = vmax.f32 %v14628_v55, 0.0  ;;  %v24676_v32 = vadd.f32 %v30425_v40, %v33013_v26  ;;  %33014 = vst [vmem:[#allocation101_spill] sm:$0xff] %v30837_v33  ;;  %v30841_v34 = vmax.f32 %v15250_v22, %v21020_v25 }
 0x817   : >> { %33012 = vst [vmem:[#allocation180_spill] sm:$0xff] %v30832_v21  ;;  %v17201_v9 = vmax.f32 %v30664_v50, %v17009_v59  ;;  %v24677_v17 = vadd.f32 %v30431_v39, %v33016_v44  ;;  %v33017_v4 = vmax.f32 %v30631_v7, %v30758_v15  ;;  %33021 = vst [vmem:[#allocation184_spill] sm:$0xff] %v30867_v6 }
 0x818   : >> { %v15285_v23 = vcombine.high %v14693_v57, %v14693_v57  ;;  %v15292_v55 = vrot.slane %v14693_v57, %v32865_v14  ;;  %v15268_v61 = vcombine.high %v14692_v53, %v14692_v53  ;;  %v15275_v40 = vrot.slane %v14692_v53, %v32865_v14 }
 0x819   : >> { %v30853_v41 = vrot.slane %v33017_v4, 7  ;;  %v30857_v22 = vrot.slane %v17201_v9, 7  ;;  %v14631_v25 = vadd.f32 %v24676_v32, %v32864_v49  ;;  %v14630_v44 = vadd.f32 %v24677_v17, %v32864_v49  ;;  %v30869_v32 = vpop.f32.mrb[58].mxu0 }
 0x81a   : >> { %v15299_v39 = vrot.slane %v15285_v23, %v32865_v14  ;;  %v15300_v59 = vcombine.high %v15292_v55, %v15292_v55  ;;  %v21029_v26 = vrot.slane %v15292_v55, 9  ;;  %v15282_v57 = vrot.slane %v15268_v61, %v32865_v14  ;;  %33022 = vst [vmem:[#allocation185_spill] sm:$0xff] %v30869_v32  ;;  %v30879_v35 = vpop.f32.mrb[59].mxu0 }
 0x81b   : >> { %33018 = vst [vmem:[#allocation70_spill] sm:$0xff] %v30853_v41  ;;  %33019 = vst [vmem:[#allocation182_spill] sm:$0xff] %v30857_v22  ;;  %v30864_v53 = vsel %vm17421_vm3, %v30857_v22, %v17200_v19  ;;  %v15283_v7 = vcombine.high %v15275_v40, %v15275_v40  ;;  %v21025_v15 = vrot.slane %v15275_v40, 9 }
 0x81c   : >> { %33020 = vst [vmem:[#allocation183_spill] sm:$0xff] %v30864_v53  ;;  %v15301_v4 = vcombine.high %v15299_v39, %v15299_v39  ;;  %v21030_v31 = vrot.slane %v15300_v59, 9  ;;  %v21031_v9 = vrot.slane %v15299_v39, 9  ;;  %v17020_v50 = vmax.f32 %v15292_v55, %v21029_v26  ;;  %v30877_v26 = vpop.f32.mrb[59].mxu1  ;;  %33026 = vst [vmem:[#allocation189_spill] sm:$0xff] %v30879_v35 }
 0x81d   : >> { %v15284_v23 = vcombine.high %v15282_v57, %v15282_v57  ;;  %v21026_v54 = vrot.slane %v15283_v7, 9  ;;  %v21027_v21 = vrot.slane %v15282_v57, 9  ;;  %v17016_v61 = vmax.f32 %v15275_v40, %v21025_v15  ;;  %33025 = vst [vmem:[#allocation188_spill] sm:$0xff] %v30877_v26 }
 0x81e   : >> { %v21032_v42 = vrot.slane %v15301_v4, 9  ;;  %v17021_v41 = vmax.f32 %v15300_v59, %v21030_v31  ;;  %v30871_v19 = vmax.f32 %v15299_v39, %v21031_v9  ;;  %v17212_v22 = vmax.f32 %v30666_v36, %v17020_v50 }
 0x81f   : >> { %v21028_v53 = vrot.slane %v15284_v23, 9  ;;  %v17017_v17 = vmax.f32 %v15283_v7, %v21026_v54  ;;  %v30874_v3 = vmax.f32 %v15282_v57, %v21027_v21  ;;  %v17208_v55 = vmax.f32 %v30708_v43, %v17016_v61 }
 0x820   : >> { %33023 = vst [vmem:[#allocation186_spill] sm:$0xff] %v30871_v19  ;;  %v30881_v52 = vmax.f32 %v15301_v4, %v21032_v42  ;;  %v17213_v40 = vmax.f32 %v30686_v8, %v17021_v41  ;;  %v14695_v39 = vmax.f32 %v14631_v25, 0.0  ;;  %v14694_v21 = vmax.f32 %v14630_v44, 0.0 }
 0x821   : >> { %33024 = vst [vmem:[#allocation187_spill] sm:$0xff] %v30874_v3  ;;  %v17019_v59 = vmax.f32 %v15284_v23, %v21028_v53  ;;  %v17209_v36 = vmax.f32 %v30710_v2, %v17017_v17  ;;  %v33029_v2 = vmax.f32 %v30644_v56, %v30770_v51 }
 0x822   : >> { %v17215_v43 = vmax.f32 %v30691_v20, %v30881_v52  ;;  %v30891_v50 = vrot.slane %v17213_v40, 7  ;;  %v15319_v42 = vcombine.high %v14695_v39, %v14695_v39  ;;  %v15326_v57 = vrot.slane %v14695_v39, %v32865_v14 }
 0x823   : >> { %v17211_v8 = vmax.f32 %v30722_v60, %v17019_v59  ;;  %v30895_v41 = vrot.slane %v17209_v36, 7  ;;  %v15302_v25 = vcombine.high %v14694_v21, %v14694_v21  ;;  %v15309_v53 = vrot.slane %v14694_v21, %v32865_v14 }
 0x824   : >> { %33027 = vst [vmem:[#allocation190_spill] sm:$0xff] %v30891_v50  ;;  %v30901_v7 = vrot.slane %v33029_v2, 7  ;;  %v30905_v20 = vsel %vm17421_vm3, %v30891_v50, %v17212_v22  ;;  %v15333_v52 = vrot.slane %v15319_v42, %v32865_v14  ;;  %v15334_v15 = vcombine.high %v15326_v57, %v15326_v57 }
 0x825   : >> { %33028 = vst [vmem:[#allocation191_spill] sm:$0xff] %v30895_v41  ;;  %33031 = vst [vmem:[#allocation193_spill] sm:$0xff] %v30905_v20  ;;  %v33032_v60 = vmax.f32 %v30651_v1, %v30805_v58  ;;  %v30915_v4 = vsel %vm17421_vm3, %v30895_v41, %v17208_v55  ;;  %v21037_v9 = vrot.slane %v15326_v57, 9  ;;  %v15316_v56 = vrot.slane %v15302_v25, %v32865_v14 }
 0x826   : >> { %33030 = vst [vmem:[#allocation192_spill] sm:$0xff] %v30901_v7  ;;  %33034 = vst [vmem:[#allocation195_spill] sm:$0xff] %v30915_v4  ;;  %v15335_v51 = vcombine.high %v15333_v52, %v15333_v52  ;;  %v21038_v23 = vrot.slane %v15334_v15, 9  ;;  %v21039_v61 = vrot.slane %v15333_v52, 9  ;;  %v15317_v22 = vcombine.high %v15309_v53, %v15309_v53 }
 0x827   : >> { %v30911_v44 = vrot.slane %v33032_v60, 7  ;;  %v17028_v17 = vmax.f32 %v15326_v57, %v21037_v9  ;;  %v15318_v40 = vcombine.high %v15316_v56, %v15316_v56  ;;  %v21033_v39 = vrot.slane %v15309_v53, 9 }
 0x828   : >> { %v21035_v59 = vrot.slane %v15316_v56, 9  ;;  %v21040_v36 = vrot.slane %v15335_v51, 9  ;;  %v17029_v21 = vmax.f32 %v15334_v15, %v21038_v23  ;;  %v30918_v1 = vmax.f32 %v15333_v52, %v21039_v61  ;;  %v33038_v15 = vld [vmem:[#allocation118_spill] sm:$0xff]  ;;  %v33039_v23 = vld [vmem:[#allocation119_spill] sm:$0xff]  ;;  %v30931_v61 = vpop.f32.mrb[60].mxu1 }
 0x829   : >> { %33033 = vst [vmem:[#allocation194_spill] sm:$0xff] %v30911_v44  ;;  %v21034_v58 = vrot.slane %v15317_v22, 9  ;;  %v17220_v42 = vmax.f32 %v30724_v0, %v17028_v17  ;;  %v21036_v55 = vrot.slane %v15318_v40, 9  ;;  %v17024_v2 = vmax.f32 %v15309_v53, %v21033_v39  ;;  %v33037_v44 = vld [vmem:[#allocation163_spill] sm:$0xff]  ;;  %v30933_v53 = vpop.f32.mrb[60].mxu0 }
 0x82a   : >> { %33035 = vst [vmem:[#allocation196_spill] sm:$0xff] %v30918_v1  ;;  %v30921_v60 = vmax.f32 %v15316_v56, %v21035_v59  ;;  %v17031_v25 = vmax.f32 %v15335_v51, %v21040_v36  ;;  %v17221_v54 = vmax.f32 %v30726_v28, %v17029_v21  ;;  %v24678_v0 = vadd.f32 %v33039_v23, %v33038_v15  ;;  %v33043_v51 = vld [vmem:[#allocation164_spill] sm:$0xff]  ;;  %v30943_v59 = vpop.f32.mrb[61].mxu0  ;;  %v33050_v15 = vld [vmem:[#allocation73_spill] sm:$0xff] }
 0x82b   : >> { %v17025_v9 = vmax.f32 %v15317_v22, %v21034_v58  ;;  %v17027_v31 = vmax.f32 %v15318_v40, %v21036_v55  ;;  %v17216_v41 = vmax.f32 %v33037_v44, %v17024_v2  ;;  %33040 = vst [vmem:[#allocation163_spill] sm:$0xff] %v30931_v61  ;;  %33041 = vst [vmem:[#allocation118_spill] sm:$0xff] %v30933_v53  ;;  %v33044_v22 = vld [vmem:[#allocation120_spill] sm:$0xff]  ;;  %v33045_v40 = vld [vmem:[#allocation121_spill] sm:$0xff]  ;;  %v30941_v44 = vpop.f32.mrb[61].mxu1 }
 0x82c   : >> { %33036 = vst [vmem:[#allocation197_spill] sm:$0xff] %v30921_v60  ;;  %v17223_v56 = vmax.f32 %v30768_v29, %v17031_v25  ;;  %v30936_v28 = vrot.slane %v17221_v54, 7  ;;  %v24679_v39 = vadd.f32 %v33045_v40, %v33044_v22  ;;  %33046 = vst [vmem:[#allocation164_spill] sm:$0xff] %v30941_v44  ;;  %v14633_v21 = vadd.f32 %v24678_v0, %v32864_v49  ;;  %v33048_v58 = vld [vmem:[#allocation123_spill] sm:$0xff]  ;;  %v33049_v55 = vld [vmem:[#allocation124_spill] sm:$0xff] }
 0x82d   : >> { %v17217_v17 = vmax.f32 %v33043_v51, %v17025_v9  ;;  %33047 = vst [vmem:[#allocation120_spill] sm:$0xff] %v30943_v59  ;;  %v17219_v36 = vmax.f32 %v30799_v47, %v17027_v31  ;;  %v24680_v2 = vadd.f32 %v33049_v55, %v33048_v58  ;;  %v33051_v29 = vld [vmem:[#allocation82_spill] sm:$0xff]  ;;  %v33052_v25 = vmax.f32 %v30679_v63, %v30841_v34  ;;  %v33059_v58 = vld [vmem:[#allocation92_spill] sm:$0xff]  ;;  %v33060_v55 = vld [vmem:[#allocation125_spill] sm:$0xff] }
 0x82e   : >> { %33042 = vst [vmem:[#allocation119_spill] sm:$0xff] %v30936_v28  ;;  %v24681_v54 = vadd.f32 %v33051_v29, %v33050_v15  ;;  %v30958_v23 = vsel %vm17421_vm3, %v30936_v28, %v17220_v42  ;;  %v14632_v47 = vadd.f32 %v24679_v39, %v32864_v49  ;;  %v30963_v31 = vrot.slane %v17215_v43, 7  ;;  %v33061_v15 = vld [vmem:[#allocation127_spill] sm:$0xff] }
 0x82f   : >> { %v30954_v9 = vrot.slane %v33052_v25, 7  ;;  %33054 = vst [vmem:[#allocation123_spill] sm:$0xff] %v30958_v23  ;;  %v30960_v51 = vrot.slane %v17217_v17, 7  ;;  %v30965_v0 = vrot.slane %v17211_v8, 7  ;;  %v14697_v22 = vmax.f32 %v14633_v21, 0.0  ;;  %v33062_v17 = vld [vmem:[#allocation128_spill] sm:$0xff] }
 0x830   : >> { %33056 = vst [vmem:[#allocation73_spill] sm:$0xff] %v30963_v31  ;;  %v14635_v40 = vadd.f32 %v24680_v2, %v32864_v49  ;;  %v14696_v63 = vmax.f32 %v14632_v47, 0.0  ;;  %v24682_v42 = vadd.f32 %v33060_v55, %v33059_v58  ;;  %v24683_v29 = vadd.f32 %v33062_v17, %v33061_v15 }
 0x831   : >> { %33053 = vst [vmem:[#allocation121_spill] sm:$0xff] %v30954_v9  ;;  %33055 = vst [vmem:[#allocation124_spill] sm:$0xff] %v30960_v51  ;;  %v30970_v34 = vsel %vm17421_vm3, %v30960_v51, %v17216_v41  ;;  %v15353_v25 = vcombine.high %v14697_v22, %v14697_v22  ;;  %v15360_v43 = vrot.slane %v14697_v22, %v32865_v14  ;;  %v30978_v21 = vrot.slane %v17223_v56, 7  ;;  %v30988_v56 = vpop.f32.mrb[62].mxu0 }
 0x832   : >> { %33057 = vst [vmem:[#allocation82_spill] sm:$0xff] %v30965_v0  ;;  %33058 = vst [vmem:[#allocation198_spill] sm:$0xff] %v30970_v34  ;;  %v14699_v39 = vmax.f32 %v14635_v40, 0.0  ;;  %v14634_v8 = vadd.f32 %v24681_v54, %v32864_v49  ;;  %v30980_v2 = vrot.slane %v17219_v36, 7  ;;  %v15336_v52 = vcombine.high %v14696_v63, %v14696_v63  ;;  %v30986_v40 = vpop.f32.mrb[62].mxu1 }
 0x833   : >> { %33063 = vst [vmem:[#allocation92_spill] sm:$0xff] %v30978_v21  ;;  %v15343_v41 = vrot.slane %v14696_v63, %v32865_v14  ;;  %v15367_v47 = vrot.slane %v15353_v25, %v32865_v14  ;;  %v15368_v57 = vcombine.high %v15360_v43, %v15360_v43  ;;  %v21045_v58 = vrot.slane %v15360_v43, 9  ;;  %33065 = vst [vmem:[#allocation127_spill] sm:$0xff] %v30986_v40  ;;  %v30999_v9 = vpop.f32.mrb[63].mxu1 }
 0x834   : >> { %33064 = vst [vmem:[#allocation125_spill] sm:$0xff] %v30980_v2  ;;  %v15387_v55 = vcombine.high %v14699_v39, %v14699_v39  ;;  %v15350_v15 = vrot.slane %v15336_v52, %v32865_v14  ;;  %v15394_v22 = vrot.slane %v14699_v39, %v32865_v14  ;;  %33066 = vst [vmem:[#allocation128_spill] sm:$0xff] %v30988_v56  ;;  %v14698_v18 = vmax.f32 %v14634_v8, 0.0  ;;  %v31001_v8 = vpop.f32.mrb[63].mxu0  ;;  %v33082_v56 = vld [vmem:[#allocation145_spill] sm:$0xff] }
 0x835   : >> { %v15351_v17 = vcombine.high %v15343_v41, %v15343_v41  ;;  %v21041_v60 = vrot.slane %v15343_v41, 9  ;;  %v15369_v36 = vcombine.high %v15367_v47, %v15367_v47  ;;  %v21046_v54 = vrot.slane %v15368_v57, 9  ;;  %33067 = vst [vmem:[#allocation199_spill] sm:$0xff] %v30999_v9  ;;  %33068 = vst [vmem:[#allocation200_spill] sm:$0xff] %v31001_v8  ;;  %v33077_v8 = vld [vmem:[#allocation88_spill] sm:$0xff] }
 0x836   : >> { %v21047_v2 = vrot.slane %v15367_v47, 9  ;;  %v15352_v63 = vcombine.high %v15350_v15, %v15350_v15  ;;  %v21043_v25 = vrot.slane %v15350_v15, 9  ;;  %v14637_v1 = vadd.f32 %v24682_v42, %v32864_v49 }
 0x837   : >> { %v21042_v21 = vrot.slane %v15351_v17, 9  ;;  %v21048_v5 = vrot.slane %v15369_v36, 9  ;;  %v30991_v51 = vmax.f32 %v15360_v43, %v21045_v58  ;;  %v15401_v52 = vrot.slane %v15387_v55, %v32865_v14 }
 0x838   : >> { %v14636_v39 = vadd.f32 %v24683_v29, %v32864_v49  ;;  %v30995_v34 = vmax.f32 %v15368_v57, %v21046_v54  ;;  %v21044_v4 = vrot.slane %v15352_v63, 9  ;;  %v30997_v28 = vmax.f32 %v15343_v41, %v21041_v60 }
 0x839   : >> { %v15402_v23 = vcombine.high %v15394_v22, %v15394_v22  ;;  %v31003_v0 = vmax.f32 %v15367_v47, %v21047_v2  ;;  %v31005_v42 = vmax.f32 %v15351_v17, %v21042_v21  ;;  %v15403_v43 = vcombine.high %v15401_v52, %v15401_v52 }
 0x83a   : >> { %v21053_v58 = vrot.slane %v15394_v22, 9  ;;  %v31007_v3 = vmax.f32 %v15350_v15, %v21043_v25  ;;  %v21055_v55 = vrot.slane %v15401_v52, 9  ;;  %v15370_v29 = vcombine.high %v14698_v18, %v14698_v18 }
 0x83b   : >> { %33069 = vst [vmem:[#allocation201_spill] sm:$0xff] %v31003_v0  ;;  %v15377_v57 = vrot.slane %v14698_v18, %v32865_v14  ;;  %v31010_v54 = vmax.f32 %v15369_v36, %v21048_v5  ;;  %v31012_v60 = vmax.f32 %v15352_v63, %v21044_v4  ;;  %v21054_v41 = vrot.slane %v15402_v23, 9 }
 0x83c   : >> { %33070 = vst [vmem:[#allocation202_spill] sm:$0xff] %v31007_v3  ;;  %v14701_v16 = vmax.f32 %v14637_v1, 0.0  ;;  %v21056_v31 = vrot.slane %v15403_v43, 9  ;;  %v31014_v19 = vmax.f32 %v15394_v22, %v21053_v58  ;;  %v15384_v21 = vrot.slane %v15370_v29, %v32865_v14 }
 0x83d   : >> { %v15385_v2 = vcombine.high %v15377_v57, %v15377_v57  ;;  %v21049_v47 = vrot.slane %v15377_v57, 9  ;;  %v14700_v25 = vmax.f32 %v14636_v39, 0.0  ;;  %v31018_v24 = vmax.f32 %v15401_v52, %v21055_v55 }
 0x83e   : >> { %v15421_v17 = vcombine.high %v14701_v16, %v14701_v16  ;;  %v15428_v15 = vrot.slane %v14701_v16, %v32865_v14  ;;  %v15386_v18 = vcombine.high %v15384_v21, %v15384_v21  ;;  %v21051_v36 = vrot.slane %v15384_v21, 9 }
 0x83f   : >> { %33071 = vst [vmem:[#allocation203_spill] sm:$0xff] %v31018_v24  ;;  %v21050_v5 = vrot.slane %v15385_v2, 9  ;;  %v15404_v50 = vcombine.high %v14700_v25, %v14700_v25  ;;  %v31021_v22 = vmax.f32 %v15402_v23, %v21054_v41  ;;  %v31023_v58 = vmax.f32 %v15403_v43, %v21056_v31  ;;  %v33073_v43 = vld [vmem:[#allocation133_spill] sm:$0xff]  ;;  %v33074_v41 = vld [vmem:[#allocation134_spill] sm:$0xff] }
 0x840   : >> { %v15435_v4 = vrot.slane %v15421_v17, %v32865_v14  ;;  %v15436_v63 = vcombine.high %v15428_v15, %v15428_v15  ;;  %v21061_v1 = vrot.slane %v15428_v15, 9  ;;  %v21052_v29 = vrot.slane %v15386_v18, 9 }
 0x841   : >> { %v15411_v20 = vrot.slane %v14700_v25, %v32865_v14  ;;  %v31026_v7 = vmax.f32 %v15377_v57, %v21049_v47  ;;  %v31028_v55 = vmax.f32 %v15385_v2, %v21050_v5  ;;  %v15418_v10 = vrot.slane %v15404_v50, %v32865_v14 }
 0x842   : >> { %v15437_v16 = vcombine.high %v15435_v4, %v15435_v4  ;;  %v21062_v52 = vrot.slane %v15436_v63, 9  ;;  %v21063_v39 = vrot.slane %v15435_v4, 9  ;;  %v31031_v37 = vmax.f32 %v15384_v21, %v21051_v36  ;;  %v33078_v36 = vld [vmem:[#allocation136_spill] sm:$0xff] }
 0x843   : >> { %v15419_v17 = vcombine.high %v15411_v20, %v15411_v20  ;;  %v21057_v62 = vrot.slane %v15411_v20, 9  ;;  %v31033_v23 = vmax.f32 %v15386_v18, %v21052_v29  ;;  %v31035_v31 = vmax.f32 %v15428_v15, %v21061_v1  ;;  %v33079_v18 = vld [vmem:[#allocation137_spill] sm:$0xff] }
 0x844   : >> { %33072 = vst [vmem:[#allocation204_spill] sm:$0xff] %v31031_v37  ;;  %v24684_v25 = vadd.f32 %v33074_v41, %v33073_v43  ;;  %v21064_v57 = vrot.slane %v15437_v16, 9  ;;  %v31039_v47 = vmax.f32 %v15436_v63, %v21062_v52  ;;  %v31041_v13 = vmax.f32 %v15435_v4, %v21063_v39  ;;  %v33080_v43 = vld [vmem:[#allocation138_spill] sm:$0xff]  ;;  %v33081_v41 = vld [vmem:[#allocation139_spill] sm:$0xff] }
 0x845   : >> { %v15420_v2 = vcombine.high %v15418_v10, %v15418_v10  ;;  %v21058_v5 = vrot.slane %v15419_v17, 9  ;;  %v24685_v21 = vadd.f32 %v33077_v8, %v33076_v12  ;;  %v24686_v29 = vadd.f32 %v33079_v18, %v33078_v36  ;;  %v33084_v8 = vld [vmem:[#allocation148_spill] sm:$0xff]  ;;  %v33085_v36 = vld [vmem:[#allocation149_spill] sm:$0xff] }
 0x846   : >> { %33075 = vst [vmem:[#allocation133_spill] sm:$0xff] %v31041_v13  ;;  %v14639_v50 = vadd.f32 %v24684_v25, %v32864_v49  ;;  %v21059_v15 = vrot.slane %v15418_v10, 9  ;;  %v31048_v9 = vmax.f32 %v15411_v20, %v21057_v62  ;;  %v24687_v63 = vadd.f32 %v33081_v41, %v33080_v43  ;;  %v33083_v25 = vld [vmem:[#allocation146_spill] sm:$0xff]  ;;  %v33087_v20 = vld [vmem:[#allocation81_spill] sm:$0xff] }
 0x847   : >> { %v21060_v1 = vrot.slane %v15420_v2, 9  ;;  %v14638_v4 = vadd.f32 %v24685_v21, %v32864_v49  ;;  %v14641_v39 = vadd.f32 %v24686_v29, %v32864_v49  ;;  %v24688_v40 = vadd.f32 %v33083_v25, %v33082_v56  ;;  %v33086_v62 = vld [vmem:[#allocation98_spill] sm:$0xff]  ;;  %v33151_v13 = vld [vmem:[#allocation185_spill] sm:$0xff] }
 0x848   : >> { %v14703_v52 = vmax.f32 %v14639_v50, 0.0  ;;  %v31056_v59 = vmax.f32 %v15437_v16, %v21064_v57  ;;  %v14640_v12 = vadd.f32 %v24687_v63, %v32864_v49  ;;  %v24689_v18 = vadd.f32 %v33085_v36, %v33084_v8 }
 0x849   : >> { %v24690_v44 = vadd.f32 %v33087_v20, %v33086_v62  ;;  %v14702_v43 = vmax.f32 %v14638_v4, 0.0  ;;  %v14705_v21 = vmax.f32 %v14641_v39, 0.0  ;;  %v31064_v41 = vmax.f32 %v15419_v17, %v21058_v5 }
 0x84a   : >> { %v15455_v53 = vcombine.high %v14703_v52, %v14703_v52  ;;  %v15462_v50 = vrot.slane %v14703_v52, %v32865_v14  ;;  %v31066_v29 = vmax.f32 %v15418_v10, %v21059_v15  ;;  %v31068_v56 = vmax.f32 %v15420_v2, %v21060_v1 }
 0x84b   : >> { %v14704_v16 = vmax.f32 %v14640_v12, 0.0  ;;  %v15438_v25 = vcombine.high %v14702_v43, %v14702_v43  ;;  %v14643_v8 = vadd.f32 %v24688_v40, %v32864_v49  ;;  %v15445_v62 = vrot.slane %v14702_v43, %v32865_v14 }
 0x84c   : >> { %33088 = vst [vmem:[#allocation134_spill] sm:$0xff] %v31066_v29  ;;  %v15469_v57 = vrot.slane %v15455_v53, %v32865_v14  ;;  %v15470_v63 = vcombine.high %v15462_v50, %v15462_v50  ;;  %v21069_v36 = vrot.slane %v15462_v50, 9  ;;  %v15489_v20 = vcombine.high %v14705_v21, %v14705_v21 }
 0x84d   : >> { %v15496_v52 = vrot.slane %v14705_v21, %v32865_v14  ;;  %v14642_v10 = vadd.f32 %v24689_v18, %v32864_v49  ;;  %v15452_v2 = vrot.slane %v15438_v25, %v32865_v14  ;;  %v15453_v15 = vcombine.high %v15445_v62, %v15445_v62 }
 0x84e   : >> { %v15471_v4 = vcombine.high %v15469_v57, %v15469_v57  ;;  %v21070_v17 = vrot.slane %v15470_v63, 9  ;;  %v21071_v5 = vrot.slane %v15469_v57, 9  ;;  %v21065_v1 = vrot.slane %v15445_v62, 9 }
 0x84f   : >> { %v15503_v53 = vrot.slane %v15489_v20, %v32865_v14  ;;  %v15504_v12 = vcombine.high %v15496_v52, %v15496_v52  ;;  %v15472_v40 = vcombine.high %v14704_v16, %v14704_v16  ;;  %v31078_v61 = vadd.f32 %v24690_v44, %v32864_v49 }
 0x850   : >> { %v21072_v39 = vrot.slane %v15471_v4, 9  ;;  %v31080_v43 = vmax.f32 %v15462_v50, %v21069_v36  ;;  %v31082_v21 = vmax.f32 %v15470_v63, %v21070_v17  ;;  %v31084_v35 = vmax.f32 %v15469_v57, %v21071_v5 }
 0x851   : >> { %v15454_v26 = vcombine.high %v15452_v2, %v15452_v2  ;;  %v21066_v18 = vrot.slane %v15453_v15, 9  ;;  %v15505_v32 = vcombine.high %v15503_v53, %v15503_v53  ;;  %v21077_v25 = vrot.slane %v15496_v52, 9 }
 0x852   : >> { %33089 = vst [vmem:[#allocation75_spill] sm:$0xff] %v31084_v35  ;;  %v21078_v6 = vrot.slane %v15504_v12, 9  ;;  %v31086_v45 = vmax.f32 %v15471_v4, %v21072_v39  ;;  %v21067_v20 = vrot.slane %v15452_v2, 9  ;;  %v31088_v33 = vmax.f32 %v15445_v62, %v21065_v1 }
 0x853   : >> { %v21079_v27 = vrot.slane %v15503_v53, 9  ;;  %v21080_v46 = vrot.slane %v15505_v32, 9  ;;  %v31090_v44 = vmax.f32 %v15496_v52, %v21077_v25  ;;  %v15479_v63 = vrot.slane %v14704_v16, %v32865_v14 }
 0x854   : >> { %v17069_v50 = vmax.f32 %v15504_v12, %v21078_v6  ;;  %v21068_v36 = vrot.slane %v15454_v26, 9  ;;  %v15486_v17 = vrot.slane %v15472_v40, %v32865_v14  ;;  %v14707_v5 = vmax.f32 %v14643_v8, 0.0 }
 0x855   : >> { %v31093_v57 = vmax.f32 %v15503_v53, %v21079_v27  ;;  %v31096_v48 = vmax.f32 %v15505_v32, %v21080_v46  ;;  %v15487_v1 = vcombine.high %v15479_v63, %v15479_v63  ;;  %v21073_v39 = vrot.slane %v15479_v63, 9 }
 0x856   : >> { %v17229_v62 = vmax.f32 %v30995_v34, %v17069_v50  ;;  %v15488_v6 = vcombine.high %v15486_v17, %v15486_v17  ;;  %v21075_v16 = vrot.slane %v15486_v17, 9  ;;  %v31103_v12 = vmax.f32 %v15453_v15, %v21066_v18 }
 0x857   : >> { %33090 = vst [vmem:[#allocation88_spill] sm:$0xff] %v31093_v57  ;;  %v21074_v8 = vrot.slane %v15487_v1, 9  ;;  %v15523_v46 = vcombine.high %v14707_v5, %v14707_v5  ;;  %v17064_v53 = vmax.f32 %v15479_v63, %v21073_v39  ;;  %v15530_v34 = vrot.slane %v14707_v5, %v32865_v14 }
 0x858   : >> { %v21076_v32 = vrot.slane %v15488_v6, 9  ;;  %v31107_v40 = vmax.f32 %v15486_v17, %v21075_v16  ;;  %v31110_v25 = vmax.f32 %v15452_v2, %v21067_v20  ;;  %v14706_v4 = vmax.f32 %v14642_v10, 0.0 }
 0x859   : >> { %v17065_v50 = vmax.f32 %v15487_v1, %v21074_v8  ;;  %v15537_v52 = vrot.slane %v15523_v46, %v32865_v14  ;;  %v17224_v15 = vmax.f32 %v30997_v28, %v17064_v53  ;;  %v15538_v27 = vcombine.high %v15530_v34, %v15530_v34 }
 0x85a   : >> { %33091 = vst [vmem:[#allocation136_spill] sm:$0xff] %v31107_v40  ;;  %33092 = vst [vmem:[#allocation137_spill] sm:$0xff] %v31110_v25  ;;  %v31113_v57 = vmax.f32 %v15488_v6, %v21076_v32  ;;  %v21085_v39 = vrot.slane %v15530_v34, 9  ;;  %v15506_v5 = vcombine.high %v14706_v4, %v14706_v4  ;;  %v15513_v10 = vrot.slane %v14706_v4, %v32865_v14 }
 0x85b   : >> { %v17225_v63 = vmax.f32 %v31005_v42, %v17065_v50  ;;  %v15539_v17 = vcombine.high %v15537_v52, %v15537_v52  ;;  %v21087_v16 = vrot.slane %v15537_v52, 9  ;;  %v21086_v20 = vrot.slane %v15538_v27, 9 }
 0x85c   : >> { %v17076_v28 = vmax.f32 %v15530_v34, %v21085_v39  ;;  %v31126_v46 = vmax.f32 %v15454_v26, %v21068_v36  ;;  %v15520_v42 = vrot.slane %v15506_v5, %v32865_v14  ;;  %v15521_v53 = vcombine.high %v15513_v10, %v15513_v10 }
 0x85d   : >> { %v31122_v1 = vrot.slane %v17225_v63, 7  ;;  %v21088_v6 = vrot.slane %v15539_v17, 9  ;;  %v31124_v8 = vmax.f32 %v15537_v52, %v21087_v16  ;;  %v17077_v32 = vmax.f32 %v15538_v27, %v21086_v20  ;;  %v33097_v20 = vld [vmem:[#allocation83_spill] sm:$0xff] }
 0x85e   : >> { %v17236_v4 = vmax.f32 %v31014_v19, %v17076_v28  ;;  %v15522_v34 = vcombine.high %v15520_v42, %v15520_v42  ;;  %v21081_v26 = vrot.slane %v15513_v10, 9  ;;  %v21082_v36 = vrot.slane %v15521_v53, 9 }
 0x85f   : >> { %33093 = vst [vmem:[#allocation138_spill] sm:$0xff] %v31122_v1  ;;  %33094 = vst [vmem:[#allocation139_spill] sm:$0xff] %v31124_v8  ;;  %v31131_v50 = vsel %vm17421_vm3, %v31122_v1, %v17224_v15  ;;  %v31133_v18 = vmax.f32 %v15539_v17, %v21088_v6  ;;  %v17237_v52 = vmax.f32 %v31021_v22, %v17077_v32  ;;  %v21083_v39 = vrot.slane %v15520_v42, 9  ;;  %v33096_v15 = vld [vmem:[#allocation100_spill] sm:$0xff] }
 0x860   : >> { %33095 = vst [vmem:[#allocation145_spill] sm:$0xff] %v31131_v50  ;;  %v14709_v16 = vmax.f32 %v31078_v61, 0.0  ;;  %v24691_v17 = vadd.f32 %v33097_v20, %v33096_v15  ;;  %v21084_v19 = vrot.slane %v15522_v34, 9  ;;  %v17072_v6 = vmax.f32 %v15513_v10, %v21081_v26 }
 0x861   : >> { %v31144_v5 = vrot.slane %v17237_v52, 7  ;;  %v17073_v28 = vmax.f32 %v15521_v53, %v21082_v36  ;;  %v31146_v63 = vrot.slane %v17229_v62, 7  ;;  %v31148_v22 = vmax.f32 %v15520_v42, %v21083_v39  ;;  %v33103_v39 = vld [vmem:[#allocation152_spill] sm:$0xff] }
 0x862   : >> { %v15557_v32 = vcombine.high %v14709_v16, %v14709_v16  ;;  %v15564_v2 = vrot.slane %v14709_v16, %v32865_v14  ;;  %v31155_v61 = vmax.f32 %v15522_v34, %v21084_v19  ;;  %v17232_v15 = vmax.f32 %v31026_v7, %v17072_v6  ;;  %v33102_v34 = vld [vmem:[#allocation151_spill] sm:$0xff] }
 0x863   : >> { %33098 = vst [vmem:[#allocation146_spill] sm:$0xff] %v31144_v5  ;;  %33099 = vst [vmem:[#allocation148_spill] sm:$0xff] %v31148_v22  ;;  %v31153_v27 = vsel %vm17421_vm3, %v31144_v5, %v17236_v4  ;;  %v17233_v52 = vmax.f32 %v31028_v55, %v17073_v28  ;;  %v14644_v4 = vadd.f32 %v24691_v17, %v32864_v49 }
 0x864   : >> { %33100 = vst [vmem:[#allocation149_spill] sm:$0xff] %v31153_v27  ;;  %v15571_v62 = vrot.slane %v15557_v32, %v32865_v14  ;;  %v15572_v42 = vcombine.high %v15564_v2, %v15564_v2  ;;  %v21093_v53 = vrot.slane %v15564_v2, 9  ;;  %v24692_v16 = vadd.f32 %v33103_v39, %v33102_v34 }
 0x865   : >> { %v31164_v36 = vrot.slane %v17233_v52, 7  ;;  %v33104_v6 = vmax.f32 %v31010_v54, %v31096_v48  ;;  %v14708_v52 = vmax.f32 %v14644_v4, 0.0  ;;  %v33108_v48 = vld [vmem:[#allocation153_spill] sm:$0xff]  ;;  %v33109_v54 = vld [vmem:[#allocation154_spill] sm:$0xff] }
 0x866   : >> { %v15573_v7 = vcombine.high %v15571_v62, %v15571_v62  ;;  %v21094_v20 = vrot.slane %v15572_v42, 9  ;;  %v21095_v55 = vrot.slane %v15571_v62, 9  ;;  %v17084_v19 = vmax.f32 %v15564_v2, %v21093_v53 }
 0x867   : >> { %33101 = vst [vmem:[#allocation98_spill] sm:$0xff] %v31164_v36  ;;  %v31172_v28 = vrot.slane %v33104_v6, 7  ;;  %v31176_v32 = vsel %vm17421_vm3, %v31164_v36, %v17232_v15  ;;  %v14647_v10 = vadd.f32 %v24692_v16, %v32864_v49  ;;  %v15540_v39 = vcombine.high %v14708_v52, %v14708_v52  ;;  %v33110_v16 = vld [vmem:[#allocation158_spill] sm:$0xff] }
 0x868   : >> { %33106 = vst [vmem:[#allocation100_spill] sm:$0xff] %v31176_v32  ;;  %v21096_v17 = vrot.slane %v15573_v7, 9  ;;  %v17085_v26 = vmax.f32 %v15572_v42, %v21094_v20  ;;  %v31179_v8 = vmax.f32 %v15571_v62, %v21095_v55  ;;  %v17244_v34 = vmax.f32 %v31035_v31, %v17084_v19  ;;  %v33111_v42 = vld [vmem:[#allocation159_spill] sm:$0xff] }
 0x869   : >> { %33105 = vst [vmem:[#allocation81_spill] sm:$0xff] %v31172_v28  ;;  %v15547_v2 = vrot.slane %v14708_v52, %v32865_v14  ;;  %v14711_v53 = vmax.f32 %v14647_v10, 0.0  ;;  %v24693_v6 = vadd.f32 %v33109_v54, %v33108_v48  ;;  %v24694_v62 = vadd.f32 %v33111_v42, %v33110_v16 }
 0x86a   : >> { %33107 = vst [vmem:[#allocation83_spill] sm:$0xff] %v31179_v8  ;;  %v31185_v24 = vmax.f32 %v15573_v7, %v21096_v17  ;;  %v17245_v15 = vmax.f32 %v31039_v47, %v17085_v26  ;;  %v15554_v20 = vrot.slane %v15540_v39, %v32865_v14  ;;  %v33113_v16 = vmax.f32 %v31012_v60, %v31113_v57 }
 0x86b   : >> { %v15555_v31 = vcombine.high %v15547_v2, %v15547_v2  ;;  %v21089_v55 = vrot.slane %v15547_v2, 9  ;;  %v15591_v19 = vcombine.high %v14711_v53, %v14711_v53  ;;  %v15598_v7 = vrot.slane %v14711_v53, %v32865_v14 }
 0x86c   : >> { %v31195_v52 = vrot.slane %v17245_v15, 7  ;;  %v14646_v47 = vadd.f32 %v24693_v6, %v32864_v49  ;;  %v15556_v26 = vcombine.high %v15554_v20, %v15554_v20  ;;  %v21091_v48 = vrot.slane %v15554_v20, 9 }
 0x86d   : >> { %v21090_v17 = vrot.slane %v15555_v31, 9  ;;  %v17080_v54 = vmax.f32 %v15547_v2, %v21089_v55  ;;  %v31202_v39 = vrot.slane %v33113_v16, 7  ;;  %v15605_v15 = vrot.slane %v15591_v19, %v32865_v14 }
 0x86e   : >> { %33112 = vst [vmem:[#allocation151_spill] sm:$0xff] %v31195_v52  ;;  %v31206_v42 = vsel %vm17421_vm3, %v31195_v52, %v17244_v34  ;;  %v15606_v4 = vcombine.high %v15598_v7, %v15598_v7  ;;  %v21092_v10 = vrot.slane %v15556_v26, 9  ;;  %v31209_v5 = vmax.f32 %v15554_v20, %v21091_v48 }
 0x86f   : >> { %33114 = vst [vmem:[#allocation152_spill] sm:$0xff] %v31202_v39  ;;  %33115 = vst [vmem:[#allocation153_spill] sm:$0xff] %v31206_v42  ;;  %v17081_v53 = vmax.f32 %v15555_v31, %v21090_v17  ;;  %v17240_v6 = vmax.f32 %v31048_v9, %v17080_v54  ;;  %v15607_v27 = vcombine.high %v15605_v15, %v15605_v15  ;;  %v21101_v2 = vrot.slane %v15598_v7, 9 }
 0x870   : >> { %33116 = vst [vmem:[#allocation154_spill] sm:$0xff] %v31209_v5  ;;  %v21102_v55 = vrot.slane %v15606_v4, 9  ;;  %v21103_v22 = vrot.slane %v15605_v15, 9  ;;  %v17083_v60 = vmax.f32 %v15556_v26, %v21092_v10  ;;  %v14710_v16 = vmax.f32 %v14646_v47, 0.0  ;;  %v33141_v47 = vld [vmem:[#allocation166_spill] sm:$0xff] }
 0x871   : >> { %v17241_v57 = vmax.f32 %v31064_v41, %v17081_v53  ;;  %v21104_v37 = vrot.slane %v15607_v27, 9  ;;  %v17092_v19 = vmax.f32 %v15598_v7, %v21101_v2 }
 0x872   : >> { %v17093_v36 = vmax.f32 %v15606_v4, %v21102_v55  ;;  %v31215_v32 = vmax.f32 %v15605_v15, %v21103_v22  ;;  %v17243_v20 = vmax.f32 %v31068_v56, %v17083_v60  ;;  %v15574_v9 = vcombine.high %v14710_v16, %v14710_v16 }
 0x873   : >> { %v31218_v31 = vrot.slane %v17241_v57, 7  ;;  %v15581_v17 = vrot.slane %v14710_v16, %v32865_v14  ;;  %v17095_v48 = vmax.f32 %v15607_v27, %v21104_v37  ;;  %v17252_v10 = vmax.f32 %v31080_v43, %v17092_v19 }
 0x874   : >> { %33117 = vst [vmem:[#allocation158_spill] sm:$0xff] %v31215_v32  ;;  %v17253_v41 = vmax.f32 %v31082_v21, %v17093_v36  ;;  %v33119_v4 = vmax.f32 %v31023_v58, %v31133_v18  ;;  %v15588_v7 = vrot.slane %v15574_v9, %v32865_v14  ;;  %v14649_v27 = vadd.f32 %v24694_v62, %v32864_v49  ;;  %v33123_v58 = vld [vmem:[#allocation85_spill] sm:$0xff]  ;;  %v33124_v18 = vld [vmem:[#allocation87_spill] sm:$0xff] }
 0x875   : >> { %33118 = vst [vmem:[#allocation159_spill] sm:$0xff] %v31218_v31  ;;  %v31232_v56 = vsel %vm17421_vm3, %v31218_v31, %v17240_v6  ;;  %v15589_v26 = vcombine.high %v15581_v17, %v15581_v17  ;;  %v17255_v37 = vmax.f32 %v31086_v45, %v17095_v48  ;;  %v21097_v21 = vrot.slane %v15581_v17, 9 }
 0x876   : >> { %v31228_v22 = vrot.slane %v33119_v4, 7  ;;  %33121 = vst [vmem:[#allocation206_spill] sm:$0xff] %v31232_v56  ;;  %v31236_v43 = vrot.slane %v17253_v41, 7  ;;  %v15590_v36 = vcombine.high %v15588_v7, %v15588_v7  ;;  %v21099_v15 = vrot.slane %v15588_v7, 9 }
 0x877   : >> { %v21098_v54 = vrot.slane %v15589_v26, 9  ;;  %v24695_v53 = vadd.f32 %v33124_v18, %v33123_v58  ;;  %v33125_v6 = vmax.f32 %v31033_v23, %v31155_v61  ;;  %v17088_v45 = vmax.f32 %v15581_v17, %v21097_v21  ;;  %v33129_v23 = vld [vmem:[#allocation89_spill] sm:$0xff]  ;;  %v33130_v61 = vld [vmem:[#allocation91_spill] sm:$0xff] }
 0x878   : >> { %33120 = vst [vmem:[#allocation205_spill] sm:$0xff] %v31228_v22  ;;  %33122 = vst [vmem:[#allocation207_spill] sm:$0xff] %v31236_v43  ;;  %v31248_v55 = vsel %vm17421_vm3, %v31236_v43, %v17252_v10  ;;  %v14713_v60 = vmax.f32 %v14649_v27, 0.0  ;;  %v21100_v57 = vrot.slane %v15590_v36, 9  ;;  %v31250_v62 = vmax.f32 %v15588_v7, %v21099_v15 }
 0x879   : >> { %v31244_v2 = vrot.slane %v33125_v6, 7  ;;  %33127 = vst [vmem:[#allocation87_spill] sm:$0xff] %v31248_v55  ;;  %v17089_v16 = vmax.f32 %v15589_v26, %v21098_v54  ;;  %v14648_v19 = vadd.f32 %v24695_v53, %v32864_v49  ;;  %v17248_v9 = vmax.f32 %v31088_v33, %v17088_v45 }
 0x87a   : >> { %33128 = vst [vmem:[#allocation208_spill] sm:$0xff] %v31250_v62  ;;  %v15625_v48 = vcombine.high %v14713_v60, %v14713_v60  ;;  %v15632_v41 = vrot.slane %v14713_v60, %v32865_v14  ;;  %v24696_v4 = vadd.f32 %v33130_v61, %v33129_v23  ;;  %v17091_v58 = vmax.f32 %v15590_v36, %v21100_v57 }
 0x87b   : >> { %33126 = vst [vmem:[#allocation85_spill] sm:$0xff] %v31244_v2  ;;  %v17249_v10 = vmax.f32 %v31103_v12, %v17089_v16  ;;  %v14712_v21 = vmax.f32 %v14648_v19, 0.0  ;;  %v33132_v12 = vmax.f32 %v31056_v59, %v31185_v24  ;;  %v31271_v57 = vrot.slane %v17243_v20, 7 }
 0x87c   : >> { %v15639_v7 = vrot.slane %v15625_v48, %v32865_v14  ;;  %v15640_v26 = vcombine.high %v15632_v41, %v15632_v41  ;;  %v21109_v27 = vrot.slane %v15632_v41, 9  ;;  %v14651_v54 = vadd.f32 %v24696_v4, %v32864_v49 }
 0x87d   : >> { %v17251_v33 = vmax.f32 %v31126_v46, %v17091_v58  ;;  %v31263_v15 = vrot.slane %v17249_v10, 7  ;;  %v15608_v18 = vcombine.high %v14712_v21, %v14712_v21  ;;  %v15615_v53 = vrot.slane %v14712_v21, %v32865_v14  ;;  %33134 = vst [vmem:[#allocation209_spill] sm:$0xff] %v31271_v57 }
 0x87e   : >> { %v31269_v36 = vrot.slane %v33132_v12, 7  ;;  %v15641_v6 = vcombine.high %v15639_v7, %v15639_v7  ;;  %v21110_v45 = vrot.slane %v15640_v26, 9  ;;  %v21111_v60 = vrot.slane %v15639_v7, 9  ;;  %v33139_v12 = vld [vmem:[#allocation95_spill] sm:$0xff] }
 0x87f   : >> { %33131 = vst [vmem:[#allocation89_spill] sm:$0xff] %v31263_v15  ;;  %v31275_v16 = vsel %vm17421_vm3, %v31263_v15, %v17248_v9  ;;  %v15622_v46 = vrot.slane %v15608_v18, %v32865_v14  ;;  %v15623_v19 = vcombine.high %v15615_v53, %v15615_v53  ;;  %v31278_v48 = vrot.slane %v17255_v37, 7  ;;  %v33138_v9 = vld [vmem:[#allocation93_spill] sm:$0xff] }
 0x880   : >> { %33133 = vst [vmem:[#allocation91_spill] sm:$0xff] %v31269_v36  ;;  %33135 = vst [vmem:[#allocation210_spill] sm:$0xff] %v31275_v16  ;;  %v31280_v23 = vrot.slane %v17251_v33, 7  ;;  %v21112_v61 = vrot.slane %v15641_v6, 9  ;;  %v31282_v24 = vmax.f32 %v15632_v41, %v21109_v27  ;;  %v31284_v59 = vmax.f32 %v15640_v26, %v21110_v45  ;;  %v33140_v18 = vld [vmem:[#allocation165_spill] sm:$0xff] }
 0x881   : >> { %33136 = vst [vmem:[#allocation211_spill] sm:$0xff] %v31278_v48  ;;  %v15624_v4 = vcombine.high %v15622_v46, %v15622_v46  ;;  %v21105_v58 = vrot.slane %v15615_v53, 9  ;;  %v14715_v20 = vmax.f32 %v14651_v54, 0.0  ;;  %v31286_v10 = vmax.f32 %v15639_v7, %v21111_v60  ;;  %v33142_v7 = vld [vmem:[#allocation168_spill] sm:$0xff]  ;;  %v33143_v45 = vld [vmem:[#allocation169_spill] sm:$0xff] }
 0x882   : >> { %33137 = vst [vmem:[#allocation212_spill] sm:$0xff] %v31280_v23  ;;  %v21106_v21 = vrot.slane %v15623_v19, 9  ;;  %v24697_v17 = vadd.f32 %v33139_v12, %v33138_v9  ;;  %v24698_v37 = vadd.f32 %v33141_v47, %v33140_v18  ;;  %v31292_v34 = vmax.f32 %v15641_v6, %v21112_v61  ;;  %v33144_v6 = vld [vmem:[#allocation174_spill] sm:$0xff] }
 0x883   : >> { %v21107_v33 = vrot.slane %v15622_v46, 9  ;;  %v21108_v23 = vrot.slane %v15624_v4, 9  ;;  %v15659_v41 = vcombine.high %v14715_v20, %v14715_v20  ;;  %v15666_v26 = vrot.slane %v14715_v20, %v32865_v14 }
 0x884   : >> { %v14650_v27 = vadd.f32 %v24697_v17, %v32864_v49  ;;  %v14653_v54 = vadd.f32 %v24698_v37, %v32864_v49  ;;  %v24699_v60 = vadd.f32 %v33143_v45, %v33142_v7  ;;  %v31299_v62 = vmax.f32 %v15615_v53, %v21105_v58 }
 0x885   : >> { %v15673_v9 = vrot.slane %v15659_v41, %v32865_v14  ;;  %v24700_v47 = vadd.f32 %v30780_v11, %v30778_v30  ;;  %v24701_v61 = vadd.f32 %v33144_v6, %v30786_v38  ;;  %v31306_v12 = vmax.f32 %v15623_v19, %v21106_v21 }
 0x886   : >> { %v15674_v20 = vcombine.high %v15666_v26, %v15666_v26  ;;  %v14714_v18 = vmax.f32 %v14650_v27, 0.0  ;;  %v14717_v17 = vmax.f32 %v14653_v54, 0.0  ;;  %v31308_v25 = vmax.f32 %v15622_v46, %v21107_v33 }
 0x887   : >> { %v31310_v37 = vmax.f32 %v15624_v4, %v21108_v23  ;;  %v15675_v7 = vcombine.high %v15673_v9, %v15673_v9  ;;  %v21117_v53 = vrot.slane %v15666_v26, 9  ;;  %v21119_v58 = vrot.slane %v15673_v9, 9 }
 0x888   : >> { %v15642_v45 = vcombine.high %v14714_v18, %v14714_v18  ;;  %v15649_v41 = vrot.slane %v14714_v18, %v32865_v14  ;;  %v14652_v30 = vadd.f32 %v24699_v60, %v32864_v49  ;;  %v21118_v11 = vrot.slane %v15674_v20, 9 }
 0x889   : >> { %v21120_v22 = vrot.slane %v15675_v7, 9  ;;  %v15693_v38 = vcombine.high %v14717_v17, %v14717_v17  ;;  %v15700_v19 = vrot.slane %v14717_v17, %v32865_v14  ;;  %v14655_v23 = vadd.f32 %v24700_v47, %v32864_v49 }
 0x88a   : >> { %v15656_v21 = vrot.slane %v15642_v45, %v32865_v14  ;;  %v15657_v27 = vcombine.high %v15649_v41, %v15649_v41  ;;  %v21113_v46 = vrot.slane %v15649_v41, 9  ;;  %v31317_v4 = vmax.f32 %v15666_v26, %v21117_v53 }
 0x88b   : >> { %v15707_v33 = vrot.slane %v15693_v38, %v32865_v14  ;;  %v15708_v54 = vcombine.high %v15700_v19, %v15700_v19  ;;  %v21125_v6 = vrot.slane %v15700_v19, 9  ;;  %v31320_v18 = vmax.f32 %v15673_v9, %v21119_v58 }
 0x88c   : >> { %v15658_v60 = vcombine.high %v15656_v21, %v15656_v21  ;;  %v21114_v48 = vrot.slane %v15657_v27, 9  ;;  %v21115_v32 = vrot.slane %v15656_v21, 9  ;;  %v31322_v35 = vmax.f32 %v15674_v20, %v21118_v11 }
 0x88d   : >> { %33145 = vst [vmem:[#allocation93_spill] sm:$0xff] %v31320_v18  ;;  %v31324_v17 = vmax.f32 %v15675_v7, %v21120_v22  ;;  %v15709_v45 = vcombine.high %v15707_v33, %v15707_v33  ;;  %v21126_v15 = vrot.slane %v15708_v54, 9  ;;  %v31326_v16 = vmax.f32 %v15649_v41, %v21113_v46  ;;  %v33147_v46 = vld [vmem:[#allocation178_spill] sm:$0xff] }
 0x88e   : >> { %v21127_v47 = vrot.slane %v15707_v33, 9  ;;  %v31328_v26 = vmax.f32 %v15700_v19, %v21125_v6  ;;  %v14716_v53 = vmax.f32 %v14652_v30, 0.0  ;;  %v21116_v38 = vrot.slane %v15658_v60, 9  ;;  %v33146_v19 = vld [vmem:[#allocation177_spill] sm:$0xff] }
 0x88f   : >> { %v31330_v31 = vmax.f32 %v15657_v27, %v21114_v48  ;;  %v31332_v9 = vmax.f32 %v15656_v21, %v21115_v32  ;;  %v14719_v58 = vmax.f32 %v14655_v23, 0.0  ;;  %v21128_v56 = vrot.slane %v15709_v45, 9 }
 0x890   : >> { %v15676_v43 = vcombine.high %v14716_v53, %v14716_v53  ;;  %v15683_v20 = vrot.slane %v14716_v53, %v32865_v14  ;;  %v14654_v22 = vadd.f32 %v24701_v61, %v32864_v49  ;;  %v31336_v7 = vmax.f32 %v15708_v54, %v21126_v15 }
 0x891   : >> { %v15727_v41 = vcombine.high %v14719_v58, %v14719_v58  ;;  %v15734_v11 = vrot.slane %v14719_v58, %v32865_v14  ;;  %v24702_v30 = vadd.f32 %v33147_v46, %v33146_v19  ;;  %v31342_v23 = vmax.f32 %v15707_v33, %v21127_v47 }
 0x892   : >> { %v15690_v48 = vrot.slane %v15676_v43, %v32865_v14  ;;  %v15691_v27 = vcombine.high %v15683_v20, %v15683_v20  ;;  %v21121_v32 = vrot.slane %v15683_v20, 9  ;;  %v14718_v21 = vmax.f32 %v14654_v22, 0.0 }
 0x893   : >> { %v15741_v6 = vrot.slane %v15727_v41, %v32865_v14  ;;  %v15742_v53 = vcombine.high %v15734_v11, %v15734_v11  ;;  %v21133_v55 = vrot.slane %v15734_v11, 9  ;;  %v14657_v2 = vadd.f32 %v24702_v30, %v32864_v49 }
 0x894   : >> { %v15692_v61 = vcombine.high %v15690_v48, %v15690_v48  ;;  %v21122_v15 = vrot.slane %v15691_v27, 9  ;;  %v21123_v54 = vrot.slane %v15690_v48, 9  ;;  %v31346_v58 = vmax.f32 %v15658_v60, %v21116_v38  ;;  %v33149_v38 = vld [vmem:[#allocation181_spill] sm:$0xff] }
 0x895   : >> { %v31348_v57 = vmax.f32 %v15709_v45, %v21128_v56  ;;  %v15743_v19 = vcombine.high %v15741_v6, %v15741_v6  ;;  %v21134_v43 = vrot.slane %v15742_v53, 9  ;;  %v31350_v46 = vmax.f32 %v15683_v20, %v21121_v32  ;;  %v33148_v45 = vld [vmem:[#allocation101_spill] sm:$0xff] }
 0x896   : >> { %v21135_v22 = vrot.slane %v15741_v6, 9  ;;  %v31352_v33 = vmax.f32 %v15734_v11, %v21133_v55  ;;  %v15710_v47 = vcombine.high %v14718_v21, %v14718_v21  ;;  %v21124_v41 = vrot.slane %v15692_v61, 9  ;;  %v33150_v11 = vld [vmem:[#allocation184_spill] sm:$0xff] }
 0x897   : >> { %v31354_v5 = vmax.f32 %v15691_v27, %v21122_v15  ;;  %v21136_v29 = vrot.slane %v15743_v19, 9  ;;  %v15717_v36 = vrot.slane %v14718_v21, %v32865_v14  ;;  %v31357_v8 = vmax.f32 %v15690_v48, %v21123_v54 }
 0x898   : >> { %v15724_v60 = vrot.slane %v15710_v47, %v32865_v14  ;;  %v14721_v56 = vmax.f32 %v14657_v2, 0.0  ;;  %v24703_v30 = vadd.f32 %v33149_v38, %v33148_v45  ;;  %v31362_v20 = vmax.f32 %v15742_v53, %v21134_v43 }
 0x899   : >> { %v15725_v32 = vcombine.high %v15717_v36, %v15717_v36  ;;  %v21129_v55 = vrot.slane %v15717_v36, 9  ;;  %v24704_v28 = vadd.f32 %v33151_v13, %v33150_v11  ;;  %v31366_v27 = vmax.f32 %v15741_v6, %v21135_v22 }
 0x89a   : >> { %v31368_v15 = vcombine.high %v15724_v60, %v15724_v60  ;;  %v15761_v21 = vcombine.high %v14721_v56, %v14721_v56  ;;  %v15768_v48 = vrot.slane %v14721_v56, %v32865_v14  ;;  %v31371_v54 = vmax.f32 %v15692_v61, %v21124_v41 }
 0x89b   : >> { %v31373_v2 = vmax.f32 %v15743_v19, %v21136_v29  ;;  %v14656_v47 = vadd.f32 %v24703_v30, %v32864_v49  ;;  %v14659_v53 = vadd.f32 %v24704_v28, %v32864_v49  ;;  %v21130_v43 = vrot.slane %v15725_v32, 9 }
 0x89c   : >> { %v21131_v45 = vrot.slane %v15724_v60, 9  ;;  %v15775_v38 = vrot.slane %v15761_v21, %v32865_v14  ;;  %v15776_v13 = vcombine.high %v15768_v48, %v15768_v48  ;;  %v31378_v6 = vmax.f32 %v15717_v36, %v21129_v55 }
 0x89d   : >> { %v21141_v22 = vrot.slane %v15768_v48, 9  ;;  %v14720_v11 = vmax.f32 %v14656_v47, 0.0  ;;  %v14723_v0 = vmax.f32 %v14659_v53, 0.0  ;;  %v21132_v56 = vrot.slane %v31368_v15, 9 }
 0x89e   : >> { %v15777_v61 = vcombine.high %v15775_v38, %v15775_v38  ;;  %v21142_v41 = vrot.slane %v15776_v13, 9  ;;  %v21143_v29 = vrot.slane %v15775_v38, 9 }
 0x89f   : >> { %v31381_v19 = vmax.f32 %v15768_v48, %v21141_v22  ;;  %v15744_v30 = vcombine.high %v14720_v11, %v14720_v11  ;;  %v15751_v28 = vrot.slane %v14720_v11, %v32865_v14  ;;  %v15795_v52 = vcombine.high %v14723_v0, %v14723_v0 }
 0x8a0   : >> { %v21144_v42 = vrot.slane %v15777_v61, 9  ;;  %v17133_v1 = vmax.f32 %v15776_v13, %v21142_v41  ;;  %v31384_v21 = vmax.f32 %v15775_v38, %v21143_v29  ;;  %v15802_v36 = vrot.slane %v14723_v0, %v32865_v14 }
 0x8a1   : >> { %33152 = vst [vmem:[#allocation95_spill] sm:$0xff] %v31381_v19  ;;  %v15758_v47 = vrot.slane %v15744_v30, %v32865_v14  ;;  %v15759_v53 = vcombine.high %v15751_v28, %v15751_v28  ;;  %v21137_v50 = vrot.slane %v15751_v28, 9  ;;  %v15809_v11 = vrot.slane %v15795_v52, %v32865_v14 }
 0x8a2   : >> { %33153 = vst [vmem:[#allocation165_spill] sm:$0xff] %v31384_v21  ;;  %v17135_v39 = vmax.f32 %v15777_v61, %v21144_v42  ;;  %v17261_v48 = vmax.f32 %v31284_v59, %v17133_v1  ;;  %v31394_v0 = vmax.f32 %v15724_v60, %v21131_v45  ;;  %v15810_v40 = vcombine.high %v15802_v36, %v15802_v36 }
 0x8a3   : >> { %v15760_v13 = vcombine.high %v15758_v47, %v15758_v47  ;;  %v21138_v38 = vrot.slane %v15759_v53, 9  ;;  %v21139_v41 = vrot.slane %v15758_v47, 9  ;;  %v17128_v29 = vmax.f32 %v15751_v28, %v21137_v50 }
 0x8a4   : >> { %v17263_v55 = vmax.f32 %v31292_v34, %v17135_v39  ;;  %v15811_v30 = vcombine.high %v15809_v11, %v15809_v11  ;;  %v31400_v59 = vmax.f32 %v15725_v32, %v21130_v43  ;;  %v21149_v61 = vrot.slane %v15802_v36, 9 }
 0x8a5   : >> { %v21140_v3 = vrot.slane %v15760_v13, 9  ;;  %v17129_v19 = vmax.f32 %v15759_v53, %v21138_v38  ;;  %v31397_v42 = vmax.f32 %v15758_v47, %v21139_v41  ;;  %v17256_v1 = vmax.f32 %v31299_v62, %v17128_v29  ;;  %v33155_v47 = vld [vmem:[#allocation188_spill] sm:$0xff]  ;;  %v33156_v53 = vld [vmem:[#allocation189_spill] sm:$0xff] }
 0x8a6   : >> { %v21150_v52 = vrot.slane %v15810_v40, 9  ;;  %v21151_v22 = vrot.slane %v15809_v11, 9  ;;  %v21152_v34 = vrot.slane %v15811_v30, 9  ;;  %v17140_v60 = vmax.f32 %v15802_v36, %v21149_v61  ;;  %v33160_v61 = vld [vmem:[#allocation164_spill] sm:$0xff] }
 0x8a7   : >> { %v31402_v21 = vmax.f32 %v15760_v13, %v21140_v3  ;;  %v17257_v50 = vmax.f32 %v31306_v12, %v17129_v19  ;;  %v24705_v62 = vadd.f32 %v33156_v53, %v33155_v47  ;;  %v33157_v13 = vld [vmem:[#allocation163_spill] sm:$0xff]  ;;  %v33158_v12 = vld [vmem:[#allocation118_spill] sm:$0xff]  ;;  %v33165_v53 = vld [vmem:[#allocation200_spill] sm:$0xff] }
 0x8a8   : >> { %v17141_v45 = vmax.f32 %v15810_v40, %v21150_v52  ;;  %v31407_v28 = vmax.f32 %v15809_v11, %v21151_v22  ;;  %v31415_v3 = vmax.f32 %v15811_v30, %v21152_v34  ;;  %v24706_v19 = vadd.f32 %v33158_v12, %v33157_v13  ;;  %v33161_v52 = vld [vmem:[#allocation120_spill] sm:$0xff]  ;;  %v33162_v34 = vld [vmem:[#allocation127_spill] sm:$0xff] }
 0x8a9   : >> { %v31413_v43 = vrot.slane %v17257_v50, 7  ;;  %v17268_v38 = vmax.f32 %v31317_v4, %v17140_v60  ;;  %v14658_v22 = vadd.f32 %v24705_v62, %v32864_v49  ;;  %v31425_v11 = vmax.f32 %v31368_v15, %v21132_v56  ;;  %v33163_v60 = vld [vmem:[#allocation128_spill] sm:$0xff]  ;;  %v33164_v47 = vld [vmem:[#allocation199_spill] sm:$0xff] }
 0x8aa   : >> { %33154 = vst [vmem:[#allocation166_spill] sm:$0xff] %v31407_v28  ;;  %v17269_v36 = vmax.f32 %v31322_v35, %v17141_v45  ;;  %v17271_v29 = vmax.f32 %v31324_v17, %v31415_v3  ;;  %v14661_v30 = vadd.f32 %v24706_v19, %v32864_v49  ;;  %v24707_v50 = vadd.f32 %v33161_v52, %v33160_v61 }
 0x8ab   : >> { %v31429_v41 = vsel %vm17421_vm3, %v31413_v43, %v17256_v1  ;;  %v14722_v35 = vmax.f32 %v14658_v22, 0.0  ;;  %v24708_v45 = vadd.f32 %v33163_v60, %v33162_v34  ;;  %v31440_v15 = vrot.slane %v17261_v48, 7 }
 0x8ac   : >> { %v31434_v4 = vrot.slane %v17269_v36, 7  ;;  %v31442_v56 = vrot.slane %v17263_v55, 7  ;;  %v14725_v1 = vmax.f32 %v14661_v30, 0.0  ;;  %v24709_v62 = vadd.f32 %v33165_v53, %v33164_v47 }
 0x8ad   : >> { %v15778_v3 = vcombine.high %v14722_v35, %v14722_v35  ;;  %v15785_v13 = vrot.slane %v14722_v35, %v32865_v14  ;;  %v14660_v12 = vadd.f32 %v24707_v50, %v32864_v49  ;;  %v14663_v48 = vadd.f32 %v24708_v45, %v32864_v49 }
 0x8ae   : >> { %33159 = vst [vmem:[#allocation168_spill] sm:$0xff] %v31434_v4  ;;  %v31448_v17 = vsel %vm17421_vm3, %v31434_v4, %v17268_v38  ;;  %v15829_v19 = vcombine.high %v14725_v1, %v14725_v1  ;;  %v15836_v36 = vrot.slane %v14725_v1, %v32865_v14  ;;  %v14662_v55 = vadd.f32 %v24709_v62, %v32864_v49 }
 0x8af   : >> { %33166 = vst [vmem:[#allocation169_spill] sm:$0xff] %v31448_v17  ;;  %v15792_v22 = vrot.slane %v15778_v3, %v32865_v14  ;;  %v15793_v30 = vcombine.high %v15785_v13, %v15785_v13  ;;  %v21145_v61 = vrot.slane %v15785_v13, 9  ;;  %v14724_v52 = vmax.f32 %v14660_v12, 0.0 }
 0x8b0   : >> { %v15843_v38 = vrot.slane %v15829_v19, %v32865_v14  ;;  %v15844_v34 = vcombine.high %v15836_v36, %v15836_v36  ;;  %v21157_v60 = vrot.slane %v15836_v36, 9  ;;  %v14727_v47 = vmax.f32 %v14663_v48, 0.0 }
 0x8b1   : >> { %v15794_v35 = vcombine.high %v15792_v22, %v15792_v22  ;;  %v21146_v53 = vrot.slane %v15793_v30, 9  ;;  %v21147_v50 = vrot.slane %v15792_v22, 9  ;;  %v17136_v40 = vmax.f32 %v15785_v13, %v21145_v61  ;;  %v33175_v13 = vld [vmem:[#allocation99_spill] sm:$0xff] }
 0x8b2   : >> { %v15845_v39 = vcombine.high %v15843_v38, %v15843_v38  ;;  %v21158_v1 = vrot.slane %v15844_v34, 9  ;;  %v21159_v32 = vrot.slane %v15843_v38, 9  ;;  %v17148_v45 = vmax.f32 %v15836_v36, %v21157_v60 }
 0x8b3   : >> { %v21148_v28 = vrot.slane %v15794_v35, 9  ;;  %v17137_v62 = vmax.f32 %v15793_v30, %v21146_v53  ;;  %v31457_v49 = vmax.f32 %v15792_v22, %v21147_v50  ;;  %v17264_v3 = vmax.f32 %v31326_v16, %v17136_v40 }
 0x8b4   : >> { %v21160_v12 = vrot.slane %v15845_v39, 9  ;;  %v17149_v18 = vmax.f32 %v15844_v34, %v21158_v1  ;;  %v31460_v19 = vmax.f32 %v15843_v38, %v21159_v32  ;;  %v17276_v48 = vmax.f32 %v31328_v26, %v17148_v45 }
 0x8b5   : >> { %v17139_v4 = vmax.f32 %v15794_v35, %v21148_v28  ;;  %v17265_v17 = vmax.f32 %v31330_v31, %v17137_v62  ;;  %v15812_v61 = vcombine.high %v14724_v52, %v14724_v52  ;;  %v15819_v16 = vrot.slane %v14724_v52, %v32865_v14 }
 0x8b6   : >> { %v17151_v36 = vmax.f32 %v15845_v39, %v21160_v12  ;;  %v17277_v30 = vmax.f32 %v31336_v7, %v17149_v18  ;;  %v17278_v22 = vmax.f32 %v31342_v23, %v31460_v19  ;;  %v15863_v28 = vcombine.high %v14727_v47, %v14727_v47 }
 0x8b7   : >> { %v17267_v32 = vmax.f32 %v31346_v58, %v17139_v4  ;;  %v31471_v40 = vrot.slane %v17265_v17, 7  ;;  %v15826_v26 = vrot.slane %v15812_v61, %v32865_v14  ;;  %v15827_v34 = vcombine.high %v15819_v16, %v15819_v16 }
 0x8b8   : >> { %v17279_v31 = vmax.f32 %v31348_v57, %v17151_v36  ;;  %v31475_v38 = vrot.slane %v17277_v30, 7  ;;  %v21153_v39 = vrot.slane %v15819_v16, 9  ;;  %v33167_v18 = vmax.f32 %v31310_v37, %v31402_v21 }
 0x8b9   : >> { %v31484_v52 = vsel %vm17421_vm3, %v31471_v40, %v17264_v3  ;;  %v15828_v58 = vcombine.high %v15826_v26, %v15826_v26  ;;  %v21155_v4 = vrot.slane %v15826_v26, 9  ;;  %v31486_v17 = vrot.slane %v17271_v29, 7 }
 0x8ba   : >> { %v31480_v7 = vrot.slane %v33167_v18, 7  ;;  %v31490_v57 = vsel %vm17421_vm3, %v31475_v38, %v17276_v48  ;;  %v21154_v60 = vrot.slane %v15827_v34, 9  ;;  %v17144_v35 = vmax.f32 %v15819_v16, %v21153_v39 }
 0x8bb   : >> { %v21156_v53 = vrot.slane %v15828_v58, 9  ;;  %v31492_v50 = vmax.f32 %v15826_v26, %v21155_v4  ;;  %v15870_v37 = vrot.slane %v14727_v47, %v32865_v14  ;;  %v15877_v21 = vrot.slane %v15863_v28, %v32865_v14 }
 0x8bc   : >> { %v31496_v1 = vrot.slane %v17267_v32, 7  ;;  %v17145_v45 = vmax.f32 %v15827_v34, %v21154_v60  ;;  %v17272_v29 = vmax.f32 %v31350_v46, %v17144_v35  ;;  %v14726_v62 = vmax.f32 %v14662_v55, 0.0 }
 0x8bd   : >> { %v17147_v3 = vmax.f32 %v15828_v58, %v21156_v53  ;;  %v17274_v12 = vmax.f32 %v31357_v8, %v31492_v50  ;;  %v15878_v48 = vcombine.high %v15870_v37, %v15870_v37  ;;  %v15879_v61 = vcombine.high %v15877_v21, %v15877_v21  ;;  %v33173_v53 = vld [vmem:[#allocation167_spill] sm:$0xff] }
 0x8be   : >> { %v17273_v36 = vmax.f32 %v31354_v5, %v17145_v45  ;;  %v21165_v30 = vrot.slane %v15870_v37, 9  ;;  %v21167_v16 = vrot.slane %v15877_v21, 9  ;;  %v15846_v47 = vcombine.high %v14726_v62, %v14726_v62 }
 0x8bf   : >> { %v17275_v26 = vmax.f32 %v31371_v54, %v17147_v3  ;;  %v21166_v28 = vrot.slane %v15878_v48, 9  ;;  %v21168_v32 = vrot.slane %v15879_v61, 9  ;;  %v15853_v34 = vrot.slane %v14726_v62, %v32865_v14 }
 0x8c0   : >> { %v31504_v39 = vrot.slane %v17273_v36, 7  ;;  %v17156_v46 = vmax.f32 %v15870_v37, %v21165_v30  ;;  %v31506_v55 = vmax.f32 %v15877_v21, %v21167_v16  ;;  %v15860_v18 = vrot.slane %v15846_v47, %v32865_v14  ;;  %v33169_v36 = vld [vmem:[#allocation103_spill] sm:$0xff] }
 0x8c1   : >> { %v31509_v58 = vrot.slane %v17279_v31, 7  ;;  %v17157_v4 = vmax.f32 %v15878_v48, %v21166_v28  ;;  %v31511_v5 = vmax.f32 %v15879_v61, %v21168_v32  ;;  %v15861_v60 = vcombine.high %v15853_v34, %v15853_v34  ;;  %v33168_v61 = vld [vmem:[#allocation72_spill] sm:$0xff]  ;;  %v33171_v30 = vld [vmem:[#allocation111_spill] sm:$0xff] }
 0x8c2   : >> { %v31515_v54 = vsel %vm17421_vm3, %v31504_v39, %v17272_v29  ;;  %v17284_v35 = vmax.f32 %v31352_v33, %v17156_v46  ;;  %v15862_v37 = vcombine.high %v15860_v18, %v15860_v18  ;;  %v21161_v45 = vrot.slane %v15853_v34, 9 }
 0x8c3   : >> { %v17285_v21 = vmax.f32 %v31362_v20, %v17157_v4  ;;  %v21162_v62 = vrot.slane %v15861_v60, 9  ;;  %v21163_v3 = vrot.slane %v15860_v18, 9  ;;  %v33170_v29 = vmax.f32 %v33168_v61, %v33169_v36  ;;  %v33172_v4 = vld [vmem:[#allocation147_spill] sm:$0xff] }
 0x8c4   : >> { %v21164_v48 = vrot.slane %v15862_v37, 9  ;;  %v17152_v47 = vmax.f32 %v15853_v34, %v21161_v45  ;;  %v33174_v31 = vmax.f32 %v33172_v4, %v33173_v53  ;;  %v33180_v4 = vld [vmem:[#allocation106_spill] sm:$0xff] }
 0x8c5   : >> { %v17439_v33 = vsel %vm17421_vm3, %v33171_v30, %v33170_v29  ;;  %v31528_v16 = vrot.slane %v17285_v21, 7  ;;  %v17153_v28 = vmax.f32 %v15861_v60, %v21162_v62  ;;  %v31530_v20 = vmax.f32 %v15860_v18, %v21163_v3  ;;  %v33177_v3 = vld [vmem:[#allocation95_spill] sm:$0xff] }
 0x8c6   : >> { %v31532_v32 = vmax.f32 %v15862_v37, %v21164_v48  ;;  %v17440_v46 = vsel %vm17423_vm4, %v33171_v30, %v17439_v33  ;;  %v17551_v61 = vsel %vm17421_vm3, %v33175_v13, %v33174_v31  ;;  %v17280_v34 = vmax.f32 %v31378_v6, %v17152_v47 }
 0x8c7   : >> { %v31543_v21 = vsel %vm17421_vm3, %v31528_v16, %v17284_v35  ;;  %v17281_v18 = vmax.f32 %v31400_v59, %v17153_v28  ;;  %v17441_v60 = vsel %vm17425_vm5, %v33171_v30, %v17440_v46  ;;  %v17282_v37 = vmax.f32 %v31394_v0, %v31530_v20  ;;  %v33179_v46 = vld [vmem:[#allocation76_spill] sm:$0xff] }
 0x8c8   : >> { %v17283_v53 = vmax.f32 %v31425_v11, %v31532_v32  ;;  %v17442_v31 = vsel %vm17427_vm6, %v33171_v30, %v17441_v60  ;;  %v17552_v35 = vsel %vm17423_vm4, %v33175_v13, %v17551_v61  ;;  %v33176_v59 = vmax.f32 %v30991_v51, %v31090_v44  ;;  %v33183_v60 = vld [vmem:[#allocation156_spill] sm:$0xff]  ;;  %v33317_v32 = vld [vmem:[#allocation107_spill] sm:$0xff] }
 0x8c9   : >> { %v31557_v45 = vrot.slane %v17281_v18, 7  ;;  %v17553_v6 = vsel %vm17425_vm5, %v33175_v13, %v17552_v35  ;;  %v33178_v48 = vmax.f32 %v31282_v24, %v33177_v3  ;;  %v31571_v29 = vrot.slane %v17275_v26, 7  ;;  %v33182_v18 = vld [vmem:[#allocation90_spill] sm:$0xff]  ;;  %v33184_v35 = vld [vmem:[#allocation171_spill] sm:$0xff]  ;;  %v33187_v3 = vld [vmem:[#allocation14_spill] sm:$0xff] }
 0x8ca   : >> { %v17663_v62 = vsel %vm17421_vm3, %v31146_v63, %v33176_v59  ;;  %v17554_v30 = vsel %vm17427_vm6, %v33175_v13, %v17553_v6  ;;  %v33181_v61 = vmax.f32 %v33179_v46, %v33180_v4  ;;  %v33185_v6 = vmax.f32 %v33183_v60, %v33184_v35  ;;  %v33186_v59 = vld [vmem:[#allocation192_spill] sm:$0xff]  ;;  %v33193_v35 = vld [vmem:[#allocation110_spill] sm:$0xff] }
 0x8cb   : >> { %v17775_v36 = vsel %vm17421_vm3, %v31440_v15, %v33178_v48  ;;  %v17664_v33 = vsel %vm17423_vm4, %v31146_v63, %v17663_v62  ;;  %v31581_v44 = vsel %vm17421_vm3, %v31557_v45, %v17280_v34  ;;  %v17970_v47 = vcombine.low %v17442_v31, %v17554_v30 }
 0x8cc   : >> { %v17776_v51 = vsel %vm17423_vm4, %v31440_v15, %v17775_v36  ;;  %v17665_v24 = vsel %vm17425_vm5, %v31146_v63, %v17664_v33  ;;  %v17432_v34 = vsel %vm17421_vm3, %v33182_v18, %v33181_v61  ;;  %v17544_v62 = vsel %vm17421_vm3, %v33186_v59, %v33185_v6  ;;  %v33188_v33 = vld [vmem:[#allocation202_spill] sm:$0xff]  ;;  %v33194_v6 = vld [vmem:[#allocation108_spill] sm:$0xff] }
 0x8cd   : >> { %v17777_v26 = vsel %vm17425_vm5, %v31440_v15, %v17776_v51  ;;  %v17666_v13 = vsel %vm17427_vm6, %v31146_v63, %v17665_v24  ;;  %v17977_v31 = vrot.slane %v17970_v47, %v33187_v3  ;;  %v17433_v63 = vsel %vm17423_vm4, %v33182_v18, %v17432_v34  ;;  %v33189_v51 = vld [vmem:[#allocation136_spill] sm:$0xff] }
 0x8ce   : >> { %v17778_v28 = vsel %vm17427_vm6, %v31440_v15, %v17777_v26  ;;  %v17545_v15 = vsel %vm17423_vm4, %v33186_v59, %v17544_v62  ;;  %v17434_v36 = vsel %vm17425_vm5, %v33182_v18, %v17433_v63  ;;  %v33190_v24 = vmax.f32 %v33188_v33, %v33189_v51  ;;  %v33191_v26 = vld [vmem:[#allocation152_spill] sm:$0xff]  ;;  %v33196_v51 = vld [vmem:[#allocation173_spill] sm:$0xff] }
 0x8cf   : >> { %v17979_v48 = vcombine.low %v17666_v13, %v17778_v28  ;;  %v17546_v30 = vsel %vm17425_vm5, %v33186_v59, %v17545_v15  ;;  %v33192_v47 = vmax.f32 %v31308_v25, %v31397_v42  ;;  %v17435_v4 = vsel %vm17427_vm6, %v33182_v18, %v17434_v36  ;;  %v33195_v33 = vld [vmem:[#allocation176_spill] sm:$0xff] }
 0x8d0   : >> { %v17656_v46 = vsel %vm17421_vm3, %v33191_v26, %v33190_v24  ;;  %v17547_v61 = vsel %vm17427_vm6, %v33186_v59, %v17546_v30  ;;  %v17424_v62 = vsel %vm17423_vm4, %v33194_v6, %v33193_v35  ;;  %v17538_v24 = vsel %vm17423_vm4, %v33196_v51, %v33195_v33  ;;  %v33201_v33 = vld [vmem:[#allocation193_spill] sm:$0xff] }
 0x8d1   : >> { %v17768_v13 = vsel %vm17421_vm3, %v31480_v7, %v33192_v47  ;;  %v17986_v28 = vrot.slane %v17979_v48, %v33187_v3  ;;  %v17657_v34 = vsel %vm17423_vm4, %v33191_v26, %v17656_v46  ;;  %v17952_v42 = vcombine.low %v17435_v4, %v17547_v61 }
 0x8d2   : >> { %v17658_v60 = vsel %vm17425_vm5, %v33191_v26, %v17657_v34  ;;  %v17769_v25 = vsel %vm17423_vm4, %v31480_v7, %v17768_v13  ;;  %v17426_v30 = vsel %vm17425_vm5, %v33194_v6, %v17424_v62  ;;  %v33197_v13 = vld [vmem:[#allocation145_spill] sm:$0xff]  ;;  %v17762_v61 = vsel %vm17423_vm4, %v31413_v43, %v31429_v41  ;;  %v33199_v34 = vld [vmem:[#allocation126_spill] sm:$0xff] }
 0x8d3   : >> { %v18274_v48 = vcombine.low %v17977_v31, %v17986_v28  ;;  %v17659_v18 = vsel %vm17427_vm6, %v33191_v26, %v17658_v60  ;;  %v17770_v59 = vsel %vm17425_vm5, %v31480_v7, %v17769_v25  ;;  %v21171_v63 = vcombine.high %v17977_v31, %v17986_v28  ;;  %v33198_v28 = vld [vmem:[#allocation138_spill] sm:$0xff] }
 0x8d4   : >> { %v17771_v15 = vsel %vm17427_vm6, %v31480_v7, %v17770_v59  ;;  %v31641_v36 = vrot.slane %v17952_v42, %v33187_v3  ;;  %v17428_v31 = vsel %vm17427_vm6, %v33194_v6, %v17426_v30  ;;  %v17539_v7 = vsel %vm17425_vm5, %v33196_v51, %v17538_v24  ;;  %v33200_v60 = vld [vmem:[#allocation86_spill] sm:$0xff] }
 0x8d5   : >> { %v18281_v46 = vrot.slane %v18274_v48, %v32865_v14  ;;  %v17961_v26 = vcombine.low %v17659_v18, %v17771_v15  ;;  %v18294_v47 = vrot.slane %v21171_v63, %v32865_v14  ;;  %v17650_v4 = vsel %vm17423_vm4, %v33198_v28, %v33197_v13 }
 0x8d6   : >> { %v17496_v25 = vsel %vm17423_vm4, %v33200_v60, %v33199_v34  ;;  %v17540_v35 = vsel %vm17427_vm6, %v33196_v51, %v17539_v7  ;;  %v17651_v6 = vsel %vm17425_vm5, %v33198_v28, %v17650_v4  ;;  %v17763_v62 = vsel %vm17425_vm5, %v31413_v43, %v17762_v61  ;;  %v33202_v51 = vld [vmem:[#allocation190_spill] sm:$0xff] }
 0x8d7   : >> { %18282 = vrot.lane.b32.xlu0 %v18281_v46, %s25410_s2  ;;  %v31665_v42 = vrot.slane %v17961_v26, %v33187_v3  ;;  %v17652_v41 = vsel %vm17427_vm6, %v33198_v28, %v17651_v6  ;;  %v17764_v48 = vsel %vm17427_vm6, %v31413_v43, %v17763_v62  ;;  %v17934_v18 = vcombine.low %v17428_v31, %v17540_v35  ;;  %v33203_v26 = vld [vmem:[#allocation153_spill] sm:$0xff]  ;;  %v33204_v31 = vld [vmem:[#allocation151_spill] sm:$0xff]  ;;  %v33205_v35 = vld [vmem:[#allocation74_spill] sm:$0xff] }
 0x8d8   : >> { %v17497_v59 = vsel %vm17425_vm5, %v33200_v60, %v17496_v25  ;;  %v17943_v15 = vcombine.low %v17652_v41, %v17764_v48  ;;  %v17608_v24 = vsel %vm17423_vm4, %v33202_v51, %v33201_v33  ;;  %v17720_v7 = vsel %vm17423_vm4, %v33204_v31, %v33203_v26  ;;  %v33206_v6 = vld [vmem:[#allocation104_spill] sm:$0xff]  ;;  %v33212_v33 = vld [vmem:[#allocation70_spill] sm:$0xff] }
 0x8d9   : >> { %v18248_v63 = vcombine.low %v31641_v36, %v31665_v42  ;;  %v17498_v30 = vsel %vm17427_vm6, %v33200_v60, %v17497_v59  ;;  %v31687_v46 = vrot.slane %v17934_v18, %v33187_v3  ;;  %v17609_v43 = vsel %vm17425_vm5, %v33202_v51, %v17608_v24 }
 0x8da   : >> { %v17832_v13 = vsel %vm17423_vm4, %v31475_v38, %v31490_v57  ;;  %v31700_v4 = vrot.slane %v17943_v15, %v33187_v3  ;;  %v17610_v61 = vsel %vm17427_vm6, %v33202_v51, %v17609_v43  ;;  %v17721_v34 = vsel %vm17425_vm5, %v33204_v31, %v17720_v7  ;;  %v33210_v15 = vld [vmem:[#allocation170_spill] sm:$0xff] }
 0x8db   : >> { %v18255_v28 = vrot.slane %v18248_v63, %v32865_v14  ;;  %18295 = vrot.lane.b32.xlu0 %v18294_v47, %s25411_s28  ;;  %v17722_v60 = vsel %vm17427_vm6, %v33204_v31, %v17721_v34  ;;  %v17833_v57 = vsel %vm17425_vm5, %v31475_v38, %v17832_v13  ;;  %v18114_v25 = vcombine.low %v17498_v30, %v17610_v61  ;;  %v33208_v47 = vld [vmem:[#allocation116_spill] sm:$0xff]  ;;  %v33209_v63 = vld [vmem:[#allocation150_spill] sm:$0xff] }
 0x8dc   : >> { %v33207_v62 = vmax.f32 %v33205_v35, %v33206_v6  ;;  %v21169_v48 = vcombine.high %v31687_v46, %v31700_v4  ;;  %v17834_v18 = vsel %vm17427_vm6, %v31475_v38, %v17833_v57  ;;  %v33211_v30 = vmax.f32 %v33209_v63, %v33210_v15  ;;  %v33214_v61 = vld [vmem:[#allocation88_spill] sm:$0xff]  ;;  %v33216_v57 = vld [vmem:[#allocation81_spill] sm:$0xff]  ;;  %v33220_v15 = vld [vmem:[#allocation122_spill] sm:$0xff] }
 0x8dd   : >> { %18256 = vrot.lane.b32.xlu1 %v18255_v28, %s25412_s7  ;;  %v18121_v24 = vrot.slane %v18114_v25, %v33187_v3  ;;  %v18123_v43 = vcombine.low %v17722_v60, %v17834_v18  ;;  %v33213_v28 = vld [vmem:[#allocation201_spill] sm:$0xff]  ;;  %v33219_v63 = vld [vmem:[#allocation84_spill] sm:$0xff] }
 0x8de   : >> { %v17446_v41 = vsel %vm17421_vm3, %v33208_v47, %v33207_v62  ;;  %v17558_v51 = vsel %vm17421_vm3, %v33212_v33, %v33211_v30  ;;  %v18242_v38 = vrot.slane %v21169_v48, %v32865_v14  ;;  %v33215_v34 = vmax.f32 %v33213_v28, %v33214_v61  ;;  %v33217_v62 = vld [vmem:[#allocation165_spill] sm:$0xff]  ;;  %v33224_v61 = vld [vmem:[#allocation186_spill] sm:$0xff] }
 0x8df   : >> { %v17447_v59 = vsel %vm17423_vm4, %v33208_v47, %v17446_v41  ;;  %v17559_v31 = vsel %vm17423_vm4, %v33212_v33, %v17558_v51  ;;  %v18130_v25 = vrot.slane %v18123_v43, %v33187_v3  ;;  %v33221_v30 = vmax.f32 %v33219_v63, %v33220_v15  ;;  %v33223_v28 = vld [vmem:[#allocation105_spill] sm:$0xff] }
 0x8e0   : >> { %v17448_v26 = vsel %vm17425_vm5, %v33208_v47, %v17447_v59  ;;  %v17560_v13 = vsel %vm17425_vm5, %v33212_v33, %v17559_v31  ;;  %v17670_v60 = vsel %vm17421_vm3, %v33216_v57, %v33215_v34  ;;  %18243 = vrot.lane.b32.xlu0 %v18242_v38, %s25413_s9  ;;  %v33225_v34 = vmax.f32 %v33223_v28, %v33224_v61 }
 0x8e1   : >> { %v17449_v7 = vsel %vm17427_vm6, %v33208_v47, %v17448_v26  ;;  %v17561_v35 = vsel %vm17427_vm6, %v33212_v33, %v17560_v13  ;;  %v17671_v6 = vsel %vm17423_vm4, %v33216_v57, %v17670_v60  ;;  %v33218_v47 = vmax.f32 %v31286_v10, %v33217_v62  ;;  %v33222_v33 = vld [vmem:[#allocation141_spill] sm:$0xff] }
 0x8e2   : >> { %v17672_v48 = vsel %vm17425_vm5, %v33216_v57, %v17671_v6  ;;  %v17988_v59 = vcombine.low %v17449_v7, %v17561_v35  ;;  %v17502_v51 = vsel %vm17421_vm3, %v33222_v33, %v33221_v30  ;;  %v18480_v10 = vcombine.low %v18121_v24, %v18130_v25  ;;  %v33226_v60 = vld [vmem:[#allocation73_spill] sm:$0xff] }
 0x8e3   : >> { %v17782_v41 = vsel %vm17421_vm3, %v31442_v56, %v33218_v47  ;;  %v17673_v43 = vsel %vm17427_vm6, %v33216_v57, %v17672_v48  ;;  %v21179_v31 = vcombine.high %v18121_v24, %v18130_v25  ;;  %v17503_v7 = vsel %vm17423_vm4, %v33222_v33, %v17502_v51  ;;  %v33227_v47 = vld [vmem:[#allocation133_spill] sm:$0xff] }
 0x8e4   : >> { %v17783_v18 = vsel %vm17423_vm4, %v31442_v56, %v17782_v41  ;;  %v17995_v13 = vrot.slane %v17988_v59, %v33187_v3  ;;  %v17614_v35 = vsel %vm17421_vm3, %v33226_v60, %v33225_v34  ;;  %v18487_v57 = vrot.slane %v18480_v10, %v32865_v14  ;;  %v33228_v41 = vld [vmem:[#allocation83_spill] sm:$0xff]  ;;  %v33231_v34 = vld [vmem:[#allocation117_spill] sm:$0xff] }
 0x8e5   : >> { %v17784_v26 = vsel %vm17425_vm5, %v31442_v56, %v17783_v18  ;;  %v18500_v62 = vrot.slane %v21179_v31, %v32865_v14  ;;  %v17504_v24 = vsel %vm17425_vm5, %v33222_v33, %v17503_v7  ;;  %v17615_v25 = vsel %vm17423_vm4, %v33226_v60, %v17614_v35  ;;  %v33230_v18 = vld [vmem:[#allocation91_spill] sm:$0xff] }
 0x8e6   : >> { %v17785_v38 = vsel %vm17427_vm6, %v31442_v56, %v17784_v26  ;;  %v17505_v56 = vsel %vm17427_vm6, %v33222_v33, %v17504_v24  ;;  %v33229_v48 = vmax.f32 %v33227_v47, %v33228_v41  ;;  %v17838_v63 = vsel %vm17421_vm3, %v31509_v58, %v17278_v22  ;;  %18488 = vrot.lane.b32.xlu1 %v18487_v57, %s25410_s2  ;;  %v33235_v41 = vld [vmem:[#allocation100_spill] sm:$0xff]  ;;  %s18684_s2 = scalar_lea.vmem %s26164_s15, %s21194_s0 [#allocation7] }
 0x8e7   : >> { %v17997_v6 = vcombine.low %v17673_v43, %v17785_v38  ;;  %v17616_v30 = vsel %vm17425_vm5, %v33226_v60, %v17615_v25  ;;  %v17839_v51 = vsel %vm17423_vm4, %v31509_v58, %v17838_v63  ;;  %v21170_v22 = vcombine.high %v31641_v36, %v31665_v42  ;;  %v33237_v63 = vld [vmem:[#allocation94_spill] sm:$0xff] }
 0x8e8   : >> { %v17726_v59 = vsel %vm17421_vm3, %v33230_v18, %v33229_v48  ;;  %v17617_v10 = vsel %vm17427_vm6, %v33226_v60, %v17616_v30  ;;  %v17840_v19 = vsel %vm17425_vm5, %v31509_v58, %v17839_v51  ;;  %v33232_v60 = vld [vmem:[#allocation115_spill] sm:$0xff]  ;;  %v33236_v48 = vld [vmem:[#allocation98_spill] sm:$0xff] }
 0x8e9   : >> { %v18004_v15 = vrot.slane %v17997_v6, %v33187_v3  ;;  %v17727_v33 = vsel %vm17423_vm4, %v33230_v18, %v17726_v59  ;;  %v17841_v38 = vsel %vm17427_vm6, %v31509_v58, %v17840_v19  ;;  %v18132_v7 = vcombine.low %v17505_v56, %v17617_v10  ;;  %v33234_v6 = vld [vmem:[#allocation182_spill] sm:$0xff] }
 0x8ea   : >> { %v17728_v23 = vsel %vm17425_vm5, %v33230_v18, %v17727_v33  ;;  %v18268_v61 = vrot.slane %v21170_v22, %v32865_v14  ;;  %v17454_v35 = vsel %vm17423_vm4, %v33232_v60, %v33231_v34  ;;  %18501 = vrot.lane.b32.xlu1 %v18500_v62, %s25411_s28  ;;  %v17790_v59 = vsel %vm17423_vm4, %v31471_v40, %v31484_v52  ;;  %v33240_v33 = vld [vmem:[#allocation142_spill] sm:$0xff]  ;;  %s21195_s28 = sshll.u32 (%p8347_p12), %s25479_s22, 10 }
 0x8eb   : >> { %v18300_v43 = vcombine.low %v17995_v13, %v18004_v15  ;;  %v21172_v26 = vcombine.high %v17995_v13, %v18004_v15  ;;  %v17729_v31 = vsel %vm17427_vm6, %v33230_v18, %v17728_v23  ;;  %v17455_v42 = vsel %vm17425_vm5, %v33232_v60, %v17454_v35  ;;  %v33233_v13 = vld [vmem:[#allocation183_spill] sm:$0xff] }
 0x8ec   : >> { %v18141_v28 = vcombine.low %v17729_v31, %v17841_v38  ;;  %v17566_v58 = vsel %vm17423_vm4, %v33234_v6, %v33233_v13  ;;  %v18139_v24 = vrot.slane %v18132_v7, %v33187_v3  ;;  %v17456_v25 = vsel %vm17427_vm6, %v33232_v60, %v17455_v42  ;;  %v33238_v15 = vld [vmem:[#allocation71_spill] sm:$0xff]  ;;  %v33244_v13 = vld [vmem:[#allocation82_spill] sm:$0xff] }
 0x8ed   : >> { %v18307_v57 = vrot.slane %v18300_v43, %v32865_v14  ;;  %v18320_v36 = vrot.slane %v21172_v26, %v32865_v14  ;;  %v17567_v47 = vsel %vm17425_vm5, %v33234_v6, %v17566_v58  ;;  %v17678_v18 = vsel %vm17423_vm4, %v33236_v48, %v33235_v41  ;;  %v33245_v58 = vld [vmem:[#allocation134_spill] sm:$0xff] }
 0x8ee   : >> { %v18148_v56 = vrot.slane %v18141_v28, %v33187_v3  ;;  %v17568_v62 = vsel %vm17427_vm6, %v33234_v6, %v17567_v47  ;;  %v33239_v30 = vmax.f32 %v33237_v63, %v33238_v15  ;;  %v17679_v19 = vsel %vm17425_vm5, %v33236_v48, %v17678_v18  ;;  %v33249_v15 = vld [vmem:[#allocation80_spill] sm:$0xff] }
 0x8ef   : >> { %18308 = vrot.lane.b32.xlu0 %v18307_v57, %s25414_s10  ;;  %v17791_v22 = vsel %vm17425_vm5, %v31471_v40, %v17790_v59  ;;  %v17680_v43 = vsel %vm17427_vm6, %v33236_v48, %v17679_v19  ;;  %v18006_v26 = vcombine.low %v17456_v25, %v17568_v62  ;;  %v33242_v57 = vld [vmem:[#allocation187_spill] sm:$0xff]  ;;  %v33248_v25 = vld [vmem:[#allocation209_spill] sm:$0xff]  ;;  %v17824_v48 = vsel %vm17421_vm3, %v31571_v29, %v17274_v12 }
 0x8f0   : >> { %v17488_v51 = vsel %vm17421_vm3, %v33240_v33, %v33239_v30  ;;  %v18506_v10 = vcombine.low %v18139_v24, %v18148_v56  ;;  %v21180_v23 = vcombine.high %v18139_v24, %v18148_v56  ;;  %v17792_v52 = vsel %vm17427_vm6, %v31471_v40, %v17791_v22  ;;  %v33241_v40 = vld [vmem:[#allocation161_spill] sm:$0xff]  ;;  %v33246_v24 = vld [vmem:[#allocation154_spill] sm:$0xff] }
 0x8f1   : >> { %v17489_v31 = vsel %vm17423_vm4, %v33240_v33, %v17488_v51  ;;  %v18015_v28 = vcombine.low %v17680_v43, %v17792_v52  ;;  %v18013_v60 = vrot.slane %v18006_v26, %v33187_v3  ;;  %v33243_v42 = vmax.f32 %v33241_v40, %v33242_v57  ;;  %v33250_v30 = vld [vmem:[#allocation113_spill] sm:$0xff] }
 0x8f2   : >> { %v18513_v38 = vrot.slane %v18506_v10, %v32865_v14  ;;  %v18526_v7 = vrot.slane %v21180_v23, %v32865_v14  ;;  %v17490_v34 = vsel %vm17425_vm5, %v33240_v33, %v17489_v31  ;;  %v33247_v56 = vmax.f32 %v33245_v58, %v33246_v24  ;;  %v33252_v51 = vld [vmem:[#allocation77_spill] sm:$0xff]  ;;  %v33258_v58 = vld [vmem:[#allocation148_spill] sm:$0xff] }
 0x8f3   : >> { %18321 = vrot.lane.b32.xlu0 %v18320_v36, %s25415_s16  ;;  %v17491_v35 = vsel %vm17427_vm6, %v33240_v33, %v17490_v34  ;;  %v17600_v6 = vsel %vm17421_vm3, %v33244_v13, %v33243_v42  ;;  %v18022_v36 = vrot.slane %v18015_v28, %v33187_v3  ;;  %v17825_v63 = vsel %vm17423_vm4, %v31571_v29, %v17824_v48  ;;  %v33253_v28 = vld [vmem:[#allocation160_spill] sm:$0xff]  ;;  %v33256_v57 = vld [vmem:[#allocation121_spill] sm:$0xff] }
 0x8f4   : >> { %v17712_v47 = vsel %vm17421_vm3, %v33248_v25, %v33247_v56  ;;  %18514 = vrot.lane.b32.xlu1 %v18513_v38, %s25414_s10  ;;  %v17601_v62 = vsel %vm17423_vm4, %v33244_v13, %v17600_v6  ;;  %v33251_v33 = vmax.f32 %v33249_v15, %v33250_v30  ;;  %v17826_v12 = vsel %vm17425_vm5, %v31571_v29, %v17825_v63  ;;  %v33254_v34 = vld [vmem:[#allocation180_spill] sm:$0xff]  ;;  %v33260_v56 = vld [vmem:[#allocation85_spill] sm:$0xff]  ;;  %s32258_s10 = scalar_lea.hbm (%p8347_p12), %s32310_s5, %s21195_s28 }
 0x8f5   : >> { %v17713_v41 = vsel %vm17423_vm4, %v33248_v25, %v17712_v47  ;;  %v17602_v18 = vsel %vm17425_vm5, %v33244_v13, %v17601_v62  ;;  %v18326_v23 = vcombine.low %v18013_v60, %v18022_v36  ;;  %v17827_v19 = vsel %vm17427_vm6, %v31571_v29, %v17826_v12  ;;  %v33257_v6 = vld [vmem:[#allocation204_spill] sm:$0xff] }
 0x8f6   : >> { %v17714_v59 = vsel %vm17425_vm5, %v33248_v25, %v17713_v41  ;;  %v17460_v10 = vsel %vm17421_vm3, %v33252_v51, %v33251_v33  ;;  %v17603_v8 = vsel %vm17427_vm6, %v33244_v13, %v17602_v18  ;;  %v21173_v43 = vcombine.high %v18013_v60, %v18022_v36  ;;  %v33262_v18 = vld [vmem:[#allocation140_spill] sm:$0xff] }
 0x8f7   : >> { %v17715_v50 = vsel %vm17427_vm6, %v33248_v25, %v17714_v59  ;;  %18269 = vrot.lane.b32.xlu0 %v18268_v61, %s25416_s11  ;;  %v18096_v22 = vcombine.low %v17491_v35, %v17603_v8  ;;  %v17461_v52 = vsel %vm17423_vm4, %v33252_v51, %v17460_v10  ;;  %v18333_v26 = vrot.slane %v18326_v23, %v32865_v14  ;;  %v33263_v59 = vld [vmem:[#allocation135_spill] sm:$0xff] }
 0x8f8   : >> { %18527 = vrot.lane.b32.xlu1 %v18526_v7, %s25415_s16  ;;  %v18105_v31 = vcombine.low %v17715_v50, %v17827_v19  ;;  %v17462_v38 = vsel %vm17425_vm5, %v33252_v51, %v17461_v52  ;;  %v33255_v40 = vmax.f32 %v33253_v28, %v33254_v34  ;;  %v18346_v60 = vrot.slane %v21173_v43, %v32865_v14  ;;  %v33264_v43 = vld [vmem:[#allocation123_spill] sm:$0xff]  ;;  %s18700_s16 = sshll.u32 (%p8347_p12), %s26164_s15, 4  ;;  %s32261_s16 = int_to_ptr.vmem [resolvable:$true] %s18700_s16 }
 0x8f9   : >> { %v18103_v29 = vrot.slane %v18096_v22, %v33187_v3  ;;  %v17463_v35 = vsel %vm17427_vm6, %v33252_v51, %v17462_v38  ;;  %v33259_v24 = vmax.f32 %v33257_v6, %v33258_v58  ;;  %v33261_v47 = vmax.f32 %v31332_v9, %v31457_v49  ;;  %v33265_v52 = vld [vmem:[#allocation119_spill] sm:$0xff] }
 0x8fa   : >> { %v17572_v61 = vsel %vm17421_vm3, %v33256_v57, %v33255_v40  ;;  %v18112_v42 = vrot.slane %v18105_v31, %v33187_v3  ;;  %v17524_v63 = vsel %vm17423_vm4, %v33263_v59, %v33262_v18  ;;  %v33267_v31 = vld [vmem:[#allocation207_spill] sm:$0xff]  ;;  %v17860_v28 = vsel %vm17423_vm4, %v31528_v16, %v31543_v21 }
 0x8fb   : >> { %v17573_v7 = vsel %vm17423_vm4, %v33256_v57, %v17572_v61  ;;  %v17684_v25 = vsel %vm17421_vm3, %v33260_v56, %v33259_v24  ;;  %v17796_v36 = vsel %vm17421_vm3, %v31496_v1, %v33261_v47  ;;  %18334 = vrot.lane.b32.xlu0 %v18333_v26, %s25417_s13  ;;  %v17525_v23 = vsel %vm17425_vm5, %v33263_v59, %v17524_v63  ;;  %v33266_v26 = vld [vmem:[#allocation87_spill] sm:$0xff] }
 0x8fc   : >> { %v17574_v13 = vsel %vm17425_vm5, %v33256_v57, %v17573_v7  ;;  %v17685_v41 = vsel %vm17423_vm4, %v33260_v56, %v17684_v25  ;;  %v17797_v48 = vsel %vm17423_vm4, %v31496_v1, %v17796_v36  ;;  %v18454_v49 = vcombine.low %v18103_v29, %v18112_v42  ;;  %v33269_v7 = vld [vmem:[#allocation129_spill] sm:$0xff]  ;;  %v33270_v25 = vld [vmem:[#allocation195_spill] sm:$0xff] }
 0x8fd   : >> { %v17575_v62 = vsel %vm17427_vm6, %v33256_v57, %v17574_v13  ;;  %v21178_v9 = vcombine.high %v18103_v29, %v18112_v42  ;;  %v17686_v15 = vsel %vm17425_vm5, %v33260_v56, %v17685_v41  ;;  %v17798_v30 = vsel %vm17425_vm5, %v31496_v1, %v17797_v48  ;;  %v33271_v47 = vld [vmem:[#allocation191_spill] sm:$0xff] }
 0x8fe   : >> { %v17687_v33 = vsel %vm17427_vm6, %v33260_v56, %v17686_v15  ;;  %v17799_v51 = vsel %vm17427_vm6, %v31496_v1, %v17798_v30  ;;  %v18024_v10 = vcombine.low %v17463_v35, %v17575_v62  ;;  %v18461_v8 = vrot.slane %v18454_v49, %v32865_v14  ;;  %v33268_v35 = vld [vmem:[#allocation132_spill] sm:$0xff]  ;;  %v33272_v62 = vld [vmem:[#allocation206_spill] sm:$0xff]  ;;  %v33273_v41 = vld [vmem:[#allocation159_spill] sm:$0xff] }
 0x8ff   : >> { %v18474_v50 = vrot.slane %v21178_v9, %v32865_v14  ;;  %v18033_v12 = vcombine.low %v17687_v33, %v17799_v51  ;;  %v17526_v19 = vsel %vm17427_vm6, %v33263_v59, %v17525_v23  ;;  %18347 = vrot.lane.b32.xlu0 %v18346_v60, %s25418_s17  ;;  %v17636_v1 = vsel %vm17423_vm4, %v33265_v52, %v33264_v43  ;;  %v33276_v43 = vld [vmem:[#allocation198_spill] sm:$0xff] }
 0x900   : >> { %v18031_v22 = vrot.slane %v18024_v10, %v33187_v3  ;;  %v17748_v38 = vsel %vm17423_vm4, %v33267_v31, %v33266_v26  ;;  %18462 = vrot.lane.b32.xlu1 %v18461_v8, %s25412_s7  ;;  %v17637_v40 = vsel %vm17425_vm5, %v33265_v52, %v17636_v1  ;;  %v17861_v61 = vsel %vm17425_vm5, %v31528_v16, %v17860_v28 }
 0x901   : >> { %v18040_v34 = vrot.slane %v18033_v12, %v33187_v3  ;;  %v17749_v57 = vsel %vm17425_vm5, %v33267_v31, %v17748_v38  ;;  %v17638_v29 = vsel %vm17427_vm6, %v33265_v52, %v17637_v40  ;;  %v17862_v21 = vsel %vm17427_vm6, %v31528_v16, %v17861_v61  ;;  %v33274_v12 = vld [vmem:[#allocation102_spill] sm:$0xff]  ;;  %v33277_v52 = vld [vmem:[#allocation124_spill] sm:$0xff]  ;;  %v33279_v61 = vld [vmem:[#allocation89_spill] sm:$0xff] }
 0x902   : >> { %v17750_v60 = vsel %vm17427_vm6, %v33267_v31, %v17749_v57  ;;  %v17482_v42 = vsel %vm17423_vm4, %v33269_v7, %v33268_v35  ;;  %v18186_v6 = vcombine.low %v17526_v19, %v17638_v29  ;;  %v17594_v36 = vsel %vm17423_vm4, %v33271_v47, %v33270_v25  ;;  %v33275_v19 = vld [vmem:[#allocation79_spill] sm:$0xff]  ;;  %v33278_v57 = vld [vmem:[#allocation210_spill] sm:$0xff] }
 0x903   : >> { %v18352_v13 = vcombine.low %v18031_v22, %v18040_v34  ;;  %v18195_v58 = vcombine.low %v17750_v60, %v17862_v21  ;;  %v21174_v24 = vcombine.high %v18031_v22, %v18040_v34  ;;  %v17483_v56 = vsel %vm17425_vm5, %v33269_v7, %v17482_v42 }
 0x904   : >> { %v17706_v48 = vsel %vm17423_vm4, %v33273_v41, %v33272_v62  ;;  %v17818_v16 = vsel %vm17423_vm4, %v31504_v39, %v31515_v54  ;;  %18475 = vrot.lane.b32.xlu1 %v18474_v50, %s25416_s11  ;;  %v18193_v59 = vrot.slane %v18186_v6, %v33187_v3  ;;  %v17484_v9 = vsel %vm17427_vm6, %v33269_v7, %v17483_v56  ;;  %v33281_v6 = vld [vmem:[#allocation114_spill] sm:$0xff]  ;;  %v33284_v62 = vld [vmem:[#allocation97_spill] sm:$0xff]  ;;  %s18687_s11 = scalar_lea.sflag (%p8347_p12), [#allocation6], %s25562_s23 }
 0x905   : >> { %v18359_v18 = vrot.slane %v18352_v13, %v32865_v14  ;;  %v18202_v63 = vrot.slane %v18195_v58, %v33187_v3  ;;  %v18372_v49 = vrot.slane %v21174_v24, %v32865_v14  ;;  %v17595_v15 = vsel %vm17425_vm5, %v33271_v47, %v17594_v36  ;;  %v33282_v58 = vld [vmem:[#allocation112_spill] sm:$0xff]  ;;  %v33283_v36 = vld [vmem:[#allocation179_spill] sm:$0xff] }
 0x906   : >> { %v17707_v30 = vsel %vm17425_vm5, %v33273_v41, %v17706_v48  ;;  %v17819_v54 = vsel %vm17425_vm5, %v31504_v39, %v17818_v16  ;;  %v17596_v10 = vsel %vm17427_vm6, %v33271_v47, %v17595_v15  ;;  %v17510_v22 = vsel %vm17423_vm4, %v33275_v19, %v33274_v12  ;;  %v33286_v15 = vld [vmem:[#allocation146_spill] sm:$0xff]  ;;  %v33292_v12 = vld [vmem:[#allocation143_spill] sm:$0xff] }
 0x907   : >> { %18360 = vrot.lane.b32.xlu0 %v18359_v18, %s25419_s25  ;;  %v18584_v33 = vcombine.low %v18193_v59, %v18202_v63  ;;  %v21183_v51 = vcombine.high %v18193_v59, %v18202_v63  ;;  %v17708_v23 = vsel %vm17427_vm6, %v33273_v41, %v17707_v30  ;;  %v17820_v8 = vsel %vm17427_vm6, %v31504_v39, %v17819_v54  ;;  %v33287_v54 = vld [vmem:[#allocation169_spill] sm:$0xff] }
 0x908   : >> { %v18078_v50 = vcombine.low %v17484_v9, %v17596_v10  ;;  %v17622_v1 = vsel %vm17423_vm4, %v33277_v52, %v33276_v43  ;;  %v18087_v38 = vcombine.low %v17708_v23, %v17820_v8  ;;  %v17511_v28 = vsel %vm17425_vm5, %v33275_v19, %v17510_v22  ;;  %v33285_v9 = vld [vmem:[#allocation149_spill] sm:$0xff]  ;;  %v33289_v23 = vld [vmem:[#allocation96_spill] sm:$0xff]  ;;  %v33290_v8 = vld [vmem:[#allocation131_spill] sm:$0xff] }
 0x909   : >> { %v18591_v26 = vrot.slane %v18584_v33, %v32865_v14  ;;  %v18604_v31 = vrot.slane %v21183_v51, %v32865_v14  ;;  %v17512_v39 = vsel %vm17427_vm6, %v33275_v19, %v17511_v28  ;;  %v17623_v40 = vsel %vm17425_vm5, %v33277_v52, %v17622_v1  ;;  %v33288_v33 = vld [vmem:[#allocation168_spill] sm:$0xff]  ;;  %v33293_v28 = vld [vmem:[#allocation162_spill] sm:$0xff] }
 0x90a   : >> { %v32025_v34 = vrot.slane %v18078_v50, %v33187_v3  ;;  %v17734_v29 = vsel %vm17423_vm4, %v33279_v61, %v33278_v57  ;;  %v33280_v60 = vmax.f32 %v31373_v2, %v31511_v5  ;;  %v32040_v35 = vrot.slane %v18087_v38, %v33187_v3  ;;  %v33296_v57 = vld [vmem:[#allocation92_spill] sm:$0xff] }
 0x90b   : >> { %18592 = vrot.lane.b32.xlu1 %v18591_v26, %s25420_s12  ;;  %18373 = vrot.lane.b32.xlu0 %v18372_v49, %s25421_s29  ;;  %v17624_v7 = vsel %vm17427_vm6, %v33277_v52, %v17623_v40  ;;  %v17735_v42 = vsel %vm17425_vm5, %v33279_v61, %v17734_v29  ;;  %v17846_v2 = vsel %vm17423_vm4, %v31557_v45, %v31581_v44 }
 0x90c   : >> { %v17865_v21 = vrot.slane %v33280_v60, 7  ;;  %v17736_v13 = vsel %vm17427_vm6, %v33279_v61, %v17735_v42  ;;  %v18150_v5 = vcombine.low %v17512_v39, %v17624_v7  ;;  %v17468_v24 = vsel %vm17423_vm4, %v33282_v58, %v33281_v6  ;;  %v33294_v39 = vld [vmem:[#allocation196_spill] sm:$0xff] }
 0x90d   : >> { %v21177_v56 = vcombine.high %v32025_v34, %v32040_v35  ;;  %v17847_v25 = vsel %vm17425_vm5, %v31557_v45, %v17846_v2  ;;  %v17469_v47 = vsel %vm17425_vm5, %v33282_v58, %v17468_v24  ;;  %v17580_v41 = vsel %vm17423_vm4, %v33284_v62, %v33283_v36  ;;  %v33297_v2 = vld [vmem:[#allocation75_spill] sm:$0xff]  ;;  %v33303_v36 = vld [vmem:[#allocation109_spill] sm:$0xff] }
 0x90e   : >> { %v17848_v44 = vsel %vm17427_vm6, %v31557_v45, %v17847_v25  ;;  %v18157_v48 = vrot.slane %v18150_v5, %v33187_v3  ;;  %v17470_v16 = vsel %vm17427_vm6, %v33282_v58, %v17469_v47  ;;  %v17581_v18 = vsel %vm17425_vm5, %v33284_v62, %v17580_v41  ;;  %v33298_v5 = vld [vmem:[#allocation158_spill] sm:$0xff]  ;;  %v33300_v58 = vld [vmem:[#allocation211_spill] sm:$0xff] }
 0x90f   : >> { %18605 = vrot.lane.b32.xlu1 %v18604_v31, %s25422_s14  ;;  %v18448_v59 = vrot.slane %v21177_v56, %v32865_v14  ;;  %v18159_v63 = vcombine.low %v17736_v13, %v17848_v44  ;;  %v17582_v49 = vsel %vm17427_vm6, %v33284_v62, %v17581_v18  ;;  %v17692_v45 = vsel %vm17423_vm4, %v33286_v15, %v33285_v9  ;;  %v33302_v47 = vld [vmem:[#allocation78_spill] sm:$0xff] }
 0x910   : >> { %v17693_v30 = vsel %vm17425_vm5, %v33286_v15, %v17692_v45  ;;  %v17804_v51 = vsel %vm17423_vm4, %v33288_v33, %v33287_v54  ;;  %v18042_v10 = vcombine.low %v17470_v16, %v17582_v49  ;;  %v33291_v50 = vmax.f32 %v33289_v23, %v33290_v8  ;;  %v33305_v41 = vld [vmem:[#allocation130_spill] sm:$0xff] }
 0x911   : >> { %18449 = vrot.lane.b32.xlu0 %v18448_v59, %s25413_s9  ;;  %v18166_v22 = vrot.slane %v18159_v63, %v33187_v3  ;;  %v17694_v43 = vsel %vm17427_vm6, %v33286_v15, %v17693_v30  ;;  %v17805_v52 = vsel %vm17425_vm5, %v33288_v33, %v17804_v51  ;;  %v33295_v40 = vmax.f32 %v33293_v28, %v33294_v39  ;;  %v33313_v28 = vld [vmem:[#allocation205_spill] sm:$0xff] }
 0x912   : >> { %v17530_v19 = vsel %vm17421_vm3, %v33292_v12, %v33291_v50  ;;  %v17806_v26 = vsel %vm17427_vm6, %v33288_v33, %v17805_v52  ;;  %v18049_v31 = vrot.slane %v18042_v10, %v33187_v3  ;;  %v33299_v6 = vmax.f32 %v33297_v2, %v33298_v5 }
 0x913   : >> { %v17531_v1 = vsel %vm17423_vm4, %v33292_v12, %v17530_v19  ;;  %v17642_v61 = vsel %vm17421_vm3, %v33296_v57, %v33295_v40  ;;  %v18532_v29 = vcombine.low %v18157_v48, %v18166_v22  ;;  %v18051_v60 = vcombine.low %v17694_v43, %v17806_v26  ;;  %v33307_v43 = vld [vmem:[#allocation175_spill] sm:$0xff]  ;;  %v33314_v40 = vld [vmem:[#allocation93_spill] sm:$0xff] }
 0x914   : >> { %v17532_v38 = vsel %vm17425_vm5, %v33292_v12, %v17531_v1  ;;  %v21181_v7 = vcombine.high %v18157_v48, %v18166_v22  ;;  %v17643_v13 = vsel %vm17423_vm4, %v33296_v57, %v17642_v61  ;;  %v17754_v24 = vsel %vm17421_vm3, %v33300_v58, %v33299_v6  ;;  %v33306_v22 = vld [vmem:[#allocation157_spill] sm:$0xff]  ;;  %v33309_v1 = vld [vmem:[#allocation194_spill] sm:$0xff]  ;;  %v33310_v26 = vld [vmem:[#allocation203_spill] sm:$0xff] }
 0x915   : >> { %v17533_v42 = vsel %vm17427_vm6, %v33292_v12, %v17532_v38  ;;  %v33301_v56 = vmax.f32 %v31366_v27, %v31506_v55  ;;  %v33304_v62 = vmax.f32 %v33302_v47, %v33303_v36  ;;  %v18539_v48 = vrot.slane %v18532_v29, %v32865_v14 }
 0x916   : >> { %v18058_v16 = vrot.slane %v18051_v60, %v33187_v3  ;;  %v18552_v18 = vrot.slane %v21181_v7, %v32865_v14  ;;  %v17644_v59 = vsel %vm17425_vm5, %v33296_v57, %v17643_v13  ;;  %v17755_v55 = vsel %vm17423_vm4, %v33300_v58, %v17754_v24 }
 0x917   : >> { %v17866_v25 = vsel %vm17421_vm3, %v17865_v21, %v33301_v56  ;;  %v17474_v44 = vsel %vm17421_vm3, %v33305_v41, %v33304_v62  ;;  %v17645_v27 = vsel %vm17427_vm6, %v33296_v57, %v17644_v59  ;;  %18540 = vrot.lane.b32.xlu1 %v18539_v48, %s25417_s13  ;;  %v17756_v45 = vsel %vm17425_vm5, %v33300_v58, %v17755_v55  ;;  %v33315_v57 = vld [vmem:[#allocation166_spill] sm:$0xff]  ;;  %v33321_v48 = vld [vmem:[#allocation172_spill] sm:$0xff]  ;;  %v33324_v59 = vld [vmem:[#allocation125_spill] sm:$0xff]  ;;  %s25297_s13 = scalar_lea.vmem (%p8347_p12), %s32261_s16, 1024 }
 0x918   : >> { %v17867_v63 = vsel %vm17423_vm4, %v17865_v21, %v17866_v25  ;;  %v17475_v49 = vsel %vm17423_vm4, %v33305_v41, %v17474_v44  ;;  %v18378_v9 = vcombine.low %v18049_v31, %v18058_v16  ;;  %v21175_v15 = vcombine.high %v18049_v31, %v18058_v16  ;;  %v33311_v31 = vld [vmem:[#allocation139_spill] sm:$0xff]  ;;  %v33322_v16 = vld [vmem:[#allocation197_spill] sm:$0xff]  ;;  %p25298_p13 = scmp.ne.s32.totalorder (%p8347_p12), %s32261_s16, %s25297_s13 }
 0x919   : >> { %v17868_v30 = vsel %vm17425_vm5, %v17865_v21, %v17867_v63  ;;  %v17757_v54 = vsel %vm17427_vm6, %v33300_v58, %v17756_v45  ;;  %v18204_v51 = vcombine.low %v17533_v42, %v17645_v27  ;;  %v17476_v10 = vsel %vm17425_vm5, %v33305_v41, %v17475_v49  ;;  %v33320_v58 = vld [vmem:[#allocation155_spill] sm:$0xff] }
 0x91a   : >> { %v17869_v33 = vsel %vm17427_vm6, %v17865_v21, %v17868_v30  ;;  %v18385_v23 = vrot.slane %v18378_v9, %v32865_v14  ;;  %v18398_v8 = vrot.slane %v21175_v15, %v32865_v14  ;;  %v17477_v12 = vsel %vm17427_vm6, %v33305_v41, %v17476_v10  ;;  %v33325_v30 = vld [vmem:[#allocation137_spill] sm:$0xff]  ;;  %p25299_p10 = pnand (%p8347_p12), %p25298_p13, %p33329_p8 }
 0x91b   : >> { %v18213_v50 = vcombine.low %v17757_v54, %v17869_v33  ;;  %v18211_v19 = vrot.slane %v18204_v51, %v33187_v3  ;;  %v33308_v52 = vmax.f32 %v33306_v22, %v33307_v43  ;;  %v33312_v38 = vmax.f32 %v33310_v26, %v33311_v31  ;;  %18553 = vrot.lane.b32.xlu1 %v18552_v18, %s25418_s17  ;;  %v33326_v54 = vld [vmem:[#allocation208_spill] sm:$0xff]  ;;  %s25301_s17 = sshll.u32 (%p8347_p12), %s25425_s26, 4  ;;  %s25302_s17 = int_to_ptr.vmem [resolvable:$false] %s25301_s17 }
 0x91c   : >> { %v33316_v61 = vmax.f32 %v33314_v40, %v33315_v57  ;;  %v17851_v60 = vrot.slane %v17283_v53, 7  ;;  %18386 = vrot.lane.b32.xlu0 %v18385_v23, %s25420_s12  ;;  %v33318_v53 = vld [vmem:[#allocation144_spill] sm:$0xff]  ;;  %v33323_v18 = vmax.f32 %v33321_v48, %v33322_v16  ;;  %v33327_v33 = vmax.f32 %v33325_v30, %v33326_v54  ;;  %p25300_p0 = pneg (%p8347_p12), %p25299_p10  ;;  %s25303_s22 = scalar_lea.vmem (%p8347_p12), %s25302_s17, 2048 }
 0x91d   : >> { %v17586_v21 = vsel %vm17421_vm3, %v33309_v1, %v33308_v52  ;;  %v17698_v39 = vsel %vm17421_vm3, %v33313_v28, %v33312_v38  ;;  %v18220_v7 = vrot.slane %v18213_v50, %v33187_v3  ;;  %v33319_v6 = vmax.f32 %v33317_v32, %v33318_v53  ;;  %v33328_v51 = vld [vmem:[#allocation212_spill] sm:$0xff]  ;;  %p25304_p2 = scmp.lt.s32.totalorder (%p8347_p12), %s32261_s16, %s25302_s17  ;;  %p25305_p4 = scmp.lt.s32.totalorder (%p8347_p12), %s25303_s22, %s25297_s13 }
 0x91e   : >> { %v17810_v29 = vsel %vm17421_vm3, %v31486_v17, %v33316_v61  ;;  %v17587_v42 = vsel %vm17423_vm4, %v33309_v1, %v17586_v21  ;;  %v17699_v13 = vsel %vm17423_vm4, %v33313_v28, %v17698_v39  ;;  %v17628_v27 = vsel %vm17421_vm3, %v33324_v59, %v33323_v18 }
 0x91f   : >> { %v17588_v2 = vsel %vm17425_vm5, %v33309_v1, %v17587_v42  ;;  %v17700_v5 = vsel %vm17425_vm5, %v33313_v28, %v17699_v13  ;;  %v17811_v11 = vsel %vm17423_vm4, %v31486_v17, %v17810_v29  ;;  %v17516_v24 = vsel %vm17421_vm3, %v33320_v58, %v33319_v6  ;;  %p25306_p5 = por (%p8347_p12), %p25305_p4, %p25304_p2 }
 0x920   : >> { %v18610_v56 = vcombine.low %v18211_v19, %v18220_v7  ;;  %v17589_v25 = vsel %vm17427_vm6, %v33309_v1, %v17588_v2  ;;  %v17701_v47 = vsel %vm17427_vm6, %v33313_v28, %v17700_v5  ;;  %v17812_v36 = vsel %vm17425_vm5, %v31486_v17, %v17811_v11  ;;  %18399 = vrot.lane.b32.xlu0 %v18398_v8, %s25422_s14 }
 0x921   : >> { %v17813_v62 = vsel %vm17427_vm6, %v31486_v17, %v17812_v36  ;;  %v18060_v41 = vcombine.low %v17477_v12, %v17589_v25  ;;  %v17517_v44 = vsel %vm17423_vm4, %v33320_v58, %v17516_v24  ;;  %v17629_v17 = vsel %vm17423_vm4, %v33324_v59, %v17628_v27  ;;  %p25307_p7 = pnand (%p8347_p12), %p25306_p5, %p25300_p0 }
 0x922   : >> { %v18617_v55 = vrot.slane %v18610_v56, %v32865_v14  ;;  %v18069_v63 = vcombine.low %v17701_v47, %v17813_v62  ;;  %v17518_v49 = vsel %vm17425_vm5, %v33320_v58, %v17517_v44  ;;  %v17630_v45 = vsel %vm17425_vm5, %v33324_v59, %v17629_v17 }
 0x923   : >> { %v18067_v9 = vrot.slane %v18060_v41, %v33187_v3  ;;  %v17519_v15 = vsel %vm17427_vm6, %v33320_v58, %v17518_v49  ;;  %v17740_v10 = vsel %vm17421_vm3, %v33328_v51, %v33327_v33  ;;  %v17631_v8 = vsel %vm17427_vm6, %v33324_v59, %v17630_v45 }
 0x924   : >> { %18618 = vrot.lane.b32.xlu1 %v18617_v55, %s25423_s27  ;;  %v18076_v23 = vrot.slane %v18069_v63, %v33187_v3  ;;  %v17741_v50 = vsel %vm17423_vm4, %v33328_v51, %v17740_v10  ;;  %v17852_v12 = vsel %vm17421_vm3, %v17851_v60, %v17282_v37  ;;  %v18168_v52 = vcombine.low %v17519_v15, %v17631_v8 }
 0x925   : >> { %v17742_v22 = vsel %vm17425_vm5, %v33328_v51, %v17741_v50  ;;  %v17853_v43 = vsel %vm17423_vm4, %v17851_v60, %v17852_v12  ;;  %v21184_v1 = vcombine.high %v18211_v19, %v18220_v7  ;;  %v18430_v19 = vcombine.low %v32025_v34, %v32040_v35 }
 0x926   : >> { %v18404_v21 = vcombine.low %v18067_v9, %v18076_v23  ;;  %v17743_v26 = vsel %vm17427_vm6, %v33328_v51, %v17742_v22  ;;  %v17854_v31 = vsel %vm17425_vm5, %v17851_v60, %v17853_v43  ;;  %v21176_v38 = vcombine.high %v18067_v9, %v18076_v23 }
 0x927   : >> { %v17855_v28 = vsel %vm17427_vm6, %v17851_v60, %v17854_v31  ;;  %v18175_v37 = vrot.slane %v18168_v52, %v33187_v3  ;;  %v18630_v7 = vrot.slane %v21184_v1, %v32865_v14  ;;  %v18224_v16 = vcombine.low %v31687_v46, %v31700_v4 }
 0x928   : >> { %v18411_v0 = vrot.slane %v18404_v21, %v32865_v14  ;;  %v18177_v20 = vcombine.low %v17743_v26, %v17855_v28  ;;  %v18424_v57 = vrot.slane %v21176_v38, %v32865_v14  ;;  %v18437_v18 = vrot.slane %v18430_v19, %v32865_v14 }
 0x929   : >> { %v18231_v27 = vrot.slane %v18224_v16, %v32865_v14  ;;  %vm18657_vm3 = vcmask 850944   ;;  %vm18659_vm4 = vcmask 916480   ;;  %vm18661_vm5 = vcmask 982016  }
 0x92a   : >> { %18412 = vrot.lane.b32.xlu0 %v18411_v0, %s25423_s27  ;;  %v18184_v39 = vrot.slane %v18177_v20, %v33187_v3 }
 0x92c   : >> { %v18558_v40 = vcombine.low %v18175_v37, %v18184_v39  ;;  %v21182_v61 = vcombine.high %v18175_v37, %v18184_v39 }
 0x92e   : >> { %v18565_v29 = vrot.slane %v18558_v40, %v32865_v14  ;;  %18425 = vrot.lane.b32.xlu0 %v18424_v57, %s25424_s8  ;;  %v18578_v60 = vrot.slane %v21182_v61, %v32865_v14 }
 0x930   : >> { %18566 = vrot.lane.b32.xlu1 %v18565_v29, %s25419_s25 }
 0x934   : >> { %18579 = vrot.lane.b32.xlu1 %v18578_v60, %s25421_s29 }
 0x938   : >> { %18631 = vrot.lane.b32.xlu1 %v18630_v7, %s25424_s8 }
 0x949   : >> { %v18283_v42 = vpop.permute.xlu0 %18282 }
 0x94d   : >> { %v18296_v13 = vpop.permute.xlu0 %18295 }
 0x94f   : >> { %v18257_v34 = vpop.permute.xlu1 %18256 }
 0x952   : >> { %v18244_v35 = vpop.permute.xlu0 %18243 }
 0x953   : >> { %v18634_v49 = vsel %vm243_vm0, %v18231_v27, %v18244_v35 }
 0x954   : >> { %v18636_v9 = vsel %vm18635_vm7, %v18634_v49, %v18257_v34 }
 0x958   : >> { %v18489_v2 = vpop.permute.xlu1 %18488 }
 0x95c   : >> { %v18502_v11 = vpop.permute.xlu1 %18501 }
 0x961   : >> { %v18309_v5 = vpop.permute.xlu0 %18308 }
 0x965   : >> { %v18322_v32 = vpop.permute.xlu0 %18321 }
 0x966   : >> { %v18515_v53 = vpop.permute.xlu1 %18514 }
 0x969   : >> { %v18270_v6 = vpop.permute.xlu0 %18269 }
 0x96a   : >> { %v18528_v58 = vpop.permute.xlu1 %18527  ;;  %v18638_v15 = vsel %vm18637_vm8, %v18636_v9, %v18270_v6 }
 0x96b   : >> { %v18640_v46 = vsel %vm18639_vm9, %v18638_v15, %v18283_v42 }
 0x96c   : >> { %v18642_v33 = vsel %vm18641_vm10, %v18640_v46, %v18296_v13 }
 0x96d   : >> { %v18335_v24 = vpop.permute.xlu0 %18334  ;;  %v18644_v8 = vsel %vm18643_vm11, %v18642_v33, %v18309_v5 }
 0x96e   : >> { %v18646_v12 = vsel %vm18645_vm12, %v18644_v8, %v18322_v32 }
 0x96f   : >> { %v18648_v1 = vsel %vm18647_vm13, %v18646_v12, %v18335_v24 }
 0x971   : >> { %v18348_v25 = vpop.permute.xlu0 %18347 }
 0x972   : >> { %v18463_v56 = vpop.permute.xlu1 %18462  ;;  %v18650_v21 = vsel %vm18649_vm14, %v18648_v1, %v18348_v25 }
 0x976   : >> { %v18476_v47 = vpop.permute.xlu1 %18475 }
 0x979   : >> { %v18361_v36 = vpop.permute.xlu0 %18360 }
 0x97a   : >> { %v18652_v31 = vsel %vm18651_vm15, %v18650_v21, %v18361_v36 }
 0x97d   : >> { %v18593_v62 = vpop.permute.xlu1 %18592  ;;  %v18374_v41 = vpop.permute.xlu0 %18373 }
 0x97e   : >> { %v18654_v0 = vsel %vm18653_vm1, %v18652_v31, %v18374_v41 }
 0x981   : >> { %v18606_v44 = vpop.permute.xlu1 %18605 }
 0x983   : >> { %v18450_v48 = vpop.permute.xlu0 %18449 }
 0x984   : >> { %v18663_v59 = vsel %vm243_vm0, %v18437_v18, %v18450_v48 }
 0x985   : >> { %v18664_v55 = vsel %vm18635_vm7, %v18663_v59, %v18463_v56 }
 0x986   : >> { %v18665_v17 = vsel %vm18637_vm8, %v18664_v55, %v18476_v47 }
 0x987   : >> { %v18666_v45 = vsel %vm18639_vm9, %v18665_v17, %v18489_v2 }
 0x988   : >> { %v18667_v4 = vsel %vm18641_vm10, %v18666_v45, %v18502_v11 }
 0x989   : >> { %v18541_v63 = vpop.permute.xlu1 %18540  ;;  %v18668_v51 = vsel %vm18643_vm11, %v18667_v4, %v18515_v53 }
 0x98a   : >> { %v18669_v50 = vsel %vm18645_vm12, %v18668_v51, %v18528_v58 }
 0x98b   : >> { %v18670_v22 = vsel %vm18647_vm13, %v18669_v50, %v18541_v63 }
 0x98d   : >> { %v18554_v54 = vpop.permute.xlu1 %18553 }
 0x98e   : >> { %v18387_v30 = vpop.permute.xlu0 %18386  ;;  %v18671_v26 = vsel %vm18649_vm14, %v18670_v22, %v18554_v54 }
 0x98f   : >> { %v18656_v37 = vsel %vm18655_vm2, %v18654_v0, %v18387_v30 }
 0x992   : >> { %v18400_v10 = vpop.permute.xlu0 %18399 }
 0x993   : >> { %v18658_v40 = vsel %vm18657_vm3, %v18656_v37, %v18400_v10 }
 0x996   : >> { %v18619_v23 = vpop.permute.xlu1 %18618 }
 0x99c   : >> { %v18413_v43 = vpop.permute.xlu0 %18412 }
 0x99d   : >> { %v18660_v61 = vsel %vm18659_vm4, %v18658_v40, %v18413_v43 }
 0x9a0   : >> { %v18426_v39 = vpop.permute.xlu0 %18425 }
 0x9a1   : >> { %v18662_v7 = vsel %vm18661_vm5, %v18660_v61, %v18426_v39 }
 0x9a2   : >> { %v18567_v52 = vpop.permute.xlu1 %18566 }
 0x9a3   : >> { %v18672_v38 = vsel %vm18651_vm15, %v18671_v26, %v18567_v52 }
 0x9a6   : >> { %v18580_v28 = vpop.permute.xlu1 %18579 }
 0x9a7   : >> { %v18673_v20 = vsel %vm18653_vm1, %v18672_v38, %v18580_v28 }
 0x9a8   : >> { %v18674_v19 = vsel %vm18655_vm2, %v18673_v20, %v18593_v62  ;;  %8349 = sbr.rel (!%p8347_p12) target bundleno = 1267 (0x4f3), region = 158 }
 0x9a9   : >> { %v18675_v57 = vsel %vm18657_vm3, %v18674_v19, %v18606_v44 }
 0x9aa   : >> { %v18676_v29 = vsel %vm18659_vm4, %v18675_v57, %v18619_v23  ;;  %v18632_v60 = vpop.permute.xlu1 %18631 }
 0x9ab   : >> { %v18677_v42 = vsel %vm18661_vm5, %v18676_v29, %v18632_v60 }
 0x9ac   : >> { %v18680_v13 = vcombine.low %v18662_v7, %v18677_v42 }
 0x9ae   : >> { %18685 = vst [vmem:[%s18684_s2] sm:$0xff] %v18680_v13 }
 0x9af   : > { %25310 = shalt.err (!%p25307_p7)
}
 0x9b0   : > { %s25311_s15 = scalar_lea.hbm %s32258_s10, 1024  ;;  %s25315_s29 = scalar_lea.hbm %s32310_s5, 2048 }
 0x9b1   : > { %p25312_p9 = scmp.ne.s32.totalorder %s32258_s10, %s25311_s15  ;;  %p25316_p6 = scmp.lt.u32.totalorder %s32258_s10, %s32310_s5 }
 0x9b2   : > { %p25317_p11 = scmp.lt.u32.totalorder %s25315_s29, %s25311_s15  ;;  %p25319_p13 = scmp.lt.u32.totalorder %s25311_s15, %s32258_s10 }
 0x9b3   : > { %p25313_p1 = pnand %p25312_p9, %p33329_p8 }
 0x9b4   : > { %p25318_p12 = por %p25317_p11, %p25316_p6 }
 0x9b5   : > { %p25314_p3 = pneg %p25313_p1 }
 0x9b6   : > { %p25320_p10 = por %p25319_p13, %p25318_p12 }
 0x9b8   : > { %p25321_p0 = pnand %p25320_p10, %p25314_p3 }
 0x9ba   : > { %25324 = shalt.err (!%p25321_p0)
}
 0x9bb   : > { %s25426_s8 = smov 128   ;;  %s25427_s0 = smov 8  }
 0x9bc   : > { %25160 = dma.vmem_to_hbm [thread:$0]  (%p33329_p8), %s32261_s16, 1024, %s32258_s10, %s18687_s11, %s25426_s8, %s25426_s8, %s25427_s0  }
 0x9bd PF: > { %s18715_s2 = sand.u32 1, %s25363_s18   ;;  %p33330_p2 = scmp.ne.s32.totalorder %s32595_s6, 0 }
 0x9be   : > { %p33331_p4 = scmp.ge.s32.totalorder %s25375_s21, 2  ;;  %s18716_s28 = scalar_lea.sflag [#allocation6], %s18715_s2 }
 0x9c0   : > { %p25167_p5 = pnand %p33331_p4, %p33330_p2 }
 0x9c2   : > { %25358 = dma.done.wait (!%p25167_p5), %s18716_s28, 1024  }
 0x9c3   : > { %25360 = vsyncadd (!%p25167_p5), %s18716_s28, 4294966272  ;;  %s33332_s7 = sld [smem:[#allocation10_spill]]  ;;  %p18_p7 = scmp.ge.s32.totalorder %s25483_s24, 4  }
 0x9c4   : > { %s33333_s18 = smov %s25367_s19  ;;  %s33334_s19 = smov %s25371_s20 }
 0x9c5   : > { %s33336_s21 = smov %s25483_s24  ;;  %20 = sbr.rel (!%p18_p7) target bundleno = 8 (0x8), region = 169 }
 0x9c9   : > { %s33335_s20 = smov %s33332_s7 }
 0x9cc   :  { %18721 = vsyncpa [#allocation5], 1 }
 0x9cd   :  { %18723 = vsyncpa [#allocation5 + $0x1], 1 }
 0x9ce   :  { %18724 = vsyncpa [#allocation6], 1 }
 0x9cf   :  { %18726 = vsyncpa [#allocation6 + $0x1], 1 }

</bundles_post_ra>
